<compile_context>
chip_gen: v7x
topology: tpu7x:2x2x1
jax: 0.10.0
libtpu: 0.0.40
codegen_flags: <defaults>
</compile_context>

<pallas_src>
import functools

import jax
import jax.numpy as jnp
from jax.experimental import pallas as pl
from jax.experimental.pallas import tpu as pltpu

BN_EPS = 1e-5
_VMEM_LIMIT = 32 * 1024 * 1024


def _round_up(n, m):
    return ((n + m - 1) // m) * m


def _pad2d(x, mp, np_):
    M, N = x.shape
    if M == mp and N == np_:
        return x
    return jnp.pad(x, ((0, mp - M), (0, np_ - N)))


# ---------------------------------------------------------------------------
# Pallas kernels
# ---------------------------------------------------------------------------
def _matmul_bias_act_kernel(a_ref, b_ref, bias_ref, o_ref, *, alpha):
    """Full-M / full-K block; grid is over N tiles only."""
    acc = jnp.dot(a_ref[...], b_ref[...], preferred_element_type=jnp.float32)
    y = acc + bias_ref[...]
    if alpha is not None:
        y = jnp.where(y > 0, y, alpha * y)
    o_ref[...] = y.astype(o_ref.dtype)


def _matmul_bias_stats_kernel(a_ref, b_ref, bias_ref, o_ref, sum_ref, sq_ref,
                              *, m_valid):
    """Conv + bias; additionally emits per-channel sum / sum-of-squares over
    the valid M rows (fused BatchNorm statistics, computed from the f32
    accumulator)."""
    acc = jnp.dot(a_ref[...], b_ref[...], preferred_element_type=jnp.float32)
    y = acc + bias_ref[...]
    o_ref[...] = y.astype(o_ref.dtype)
    row = jax.lax.broadcasted_iota(jnp.int32, y.shape, 0)
    ym = jnp.where(row < m_valid, y, 0.0)          # exclude padded rows
    sum_ref[...] = jnp.sum(ym, axis=0, keepdims=True)
    sq_ref[...] = jnp.sum(ym * ym, axis=0, keepdims=True)


def _affine_act_kernel(x_ref, scale_ref, shift_ref, o_ref, *, alpha):
    """Per-channel affine (BatchNorm) + LeakyReLU, computed in f32."""
    y = x_ref[...].astype(jnp.float32) * scale_ref[...] + shift_ref[...]
    o_ref[...] = jnp.where(y > 0, y, alpha * y).astype(o_ref.dtype)


# ---------------------------------------------------------------------------
# Wrappers
# ---------------------------------------------------------------------------
def matmul_bias(a, b, bias, *, alpha=None, compute_stats=False,
                out_dtype=jnp.bfloat16):
    """(M,K) @ (K,O) + bias, optional LeakyReLU, optional per-channel stats.

    M and K are collapsed into a single block (fits VMEM in bf16 at this
    network's sizes); the grid runs over N tiles only.  TN=256 when O >= 512,
    otherwise 128, so layers with O in {256, 512} still give >=2 parallel
    blocks for v7x megacore.
    """
    M, K = a.shape
    O = b.shape[1]
    Mp = _round_up(M, 8)
    Kp = _round_up(K, 128)
    Np = _round_up(O, 128)
    tn = 256 if Np >= 512 else 128

    ap = _pad2d(a, Mp, Kp).astype(jnp.bfloat16)
    bp = _pad2d(b, Kp, Np).astype(jnp.bfloat16)
    biasp = _pad2d(bias.reshape(1, -1).astype(jnp.float32), 1, Np)

    grid = (Np // tn,)
    in_specs = [
        pl.BlockSpec((Mp, Kp), lambda j: (0, 0)),   # A stays VMEM-resident
        pl.BlockSpec((Kp, tn), lambda j: (0, j)),
        pl.BlockSpec((1, tn), lambda j: (0, j)),
    ]
    cparams = pltpu.CompilerParams(
        dimension_semantics=("parallel",),
        vmem_limit_bytes=_VMEM_LIMIT)

    if not compute_stats:
        out = pl.pallas_call(
            functools.partial(_matmul_bias_act_kernel, alpha=alpha),
            out_shape=jax.ShapeDtypeStruct((Mp, Np), out_dtype),
            grid_spec=pltpu.PrefetchScalarGridSpec(
                num_scalar_prefetch=0, grid=grid,
                in_specs=in_specs,
                out_specs=pl.BlockSpec((Mp, tn), lambda j: (0, j))),
            compiler_params=cparams,
        )(ap, bp, biasp)
        return out[:M, :O]

    y, ssum, ssq = pl.pallas_call(
        functools.partial(_matmul_bias_stats_kernel, m_valid=M),
        out_shape=(jax.ShapeDtypeStruct((Mp, Np), out_dtype),
                   jax.ShapeDtypeStruct((1, Np), jnp.float32),
                   jax.ShapeDtypeStruct((1, Np), jnp.float32)),
        grid_spec=pltpu.PrefetchScalarGridSpec(
            num_scalar_prefetch=0, grid=grid,
            in_specs=in_specs,
            out_specs=[pl.BlockSpec((Mp, tn), lambda j: (0, j)),
                       pl.BlockSpec((1, tn), lambda j: (0, j)),
                       pl.BlockSpec((1, tn), lambda j: (0, j))]),
        compiler_params=cparams,
    )(ap, bp, biasp)
    # Columns beyond O (none for the BN layers: 128/256/512 are 128-aligned);
    # padded rows are kept and sliced off after the affine pass.
    return y[:, :O], ssum[0, :O], ssq[0, :O]


def affine_act(y_pad, scale, shift, *, alpha, out_dtype=jnp.bfloat16):
    """BN affine + LeakyReLU over a (Mp, C) activation as one VMEM block."""
    Mp, C = y_pad.shape
    return pl.pallas_call(
        functools.partial(_affine_act_kernel, alpha=alpha),
        out_shape=jax.ShapeDtypeStruct((Mp, C), out_dtype),
        grid_spec=pltpu.PrefetchScalarGridSpec(
            num_scalar_prefetch=0, grid=(1,),
            in_specs=[pl.BlockSpec((Mp, C), lambda i: (0, 0)),
                      pl.BlockSpec((1, C), lambda i: (0, 0)),
                      pl.BlockSpec((1, C), lambda i: (0, 0))],
            out_specs=pl.BlockSpec((Mp, C), lambda i: (0, 0))),
        compiler_params=pltpu.CompilerParams(
            dimension_semantics=("arbitrary",),
            vmem_limit_bytes=_VMEM_LIMIT),
    )(y_pad,
      scale.reshape(1, -1).astype(jnp.float32),
      shift.reshape(1, -1).astype(jnp.float32))


def _im2col_nhwc(x, ksize, stride, pad):
    """x: (N,H,W,C) -> patches (N*Ho*Wo, ksize*ksize*C), patch order (kh,kw,c)."""
    N, H, W, C = x.shape
    Ho = (H + 2 * pad - ksize) // stride + 1
    Wo = (W + 2 * pad - ksize) // stride + 1
    xp = jnp.pad(x, ((0, 0), (pad, pad), (pad, pad), (0, 0)))
    cols = []
    for kh in range(ksize):
        for kw in range(ksize):
            sl = xp[:, kh:kh + (Ho - 1) * stride + 1:stride,
                    kw:kw + (Wo - 1) * stride + 1:stride, :]
            cols.append(sl)
    patches = jnp.concatenate(cols, axis=-1)
    return patches.reshape(N * Ho * Wo, ksize * ksize * C), Ho, Wo


def conv2d(x_nhwc, w_oikk, bias, stride, pad, *, alpha=None, bn=None,
           out_dtype=jnp.bfloat16):
    """NHWC conv via im2col + Pallas matmul.  w_oikk is PyTorch (O, C, Kh, Kw).

    bn=None           : conv + bias (+ LeakyReLU(alpha) fused in the kernel).
    bn=(gamma, beta)  : conv + bias with fused per-channel batch statistics,
                        then BN affine + LeakyReLU(alpha) (training-mode BN).
    """
    O, C, Kh, Kw = w_oikk.shape
    N = x_nhwc.shape[0]
    # TODO(synk): im2col is still XLA glue (materializes the Kh*Kw-duplicated
    # patch matrix in HBM); in-kernel strided-window DMA would remove it.
    a, Ho, Wo = _im2col_nhwc(x_nhwc.astype(jnp.bfloat16), Kh, stride, pad)
    b = jnp.transpose(w_oikk, (2, 3, 1, 0)).reshape(Kh * Kw * C, O)  # (kh,kw,c)->O
    M = N * Ho * Wo

    if bn is None:
        y = matmul_bias(a, b, bias, alpha=alpha, out_dtype=out_dtype)
        return y.reshape(N, Ho, Wo, O)

    gamma, beta = bn
    y_pad, ssum, ssq = matmul_bias(a, b, bias, compute_stats=True,
                                   out_dtype=jnp.bfloat16)
    mean = ssum / M
    var = jnp.maximum(ssq / M - mean * mean, 0.0)   # biased var (PyTorch BN fwd)
    scale = gamma / jnp.sqrt(var + BN_EPS)
    shift = beta - mean * scale
    out = affine_act(y_pad, scale, shift, alpha=alpha, out_dtype=out_dtype)
    return out[:M].reshape(N, Ho, Wo, O)


# ---------------------------------------------------------------------------
# Module: D
# ---------------------------------------------------------------------------
def init_params(key, in_channels):
    """Deterministic init (PyTorch-style uniform(-1/sqrt(fan_in), 1/sqrt(fan_in)))."""
    shapes = [
        (64, in_channels, 4, 4),   # input_conv
        (128, 64, 4, 4),           # conv_layers[0]
        (256, 128, 4, 4),          # conv_layers[3]
        (512, 256, 4, 4),          # conv_layers[6]
        (1, 512, 4, 4),            # classifier
    ]
    params = {}
    for idx, shp in enumerate(shapes):
        key, kw, kb = jax.random.split(key, 3)
        fan_in = shp[1] * shp[2] * shp[3]
        bound = 1.0 / (fan_in ** 0.5)
        params[f"w{idx}"] = jax.random.uniform(
            kw, shp, jnp.float32, minval=-bound, maxval=bound)
        params[f"b{idx}"] = jax.random.uniform(
            kb, (shp[0],), jnp.float32, minval=-bound, maxval=bound)
    for idx, ch in [(1, 128), (2, 256), (3, 512)]:
        params[f"g{idx}"] = jnp.ones((ch,), jnp.float32)    # BN gamma
        params[f"be{idx}"] = jnp.zeros((ch,), jnp.float32)  # BN beta
    return params


def d_forward(x_nchw, params):
    x = jnp.transpose(x_nchw, (0, 2, 3, 1))  # NCHW -> NHWC internally

    # input_conv: Conv(in, 64, k4, s2, p1) + LeakyReLU() (default slope 0.01, fused)
    x = conv2d(x, params["w0"], params["b0"], stride=2, pad=1, alpha=0.01)

    # conv_layers: Conv -> BN(batch stats) -> LeakyReLU(0.3)
    # TODO(synk): training-mode batch statistics; running_mean/var (eval mode)
    # are not modeled since this is a forward-only kernel.
    x = conv2d(x, params["w1"], params["b1"], stride=2, pad=1, alpha=0.3,
               bn=(params["g1"], params["be1"]))
    x = conv2d(x, params["w2"], params["b2"], stride=2, pad=1, alpha=0.3,
               bn=(params["g2"], params["be2"]))
    x = conv2d(x, params["w3"], params["b3"], stride=1, pad=1, alpha=0.3,
               bn=(params["g3"], params["be3"]))

    # classifier: Conv(512, 1, k4, s1, p1), no activation, f32 output
    x = conv2d(x, params["w4"], params["b4"], stride=1, pad=1, alpha=None,
               out_dtype=jnp.float32)

    return jnp.transpose(x, (0, 3, 1, 2)).astype(jnp.float32)  # back to NCHW


if __name__ == "__main__":
    key = jax.random.PRNGKey(0)
    k_param, k_x = jax.random.split(key)

    in_channels = 3
    params = init_params(k_param, in_channels)
    # 32x32 input -> 16 -> 8 -> 4 -> 3 -> 2 spatial; output (2, 1, 2, 2)
    x = jax.random.normal(k_x, (2, in_channels, 32, 32), jnp.float32)

    out = jax.jit(d_forward)(x, params)
    out = jax.block_until_ready(out)
    assert out.shape == (2, 1, 2, 2), out.shape
    print("KERNEL_OK")
</pallas_src>

<mosaic_0001>
module attributes {stable_mosaic.version = 11 : i64} {
  func.func @_matmul_bias_act_kernel(%arg0: i32, %arg1: memref<512x128xbf16, #tpu.memory_space<vmem>>, %arg2: memref<128x128xbf16, #tpu.memory_space<vmem>>, %arg3: memref<1x128xf32, #tpu.memory_space<vmem>>, %arg4: memref<512x128xbf16, #tpu.memory_space<vmem>>) attributes {dimension_semantics = [#tpu.dimension_semantics<parallel>], iteration_bounds = array<i64: 1>, scalar_prefetch = 0 : i64, scratch_operands = 0 : i64, tpu.core_type = #tpu.core_type<tc>, window_params = [{pipeline_mode = #tpu.pipeline_mode<synchronous>, transform_indices = @transform_0, window_bounds = array<i64: 512, 128>}, {transform_indices = @transform_1, window_bounds = array<i64: 128, 128>}, {transform_indices = @transform_2, window_bounds = array<i64: 1, 128>}, {transform_indices = @transform_3, window_bounds = array<i64: 512, 128>}]} {
    %c0 = arith.constant 0 : index
    %c0_0 = arith.constant 0 : index
    %0 = vector.load %arg1[%c0, %c0_0] : memref<512x128xbf16, #tpu.memory_space<vmem>>, vector<512x128xbf16>
    %c0_1 = arith.constant 0 : index
    %c0_2 = arith.constant 0 : index
    %1 = vector.load %arg2[%c0_1, %c0_2] : memref<128x128xbf16, #tpu.memory_space<vmem>>, vector<128x128xbf16>
    %cst = arith.constant dense<0.000000e+00> : vector<512x128xf32>
    %2 = tpu.matmul %0, %1, %cst {dimension_numbers = #tpu.dot_dimension_numbers<[1], [0], [0], [1], [0, 0, 1, 1], [], []>} : vector<512x128xbf16>, vector<128x128xbf16>, vector<512x128xf32> -> vector<512x128xf32>
    %c0_3 = arith.constant 0 : index
    %c0_4 = arith.constant 0 : index
    %3 = vector.load %arg3[%c0_3, %c0_4] : memref<1x128xf32, #tpu.memory_space<vmem>>, vector<1x128xf32>
    %4 = vector.broadcast %3 : vector<1x128xf32> to vector<512x128xf32>
    %5 = arith.addf %2, %4 : vector<512x128xf32>
    %cst_5 = arith.constant 0.000000e+00 : f32
    %6 = vector.broadcast %cst_5 : f32 to vector<512x128xf32>
    %7 = arith.cmpf ogt, %5, %6 : vector<512x128xf32>
    %cst_6 = arith.constant 0.00999999977 : f32
    %8 = vector.broadcast %cst_6 : f32 to vector<512x128xf32>
    %9 = arith.mulf %8, %5 : vector<512x128xf32>
    %10 = arith.select %7, %5, %9 : vector<512x128xi1>, vector<512x128xf32>
    %11 = arith.truncf %10 : vector<512x128xf32> to vector<512x128xbf16>
    %c0_7 = arith.constant 0 : index
    %c0_8 = arith.constant 0 : index
    %12 = vector.load %arg4[%c0_7, %c0_8] : memref<512x128xbf16, #tpu.memory_space<vmem>>, vector<512x128xbf16>
    tpu.vector_store %arg4[%c0_7, %c0_8], %11 {strides = array<i32>} : memref<512x128xbf16, #tpu.memory_space<vmem>>, vector<512x128xbf16>,
    return
  }
  func.func @transform_0(%arg0: i32) -> (i32, i32) {
    %c0_i32 = arith.constant 0 : i32
    %c0_i32_0 = arith.constant 0 : i32
    %c0_i32_1 = arith.constant 0 : i32
    return %c0_i32, %c0_i32_0 : i32, i32
  }
  func.func @transform_1(%arg0: i32) -> (i32, i32) {
    %c0_i32 = arith.constant 0 : i32
    %c0_i32_0 = arith.constant 0 : i32
    return %c0_i32, %arg0 : i32, i32
  }
  func.func @transform_2(%arg0: i32) -> (i32, i32) {
    %c0_i32 = arith.constant 0 : i32
    %c0_i32_0 = arith.constant 0 : i32
    return %c0_i32, %arg0 : i32, i32
  }
  func.func @transform_3(%arg0: i32) -> (i32, i32) {
    %c0_i32 = arith.constant 0 : i32
    %c0_i32_0 = arith.constant 0 : i32
    return %c0_i32, %arg0 : i32, i32
  }
}

module attributes {stable_mosaic.version = 11 : i64} {
  func.func @_matmul_bias_stats_kernel(%arg0: i32, %arg1: memref<128x1024xbf16, #tpu.memory_space<vmem>>, %arg2: memref<1024x128xbf16, #tpu.memory_space<vmem>>, %arg3: memref<1x128xf32, #tpu.memory_space<vmem>>, %arg4: memref<128x128xbf16, #tpu.memory_space<vmem>>, %arg5: memref<1x128xf32, #tpu.memory_space<vmem>>, %arg6: memref<1x128xf32, #tpu.memory_space<vmem>>) attributes {dimension_semantics = [#tpu.dimension_semantics<parallel>], iteration_bounds = array<i64: 1>, scalar_prefetch = 0 : i64, scratch_operands = 0 : i64, tpu.core_type = #tpu.core_type<tc>, window_params = [{pipeline_mode = #tpu.pipeline_mode<synchronous>, transform_indices = @transform_0, window_bounds = array<i64: 128, 1024>}, {transform_indices = @transform_1, window_bounds = array<i64: 1024, 128>}, {transform_indices = @transform_2, window_bounds = array<i64: 1, 128>}, {transform_indices = @transform_3, window_bounds = array<i64: 128, 128>}, {transform_indices = @transform_4, window_bounds = array<i64: 1, 128>}, {transform_indices = @transform_5, window_bounds = array<i64: 1, 128>}]} {
    %c0 = arith.constant 0 : index
    %c0_0 = arith.constant 0 : index
    %0 = vector.load %arg1[%c0, %c0_0] : memref<128x1024xbf16, #tpu.memory_space<vmem>>, vector<128x1024xbf16>
    %c0_1 = arith.constant 0 : index
    %c0_2 = arith.constant 0 : index
    %1 = vector.load %arg2[%c0_1, %c0_2] : memref<1024x128xbf16, #tpu.memory_space<vmem>>, vector<1024x128xbf16>
    %cst = arith.constant dense<0.000000e+00> : vector<128x128xf32>
    %2 = tpu.matmul %0, %1, %cst {dimension_numbers = #tpu.dot_dimension_numbers<[1], [0], [0], [1], [0, 0, 1, 1], [], []>} : vector<128x1024xbf16>, vector<1024x128xbf16>, vector<128x128xf32> -> vector<128x128xf32>
    %c0_3 = arith.constant 0 : index
    %c0_4 = arith.constant 0 : index
    %3 = vector.load %arg3[%c0_3, %c0_4] : memref<1x128xf32, #tpu.memory_space<vmem>>, vector<1x128xf32>
    %4 = vector.broadcast %3 : vector<1x128xf32> to vector<128x128xf32>
    %5 = arith.addf %2, %4 : vector<128x128xf32>
    %6 = arith.truncf %5 : vector<128x128xf32> to vector<128x128xbf16>
    %c0_5 = arith.constant 0 : index
    %c0_6 = arith.constant 0 : index
    %7 = vector.load %arg4[%c0_5, %c0_6] : memref<128x128xbf16, #tpu.memory_space<vmem>>, vector<128x128xbf16>
    tpu.vector_store %arg4[%c0_5, %c0_6], %6 {strides = array<i32>} : memref<128x128xbf16, #tpu.memory_space<vmem>>, vector<128x128xbf16>,
    %8 = tpu.iota {dimensions = array<i32: 0>} : vector<128x128xi32>
    %c128_i32 = arith.constant 128 : i32
    %9 = vector.broadcast %c128_i32 : i32 to vector<128x128xi32>
    %10 = arith.cmpi slt, %8, %9 : vector<128x128xi32>
    %cst_7 = arith.constant 0.000000e+00 : f32
    %11 = vector.broadcast %cst_7 : f32 to vector<128x128xf32>
    %12 = arith.select %10, %5, %11 : vector<128x128xi1>, vector<128x128xf32>
    %cst_8 = arith.constant dense<0.000000e+00> : vector<128xf32>
    %13 = vector.multi_reduction <add>, %12, %cst_8 [0] : vector<128x128xf32> to vector<128xf32>
    %14 = vector.shape_cast %13 : vector<128xf32> to vector<1x128xf32>
    %c0_9 = arith.constant 0 : index
    %c0_10 = arith.constant 0 : index
    %15 = vector.load %arg5[%c0_9, %c0_10] : memref<1x128xf32, #tpu.memory_space<vmem>>, vector<1x128xf32>
    tpu.vector_store %arg5[%c0_9, %c0_10], %14 {strides = array<i32>} : memref<1x128xf32, #tpu.memory_space<vmem>>, vector<1x128xf32>,
    %16 = arith.mulf %12, %12 : vector<128x128xf32>
    %cst_11 = arith.constant dense<0.000000e+00> : vector<128xf32>
    %17 = vector.multi_reduction <add>, %16, %cst_11 [0] : vector<128x128xf32> to vector<128xf32>
    %18 = vector.shape_cast %17 : vector<128xf32> to vector<1x128xf32>
    %c0_12 = arith.constant 0 : index
    %c0_13 = arith.constant 0 : index
    %19 = vector.load %arg6[%c0_12, %c0_13] : memref<1x128xf32, #tpu.memory_space<vmem>>, vector<1x128xf32>
    tpu.vector_store %arg6[%c0_12, %c0_13], %18 {strides = array<i32>} : memref<1x128xf32, #tpu.memory_space<vmem>>, vector<1x128xf32>,
    return
  }
  func.func @transform_0(%arg0: i32) -> (i32, i32) {
    %c0_i32 = arith.constant 0 : i32
    %c0_i32_0 = arith.constant 0 : i32
    %c0_i32_1 = arith.constant 0 : i32
    return %c0_i32, %c0_i32_0 : i32, i32
  }
  func.func @transform_1(%arg0: i32) -> (i32, i32) {
    %c0_i32 = arith.constant 0 : i32
    %c0_i32_0 = arith.constant 0 : i32
    return %c0_i32, %arg0 : i32, i32
  }
  func.func @transform_2(%arg0: i32) -> (i32, i32) {
    %c0_i32 = arith.constant 0 : i32
    %c0_i32_0 = arith.constant 0 : i32
    return %c0_i32, %arg0 : i32, i32
  }
  func.func @transform_3(%arg0: i32) -> (i32, i32) {
    %c0_i32 = arith.constant 0 : i32
    %c0_i32_0 = arith.constant 0 : i32
    return %c0_i32, %arg0 : i32, i32
  }
  func.func @transform_4(%arg0: i32) -> (i32, i32) {
    %c0_i32 = arith.constant 0 : i32
    %c0_i32_0 = arith.constant 0 : i32
    return %c0_i32, %arg0 : i32, i32
  }
  func.func @transform_5(%arg0: i32) -> (i32, i32) {
    %c0_i32 = arith.constant 0 : i32
    %c0_i32_0 = arith.constant 0 : i32
    return %c0_i32, %arg0 : i32, i32
  }
}

module attributes {stable_mosaic.version = 11 : i64} {
  func.func @_affine_act_kernel(%arg0: i32, %arg1: memref<128x128xbf16, #tpu.memory_space<vmem>>, %arg2: memref<1x128xf32, #tpu.memory_space<vmem>>, %arg3: memref<1x128xf32, #tpu.memory_space<vmem>>, %arg4: memref<128x128xbf16, #tpu.memory_space<vmem>>) attributes {dimension_semantics = [#tpu.dimension_semantics<arbitrary>], iteration_bounds = array<i64: 1>, scalar_prefetch = 0 : i64, scratch_operands = 0 : i64, tpu.core_type = #tpu.core_type<tc>, window_params = [{pipeline_mode = #tpu.pipeline_mode<synchronous>, transform_indices = @transform_0, window_bounds = array<i64: 128, 128>}, {pipeline_mode = #tpu.pipeline_mode<synchronous>, transform_indices = @transform_1, window_bounds = array<i64: 1, 128>}, {pipeline_mode = #tpu.pipeline_mode<synchronous>, transform_indices = @transform_2, window_bounds = array<i64: 1, 128>}, {pipeline_mode = #tpu.pipeline_mode<synchronous>, transform_indices = @transform_3, window_bounds = array<i64: 128, 128>}]} {
    %c0 = arith.constant 0 : index
    %c0_0 = arith.constant 0 : index
    %0 = vector.load %arg1[%c0, %c0_0] : memref<128x128xbf16, #tpu.memory_space<vmem>>, vector<128x128xbf16>
    %1 = arith.extf %0 : vector<128x128xbf16> to vector<128x128xf32>
    %c0_1 = arith.constant 0 : index
    %c0_2 = arith.constant 0 : index
    %2 = vector.load %arg2[%c0_1, %c0_2] : memref<1x128xf32, #tpu.memory_space<vmem>>, vector<1x128xf32>
    %3 = vector.broadcast %2 : vector<1x128xf32> to vector<128x128xf32>
    %4 = arith.mulf %1, %3 : vector<128x128xf32>
    %c0_3 = arith.constant 0 : index
    %c0_4 = arith.constant 0 : index
    %5 = vector.load %arg3[%c0_3, %c0_4] : memref<1x128xf32, #tpu.memory_space<vmem>>, vector<1x128xf32>
    %6 = vector.broadcast %5 : vector<1x128xf32> to vector<128x128xf32>
    %7 = arith.addf %4, %6 : vector<128x128xf32>
    %cst = arith.constant 0.000000e+00 : f32
    %8 = vector.broadcast %cst : f32 to vector<128x128xf32>
    %9 = arith.cmpf ogt, %7, %8 : vector<128x128xf32>
    %cst_5 = arith.constant 3.000000e-01 : f32
    %10 = vector.broadcast %cst_5 : f32 to vector<128x128xf32>
    %11 = arith.mulf %10, %7 : vector<128x128xf32>
    %12 = arith.select %9, %7, %11 : vector<128x128xi1>, vector<128x128xf32>
    %13 = arith.truncf %12 : vector<128x128xf32> to vector<128x128xbf16>
    %c0_6 = arith.constant 0 : index
    %c0_7 = arith.constant 0 : index
    %14 = vector.load %arg4[%c0_6, %c0_7] : memref<128x128xbf16, #tpu.memory_space<vmem>>, vector<128x128xbf16>
    tpu.vector_store %arg4[%c0_6, %c0_7], %13 {strides = array<i32>} : memref<128x128xbf16, #tpu.memory_space<vmem>>, vector<128x128xbf16>,
    return
  }
  func.func @transform_0(%arg0: i32) -> (i32, i32) {
    %c0_i32 = arith.constant 0 : i32
    %c0_i32_0 = arith.constant 0 : i32
    %c0_i32_1 = arith.constant 0 : i32
    return %c0_i32, %c0_i32_0 : i32, i32
  }
  func.func @transform_1(%arg0: i32) -> (i32, i32) {
    %c0_i32 = arith.constant 0 : i32
    %c0_i32_0 = arith.constant 0 : i32
    %c0_i32_1 = arith.constant 0 : i32
    return %c0_i32, %c0_i32_0 : i32, i32
  }
  func.func @transform_2(%arg0: i32) -> (i32, i32) {
    %c0_i32 = arith.constant 0 : i32
    %c0_i32_0 = arith.constant 0 : i32
    %c0_i32_1 = arith.constant 0 : i32
    return %c0_i32, %c0_i32_0 : i32, i32
  }
  func.func @transform_3(%arg0: i32) -> (i32, i32) {
    %c0_i32 = arith.constant 0 : i32
    %c0_i32_0 = arith.constant 0 : i32
    %c0_i32_1 = arith.constant 0 : i32
    return %c0_i32, %c0_i32_0 : i32, i32
  }
}

module attributes {stable_mosaic.version = 11 : i64} {
  func.func @_matmul_bias_stats_kernel(%arg0: i32, %arg1: memref<32x2048xbf16, #tpu.memory_space<vmem>>, %arg2: memref<2048x128xbf16, #tpu.memory_space<vmem>>, %arg3: memref<1x128xf32, #tpu.memory_space<vmem>>, %arg4: memref<32x128xbf16, #tpu.memory_space<vmem>>, %arg5: memref<1x128xf32, #tpu.memory_space<vmem>>, %arg6: memref<1x128xf32, #tpu.memory_space<vmem>>) attributes {dimension_semantics = [#tpu.dimension_semantics<parallel>], iteration_bounds = array<i64: 2>, scalar_prefetch = 0 : i64, scratch_operands = 0 : i64, tpu.core_type = #tpu.core_type<tc>, window_params = [{pipeline_mode = #tpu.pipeline_mode<synchronous>, transform_indices = @transform_0, window_bounds = array<i64: 32, 2048>}, {transform_indices = @transform_1, window_bounds = array<i64: 2048, 128>}, {transform_indices = @transform_2, window_bounds = array<i64: 1, 128>}, {transform_indices = @transform_3, window_bounds = array<i64: 32, 128>}, {transform_indices = @transform_4, window_bounds = array<i64: 1, 128>}, {transform_indices = @transform_5, window_bounds = array<i64: 1, 128>}]} {
    %c0 = arith.constant 0 : index
    %c0_0 = arith.constant 0 : index
    %0 = vector.load %arg1[%c0, %c0_0] : memref<32x2048xbf16, #tpu.memory_space<vmem>>, vector<32x2048xbf16>
    %c0_1 = arith.constant 0 : index
    %c0_2 = arith.constant 0 : index
    %1 = vector.load %arg2[%c0_1, %c0_2] : memref<2048x128xbf16, #tpu.memory_space<vmem>>, vector<2048x128xbf16>
    %cst = arith.constant dense<0.000000e+00> : vector<32x128xf32>
    %2 = tpu.matmul %0, %1, %cst {dimension_numbers = #tpu.dot_dimension_numbers<[1], [0], [0], [1], [0, 0, 1, 1], [], []>} : vector<32x2048xbf16>, vector<2048x128xbf16>, vector<32x128xf32> -> vector<32x128xf32>
    %c0_3 = arith.constant 0 : index
    %c0_4 = arith.constant 0 : index
    %3 = vector.load %arg3[%c0_3, %c0_4] : memref<1x128xf32, #tpu.memory_space<vmem>>, vector<1x128xf32>
    %4 = vector.broadcast %3 : vector<1x128xf32> to vector<32x128xf32>
    %5 = arith.addf %2, %4 : vector<32x128xf32>
    %6 = arith.truncf %5 : vector<32x128xf32> to vector<32x128xbf16>
    %c0_5 = arith.constant 0 : index
    %c0_6 = arith.constant 0 : index
    %7 = vector.load %arg4[%c0_5, %c0_6] : memref<32x128xbf16, #tpu.memory_space<vmem>>, vector<32x128xbf16>
    tpu.vector_store %arg4[%c0_5, %c0_6], %6 {strides = array<i32>} : memref<32x128xbf16, #tpu.memory_space<vmem>>, vector<32x128xbf16>,
    %8 = tpu.iota {dimensions = array<i32: 0>} : vector<32x128xi32>
    %c32_i32 = arith.constant 32 : i32
    %9 = vector.broadcast %c32_i32 : i32 to vector<32x128xi32>
    %10 = arith.cmpi slt, %8, %9 : vector<32x128xi32>
    %cst_7 = arith.constant 0.000000e+00 : f32
    %11 = vector.broadcast %cst_7 : f32 to vector<32x128xf32>
    %12 = arith.select %10, %5, %11 : vector<32x128xi1>, vector<32x128xf32>
    %cst_8 = arith.constant dense<0.000000e+00> : vector<128xf32>
    %13 = vector.multi_reduction <add>, %12, %cst_8 [0] : vector<32x128xf32> to vector<128xf32>
    %14 = vector.shape_cast %13 : vector<128xf32> to vector<1x128xf32>
    %c0_9 = arith.constant 0 : index
    %c0_10 = arith.constant 0 : index
    %15 = vector.load %arg5[%c0_9, %c0_10] : memref<1x128xf32, #tpu.memory_space<vmem>>, vector<1x128xf32>
    tpu.vector_store %arg5[%c0_9, %c0_10], %14 {strides = array<i32>} : memref<1x128xf32, #tpu.memory_space<vmem>>, vector<1x128xf32>,
    %16 = arith.mulf %12, %12 : vector<32x128xf32>
    %cst_11 = arith.constant dense<0.000000e+00> : vector<128xf32>
    %17 = vector.multi_reduction <add>, %16, %cst_11 [0] : vector<32x128xf32> to vector<128xf32>
    %18 = vector.shape_cast %17 : vector<128xf32> to vector<1x128xf32>
    %c0_12 = arith.constant 0 : index
    %c0_13 = arith.constant 0 : index
    %19 = vector.load %arg6[%c0_12, %c0_13] : memref<1x128xf32, #tpu.memory_space<vmem>>, vector<1x128xf32>
    tpu.vector_store %arg6[%c0_12, %c0_13], %18 {strides = array<i32>} : memref<1x128xf32, #tpu.memory_space<vmem>>, vector<1x128xf32>,
    return
  }
  func.func @transform_0(%arg0: i32) -> (i32, i32) {
    %c0_i32 = arith.constant 0 : i32
    %c0_i32_0 = arith.constant 0 : i32
    %c0_i32_1 = arith.constant 0 : i32
    return %c0_i32, %c0_i32_0 : i32, i32
  }
  func.func @transform_1(%arg0: i32) -> (i32, i32) {
    %c0_i32 = arith.constant 0 : i32
    %c0_i32_0 = arith.constant 0 : i32
    return %c0_i32, %arg0 : i32, i32
  }
  func.func @transform_2(%arg0: i32) -> (i32, i32) {
    %c0_i32 = arith.constant 0 : i32
    %c0_i32_0 = arith.constant 0 : i32
    return %c0_i32, %arg0 : i32, i32
  }
  func.func @transform_3(%arg0: i32) -> (i32, i32) {
    %c0_i32 = arith.constant 0 : i32
    %c0_i32_0 = arith.constant 0 : i32
    return %c0_i32, %arg0 : i32, i32
  }
  func.func @transform_4(%arg0: i32) -> (i32, i32) {
    %c0_i32 = arith.constant 0 : i32
    %c0_i32_0 = arith.constant 0 : i32
    return %c0_i32, %arg0 : i32, i32
  }
  func.func @transform_5(%arg0: i32) -> (i32, i32) {
    %c0_i32 = arith.constant 0 : i32
    %c0_i32_0 = arith.constant 0 : i32
    return %c0_i32, %arg0 : i32, i32
  }
}

module attributes {stable_mosaic.version = 11 : i64} {
  func.func @_affine_act_kernel(%arg0: i32, %arg1: memref<32x256xbf16, #tpu.memory_space<vmem>>, %arg2: memref<1x256xf32, #tpu.memory_space<vmem>>, %arg3: memref<1x256xf32, #tpu.memory_space<vmem>>, %arg4: memref<32x256xbf16, #tpu.memory_space<vmem>>) attributes {dimension_semantics = [#tpu.dimension_semantics<arbitrary>], iteration_bounds = array<i64: 1>, scalar_prefetch = 0 : i64, scratch_operands = 0 : i64, tpu.core_type = #tpu.core_type<tc>, window_params = [{pipeline_mode = #tpu.pipeline_mode<synchronous>, transform_indices = @transform_0, window_bounds = array<i64: 32, 256>}, {pipeline_mode = #tpu.pipeline_mode<synchronous>, transform_indices = @transform_1, window_bounds = array<i64: 1, 256>}, {pipeline_mode = #tpu.pipeline_mode<synchronous>, transform_indices = @transform_2, window_bounds = array<i64: 1, 256>}, {pipeline_mode = #tpu.pipeline_mode<synchronous>, transform_indices = @transform_3, window_bounds = array<i64: 32, 256>}]} {
    %c0 = arith.constant 0 : index
    %c0_0 = arith.constant 0 : index
    %0 = vector.load %arg1[%c0, %c0_0] : memref<32x256xbf16, #tpu.memory_space<vmem>>, vector<32x256xbf16>
    %1 = arith.extf %0 : vector<32x256xbf16> to vector<32x256xf32>
    %c0_1 = arith.constant 0 : index
    %c0_2 = arith.constant 0 : index
    %2 = vector.load %arg2[%c0_1, %c0_2] : memref<1x256xf32, #tpu.memory_space<vmem>>, vector<1x256xf32>
    %3 = vector.broadcast %2 : vector<1x256xf32> to vector<32x256xf32>
    %4 = arith.mulf %1, %3 : vector<32x256xf32>
    %c0_3 = arith.constant 0 : index
    %c0_4 = arith.constant 0 : index
    %5 = vector.load %arg3[%c0_3, %c0_4] : memref<1x256xf32, #tpu.memory_space<vmem>>, vector<1x256xf32>
    %6 = vector.broadcast %5 : vector<1x256xf32> to vector<32x256xf32>
    %7 = arith.addf %4, %6 : vector<32x256xf32>
    %cst = arith.constant 0.000000e+00 : f32
    %8 = vector.broadcast %cst : f32 to vector<32x256xf32>
    %9 = arith.cmpf ogt, %7, %8 : vector<32x256xf32>
    %cst_5 = arith.constant 3.000000e-01 : f32
    %10 = vector.broadcast %cst_5 : f32 to vector<32x256xf32>
    %11 = arith.mulf %10, %7 : vector<32x256xf32>
    %12 = arith.select %9, %7, %11 : vector<32x256xi1>, vector<32x256xf32>
    %13 = arith.truncf %12 : vector<32x256xf32> to vector<32x256xbf16>
    %c0_6 = arith.constant 0 : index
    %c0_7 = arith.constant 0 : index
    %14 = vector.load %arg4[%c0_6, %c0_7] : memref<32x256xbf16, #tpu.memory_space<vmem>>, vector<32x256xbf16>
    tpu.vector_store %arg4[%c0_6, %c0_7], %13 {strides = array<i32>} : memref<32x256xbf16, #tpu.memory_space<vmem>>, vector<32x256xbf16>,
    return
  }
  func.func @transform_0(%arg0: i32) -> (i32, i32) {
    %c0_i32 = arith.constant 0 : i32
    %c0_i32_0 = arith.constant 0 : i32
    %c0_i32_1 = arith.constant 0 : i32
    return %c0_i32, %c0_i32_0 : i32, i32
  }
  func.func @transform_1(%arg0: i32) -> (i32, i32) {
    %c0_i32 = arith.constant 0 : i32
    %c0_i32_0 = arith.constant 0 : i32
    %c0_i32_1 = arith.constant 0 : i32
    return %c0_i32, %c0_i32_0 : i32, i32
  }
  func.func @transform_2(%arg0: i32) -> (i32, i32) {
    %c0_i32 = arith.constant 0 : i32
    %c0_i32_0 = arith.constant 0 : i32
    %c0_i32_1 = arith.constant 0 : i32
    return %c0_i32, %c0_i32_0 : i32, i32
  }
  func.func @transform_3(%arg0: i32) -> (i32, i32) {
    %c0_i32 = arith.constant 0 : i32
    %c0_i32_0 = arith.constant 0 : i32
    %c0_i32_1 = arith.constant 0 : i32
    return %c0_i32, %c0_i32_0 : i32, i32
  }
}

module attributes {stable_mosaic.version = 11 : i64} {
  func.func @_matmul_bias_stats_kernel(%arg0: i32, %arg1: memref<24x4096xbf16, #tpu.memory_space<vmem>>, %arg2: memref<4096x256xbf16, #tpu.memory_space<vmem>>, %arg3: memref<1x256xf32, #tpu.memory_space<vmem>>, %arg4: memref<24x256xbf16, #tpu.memory_space<vmem>>, %arg5: memref<1x256xf32, #tpu.memory_space<vmem>>, %arg6: memref<1x256xf32, #tpu.memory_space<vmem>>) attributes {dimension_semantics = [#tpu.dimension_semantics<parallel>], iteration_bounds = array<i64: 2>, scalar_prefetch = 0 : i64, scratch_operands = 0 : i64, tpu.core_type = #tpu.core_type<tc>, window_params = [{pipeline_mode = #tpu.pipeline_mode<synchronous>, transform_indices = @transform_0, window_bounds = array<i64: 24, 4096>}, {transform_indices = @transform_1, window_bounds = array<i64: 4096, 256>}, {transform_indices = @transform_2, window_bounds = array<i64: 1, 256>}, {transform_indices = @transform_3, window_bounds = array<i64: 24, 256>}, {transform_indices = @transform_4, window_bounds = array<i64: 1, 256>}, {transform_indices = @transform_5, window_bounds = array<i64: 1, 256>}]} {
    %c0 = arith.constant 0 : index
    %c0_0 = arith.constant 0 : index
    %0 = vector.load %arg1[%c0, %c0_0] : memref<24x4096xbf16, #tpu.memory_space<vmem>>, vector<24x4096xbf16>
    %c0_1 = arith.constant 0 : index
    %c0_2 = arith.constant 0 : index
    %1 = vector.load %arg2[%c0_1, %c0_2] : memref<4096x256xbf16, #tpu.memory_space<vmem>>, vector<4096x256xbf16>
    %cst = arith.constant dense<0.000000e+00> : vector<24x256xf32>
    %2 = tpu.matmul %0, %1, %cst {dimension_numbers = #tpu.dot_dimension_numbers<[1], [0], [0], [1], [0, 0, 1, 1], [], []>} : vector<24x4096xbf16>, vector<4096x256xbf16>, vector<24x256xf32> -> vector<24x256xf32>
    %c0_3 = arith.constant 0 : index
    %c0_4 = arith.constant 0 : index
    %3 = vector.load %arg3[%c0_3, %c0_4] : memref<1x256xf32, #tpu.memory_space<vmem>>, vector<1x256xf32>
    %4 = vector.broadcast %3 : vector<1x256xf32> to vector<24x256xf32>
    %5 = arith.addf %2, %4 : vector<24x256xf32>
    %6 = arith.truncf %5 : vector<24x256xf32> to vector<24x256xbf16>
    %c0_5 = arith.constant 0 : index
    %c0_6 = arith.constant 0 : index
    %7 = vector.load %arg4[%c0_5, %c0_6] : memref<24x256xbf16, #tpu.memory_space<vmem>>, vector<24x256xbf16>
    tpu.vector_store %arg4[%c0_5, %c0_6], %6 {strides = array<i32>} : memref<24x256xbf16, #tpu.memory_space<vmem>>, vector<24x256xbf16>,
    %8 = tpu.iota {dimensions = array<i32: 0>} : vector<24x256xi32>
    %c18_i32 = arith.constant 18 : i32
    %9 = vector.broadcast %c18_i32 : i32 to vector<24x256xi32>
    %10 = arith.cmpi slt, %8, %9 : vector<24x256xi32>
    %cst_7 = arith.constant 0.000000e+00 : f32
    %11 = vector.broadcast %cst_7 : f32 to vector<24x256xf32>
    %12 = arith.select %10, %5, %11 : vector<24x256xi1>, vector<24x256xf32>
    %cst_8 = arith.constant dense<0.000000e+00> : vector<256xf32>
    %13 = vector.multi_reduction <add>, %12, %cst_8 [0] : vector<24x256xf32> to vector<256xf32>
    %14 = vector.shape_cast %13 : vector<256xf32> to vector<1x256xf32>
    %c0_9 = arith.constant 0 : index
    %c0_10 = arith.constant 0 : index
    %15 = vector.load %arg5[%c0_9, %c0_10] : memref<1x256xf32, #tpu.memory_space<vmem>>, vector<1x256xf32>
    tpu.vector_store %arg5[%c0_9, %c0_10], %14 {strides = array<i32>} : memref<1x256xf32, #tpu.memory_space<vmem>>, vector<1x256xf32>,
    %16 = arith.mulf %12, %12 : vector<24x256xf32>
    %cst_11 = arith.constant dense<0.000000e+00> : vector<256xf32>
    %17 = vector.multi_reduction <add>, %16, %cst_11 [0] : vector<24x256xf32> to vector<256xf32>
    %18 = vector.shape_cast %17 : vector<256xf32> to vector<1x256xf32>
    %c0_12 = arith.constant 0 : index
    %c0_13 = arith.constant 0 : index
    %19 = vector.load %arg6[%c0_12, %c0_13] : memref<1x256xf32, #tpu.memory_space<vmem>>, vector<1x256xf32>
    tpu.vector_store %arg6[%c0_12, %c0_13], %18 {strides = array<i32>} : memref<1x256xf32, #tpu.memory_space<vmem>>, vector<1x256xf32>,
    return
  }
  func.func @transform_0(%arg0: i32) -> (i32, i32) {
    %c0_i32 = arith.constant 0 : i32
    %c0_i32_0 = arith.constant 0 : i32
    %c0_i32_1 = arith.constant 0 : i32
    return %c0_i32, %c0_i32_0 : i32, i32
  }
  func.func @transform_1(%arg0: i32) -> (i32, i32) {
    %c0_i32 = arith.constant 0 : i32
    %c0_i32_0 = arith.constant 0 : i32
    return %c0_i32, %arg0 : i32, i32
  }
  func.func @transform_2(%arg0: i32) -> (i32, i32) {
    %c0_i32 = arith.constant 0 : i32
    %c0_i32_0 = arith.constant 0 : i32
    return %c0_i32, %arg0 : i32, i32
  }
  func.func @transform_3(%arg0: i32) -> (i32, i32) {
    %c0_i32 = arith.constant 0 : i32
    %c0_i32_0 = arith.constant 0 : i32
    return %c0_i32, %arg0 : i32, i32
  }
  func.func @transform_4(%arg0: i32) -> (i32, i32) {
    %c0_i32 = arith.constant 0 : i32
    %c0_i32_0 = arith.constant 0 : i32
    return %c0_i32, %arg0 : i32, i32
  }
  func.func @transform_5(%arg0: i32) -> (i32, i32) {
    %c0_i32 = arith.constant 0 : i32
    %c0_i32_0 = arith.constant 0 : i32
    return %c0_i32, %arg0 : i32, i32
  }
}

module attributes {stable_mosaic.version = 11 : i64} {
  func.func @_affine_act_kernel(%arg0: i32, %arg1: memref<24x512xbf16, #tpu.memory_space<vmem>>, %arg2: memref<1x512xf32, #tpu.memory_space<vmem>>, %arg3: memref<1x512xf32, #tpu.memory_space<vmem>>, %arg4: memref<24x512xbf16, #tpu.memory_space<vmem>>) attributes {dimension_semantics = [#tpu.dimension_semantics<arbitrary>], iteration_bounds = array<i64: 1>, scalar_prefetch = 0 : i64, scratch_operands = 0 : i64, tpu.core_type = #tpu.core_type<tc>, window_params = [{pipeline_mode = #tpu.pipeline_mode<synchronous>, transform_indices = @transform_0, window_bounds = array<i64: 24, 512>}, {pipeline_mode = #tpu.pipeline_mode<synchronous>, transform_indices = @transform_1, window_bounds = array<i64: 1, 512>}, {pipeline_mode = #tpu.pipeline_mode<synchronous>, transform_indices = @transform_2, window_bounds = array<i64: 1, 512>}, {pipeline_mode = #tpu.pipeline_mode<synchronous>, transform_indices = @transform_3, window_bounds = array<i64: 24, 512>}]} {
    %c0 = arith.constant 0 : index
    %c0_0 = arith.constant 0 : index
    %0 = vector.load %arg1[%c0, %c0_0] : memref<24x512xbf16, #tpu.memory_space<vmem>>, vector<24x512xbf16>
    %1 = arith.extf %0 : vector<24x512xbf16> to vector<24x512xf32>
    %c0_1 = arith.constant 0 : index
    %c0_2 = arith.constant 0 : index
    %2 = vector.load %arg2[%c0_1, %c0_2] : memref<1x512xf32, #tpu.memory_space<vmem>>, vector<1x512xf32>
    %3 = vector.broadcast %2 : vector<1x512xf32> to vector<24x512xf32>
    %4 = arith.mulf %1, %3 : vector<24x512xf32>
    %c0_3 = arith.constant 0 : index
    %c0_4 = arith.constant 0 : index
    %5 = vector.load %arg3[%c0_3, %c0_4] : memref<1x512xf32, #tpu.memory_space<vmem>>, vector<1x512xf32>
    %6 = vector.broadcast %5 : vector<1x512xf32> to vector<24x512xf32>
    %7 = arith.addf %4, %6 : vector<24x512xf32>
    %cst = arith.constant 0.000000e+00 : f32
    %8 = vector.broadcast %cst : f32 to vector<24x512xf32>
    %9 = arith.cmpf ogt, %7, %8 : vector<24x512xf32>
    %cst_5 = arith.constant 3.000000e-01 : f32
    %10 = vector.broadcast %cst_5 : f32 to vector<24x512xf32>
    %11 = arith.mulf %10, %7 : vector<24x512xf32>
    %12 = arith.select %9, %7, %11 : vector<24x512xi1>, vector<24x512xf32>
    %13 = arith.truncf %12 : vector<24x512xf32> to vector<24x512xbf16>
    %c0_6 = arith.constant 0 : index
    %c0_7 = arith.constant 0 : index
    %14 = vector.load %arg4[%c0_6, %c0_7] : memref<24x512xbf16, #tpu.memory_space<vmem>>, vector<24x512xbf16>
    tpu.vector_store %arg4[%c0_6, %c0_7], %13 {strides = array<i32>} : memref<24x512xbf16, #tpu.memory_space<vmem>>, vector<24x512xbf16>,
    return
  }
  func.func @transform_0(%arg0: i32) -> (i32, i32) {
    %c0_i32 = arith.constant 0 : i32
    %c0_i32_0 = arith.constant 0 : i32
    %c0_i32_1 = arith.constant 0 : i32
    return %c0_i32, %c0_i32_0 : i32, i32
  }
  func.func @transform_1(%arg0: i32) -> (i32, i32) {
    %c0_i32 = arith.constant 0 : i32
    %c0_i32_0 = arith.constant 0 : i32
    %c0_i32_1 = arith.constant 0 : i32
    return %c0_i32, %c0_i32_0 : i32, i32
  }
  func.func @transform_2(%arg0: i32) -> (i32, i32) {
    %c0_i32 = arith.constant 0 : i32
    %c0_i32_0 = arith.constant 0 : i32
    %c0_i32_1 = arith.constant 0 : i32
    return %c0_i32, %c0_i32_0 : i32, i32
  }
  func.func @transform_3(%arg0: i32) -> (i32, i32) {
    %c0_i32 = arith.constant 0 : i32
    %c0_i32_0 = arith.constant 0 : i32
    %c0_i32_1 = arith.constant 0 : i32
    return %c0_i32, %c0_i32_0 : i32, i32
  }
}

module attributes {stable_mosaic.version = 11 : i64} {
  func.func @_matmul_bias_act_kernel(%arg0: i32, %arg1: memref<8x8192xbf16, #tpu.memory_space<vmem>>, %arg2: memref<8192x128xbf16, #tpu.memory_space<vmem>>, %arg3: memref<1x128xf32, #tpu.memory_space<vmem>>, %arg4: memref<8x128xf32, #tpu.memory_space<vmem>>) attributes {dimension_semantics = [#tpu.dimension_semantics<parallel>], iteration_bounds = array<i64: 1>, scalar_prefetch = 0 : i64, scratch_operands = 0 : i64, tpu.core_type = #tpu.core_type<tc>, window_params = [{pipeline_mode = #tpu.pipeline_mode<synchronous>, transform_indices = @transform_0, window_bounds = array<i64: 8, 8192>}, {transform_indices = @transform_1, window_bounds = array<i64: 8192, 128>}, {transform_indices = @transform_2, window_bounds = array<i64: 1, 128>}, {transform_indices = @transform_3, window_bounds = array<i64: 8, 128>}]} {
    %c0 = arith.constant 0 : index
    %c0_0 = arith.constant 0 : index
    %0 = vector.load %arg1[%c0, %c0_0] : memref<8x8192xbf16, #tpu.memory_space<vmem>>, vector<8x8192xbf16>
    %c0_1 = arith.constant 0 : index
    %c0_2 = arith.constant 0 : index
    %1 = vector.load %arg2[%c0_1, %c0_2] : memref<8192x128xbf16, #tpu.memory_space<vmem>>, vector<8192x128xbf16>
    %cst = arith.constant dense<0.000000e+00> : vector<8x128xf32>
    %2 = tpu.matmul %0, %1, %cst {dimension_numbers = #tpu.dot_dimension_numbers<[1], [0], [0], [1], [0, 0, 1, 1], [], []>} : vector<8x8192xbf16>, vector<8192x128xbf16>, vector<8x128xf32> -> vector<8x128xf32>
    %c0_3 = arith.constant 0 : index
    %c0_4 = arith.constant 0 : index
    %3 = vector.load %arg3[%c0_3, %c0_4] : memref<1x128xf32, #tpu.memory_space<vmem>>, vector<1x128xf32>
    %4 = vector.broadcast %3 : vector<1x128xf32> to vector<8x128xf32>
    %5 = arith.addf %2, %4 : vector<8x128xf32>
    %c0_5 = arith.constant 0 : index
    %c0_6 = arith.constant 0 : index
    %6 = vector.load %arg4[%c0_5, %c0_6] : memref<8x128xf32, #tpu.memory_space<vmem>>, vector<8x128xf32>
    tpu.vector_store %arg4[%c0_5, %c0_6], %5 {strides = array<i32>} : memref<8x128xf32, #tpu.memory_space<vmem>>, vector<8x128xf32>,
    return
  }
  func.func @transform_0(%arg0: i32) -> (i32, i32) {
    %c0_i32 = arith.constant 0 : i32
    %c0_i32_0 = arith.constant 0 : i32
    %c0_i32_1 = arith.constant 0 : i32
    return %c0_i32, %c0_i32_0 : i32, i32
  }
  func.func @transform_1(%arg0: i32) -> (i32, i32) {
    %c0_i32 = arith.constant 0 : i32
    %c0_i32_0 = arith.constant 0 : i32
    return %c0_i32, %arg0 : i32, i32
  }
  func.func @transform_2(%arg0: i32) -> (i32, i32) {
    %c0_i32 = arith.constant 0 : i32
    %c0_i32_0 = arith.constant 0 : i32
    return %c0_i32, %arg0 : i32, i32
  }
  func.func @transform_3(%arg0: i32) -> (i32, i32) {
    %c0_i32 = arith.constant 0 : i32
    %c0_i32_0 = arith.constant 0 : i32
    return %c0_i32, %arg0 : i32, i32
  }
}

</mosaic_0001>

<bundles_post_ra>
// kernel: d_forward.8
= control target key start
LH: loop header
LB: loop body
LE: loop exit
PB: predicated region body
PF: predicated region fallthrough
CT: control target
= control target key end

     0   :  { %s1997_s1 = inlined_call_operand.vmem [shape: bf16[128,128], index: 1, kind: input, shape index: {}]   ;;  %s1998_s0 = inlined_call_operand.vmem [shape: bf16[512,128], index: 0, kind: input, shape index: {}]   ;;  %s1999_s2 = inlined_call_operand.vmem [shape: f32[1,128], index: 2, kind: input, shape index: {}]   ;;  %s2000_s3 = inlined_call_operand.vmem [shape: bf16[512,128], index: 3, kind: output, shape index: {}]  }
   0x1   :  { %v1643_v0 = vld [vmem:[%s1997_s1] sm:$0xff]   ;;  %v1644_v1 = vld [vmem:[%s1997_s1 + $0x8] sm:$0xff]   ;;  %v1645_v2 = vld [vmem:[%s1997_s1 + $0x10] sm:$0xff]  }
   0x2   :  { %1547 = vmatprep.subr.bf16.mxu0 %v1643_v0  ;;  %1627 = vmatprep.subr.bf16.mxu1 %v1643_v0  ;;  %v1646_v3 = vld [vmem:[%s1997_s1 + $0x18] sm:$0xff]   ;;  %v1651_v4 = vld [vmem:[%s1998_s0] sm:$0xff]   ;;  %v1648_v7 = vld [vmem:[%s1997_s1 + $0x28] sm:$0xff]  }
   0x3   :  { %1548 = vmatpush3.bf16.msra.mxu0 %v1643_v0  ;;  %1635 = vmatpush3.bf16.msra.mxu1 %v1643_v0  ;;  %v1652_v5 = vld [vmem:[%s1998_s0 + $0x80] sm:$0xff]   ;;  %v1649_v8 = vld [vmem:[%s1997_s1 + $0x30] sm:$0xff]   ;;  %v1650_v9 = vld [vmem:[%s1997_s1 + $0x38] sm:$0xff]  }
   0x4   :  { %1549 = vmatprep.subr.bf16.mxu0 %v1644_v1  ;;  %1628 = vmatprep.subr.bf16.mxu1 %v1644_v1  ;;  %v1647_v6 = vld [vmem:[%s1997_s1 + $0x20] sm:$0xff]   ;;  %v1653_v10 = vld [vmem:[%s1998_s0 + $0x8] sm:$0xff]   ;;  %v1655_v12 = vld [vmem:[%s1998_s0 + $0x10] sm:$0xff]  }
   0x5   :  { %1563 = vmatprep.mubr.bf16.mxu0 %v1651_v4  ;;  %1595 = vmatprep.mubr.bf16.mxu1 %v1652_v5  ;;  %v1654_v11 = vld [vmem:[%s1998_s0 + $0x88] sm:$0xff]   ;;  %v1656_v13 = vld [vmem:[%s1998_s0 + $0x90] sm:$0xff]   ;;  %v1657_v14 = vld [vmem:[%s1998_s0 + $0x18] sm:$0xff]  }
   0x6   :  { %v1658_v15 = vld [vmem:[%s1998_s0 + $0x98] sm:$0xff]   ;;  %v1659_v16 = vld [vmem:[%s1998_s0 + $0x20] sm:$0xff]   ;;  %v1661_v18 = vld [vmem:[%s1998_s0 + $0x28] sm:$0xff]  }
   0x7   :  { %1550 = vmatpush3.bf16.msra.mxu0 %v1644_v1  ;;  %1636 = vmatpush3.bf16.msra.mxu1 %v1644_v1  ;;  %v1660_v17 = vld [vmem:[%s1998_s0 + $0xa0] sm:$0xff]   ;;  %v1662_v19 = vld [vmem:[%s1998_s0 + $0xa8] sm:$0xff]   ;;  %v1663_v20 = vld [vmem:[%s1998_s0 + $0x30] sm:$0xff]  }
   0x8   :  { %1551 = vmatprep.subr.bf16.mxu0 %v1645_v2  ;;  %1629 = vmatprep.subr.bf16.mxu1 %v1645_v2  ;;  %v1664_v21 = vld [vmem:[%s1998_s0 + $0xb0] sm:$0xff]   ;;  %v1665_v22 = vld [vmem:[%s1998_s0 + $0x38] sm:$0xff]   ;;  %v1667_v24 = vld [vmem:[%s1998_s0 + $0x40] sm:$0xff]  }
   0x9   :  { %v1666_v23 = vld [vmem:[%s1998_s0 + $0xb8] sm:$0xff]   ;;  %v1668_v25 = vld [vmem:[%s1998_s0 + $0xc0] sm:$0xff]   ;;  %v1669_v26 = vld [vmem:[%s1998_s0 + $0x48] sm:$0xff]  }
   0xa   :  { %v1670_v27 = vld [vmem:[%s1998_s0 + $0xc8] sm:$0xff]   ;;  %v1671_v28 = vld [vmem:[%s1998_s0 + $0x50] sm:$0xff]   ;;  %v1673_v30 = vld [vmem:[%s1998_s0 + $0x58] sm:$0xff]  }
   0xb   :  { %1552 = vmatpush3.bf16.msra.mxu0 %v1645_v2  ;;  %1637 = vmatpush3.bf16.msra.mxu1 %v1645_v2  ;;  %v1672_v29 = vld [vmem:[%s1998_s0 + $0xd0] sm:$0xff]   ;;  %v1674_v31 = vld [vmem:[%s1998_s0 + $0xd8] sm:$0xff]   ;;  %v1675_v32 = vld [vmem:[%s1998_s0 + $0x60] sm:$0xff]  }
   0xc   :  { %1553 = vmatprep.subr.bf16.mxu0 %v1646_v3  ;;  %1630 = vmatprep.subr.bf16.mxu1 %v1646_v3  ;;  %v1676_v33 = vld [vmem:[%s1998_s0 + $0xe0] sm:$0xff]   ;;  %v1677_v34 = vld [vmem:[%s1998_s0 + $0x68] sm:$0xff]   ;;  %v1679_v36 = vld [vmem:[%s1998_s0 + $0x70] sm:$0xff]  }
   0xd   :  { %v1678_v35 = vld [vmem:[%s1998_s0 + $0xe8] sm:$0xff]   ;;  %v1680_v37 = vld [vmem:[%s1998_s0 + $0xf0] sm:$0xff]   ;;  %v1681_v38 = vld [vmem:[%s1998_s0 + $0x78] sm:$0xff]  }
   0xe   :  { %v1682_v39 = vld [vmem:[%s1998_s0 + $0xf8] sm:$0xff]   ;;  %v1826_v40 = vld [vmem:[%s1999_s2] ss:$0 sm:$0xff] }
   0xf   :  { %1554 = vmatpush3.bf16.msra.mxu0 %v1646_v3  ;;  %1638 = vmatpush3.bf16.msra.mxu1 %v1646_v3 }
  0x10   :  { %1555 = vmatprep.subr.bf16.mxu0 %v1647_v6  ;;  %1631 = vmatprep.subr.bf16.mxu1 %v1647_v6 }
  0x13   :  { %1556 = vmatpush3.bf16.msra.mxu0 %v1647_v6  ;;  %1639 = vmatpush3.bf16.msra.mxu1 %v1647_v6 }
  0x14   :  { %1557 = vmatprep.subr.bf16.mxu0 %v1648_v7  ;;  %1632 = vmatprep.subr.bf16.mxu1 %v1648_v7 }
  0x17   :  { %1558 = vmatpush3.bf16.msra.mxu0 %v1648_v7  ;;  %1640 = vmatpush3.bf16.msra.mxu1 %v1648_v7 }
  0x18   :  { %1559 = vmatprep.subr.bf16.mxu0 %v1649_v8  ;;  %1633 = vmatprep.subr.bf16.mxu1 %v1649_v8 }
  0x1b   :  { %1560 = vmatpush3.bf16.msra.mxu0 %v1649_v8  ;;  %1641 = vmatpush3.bf16.msra.mxu1 %v1649_v8 }
  0x1c   :  { %1561 = vmatprep.subr.bf16.mxu0 %v1650_v9  ;;  %1634 = vmatprep.subr.bf16.mxu1 %v1650_v9 }
  0x1f   :  { %1562 = vmatpush3.bf16.msra.mxu0 %v1650_v9  ;;  %1642 = vmatpush3.bf16.msra.mxu1 %v1650_v9 }
  0x22   :  { %1564 = vmatmul.mubr.bf16.vlgmr.msra.gmra.mrb[0].mxu0 %v1653_v10  ;;  %1596 = vmatmul.mubr.bf16.vlgmr.msra.gmra.mrb[0].mxu1 %v1654_v11 }
  0x23   :  { %1567 = vmatprep.mubr.bf16.mxu0 %v1655_v12  ;;  %1599 = vmatprep.mubr.bf16.mxu1 %v1656_v13 }
  0x2a   :  { %1568 = vmatmul.mubr.bf16.gmra.mrb[4].mxu0 %v1657_v14  ;;  %1600 = vmatmul.mubr.bf16.gmra.mrb[4].mxu1 %v1658_v15 }
  0x2b   :  { %1571 = vmatprep.mubr.bf16.mxu0 %v1659_v16  ;;  %1603 = vmatprep.mubr.bf16.mxu1 %v1660_v17 }
  0x32   :  { %1572 = vmatmul.mubr.bf16.gmra.mrb[8].mxu0 %v1661_v18  ;;  %1604 = vmatmul.mubr.bf16.gmra.mrb[8].mxu1 %v1662_v19 }
  0x33   :  { %1575 = vmatprep.mubr.bf16.mxu0 %v1663_v20  ;;  %1607 = vmatprep.mubr.bf16.mxu1 %v1664_v21 }
  0x3a   :  { %1576 = vmatmul.mubr.bf16.gmra.mrb[12].mxu0 %v1665_v22  ;;  %1608 = vmatmul.mubr.bf16.gmra.mrb[12].mxu1 %v1666_v23 }
  0x3b   :  { %1579 = vmatprep.mubr.bf16.mxu0 %v1667_v24  ;;  %1611 = vmatprep.mubr.bf16.mxu1 %v1668_v25 }
  0x42   :  { %1580 = vmatmul.mubr.bf16.gmra.mrb[16].mxu0 %v1669_v26  ;;  %1612 = vmatmul.mubr.bf16.gmra.mrb[16].mxu1 %v1670_v27 }
  0x43   :  { %1583 = vmatprep.mubr.bf16.mxu0 %v1671_v28  ;;  %1615 = vmatprep.mubr.bf16.mxu1 %v1672_v29 }
  0x4a   :  { %1584 = vmatmul.mubr.bf16.gmra.mrb[20].mxu0 %v1673_v30  ;;  %1616 = vmatmul.mubr.bf16.gmra.mrb[20].mxu1 %v1674_v31 }
  0x4b   :  { %1587 = vmatprep.mubr.bf16.mxu0 %v1675_v32  ;;  %1619 = vmatprep.mubr.bf16.mxu1 %v1676_v33 }
  0x52   :  { %1588 = vmatmul.mubr.bf16.gmra.mrb[24].mxu0 %v1677_v34  ;;  %1620 = vmatmul.mubr.bf16.gmra.mrb[24].mxu1 %v1678_v35 }
  0x53   :  { %1591 = vmatprep.mubr.bf16.mxu0 %v1679_v36  ;;  %1623 = vmatprep.mubr.bf16.mxu1 %v1680_v37 }
  0x5a   :  { %1592 = vmatmul.mubr.bf16.gmra.mrb[28].mxu0 %v1681_v38  ;;  %1624 = vmatmul.mubr.bf16.gmra.mrb[28].mxu1 %v1682_v39 }
  0xf5   :  { %v1565_v41 = vpop.f32.mrb[0].mxu0  ;;  %v1597_v42 = vpop.f32.mrb[0].mxu1 }
  0xf6   :  { %v385_v43 = vadd.f32 %v1565_v41, %v1826_v40  ;;  %v513_v44 = vadd.f32 %v1597_v42, %v1826_v40  ;;  %v376_v45 = vpop.f32.mrb[1].mxu0  ;;  %v504_v46 = vpop.f32.mrb[1].mxu1 }
  0xf7   :  { %v377_v47 = vadd.f32 %v1826_v40, %v376_v45  ;;  %v505_v48 = vadd.f32 %v1826_v40, %v504_v46  ;;  %v1566_v49 = vpop.f32.mrb[2].mxu0  ;;  %v1598_v50 = vpop.f32.mrb[2].mxu1 }
  0xf8   :  { %vm633_vm0 = vcmp.gt.f32.partialorder %v385_v43, 0.0  ;;  %v697_v51 = vmul.f32 0.01, %v385_v43  ;;  %vm665_vm1 = vcmp.gt.f32.partialorder %v513_v44, 0.0  ;;  %v729_v52 = vmul.f32 0.01, %v513_v44 }
  0xf9   :  { %vm631_vm2 = vcmp.gt.f32.partialorder %v377_v47, 0.0  ;;  %v695_v53 = vmul.f32 0.01, %v377_v47  ;;  %vm663_vm3 = vcmp.gt.f32.partialorder %v505_v48, 0.0  ;;  %v727_v54 = vmul.f32 0.01, %v505_v48 }
  0xfa   :  { %v388_v55 = vadd.f32 %v1566_v49, %v1826_v40  ;;  %v516_v56 = vadd.f32 %v1598_v50, %v1826_v40  ;;  %v379_v57 = vpop.f32.mrb[3].mxu0  ;;  %v507_v58 = vpop.f32.mrb[3].mxu1  ;;  %v761_v59 = vsel %vm633_vm0, %v385_v43, %v697_v51  ;;  %v793_v60 = vsel %vm665_vm1, %v513_v44, %v729_v52 }
  0xfb   :  { %v380_v61 = vadd.f32 %v1826_v40, %v379_v57  ;;  %v508_v62 = vadd.f32 %v1826_v40, %v507_v58  ;;  %v759_v3 = vsel %vm631_vm2, %v377_v47, %v695_v53  ;;  %v791_v4 = vsel %vm663_vm3, %v505_v48, %v727_v54 }
  0xfc   :  { %vm634_vm4 = vcmp.gt.f32.partialorder %v388_v55, 0.0  ;;  %v698_v63 = vmul.f32 0.01, %v388_v55  ;;  %vm666_vm5 = vcmp.gt.f32.partialorder %v516_v56, 0.0  ;;  %v730_v0 = vmul.f32 0.01, %v516_v56 }
  0xfd   :  { %vm632_vm6 = vcmp.gt.f32.partialorder %v380_v61, 0.0  ;;  %v696_v1 = vmul.f32 0.01, %v380_v61  ;;  %vm664_vm7 = vcmp.gt.f32.partialorder %v508_v62, 0.0  ;;  %v728_v2 = vmul.f32 0.01, %v508_v62 }
  0xfe   :  { %v762_v5 = vsel %vm634_vm4, %v388_v55, %v698_v63  ;;  %v794_v6 = vsel %vm666_vm5, %v516_v56, %v730_v0  ;;  %v1569_v7 = vpop.f32.mrb[4].mxu0  ;;  %v1601_v8 = vpop.f32.mrb[4].mxu1 }
  0xff   :  { %v1324_v9 = vpack.c.bf16 %v762_v5, %v761_v59  ;;  %v1404_v10 = vpack.c.bf16 %v794_v6, %v793_v60  ;;  %v760_v11 = vsel %vm632_vm6, %v380_v61, %v696_v1  ;;  %v792_v12 = vsel %vm664_vm7, %v508_v62, %v728_v2  ;;  %v392_v13 = vpop.f32.mrb[5].mxu0  ;;  %v520_v14 = vpop.f32.mrb[5].mxu1 }
 0x100   :  { %v1319_v15 = vpack.c.bf16 %v760_v11, %v759_v3  ;;  %v1399_v16 = vpack.c.bf16 %v792_v12, %v791_v4  ;;  %v401_v17 = vadd.f32 %v1569_v7, %v1826_v40  ;;  %v529_v18 = vadd.f32 %v1601_v8, %v1826_v40  ;;  %v1570_v19 = vpop.f32.mrb[6].mxu0  ;;  %v1602_v20 = vpop.f32.mrb[6].mxu1 }
 0x101   :  { %1476 = vst [vmem:[%s2000_s3 + $0x8] sm:$0xff] %v1324_v9   ;;  %1492 = vst [vmem:[%s2000_s3 + $0x88] sm:$0xff] %v1404_v10   ;;  %v393_v21 = vadd.f32 %v1826_v40, %v392_v13  ;;  %v521_v22 = vadd.f32 %v1826_v40, %v520_v14  ;;  %v404_v23 = vadd.f32 %v1570_v19, %v1826_v40  ;;  %v395_v25 = vpop.f32.mrb[7].mxu0  ;;  %v523_v26 = vpop.f32.mrb[7].mxu1 }
 0x102   :  { %v532_v24 = vadd.f32 %v1602_v20, %v1826_v40  ;;  %1320 = vst [vmem:[%s2000_s3] sm:$0xff] %v1319_v15   ;;  %1491 = vst [vmem:[%s2000_s3 + $0x80] sm:$0xff] %v1399_v16   ;;  %vm637_vm8 = vcmp.gt.f32.partialorder %v401_v17, 0.0  ;;  %v701_v27 = vmul.f32 0.01, %v401_v17  ;;  %vm669_vm9 = vcmp.gt.f32.partialorder %v529_v18, 0.0 }
 0x103   :  { %v733_v28 = vmul.f32 0.01, %v529_v18  ;;  %vm635_vm10 = vcmp.gt.f32.partialorder %v393_v21, 0.0  ;;  %v699_v29 = vmul.f32 0.01, %v393_v21  ;;  %vm667_vm11 = vcmp.gt.f32.partialorder %v521_v22, 0.0 }
 0x104   :  { %v731_v30 = vmul.f32 0.01, %v521_v22  ;;  %v765_v31 = vsel %vm637_vm8, %v401_v17, %v701_v27  ;;  %vm638_vm12 = vcmp.gt.f32.partialorder %v404_v23, 0.0  ;;  %v702_v33 = vmul.f32 0.01, %v404_v23 }
 0x105   :  { %v797_v32 = vsel %vm669_vm9, %v529_v18, %v733_v28  ;;  %v763_v34 = vsel %vm635_vm10, %v393_v21, %v699_v29  ;;  %vm670_vm13 = vcmp.gt.f32.partialorder %v532_v24, 0.0  ;;  %v734_v36 = vmul.f32 0.01, %v532_v24  ;;  %v1573_v37 = vpop.f32.mrb[8].mxu0  ;;  %v1605_v38 = vpop.f32.mrb[8].mxu1 }
 0x106   :  { %v795_v35 = vsel %vm667_vm11, %v521_v22, %v731_v30  ;;  %v766_v39 = vsel %vm638_vm12, %v404_v23, %v702_v33  ;;  %v396_v41 = vadd.f32 %v1826_v40, %v395_v25  ;;  %v524_v42 = vadd.f32 %v1826_v40, %v523_v26  ;;  %v408_v44 = vpop.f32.mrb[9].mxu0  ;;  %v536_v45 = vpop.f32.mrb[9].mxu1 }
 0x107   :  { %v417_v43 = vadd.f32 %v1573_v37, %v1826_v40  ;;  %v1334_v46 = vpack.c.bf16 %v766_v39, %v765_v31  ;;  %v798_v47 = vsel %vm670_vm13, %v532_v24, %v734_v36  ;;  %v545_v48 = vadd.f32 %v1605_v38, %v1826_v40  ;;  %v1574_v50 = vpop.f32.mrb[10].mxu0  ;;  %v1606_v51 = vpop.f32.mrb[10].mxu1 }
 0x108   :  { %v409_v49 = vadd.f32 %v1826_v40, %v408_v44  ;;  %v1414_v52 = vpack.c.bf16 %v798_v47, %v797_v32  ;;  %vm636_vm14 = vcmp.gt.f32.partialorder %v396_v41, 0.0  ;;  %v700_v53 = vmul.f32 0.01, %v396_v41  ;;  %v411_v54 = vpop.f32.mrb[11].mxu0  ;;  %v539_v55 = vpop.f32.mrb[11].mxu1 }
 0x109   :  { %vm668_vm15 = vcmp.gt.f32.partialorder %v524_v42, 0.0  ;;  %1478 = vst [vmem:[%s2000_s3 + $0x18] sm:$0xff] %v1334_v46   ;;  %v732_v56 = vmul.f32 0.01, %v524_v42  ;;  %vm641_vm0 = vcmp.gt.f32.partialorder %v417_v43, 0.0  ;;  %vm673_vm1 = vcmp.gt.f32.partialorder %v545_v48, 0.0 }
 0x10a   :  { %v705_v57 = vmul.f32 0.01, %v417_v43  ;;  %1494 = vst [vmem:[%s2000_s3 + $0x98] sm:$0xff] %v1414_v52   ;;  %v764_v58 = vsel %vm636_vm14, %v396_v41, %v700_v53  ;;  %v737_v59 = vmul.f32 0.01, %v545_v48  ;;  %vm639_vm2 = vcmp.gt.f32.partialorder %v409_v49, 0.0 }
 0x10b   :  { %v703_v60 = vmul.f32 0.01, %v409_v49  ;;  %v1329_v61 = vpack.c.bf16 %v764_v58, %v763_v34  ;;  %v796_v62 = vsel %vm668_vm15, %v524_v42, %v732_v56  ;;  %v537_v0 = vadd.f32 %v1826_v40, %v536_v45 }
 0x10c   :  { %v769_v63 = vsel %vm641_vm0, %v417_v43, %v705_v57  ;;  %v1409_v1 = vpack.c.bf16 %v796_v62, %v795_v35  ;;  %v801_v2 = vsel %vm673_vm1, %v545_v48, %v737_v59  ;;  %v420_v4 = vadd.f32 %v1574_v50, %v1826_v40 }
 0x10d   :  { %v767_v3 = vsel %vm639_vm2, %v409_v49, %v703_v60  ;;  %1477 = vst [vmem:[%s2000_s3 + $0x10] sm:$0xff] %v1329_v61   ;;  %vm671_vm3 = vcmp.gt.f32.partialorder %v537_v0, 0.0  ;;  %v735_v5 = vmul.f32 0.01, %v537_v0  ;;  %v548_v6 = vadd.f32 %v1606_v51, %v1826_v40  ;;  %v1577_v8 = vpop.f32.mrb[12].mxu0  ;;  %v1609_v9 = vpop.f32.mrb[12].mxu1 }
 0x10e   :  { %v412_v7 = vadd.f32 %v1826_v40, %v411_v54  ;;  %1493 = vst [vmem:[%s2000_s3 + $0x90] sm:$0xff] %v1409_v1   ;;  %vm642_vm4 = vcmp.gt.f32.partialorder %v420_v4, 0.0  ;;  %v706_v10 = vmul.f32 0.01, %v420_v4  ;;  %v540_v11 = vadd.f32 %v1826_v40, %v539_v55  ;;  %v424_v13 = vpop.f32.mrb[13].mxu0  ;;  %v552_v14 = vpop.f32.mrb[13].mxu1 }
 0x10f   :  { %v433_v12 = vadd.f32 %v1577_v8, %v1826_v40  ;;  %v799_v15 = vsel %vm671_vm3, %v537_v0, %v735_v5  ;;  %vm674_vm5 = vcmp.gt.f32.partialorder %v548_v6, 0.0  ;;  %v738_v16 = vmul.f32 0.01, %v548_v6  ;;  %v1578_v17 = vpop.f32.mrb[14].mxu0  ;;  %v1610_v18 = vpop.f32.mrb[14].mxu1 }
 0x110   :  { %vm640_vm6 = vcmp.gt.f32.partialorder %v412_v7, 0.0  ;;  %v770_v19 = vsel %vm642_vm4, %v420_v4, %v706_v10  ;;  %v704_v20 = vmul.f32 0.01, %v412_v7  ;;  %vm672_vm7 = vcmp.gt.f32.partialorder %v540_v11, 0.0  ;;  %v427_v22 = vpop.f32.mrb[15].mxu0  ;;  %v555_v26 = vpop.f32.mrb[15].mxu1 }
 0x111   :  { %v736_v21 = vmul.f32 0.01, %v540_v11  ;;  %v1344_v23 = vpack.c.bf16 %v770_v19, %v769_v63  ;;  %v802_v24 = vsel %vm674_vm5, %v548_v6, %v738_v16  ;;  %vm645_vm8 = vcmp.gt.f32.partialorder %v433_v12, 0.0 }
 0x112   :  { %v709_v25 = vmul.f32 0.01, %v433_v12  ;;  %v1424_v27 = vpack.c.bf16 %v802_v24, %v801_v2  ;;  %v768_v28 = vsel %vm640_vm6, %v412_v7, %v704_v20  ;;  %v561_v30 = vadd.f32 %v1609_v9, %v1826_v40 }
 0x113   :  { %v800_v29 = vsel %vm672_vm7, %v540_v11, %v736_v21  ;;  %1480 = vst [vmem:[%s2000_s3 + $0x28] sm:$0xff] %v1344_v23   ;;  %v1339_v31 = vpack.c.bf16 %v768_v28, %v767_v3  ;;  %v425_v34 = vadd.f32 %v1826_v40, %v424_v13  ;;  %v553_v36 = vadd.f32 %v1826_v40, %v552_v14 }
 0x114   :  { %v1419_v32 = vpack.c.bf16 %v800_v29, %v799_v15  ;;  %v773_v33 = vsel %vm645_vm8, %v433_v12, %v709_v25  ;;  %1496 = vst [vmem:[%s2000_s3 + $0xa8] sm:$0xff] %v1424_v27   ;;  %vm677_vm9 = vcmp.gt.f32.partialorder %v561_v30, 0.0  ;;  %v741_v35 = vmul.f32 0.01, %v561_v30 }
 0x115   :  { %v436_v37 = vadd.f32 %v1578_v17, %v1826_v40  ;;  %1479 = vst [vmem:[%s2000_s3 + $0x20] sm:$0xff] %v1339_v31   ;;  %vm643_vm10 = vcmp.gt.f32.partialorder %v425_v34, 0.0  ;;  %v707_v38 = vmul.f32 0.01, %v425_v34  ;;  %v564_v39 = vadd.f32 %v1610_v18, %v1826_v40  ;;  %v1581_v42 = vpop.f32.mrb[16].mxu0  ;;  %v1613_v43 = vpop.f32.mrb[16].mxu1 }
 0x116   :  { %1495 = vst [vmem:[%s2000_s3 + $0xa0] sm:$0xff] %v1419_v32   ;;  %v428_v41 = vadd.f32 %v1826_v40, %v427_v22  ;;  %v805_v44 = vsel %vm677_vm9, %v561_v30, %v741_v35  ;;  %vm675_vm11 = vcmp.gt.f32.partialorder %v553_v36, 0.0  ;;  %v739_v45 = vmul.f32 0.01, %v553_v36  ;;  %v440_v46 = vpop.f32.mrb[17].mxu0  ;;  %v568_v47 = vpop.f32.mrb[17].mxu1 }
 0x117   :  { %vm646_vm12 = vcmp.gt.f32.partialorder %v436_v37, 0.0  ;;  %v771_v48 = vsel %vm643_vm10, %v425_v34, %v707_v38  ;;  %v710_v49 = vmul.f32 0.01, %v436_v37  ;;  %vm678_vm13 = vcmp.gt.f32.partialorder %v564_v39, 0.0  ;;  %v1582_v51 = vpop.f32.mrb[18].mxu0  ;;  %v1614_v55 = vpop.f32.mrb[18].mxu1 }
 0x118   :  { %v742_v50 = vmul.f32 0.01, %v564_v39  ;;  %v803_v52 = vsel %vm675_vm11, %v553_v36, %v739_v45  ;;  %vm644_vm14 = vcmp.gt.f32.partialorder %v428_v41, 0.0  ;;  %v708_v53 = vmul.f32 0.01, %v428_v41  ;;  %v443_v56 = vpop.f32.mrb[19].mxu0 }
 0x119   :  { %v556_v54 = vadd.f32 %v1826_v40, %v555_v26  ;;  %v774_v57 = vsel %vm646_vm12, %v436_v37, %v710_v49  ;;  %v449_v59 = vadd.f32 %v1581_v42, %v1826_v40  ;;  %v577_v60 = vadd.f32 %v1613_v43, %v1826_v40  ;;  %v571_v61 = vpop.f32.mrb[19].mxu1 }
 0x11a   :  { %v806_v58 = vsel %vm678_vm13, %v564_v39, %v742_v50  ;;  %v1354_v62 = vpack.c.bf16 %v774_v57, %v773_v33  ;;  %v772_v0 = vsel %vm644_vm14, %v428_v41, %v708_v53  ;;  %v441_v5 = vadd.f32 %v1826_v40, %v440_v46 }
 0x11b   :  { %v1434_v63 = vpack.c.bf16 %v806_v58, %v805_v44  ;;  %vm676_vm15 = vcmp.gt.f32.partialorder %v556_v54, 0.0  ;;  %v1349_v1 = vpack.c.bf16 %v772_v0, %v771_v48  ;;  %v740_v2 = vmul.f32 0.01, %v556_v54 }
 0x11c   :  { %vm649_vm0 = vcmp.gt.f32.partialorder %v449_v59, 0.0  ;;  %v713_v3 = vmul.f32 0.01, %v449_v59  ;;  %1482 = vst [vmem:[%s2000_s3 + $0x38] sm:$0xff] %v1354_v62   ;;  %vm681_vm1 = vcmp.gt.f32.partialorder %v577_v60, 0.0  ;;  %v569_v6 = vadd.f32 %v1826_v40, %v568_v47 }
 0x11d   :  { %1498 = vst [vmem:[%s2000_s3 + $0xb8] sm:$0xff] %v1434_v63   ;;  %v745_v4 = vmul.f32 0.01, %v577_v60  ;;  %1481 = vst [vmem:[%s2000_s3 + $0x30] sm:$0xff] %v1349_v1   ;;  %v804_v7 = vsel %vm676_vm15, %v556_v54, %v740_v2  ;;  %v452_v9 = vadd.f32 %v1582_v51, %v1826_v40  ;;  %v580_v10 = vadd.f32 %v1614_v55, %v1826_v40  ;;  %v1585_v11 = vpop.f32.mrb[20].mxu0  ;;  %v1617_v12 = vpop.f32.mrb[20].mxu1 }
 0x11e   :  { %v777_v8 = vsel %vm649_vm0, %v449_v59, %v713_v3  ;;  %v1429_v13 = vpack.c.bf16 %v804_v7, %v803_v52  ;;  %vm647_vm2 = vcmp.gt.f32.partialorder %v441_v5, 0.0  ;;  %v711_v15 = vmul.f32 0.01, %v441_v5  ;;  %v456_v16 = vpop.f32.mrb[21].mxu0  ;;  %v584_v17 = vpop.f32.mrb[21].mxu1 }
 0x11f   :  { %v809_v14 = vsel %vm681_vm1, %v577_v60, %v745_v4  ;;  %vm679_vm3 = vcmp.gt.f32.partialorder %v569_v6, 0.0  ;;  %v743_v18 = vmul.f32 0.01, %v569_v6  ;;  %vm650_vm4 = vcmp.gt.f32.partialorder %v452_v9, 0.0  ;;  %v1586_v23 = vpop.f32.mrb[22].mxu0  ;;  %v1618_v24 = vpop.f32.mrb[22].mxu1 }
 0x120   :  { %v714_v19 = vmul.f32 0.01, %v452_v9  ;;  %1497 = vst [vmem:[%s2000_s3 + $0xb0] sm:$0xff] %v1429_v13   ;;  %v775_v20 = vsel %vm647_vm2, %v441_v5, %v711_v15  ;;  %vm682_vm5 = vcmp.gt.f32.partialorder %v580_v10, 0.0  ;;  %v746_v21 = vmul.f32 0.01, %v580_v10 }
 0x121   :  { %v444_v22 = vadd.f32 %v1826_v40, %v443_v56  ;;  %v807_v25 = vsel %vm679_vm3, %v569_v6, %v743_v18  ;;  %v572_v27 = vadd.f32 %v1826_v40, %v571_v61  ;;  %v465_v28 = vadd.f32 %v1585_v11, %v1826_v40  ;;  %v459_v29 = vpop.f32.mrb[23].mxu0  ;;  %v587_v30 = vpop.f32.mrb[23].mxu1 }
 0x122   :  { %v778_v26 = vsel %vm650_vm4, %v452_v9, %v714_v19  ;;  %v810_v32 = vsel %vm682_vm5, %v580_v10, %v746_v21  ;;  %v593_v38 = vadd.f32 %v1617_v12, %v1826_v40  ;;  %v457_v39 = vadd.f32 %v1826_v40, %v456_v16 }
 0x123   :  { %v1364_v31 = vpack.c.bf16 %v778_v26, %v777_v8  ;;  %vm648_vm6 = vcmp.gt.f32.partialorder %v444_v22, 0.0  ;;  %v712_v33 = vmul.f32 0.01, %v444_v22  ;;  %v1444_v34 = vpack.c.bf16 %v810_v32, %v809_v14 }
 0x124   :  { %vm680_vm7 = vcmp.gt.f32.partialorder %v572_v27, 0.0  ;;  %v744_v35 = vmul.f32 0.01, %v572_v27  ;;  %vm653_vm8 = vcmp.gt.f32.partialorder %v465_v28, 0.0  ;;  %v717_v37 = vmul.f32 0.01, %v465_v28 }
 0x125   :  { %1484 = vst [vmem:[%s2000_s3 + $0x48] sm:$0xff] %v1364_v31   ;;  %v776_v36 = vsel %vm648_vm6, %v444_v22, %v712_v33  ;;  %1500 = vst [vmem:[%s2000_s3 + $0xc8] sm:$0xff] %v1444_v34   ;;  %v585_v43 = vadd.f32 %v1826_v40, %v584_v17  ;;  %v468_v44 = vadd.f32 %v1586_v23, %v1826_v40  ;;  %v1589_v45 = vpop.f32.mrb[24].mxu0  ;;  %v1621_v46 = vpop.f32.mrb[24].mxu1  ;;  %vm685_vm9 = vcmp.gt.f32.partialorder %v593_v38, 0.0 }
 0x126   :  { %v1359_v41 = vpack.c.bf16 %v776_v36, %v775_v20  ;;  %v808_v42 = vsel %vm680_vm7, %v572_v27, %v744_v35  ;;  %v749_v48 = vmul.f32 0.01, %v593_v38  ;;  %v472_v49 = vpop.f32.mrb[25].mxu0  ;;  %v600_v50 = vpop.f32.mrb[25].mxu1  ;;  %v781_v51 = vsel %vm653_vm8, %v465_v28, %v717_v37 }
 0x127   :  { %v1439_v47 = vpack.c.bf16 %v808_v42, %v807_v25  ;;  %vm651_vm10 = vcmp.gt.f32.partialorder %v457_v39, 0.0  ;;  %v715_v52 = vmul.f32 0.01, %v457_v39  ;;  %v747_v53 = vmul.f32 0.01, %v585_v43  ;;  %v1590_v56 = vpop.f32.mrb[26].mxu0 }
 0x128   :  { %1483 = vst [vmem:[%s2000_s3 + $0x40] sm:$0xff] %v1359_v41   ;;  %vm683_vm11 = vcmp.gt.f32.partialorder %v585_v43, 0.0  ;;  %vm654_vm12 = vcmp.gt.f32.partialorder %v468_v44, 0.0  ;;  %v718_v54 = vmul.f32 0.01, %v468_v44  ;;  %v596_v55 = vadd.f32 %v1618_v24, %v1826_v40  ;;  %v1622_v57 = vpop.f32.mrb[26].mxu1 }
 0x129   :  { %1499 = vst [vmem:[%s2000_s3 + $0xc0] sm:$0xff] %v1439_v47   ;;  %v813_v58 = vsel %vm685_vm9, %v593_v38, %v749_v48  ;;  %v779_v59 = vsel %vm651_vm10, %v457_v39, %v715_v52  ;;  %v460_v60 = vadd.f32 %v1826_v40, %v459_v29  ;;  %v588_v61 = vadd.f32 %v1826_v40, %v587_v30  ;;  %v475_v62 = vpop.f32.mrb[27].mxu0  ;;  %v603_v63 = vpop.f32.mrb[27].mxu1 }
 0x12a   :  { %v782_v0 = vsel %vm654_vm12, %v468_v44, %v718_v54  ;;  %vm686_vm13 = vcmp.gt.f32.partialorder %v596_v55, 0.0  ;;  %v750_v1 = vmul.f32 0.01, %v596_v55  ;;  %v481_v2 = vadd.f32 %v1589_v45, %v1826_v40 }
 0x12b   :  { %v1374_v3 = vpack.c.bf16 %v782_v0, %v781_v51  ;;  %vm652_vm14 = vcmp.gt.f32.partialorder %v460_v60, 0.0  ;;  %v716_v4 = vmul.f32 0.01, %v460_v60  ;;  %vm684_vm15 = vcmp.gt.f32.partialorder %v588_v61, 0.0 }
 0x12c   :  { %v814_v5 = vsel %vm686_vm13, %v596_v55, %v750_v1  ;;  %v748_v6 = vmul.f32 0.01, %v588_v61  ;;  %vm657_vm0 = vcmp.gt.f32.partialorder %v481_v2, 0.0  ;;  %v721_v7 = vmul.f32 0.01, %v481_v2 }
 0x12d   :  { %1486 = vst [vmem:[%s2000_s3 + $0x58] sm:$0xff] %v1374_v3   ;;  %v1454_v8 = vpack.c.bf16 %v814_v5, %v813_v58  ;;  %v780_v9 = vsel %vm652_vm14, %v460_v60, %v716_v4  ;;  %v609_v10 = vadd.f32 %v1621_v46, %v1826_v40  ;;  %v473_v11 = vadd.f32 %v1826_v40, %v472_v49  ;;  %v1593_v12 = vpop.f32.mrb[28].mxu0  ;;  %v1625_v13 = vpop.f32.mrb[28].mxu1 }
 0x12e   :  { %v811_v14 = vsel %vm683_vm11, %v585_v43, %v747_v53  ;;  %v1369_v15 = vpack.c.bf16 %v780_v9, %v779_v59  ;;  %v812_v16 = vsel %vm684_vm15, %v588_v61, %v748_v6  ;;  %v601_v17 = vadd.f32 %v1826_v40, %v600_v50  ;;  %v488_v18 = vpop.f32.mrb[29].mxu0  ;;  %v616_v19 = vpop.f32.mrb[29].mxu1 }
 0x12f   :  { %1502 = vst [vmem:[%s2000_s3 + $0xd8] sm:$0xff] %v1454_v8   ;;  %v1449_v20 = vpack.c.bf16 %v812_v16, %v811_v14  ;;  %vm689_vm1 = vcmp.gt.f32.partialorder %v609_v10, 0.0  ;;  %v753_v21 = vmul.f32 0.01, %v609_v10  ;;  %vm655_vm2 = vcmp.gt.f32.partialorder %v473_v11, 0.0  ;;  %v1594_v22 = vpop.f32.mrb[30].mxu0 }
 0x130   :  { %v1626_v23 = vpop.f32.mrb[30].mxu1  ;;  %1485 = vst [vmem:[%s2000_s3 + $0x50] sm:$0xff] %v1369_v15   ;;  %v785_v24 = vsel %vm657_vm0, %v481_v2, %v721_v7  ;;  %v719_v25 = vmul.f32 0.01, %v473_v11  ;;  %vm687_vm3 = vcmp.gt.f32.partialorder %v601_v17, 0.0  ;;  %v484_v26 = vadd.f32 %v1590_v56, %v1826_v40  ;;  %v491_v27 = vpop.f32.mrb[31].mxu0 }
 0x131   :  { %1501 = vst [vmem:[%s2000_s3 + $0xd0] sm:$0xff] %v1449_v20   ;;  %v751_v28 = vmul.f32 0.01, %v601_v17  ;;  %v612_v29 = vadd.f32 %v1622_v57, %v1826_v40  ;;  %v476_v30 = vadd.f32 %v1826_v40, %v475_v62  ;;  %v604_v31 = vadd.f32 %v1826_v40, %v603_v63  ;;  %v619_v32 = vpop.f32.mrb[31].mxu1 }
 0x132   :  { %v817_v33 = vsel %vm689_vm1, %v609_v10, %v753_v21  ;;  %v783_v34 = vsel %vm655_vm2, %v473_v11, %v719_v25  ;;  %vm658_vm4 = vcmp.gt.f32.partialorder %v484_v26, 0.0  ;;  %v722_v35 = vmul.f32 0.01, %v484_v26 }
 0x133   :  { %vm690_vm5 = vcmp.gt.f32.partialorder %v612_v29, 0.0  ;;  %v754_v36 = vmul.f32 0.01, %v612_v29  ;;  %vm656_vm6 = vcmp.gt.f32.partialorder %v476_v30, 0.0  ;;  %v720_v37 = vmul.f32 0.01, %v476_v30 }
 0x134   :  { %v786_v38 = vsel %vm658_vm4, %v484_v26, %v722_v35  ;;  %vm688_vm7 = vcmp.gt.f32.partialorder %v604_v31, 0.0  ;;  %v752_v39 = vmul.f32 0.01, %v604_v31  ;;  %v497_v41 = vadd.f32 %v1593_v12, %v1826_v40 }
 0x135   :  { %v1384_v42 = vpack.c.bf16 %v786_v38, %v785_v24  ;;  %v818_v43 = vsel %vm690_vm5, %v612_v29, %v754_v36  ;;  %v784_v44 = vsel %vm656_vm6, %v476_v30, %v720_v37  ;;  %v625_v45 = vadd.f32 %v1625_v13, %v1826_v40 }
 0x136   :  { %v815_v46 = vsel %vm687_vm3, %v601_v17, %v751_v28  ;;  %v1464_v47 = vpack.c.bf16 %v818_v43, %v817_v33  ;;  %v1379_v48 = vpack.c.bf16 %v784_v44, %v783_v34  ;;  %v816_v49 = vsel %vm688_vm7, %v604_v31, %v752_v39 }
 0x137   :  { %1488 = vst [vmem:[%s2000_s3 + $0x68] sm:$0xff] %v1384_v42   ;;  %v1459_v50 = vpack.c.bf16 %v816_v49, %v815_v46  ;;  %vm661_vm8 = vcmp.gt.f32.partialorder %v497_v41, 0.0  ;;  %v725_v51 = vmul.f32 0.01, %v497_v41  ;;  %v757_v52 = vmul.f32 0.01, %v625_v45 }
 0x138   :  { %1504 = vst [vmem:[%s2000_s3 + $0xe8] sm:$0xff] %v1464_v47   ;;  %1487 = vst [vmem:[%s2000_s3 + $0x60] sm:$0xff] %v1379_v48   ;;  %v489_v53 = vadd.f32 %v1826_v40, %v488_v18  ;;  %v617_v54 = vadd.f32 %v1826_v40, %v616_v19  ;;  %v500_v55 = vadd.f32 %v1594_v22, %v1826_v40  ;;  %vm693_vm9 = vcmp.gt.f32.partialorder %v625_v45, 0.0 }
 0x139   :  { %v628_v56 = vadd.f32 %v1626_v23, %v1826_v40  ;;  %1503 = vst [vmem:[%s2000_s3 + $0xe0] sm:$0xff] %v1459_v50   ;;  %v492_v57 = vadd.f32 %v1826_v40, %v491_v27  ;;  %v620_v58 = vadd.f32 %v1826_v40, %v619_v32  ;;  %v789_v59 = vsel %vm661_vm8, %v497_v41, %v725_v51 }
 0x13a   :  { %vm659_vm10 = vcmp.gt.f32.partialorder %v489_v53, 0.0  ;;  %v723_v60 = vmul.f32 0.01, %v489_v53  ;;  %v755_v61 = vmul.f32 0.01, %v617_v54  ;;  %vm662_vm11 = vcmp.gt.f32.partialorder %v500_v55, 0.0 }
 0x13b   :  { %v726_v62 = vmul.f32 0.01, %v500_v55  ;;  %vm694_vm12 = vcmp.gt.f32.partialorder %v628_v56, 0.0  ;;  %v758_v63 = vmul.f32 0.01, %v628_v56  ;;  %v821_v0 = vsel %vm693_vm9, %v625_v45, %v757_v52 }
 0x13c   :  { %vm691_vm13 = vcmp.gt.f32.partialorder %v617_v54, 0.0  ;;  %vm660_vm14 = vcmp.gt.f32.partialorder %v492_v57, 0.0  ;;  %v724_v1 = vmul.f32 0.01, %v492_v57  ;;  %vm692_vm15 = vcmp.gt.f32.partialorder %v620_v58, 0.0 }
 0x13d   :  { %v790_v2 = vsel %vm662_vm11, %v500_v55, %v726_v62  ;;  %v822_v3 = vsel %vm694_vm12, %v628_v56, %v758_v63  ;;  %v756_v4 = vmul.f32 0.01, %v620_v58  ;;  %v787_v5 = vsel %vm659_vm10, %v489_v53, %v723_v60 }
 0x13e   :  { %v1394_v6 = vpack.c.bf16 %v790_v2, %v789_v59  ;;  %v1474_v7 = vpack.c.bf16 %v822_v3, %v821_v0  ;;  %v788_v40 = vsel %vm660_vm14, %v492_v57, %v724_v1  ;;  %v819_v8 = vsel %vm691_vm13, %v617_v54, %v755_v61 }
 0x13f   :  { %v1389_v9 = vpack.c.bf16 %v788_v40, %v787_v5  ;;  %v820_v10 = vsel %vm692_vm15, %v620_v58, %v756_v4 }
 0x140   :  { %1490 = vst [vmem:[%s2000_s3 + $0x78] sm:$0xff] %v1394_v6   ;;  %1506 = vst [vmem:[%s2000_s3 + $0xf8] sm:$0xff] %v1474_v7   ;;  %v1469_v11 = vpack.c.bf16 %v820_v10, %v819_v8 }
 0x141   :  { %1489 = vst [vmem:[%s2000_s3 + $0x70] sm:$0xff] %v1389_v9  }
 0x142   :  { %1505 = vst [vmem:[%s2000_s3 + $0xf0] sm:$0xff] %v1469_v11  }

// kernel: d_forward.10
= control target key start
LH: loop header
LB: loop body
LE: loop exit
PB: predicated region body
PF: predicated region fallthrough
CT: control target
= control target key end

     0   :  { %s455_s0 = inlined_call_operand.vmem [shape: bf16[128,128], index: 0, kind: input, shape index: {}]   ;;  %s456_s1 = inlined_call_operand.vmem [shape: f32[1,128], index: 1, kind: input, shape index: {}]   ;;  %s457_s2 = inlined_call_operand.vmem [shape: f32[1,128], index: 2, kind: input, shape index: {}]   ;;  %s458_s3 = inlined_call_operand.vmem [shape: bf16[128,128], index: 3, kind: output, shape index: {}]  }
   0x1   :  { %v259_v0 = vld [vmem:[%s455_s0] sm:$0xff]   ;;  %v330_v4 = vld [vmem:[%s455_s0 + $0x8] sm:$0xff]   ;;  %v331_v5 = vld [vmem:[%s455_s0 + $0x10] sm:$0xff]  }
   0x2   :  { %v370_v1 = vld [vmem:[%s456_s1] ss:$0 sm:$0xff]  ;;  %v260_v2 = vunpack.c.l.bf16 %v259_v0  ;;  %v261_v3 = vunpack.c.h.bf16 %v259_v0  ;;  %v332_v6 = vld [vmem:[%s455_s0 + $0x18] sm:$0xff]   ;;  %v264_v8 = vunpack.c.l.bf16 %v330_v4  ;;  %v265_v9 = vunpack.c.h.bf16 %v330_v4  ;;  %v334_v35 = vld [vmem:[%s455_s0 + $0x28] sm:$0xff]  }
   0x3   :  { %v384_v7 = vld [vmem:[%s457_s2] ss:$0 sm:$0xff]  ;;  %v268_v10 = vunpack.c.l.bf16 %v331_v5  ;;  %v269_v11 = vunpack.c.h.bf16 %v331_v5  ;;  %v272_v14 = vunpack.c.l.bf16 %v332_v6  ;;  %v273_v15 = vunpack.c.h.bf16 %v332_v6  ;;  %v335_v48 = vld [vmem:[%s455_s0 + $0x30] sm:$0xff]   ;;  %v336_v4 = vld [vmem:[%s455_s0 + $0x38] sm:$0xff]  }
   0x4   :  { %v53_v12 = vmul.f32 %v260_v2, %v370_v1  ;;  %v54_v13 = vmul.f32 %v261_v3, %v370_v1  ;;  %v55_v16 = vmul.f32 %v264_v8, %v370_v1  ;;  %v56_v17 = vmul.f32 %v265_v9, %v370_v1  ;;  %v333_v34 = vld [vmem:[%s455_s0 + $0x20] sm:$0xff]  }
   0x5   :  { %v57_v18 = vmul.f32 %v268_v10, %v370_v1  ;;  %v58_v19 = vmul.f32 %v269_v11, %v370_v1  ;;  %v59_v22 = vmul.f32 %v272_v14, %v370_v1  ;;  %v60_v23 = vmul.f32 %v273_v15, %v370_v1 }
   0x6   :  { %v76_v20 = vadd.f32 %v384_v7, %v53_v12  ;;  %v77_v21 = vadd.f32 %v384_v7, %v54_v13  ;;  %v78_v24 = vadd.f32 %v384_v7, %v55_v16  ;;  %v79_v25 = vadd.f32 %v384_v7, %v56_v17 }
   0x7   :  { %v80_v26 = vadd.f32 %v384_v7, %v57_v18  ;;  %v81_v27 = vadd.f32 %v384_v7, %v58_v19  ;;  %v82_v42 = vadd.f32 %v384_v7, %v59_v22  ;;  %v83_v43 = vadd.f32 %v384_v7, %v60_v23 }
   0x8   :  { %vm92_vm0 = vcmp.gt.f32.partialorder %v76_v20, 0.0  ;;  %vm93_vm1 = vcmp.gt.f32.partialorder %v77_v21, 0.0  ;;  %v108_v28 = vmul.f32 0.3, %v76_v20  ;;  %v109_v29 = vmul.f32 0.3, %v77_v21 }
   0x9   :  { %vm94_vm2 = vcmp.gt.f32.partialorder %v78_v24, 0.0  ;;  %vm95_vm3 = vcmp.gt.f32.partialorder %v79_v25, 0.0  ;;  %v110_v30 = vmul.f32 0.3, %v78_v24  ;;  %v111_v31 = vmul.f32 0.3, %v79_v25 }
   0xa   :  { %v124_v32 = vsel %vm92_vm0, %v76_v20, %v108_v28  ;;  %v125_v33 = vsel %vm93_vm1, %v77_v21, %v109_v29  ;;  %vm96_vm4 = vcmp.gt.f32.partialorder %v80_v26, 0.0  ;;  %vm97_vm5 = vcmp.gt.f32.partialorder %v81_v27, 0.0 }
   0xb   :  { %v293_v36 = vpack.c.bf16 %v125_v33, %v124_v32  ;;  %v126_v37 = vsel %vm94_vm2, %v78_v24, %v110_v30  ;;  %v127_v38 = vsel %vm95_vm3, %v79_v25, %v111_v31  ;;  %v112_v39 = vmul.f32 0.3, %v80_v26 }
   0xc   :  { %v298_v40 = vpack.c.bf16 %v127_v38, %v126_v37  ;;  %v113_v41 = vmul.f32 0.3, %v81_v27  ;;  %v276_v45 = vunpack.c.l.bf16 %v333_v34  ;;  %v277_v46 = vunpack.c.h.bf16 %v333_v34 }
   0xd   :  { %294 = vst [vmem:[%s458_s3] sm:$0xff] %v293_v36   ;;  %v128_v44 = vsel %vm96_vm4, %v80_v26, %v112_v39  ;;  %v280_v47 = vunpack.c.l.bf16 %v334_v35  ;;  %vm98_vm6 = vcmp.gt.f32.partialorder %v82_v42, 0.0  ;;  %vm99_vm7 = vcmp.gt.f32.partialorder %v83_v43, 0.0 }
   0xe   :  { %337 = vst [vmem:[%s458_s3 + $0x8] sm:$0xff] %v298_v40   ;;  %v129_v49 = vsel %vm97_vm5, %v81_v27, %v113_v41  ;;  %v114_v50 = vmul.f32 0.3, %v82_v42  ;;  %v115_v52 = vmul.f32 0.3, %v83_v43  ;;  %v61_v53 = vmul.f32 %v276_v45, %v370_v1 }
   0xf   :  { %v303_v51 = vpack.c.bf16 %v129_v49, %v128_v44  ;;  %v62_v54 = vmul.f32 %v277_v46, %v370_v1  ;;  %v281_v56 = vunpack.c.h.bf16 %v334_v35  ;;  %v63_v57 = vmul.f32 %v280_v47, %v370_v1 }
  0x10   :  { %v130_v55 = vsel %vm98_vm6, %v82_v42, %v114_v50  ;;  %v284_v58 = vunpack.c.l.bf16 %v335_v48  ;;  %v131_v59 = vsel %vm99_vm7, %v83_v43, %v115_v52  ;;  %v84_v60 = vadd.f32 %v384_v7, %v61_v53 }
  0x11   :  { %338 = vst [vmem:[%s458_s3 + $0x10] sm:$0xff] %v303_v51   ;;  %v85_v61 = vadd.f32 %v384_v7, %v62_v54  ;;  %v285_v62 = vunpack.c.h.bf16 %v335_v48  ;;  %v308_v63 = vpack.c.bf16 %v131_v59, %v130_v55  ;;  %v64_v0 = vmul.f32 %v281_v56, %v370_v1 }
  0x12   :  { %v86_v2 = vadd.f32 %v384_v7, %v63_v57  ;;  %v65_v3 = vmul.f32 %v284_v58, %v370_v1  ;;  %vm100_vm8 = vcmp.gt.f32.partialorder %v84_v60, 0.0  ;;  %v116_v5 = vmul.f32 0.3, %v84_v60 }
  0x13   :  { %vm101_vm9 = vcmp.gt.f32.partialorder %v85_v61, 0.0  ;;  %v117_v6 = vmul.f32 0.3, %v85_v61  ;;  %339 = vst [vmem:[%s458_s3 + $0x18] sm:$0xff] %v308_v63   ;;  %v87_v8 = vadd.f32 %v384_v7, %v64_v0  ;;  %v66_v10 = vmul.f32 %v285_v62, %v370_v1 }
  0x14   :  { %vm102_vm10 = vcmp.gt.f32.partialorder %v86_v2, 0.0  ;;  %v118_v9 = vmul.f32 0.3, %v86_v2  ;;  %v132_v11 = vsel %vm100_vm8, %v84_v60, %v116_v5  ;;  %v88_v13 = vadd.f32 %v384_v7, %v65_v3 }
  0x15   :  { %v133_v12 = vsel %vm101_vm9, %v85_v61, %v117_v6  ;;  %v288_v14 = vunpack.c.l.bf16 %v336_v4  ;;  %vm103_vm11 = vcmp.gt.f32.partialorder %v87_v8, 0.0  ;;  %v119_v16 = vmul.f32 0.3, %v87_v8 }
  0x16   :  { %v313_v15 = vpack.c.bf16 %v133_v12, %v132_v11  ;;  %v134_v17 = vsel %vm102_vm10, %v86_v2, %v118_v9  ;;  %v89_v18 = vadd.f32 %v384_v7, %v66_v10  ;;  %vm104_vm12 = vcmp.gt.f32.partialorder %v88_v13, 0.0 }
  0x17   :  { %v120_v19 = vmul.f32 0.3, %v88_v13  ;;  %v289_v20 = vunpack.c.h.bf16 %v336_v4  ;;  %v135_v21 = vsel %vm103_vm11, %v87_v8, %v119_v16  ;;  %v67_v22 = vmul.f32 %v288_v14, %v370_v1 }
  0x18   :  { %340 = vst [vmem:[%s458_s3 + $0x20] sm:$0xff] %v313_v15   ;;  %v318_v23 = vpack.c.bf16 %v135_v21, %v134_v17  ;;  %vm105_vm13 = vcmp.gt.f32.partialorder %v89_v18, 0.0  ;;  %v121_v24 = vmul.f32 0.3, %v89_v18 }
  0x19   :  { %v136_v25 = vsel %vm104_vm12, %v88_v13, %v120_v19  ;;  %v68_v26 = vmul.f32 %v289_v20, %v370_v1  ;;  %v90_v27 = vadd.f32 %v384_v7, %v67_v22 }
  0x1a   :  { %341 = vst [vmem:[%s458_s3 + $0x28] sm:$0xff] %v318_v23   ;;  %v137_v28 = vsel %vm105_vm13, %v89_v18, %v121_v24 }
  0x1b   :  { %v323_v29 = vpack.c.bf16 %v137_v28, %v136_v25  ;;  %v91_v30 = vadd.f32 %v384_v7, %v68_v26  ;;  %vm106_vm14 = vcmp.gt.f32.partialorder %v90_v27, 0.0  ;;  %v122_v31 = vmul.f32 0.3, %v90_v27 }
  0x1d   :  { %342 = vst [vmem:[%s458_s3 + $0x30] sm:$0xff] %v323_v29   ;;  %vm107_vm15 = vcmp.gt.f32.partialorder %v91_v30, 0.0  ;;  %v123_v32 = vmul.f32 0.3, %v91_v30  ;;  %v138_v33 = vsel %vm106_vm14, %v90_v27, %v122_v31 }
  0x1f   :  { %v139_v1 = vsel %vm107_vm15, %v91_v30, %v123_v32 }
  0x20   :  { %v328_v34 = vpack.c.bf16 %v139_v1, %v138_v33 }
  0x22   :  { %343 = vst [vmem:[%s458_s3 + $0x38] sm:$0xff] %v328_v34  }

// kernel: d_forward.9
= control target key start
LH: loop header
LB: loop body
LE: loop exit
PB: predicated region body
PF: predicated region fallthrough
CT: control target
= control target key end

     0   :  { %s2551_s1 = inlined_call_operand.vmem [shape: bf16[1024,128], index: 1, kind: input, shape index: {}]   ;;  %s2552_s0 = inlined_call_operand.vmem [shape: bf16[128,1024], index: 0, kind: input, shape index: {}]   ;;  %s2553_s2 = inlined_call_operand.vmem [shape: f32[1,128], index: 2, kind: input, shape index: {}]   ;;  %s2554_s3 = inlined_call_operand.vmem [shape: bf16[128,128], index: 3, kind: output, shape index: {0}]   ;;  %s2555_s4 = inlined_call_operand.vmem [shape: f32[1,128], index: 4, kind: output, shape index: {1}]   ;;  %s2556_s5 = inlined_call_operand.vmem [shape: f32[1,128], index: 5, kind: output, shape index: {2}]  }
   0x1   :  { %v1974_v0 = vld [vmem:[%s2551_s1 + $0x40] sm:$0xff]   ;;  %v1978_v4 = vld [vmem:[%s2551_s1 + $0x48] sm:$0xff]   ;;  %v1982_v8 = vld [vmem:[%s2551_s1 + $0x50] sm:$0xff]  }
   0x2   :  { %v1975_v1 = vld [vmem:[%s2551_s1 + $0xc0] sm:$0xff]   ;;  %1718 = vmatprep.subr.bf16.mxu0 %v1974_v0  ;;  %v1979_v5 = vld [vmem:[%s2551_s1 + $0xc8] sm:$0xff]   ;;  %v1983_v9 = vld [vmem:[%s2551_s1 + $0xd0] sm:$0xff]  }
   0x3   :  { %v1976_v2 = vld [vmem:[%s2551_s1] sm:$0xff]   ;;  %1782 = vmatprep.subr.bf16.mxu1 %v1975_v1  ;;  %v1980_v6 = vld [vmem:[%s2551_s1 + $0x8] sm:$0xff]   ;;  %v1984_v10 = vld [vmem:[%s2551_s1 + $0x10] sm:$0xff]  }
   0x4   :  { %v1977_v3 = vld [vmem:[%s2551_s1 + $0x80] sm:$0xff]   ;;  %1719 = vmatpush3.bf16.msra.mxu0 %v1976_v2  ;;  %v1981_v7 = vld [vmem:[%s2551_s1 + $0x88] sm:$0xff]   ;;  %v1985_v11 = vld [vmem:[%s2551_s1 + $0x90] sm:$0xff]  }
   0x5   :  { %1783 = vmatpush3.bf16.msra.mxu1 %v1977_v3  ;;  %1720 = vmatprep.subr.bf16.mxu0 %v1978_v4  ;;  %v1986_v12 = vld [vmem:[%s2551_s1 + $0x58] sm:$0xff]   ;;  %v1990_v16 = vld [vmem:[%s2551_s1 + $0x60] sm:$0xff]   ;;  %v1994_v20 = vld [vmem:[%s2551_s1 + $0x68] sm:$0xff]  }
   0x6   :  { %1784 = vmatprep.subr.bf16.mxu1 %v1979_v5  ;;  %v1987_v13 = vld [vmem:[%s2551_s1 + $0xd8] sm:$0xff]   ;;  %v1991_v17 = vld [vmem:[%s2551_s1 + $0xe0] sm:$0xff]   ;;  %v1995_v21 = vld [vmem:[%s2551_s1 + $0xe8] sm:$0xff]  }
   0x7   :  { %v1988_v14 = vld [vmem:[%s2551_s1 + $0x18] sm:$0xff]   ;;  %v1992_v18 = vld [vmem:[%s2551_s1 + $0x20] sm:$0xff]   ;;  %v1996_v22 = vld [vmem:[%s2551_s1 + $0x28] sm:$0xff]  }
   0x8   :  { %1721 = vmatpush3.bf16.msra.mxu0 %v1980_v6  ;;  %v1989_v15 = vld [vmem:[%s2551_s1 + $0x98] sm:$0xff]   ;;  %v1993_v19 = vld [vmem:[%s2551_s1 + $0xa0] sm:$0xff]   ;;  %v1997_v23 = vld [vmem:[%s2551_s1 + $0xa8] sm:$0xff]  }
   0x9   :  { %1785 = vmatpush3.bf16.msra.mxu1 %v1981_v7  ;;  %1722 = vmatprep.subr.bf16.mxu0 %v1982_v8  ;;  %v1998_v24 = vld [vmem:[%s2551_s1 + $0x70] sm:$0xff]   ;;  %v2002_v28 = vld [vmem:[%s2551_s1 + $0x78] sm:$0xff]   ;;  %v18_v32 = vld [vmem:[%s2552_s0] sm:$0xff] }
   0xa   :  { %1786 = vmatprep.subr.bf16.mxu1 %v1983_v9  ;;  %v1999_v25 = vld [vmem:[%s2551_s1 + $0xf0] sm:$0xff]   ;;  %v2003_v29 = vld [vmem:[%s2551_s1 + $0xf8] sm:$0xff]   ;;  %v22_v33 = vld [vmem:[%s2552_s0 + $0x20] sm:$0xff] }
   0xb   :  { %v2000_v26 = vld [vmem:[%s2551_s1 + $0x30] sm:$0xff]   ;;  %v2004_v30 = vld [vmem:[%s2551_s1 + $0x38] sm:$0xff]   ;;  %v19_v34 = vld [vmem:[%s2552_s0 + $0x8] sm:$0xff]  ;;  %v1511_v35 = vcombine.low %v18_v32, %v22_v33  ;;  %v1512_v36 = vcombine.high %v18_v32, %v22_v33 }
   0xc   :  { %1723 = vmatpush3.bf16.msra.mxu0 %v1984_v10  ;;  %v2001_v27 = vld [vmem:[%s2551_s1 + $0xb0] sm:$0xff]   ;;  %v2005_v31 = vld [vmem:[%s2551_s1 + $0xb8] sm:$0xff]   ;;  %v23_v37 = vld [vmem:[%s2552_s0 + $0x28] sm:$0xff] }
   0xd   :  { %1787 = vmatpush3.bf16.msra.mxu1 %v1985_v11  ;;  %1724 = vmatprep.subr.bf16.mxu0 %v1986_v12  ;;  %v1513_v38 = vcombine.low %v19_v34, %v23_v37  ;;  %v1514_v39 = vcombine.high %v19_v34, %v23_v37  ;;  %v2006_v40 = vld [vmem:[%s2551_s1 + $0x140] sm:$0xff]   ;;  %v27_v47 = vld [vmem:[%s2552_s0 + $0x48] sm:$0xff]  ;;  %v2014_v62 = vld [vmem:[%s2551_s1 + $0x150] sm:$0xff]  }
   0xe   :  { %1788 = vmatprep.subr.bf16.mxu1 %v1987_v13  ;;  %953 = vmatprep.mubr.bf16.mxu0 %v1512_v36  ;;  %v2007_v41 = vld [vmem:[%s2551_s1 + $0x100] sm:$0xff]   ;;  %v31_v48 = vld [vmem:[%s2552_s0 + $0x68] sm:$0xff]  ;;  %v2015_v63 = vld [vmem:[%s2551_s1 + $0x110] sm:$0xff]  }
   0xf   :  { %1050 = vmatprep.mubr.bf16.mxu1 %v1514_v39  ;;  %v2008_v42 = vld [vmem:[%s2551_s1 + $0x1c0] sm:$0xff]   ;;  %v1522_v49 = vcombine.high %v27_v47, %v31_v48  ;;  %v2010_v50 = vld [vmem:[%s2551_s1 + $0x148] sm:$0xff]   ;;  %v1521_v53 = vcombine.low %v27_v47, %v31_v48  ;;  %v2016_v0 = vld [vmem:[%s2551_s1 + $0x1d0] sm:$0xff]  }
  0x10   :  { %1725 = vmatpush3.bf16.msra.mxu0 %v1988_v14  ;;  %v2009_v43 = vld [vmem:[%s2551_s1 + $0x180] sm:$0xff]   ;;  %v2011_v52 = vld [vmem:[%s2551_s1 + $0x108] sm:$0xff]   ;;  %v2017_v1 = vld [vmem:[%s2551_s1 + $0x190] sm:$0xff]  }
  0x11   :  { %1789 = vmatpush3.bf16.msra.mxu1 %v1989_v15  ;;  %1726 = vmatprep.subr.bf16.mxu0 %v1990_v16  ;;  %v26_v44 = vld [vmem:[%s2552_s0 + $0x40] sm:$0xff]  ;;  %v2012_v54 = vld [vmem:[%s2551_s1 + $0x1c8] sm:$0xff]   ;;  %v2018_v10 = vld [vmem:[%s2551_s1 + $0x158] sm:$0xff]  }
  0x12   :  { %1790 = vmatprep.subr.bf16.mxu1 %v1991_v17  ;;  %v30_v45 = vld [vmem:[%s2552_s0 + $0x60] sm:$0xff]  ;;  %v2013_v55 = vld [vmem:[%s2551_s1 + $0x188] sm:$0xff]   ;;  %v2019_v11 = vld [vmem:[%s2551_s1 + $0x118] sm:$0xff]  }
  0x13   :  { %v1520_v46 = vcombine.high %v26_v44, %v30_v45  ;;  %v1519_v51 = vcombine.low %v26_v44, %v30_v45  ;;  %v34_v56 = vld [vmem:[%s2552_s0 + $0x80] sm:$0xff]  ;;  %v35_v58 = vld [vmem:[%s2552_s0 + $0x88] sm:$0xff]  ;;  %v2020_v12 = vld [vmem:[%s2551_s1 + $0x1d8] sm:$0xff]  }
  0x14   :  { %1727 = vmatpush3.bf16.msra.mxu0 %v1992_v18  ;;  %v38_v57 = vld [vmem:[%s2552_s0 + $0xa0] sm:$0xff]  ;;  %v39_v59 = vld [vmem:[%s2552_s0 + $0xa8] sm:$0xff]  ;;  %v2021_v13 = vld [vmem:[%s2551_s1 + $0x198] sm:$0xff]  }
  0x15   :  { %1791 = vmatpush3.bf16.msra.mxu1 %v1993_v19  ;;  %1728 = vmatprep.subr.bf16.mxu0 %v1994_v20  ;;  %v1528_v60 = vcombine.high %v34_v56, %v38_v57  ;;  %v1530_v61 = vcombine.high %v35_v58, %v39_v59  ;;  %v1527_v2 = vcombine.low %v34_v56, %v38_v57  ;;  %v42_v3 = vld [vmem:[%s2552_s0 + $0xc0] sm:$0xff]  ;;  %v43_v5 = vld [vmem:[%s2552_s0 + $0xc8] sm:$0xff]  ;;  %v2031_v39 = vld [vmem:[%s2551_s1 + $0x130] sm:$0xff]  }
  0x16   :  { %1792 = vmatprep.subr.bf16.mxu1 %v1995_v21  ;;  %v46_v4 = vld [vmem:[%s2552_s0 + $0xe0] sm:$0xff]  ;;  %v1529_v6 = vcombine.low %v35_v58, %v39_v59  ;;  %v47_v8 = vld [vmem:[%s2552_s0 + $0xe8] sm:$0xff]  ;;  %v2035_v48 = vld [vmem:[%s2551_s1 + $0x138] sm:$0xff]  }
  0x17   :  { %v1536_v7 = vcombine.high %v42_v3, %v46_v4  ;;  %v1538_v9 = vcombine.high %v43_v5, %v47_v8  ;;  %v50_v14 = vld [vmem:[%s2552_s0 + $0x100] sm:$0xff]  ;;  %v51_v16 = vld [vmem:[%s2552_s0 + $0x108] sm:$0xff]  ;;  %v1535_v19 = vcombine.low %v42_v3, %v46_v4  ;;  %v1537_v21 = vcombine.low %v43_v5, %v47_v8  ;;  %v29_v8 = vld [vmem:[%s2552_s0 + $0x58] sm:$0xff] }
  0x18   :  { %1729 = vmatpush3.bf16.msra.mxu0 %v1996_v22  ;;  %v54_v15 = vld [vmem:[%s2552_s0 + $0x120] sm:$0xff]  ;;  %v55_v17 = vld [vmem:[%s2552_s0 + $0x128] sm:$0xff] }
  0x19   :  { %1793 = vmatpush3.bf16.msra.mxu1 %v1997_v23  ;;  %1730 = vmatprep.subr.bf16.mxu0 %v1998_v24  ;;  %v2022_v18 = vld [vmem:[%s2551_s1 + $0x160] sm:$0xff]   ;;  %v1544_v22 = vcombine.high %v50_v14, %v54_v15  ;;  %v1546_v24 = vcombine.high %v51_v16, %v55_v17  ;;  %v2028_v32 = vld [vmem:[%s2551_s1 + $0x1e8] sm:$0xff]   ;;  %v1543_v34 = vcombine.low %v50_v14, %v54_v15  ;;  %v36_v14 = vld [vmem:[%s2552_s0 + $0x90] sm:$0xff] }
  0x1a   :  { %1794 = vmatprep.subr.bf16.mxu1 %v1999_v25  ;;  %v2023_v20 = vld [vmem:[%s2551_s1 + $0x120] sm:$0xff]   ;;  %v2029_v33 = vld [vmem:[%s2551_s1 + $0x1a8] sm:$0xff]   ;;  %v40_v15 = vld [vmem:[%s2552_s0 + $0xb0] sm:$0xff] }
  0x1b   :  { %v2024_v23 = vld [vmem:[%s2551_s1 + $0x1e0] sm:$0xff]   ;;  %v67_v44 = vld [vmem:[%s2552_s0 + $0x188] sm:$0xff] }
  0x1c   :  { %1731 = vmatpush3.bf16.msra.mxu0 %v2000_v26  ;;  %v2025_v25 = vld [vmem:[%s2551_s1 + $0x1a0] sm:$0xff]   ;;  %v71_v45 = vld [vmem:[%s2552_s0 + $0x1a8] sm:$0xff] }
  0x1d   :  { %1795 = vmatpush3.bf16.msra.mxu1 %v2001_v27  ;;  %1732 = vmatprep.subr.bf16.mxu0 %v2002_v28  ;;  %v58_v26 = vld [vmem:[%s2552_s0 + $0x140] sm:$0xff]  ;;  %v2026_v28 = vld [vmem:[%s2551_s1 + $0x168] sm:$0xff]   ;;  %v1561_v59 = vcombine.low %v67_v44, %v71_v45 }
  0x1e   :  { %1796 = vmatprep.subr.bf16.mxu1 %v2003_v29  ;;  %v62_v27 = vld [vmem:[%s2552_s0 + $0x160] sm:$0xff]  ;;  %v59_v29 = vld [vmem:[%s2552_s0 + $0x148] sm:$0xff] }
  0x1f   :  { %v1552_v36 = vcombine.high %v58_v26, %v62_v27  ;;  %v1551_v47 = vcombine.low %v58_v26, %v62_v27  ;;  %v75_v56 = vld [vmem:[%s2552_s0 + $0x1c8] sm:$0xff]  ;;  %v1531_v26 = vcombine.low %v36_v14, %v40_v15 }
  0x20   :  { %1733 = vmatpush3.bf16.msra.mxu0 %v2004_v30  ;;  %v63_v30 = vld [vmem:[%s2552_s0 + $0x168] sm:$0xff] }
  0x21   :  { %1797 = vmatpush3.bf16.msra.mxu1 %v2005_v31  ;;  %1846 = vmatprep.subr.bf16.mxu0 %v2006_v40  ;;  %v2027_v31 = vld [vmem:[%s2551_s1 + $0x128] sm:$0xff]   ;;  %v1554_v37 = vcombine.high %v59_v29, %v63_v30  ;;  %v2032_v40 = vld [vmem:[%s2551_s1 + $0x1f0] sm:$0xff]  }
  0x22   :  { %1910 = vmatprep.subr.bf16.mxu1 %v2008_v42  ;;  %v70_v42 = vld [vmem:[%s2552_s0 + $0x1a0] sm:$0xff]  ;;  %v79_v57 = vld [vmem:[%s2552_s0 + $0x1e8] sm:$0xff] }
  0x23   :  { %954 = vmatmul.mubr.bf16.vlgmr.msra.gmra.mrb[0].mxu0 %v1511_v35  ;;  %v1545_v35 = vcombine.low %v51_v16, %v55_v17  ;;  %v1569_v3 = vcombine.low %v75_v56, %v79_v57  ;;  %v37_v16 = vld [vmem:[%s2552_s0 + $0x98] sm:$0xff] }
  0x24   :  { %1051 = vmatmul.mubr.bf16.vlgmr.msra.gmra.mrb[0].mxu1 %v1513_v38  ;;  %1847 = vmatpush3.bf16.msra.mxu0 %v2007_v41  ;;  %v2030_v38 = vld [vmem:[%s2551_s1 + $0x170] sm:$0xff]   ;;  %v66_v41 = vld [vmem:[%s2552_s0 + $0x180] sm:$0xff]  ;;  %v41_v17 = vld [vmem:[%s2552_s0 + $0xb8] sm:$0xff] }
  0x25   :  { %1911 = vmatpush3.bf16.msra.mxu1 %v2009_v43  ;;  %961 = vmatprep.mubr.bf16.mxu0 %v1520_v46  ;;  %v2033_v43 = vld [vmem:[%s2551_s1 + $0x1b0] sm:$0xff]   ;;  %v2034_v46 = vld [vmem:[%s2551_s1 + $0x178] sm:$0xff]   ;;  %v1559_v58 = vcombine.low %v66_v41, %v70_v42  ;;  %v1533_v27 = vcombine.low %v37_v16, %v41_v17 }
  0x26   :  { %1058 = vmatprep.mubr.bf16.mxu1 %v1522_v49  ;;  %1848 = vmatprep.subr.bf16.mxu0 %v2010_v50  ;;  %v1553_v49 = vcombine.low %v59_v29, %v63_v30  ;;  %v1560_v50 = vcombine.high %v66_v41, %v70_v42  ;;  %v52_v30 = vld [vmem:[%s2552_s0 + $0x110] sm:$0xff]  ;;  %v65_v41 = vld [vmem:[%s2552_s0 + $0x178] sm:$0xff] }
  0x27   :  { %1912 = vmatprep.subr.bf16.mxu1 %v2012_v54  ;;  %v74_v54 = vld [vmem:[%s2552_s0 + $0x1c0] sm:$0xff] }
  0x28   :  { %1849 = vmatpush3.bf16.msra.mxu0 %v2011_v52  ;;  %v1562_v52 = vcombine.high %v67_v44, %v71_v45 }
  0x29   :  { %1913 = vmatpush3.bf16.msra.mxu1 %v2013_v55  ;;  %1850 = vmatprep.subr.bf16.mxu0 %v2014_v62  ;;  %v78_v55 = vld [vmem:[%s2552_s0 + $0x1e0] sm:$0xff]  ;;  %v20_v62 = vld [vmem:[%s2552_s0 + $0x10] sm:$0xff] }
  0x2a   :  { %1914 = vmatprep.subr.bf16.mxu1 %v2016_v0  ;;  %v21_v0 = vld [vmem:[%s2552_s0 + $0x18] sm:$0xff] }
  0x2b   :  { %962 = vmatmul.mubr.bf16.gmra.mrb[4].mxu0 %v1519_v51  ;;  %v2036_v51 = vld [vmem:[%s2551_s1 + $0x1f8] sm:$0xff]  }
  0x2c   :  { %1059 = vmatmul.mubr.bf16.gmra.mrb[4].mxu1 %v1521_v53  ;;  %969 = vmatprep.mubr.bf16.mxu0 %v1528_v60  ;;  %v2037_v53 = vld [vmem:[%s2551_s1 + $0x1b8] sm:$0xff]   ;;  %v1568_v60 = vcombine.high %v74_v54, %v78_v55 }
  0x2d   :  { %1066 = vmatprep.mubr.bf16.mxu1 %v1530_v61  ;;  %1851 = vmatpush3.bf16.msra.mxu0 %v2015_v63  ;;  %v1570_v61 = vcombine.high %v75_v56, %v79_v57  ;;  %v24_v63 = vld [vmem:[%s2552_s0 + $0x30] sm:$0xff]  ;;  %v77_v56 = vld [vmem:[%s2552_s0 + $0x1d8] sm:$0xff] }
  0x2e   :  { %1915 = vmatpush3.bf16.msra.mxu1 %v2017_v1  ;;  %1852 = vmatprep.subr.bf16.mxu0 %v2018_v10  ;;  %v25_v1 = vld [vmem:[%s2552_s0 + $0x38] sm:$0xff]  ;;  %v1516_v4 = vcombine.high %v20_v62, %v24_v63  ;;  %v1515_v10 = vcombine.low %v20_v62, %v24_v63 }
  0x2f   :  { %1916 = vmatprep.subr.bf16.mxu1 %v2020_v12  ;;  %v1518_v5 = vcombine.high %v21_v0, %v25_v1  ;;  %v81_v57 = vld [vmem:[%s2552_s0 + $0x1f8] sm:$0xff] }
  0x30   :  { %v1573_v63 = vcombine.low %v77_v56, %v81_v57 }
  0x31   :  { %1853 = vmatpush3.bf16.msra.mxu0 %v2019_v11  ;;  %v1517_v11 = vcombine.low %v21_v0, %v25_v1 }
  0x32   :  { %1917 = vmatpush3.bf16.msra.mxu1 %v2021_v13  ;;  %1854 = vmatprep.subr.bf16.mxu0 %v2022_v18 }
  0x33   :  { %970 = vmatmul.mubr.bf16.gmra.mrb[8].mxu0 %v1527_v2  ;;  %1918 = vmatprep.subr.bf16.mxu1 %v2024_v23  ;;  %v1567_v2 = vcombine.low %v74_v54, %v78_v55  ;;  %v48_v23 = vld [vmem:[%s2552_s0 + $0xf0] sm:$0xff] }
  0x34   :  { %1067 = vmatmul.mubr.bf16.gmra.mrb[8].mxu1 %v1529_v6  ;;  %977 = vmatprep.mubr.bf16.mxu0 %v1536_v7  ;;  %v28_v6 = vld [vmem:[%s2552_s0 + $0x50] sm:$0xff] }
  0x35   :  { %1074 = vmatprep.mubr.bf16.mxu1 %v1538_v9  ;;  %1855 = vmatpush3.bf16.msra.mxu0 %v2023_v20  ;;  %v32_v7 = vld [vmem:[%s2552_s0 + $0x70] sm:$0xff]  ;;  %v33_v9 = vld [vmem:[%s2552_s0 + $0x78] sm:$0xff]  ;;  %v1532_v20 = vcombine.high %v36_v14, %v40_v15 }
  0x36   :  { %1919 = vmatpush3.bf16.msra.mxu1 %v2025_v25  ;;  %1856 = vmatprep.subr.bf16.mxu0 %v2026_v28  ;;  %v1524_v12 = vcombine.high %v28_v6, %v32_v7  ;;  %v1526_v13 = vcombine.high %v29_v8, %v33_v9  ;;  %v1523_v18 = vcombine.low %v28_v6, %v32_v7  ;;  %v49_v25 = vld [vmem:[%s2552_s0 + $0xf8] sm:$0xff]  ;;  %v76_v54 = vld [vmem:[%s2552_s0 + $0x1d0] sm:$0xff] }
  0x37   :  { %1920 = vmatprep.subr.bf16.mxu1 %v2028_v32  ;;  %v53_v32 = vld [vmem:[%s2552_s0 + $0x118] sm:$0xff]  ;;  %v80_v55 = vld [vmem:[%s2552_s0 + $0x1f0] sm:$0xff] }
  0x38   :  { %v1571_v62 = vcombine.low %v76_v54, %v80_v55 }
  0x39   :  { %1857 = vmatpush3.bf16.msra.mxu0 %v2027_v31  ;;  %v56_v31 = vld [vmem:[%s2552_s0 + $0x130] sm:$0xff] }
  0x3a   :  { %1921 = vmatpush3.bf16.msra.mxu1 %v2029_v33  ;;  %1858 = vmatprep.subr.bf16.mxu0 %v2030_v38  ;;  %v57_v33 = vld [vmem:[%s2552_s0 + $0x138] sm:$0xff]  ;;  %v60_v38 = vld [vmem:[%s2552_s0 + $0x150] sm:$0xff]  ;;  %v1547_v42 = vcombine.low %v52_v30, %v56_v31 }
  0x3b   :  { %978 = vmatmul.mubr.bf16.gmra.mrb[12].mxu0 %v1535_v19  ;;  %1922 = vmatprep.subr.bf16.mxu1 %v2032_v40  ;;  %v1525_v19 = vcombine.low %v29_v8, %v33_v9  ;;  %v61_v40 = vld [vmem:[%s2552_s0 + $0x158] sm:$0xff] }
  0x3c   :  { %1075 = vmatmul.mubr.bf16.gmra.mrb[12].mxu1 %v1537_v21  ;;  %985 = vmatprep.mubr.bf16.mxu0 %v1544_v22  ;;  %v1534_v21 = vcombine.high %v37_v16, %v41_v17  ;;  %v44_v22 = vld [vmem:[%s2552_s0 + $0xd0] sm:$0xff]  ;;  %v1558_v45 = vcombine.high %v61_v40, %v65_v41 }
  0x3d   :  { %1082 = vmatprep.mubr.bf16.mxu1 %v1546_v24  ;;  %1859 = vmatpush3.bf16.msra.mxu0 %v2031_v39  ;;  %v45_v24 = vld [vmem:[%s2552_s0 + $0xd8] sm:$0xff]  ;;  %v1540_v28 = vcombine.high %v44_v22, %v48_v23  ;;  %v64_v39 = vld [vmem:[%s2552_s0 + $0x170] sm:$0xff] }
  0x3e   :  { %1923 = vmatpush3.bf16.msra.mxu1 %v2033_v43  ;;  %1860 = vmatprep.subr.bf16.mxu0 %v2034_v46  ;;  %v1542_v29 = vcombine.high %v45_v24, %v49_v25  ;;  %v1549_v43 = vcombine.low %v53_v32, %v57_v33  ;;  %v1556_v44 = vcombine.high %v60_v38, %v64_v39  ;;  %v68_v46 = vld [vmem:[%s2552_s0 + $0x190] sm:$0xff] }
  0x3f   :  { %1924 = vmatprep.subr.bf16.mxu1 %v2036_v51  ;;  %v1557_v51 = vcombine.low %v61_v40, %v65_v41 }
  0x41   :  { %1861 = vmatpush3.bf16.msra.mxu0 %v2035_v48  ;;  %v69_v48 = vld [vmem:[%s2552_s0 + $0x198] sm:$0xff] }
  0x42   :  { %1925 = vmatpush3.bf16.msra.mxu1 %v2037_v53 }
  0x43   :  { %986 = vmatmul.mubr.bf16.gmra.mrb[16].mxu0 %v1543_v34  ;;  %v1539_v34 = vcombine.low %v44_v22, %v48_v23 }
  0x44   :  { %1083 = vmatmul.mubr.bf16.gmra.mrb[16].mxu1 %v1545_v35  ;;  %993 = vmatprep.mubr.bf16.mxu0 %v1552_v36  ;;  %v1541_v35 = vcombine.low %v45_v24, %v49_v25  ;;  %v1548_v36 = vcombine.high %v52_v30, %v56_v31 }
  0x45   :  { %1090 = vmatprep.mubr.bf16.mxu1 %v1554_v37  ;;  %v1550_v37 = vcombine.high %v53_v32, %v57_v33 }
  0x4b   :  { %994 = vmatmul.mubr.bf16.gmra.mrb[20].mxu0 %v1551_v47  ;;  %v72_v47 = vld [vmem:[%s2552_s0 + $0x1b0] sm:$0xff] }
  0x4c   :  { %1091 = vmatmul.mubr.bf16.gmra.mrb[20].mxu1 %v1553_v49  ;;  %1001 = vmatprep.mubr.bf16.mxu0 %v1560_v50  ;;  %v73_v49 = vld [vmem:[%s2552_s0 + $0x1b8] sm:$0xff]  ;;  %v1555_v50 = vcombine.low %v60_v38, %v64_v39 }
  0x4d   :  { %1098 = vmatprep.mubr.bf16.mxu1 %v1562_v52  ;;  %v1564_v52 = vcombine.high %v68_v46, %v72_v47  ;;  %v1566_v53 = vcombine.high %v69_v48, %v73_v49 }
  0x53   :  { %1002 = vmatmul.mubr.bf16.gmra.mrb[24].mxu0 %v1559_v58  ;;  %v1563_v58 = vcombine.low %v68_v46, %v72_v47 }
  0x54   :  { %1099 = vmatmul.mubr.bf16.gmra.mrb[24].mxu1 %v1561_v59  ;;  %1009 = vmatprep.mubr.bf16.mxu0 %v1568_v60  ;;  %v1565_v59 = vcombine.low %v69_v48, %v73_v49  ;;  %v1572_v60 = vcombine.high %v76_v54, %v80_v55 }
  0x55   :  { %1106 = vmatprep.mubr.bf16.mxu1 %v1570_v61  ;;  %v1574_v61 = vcombine.high %v77_v56, %v81_v57 }
  0x5b   :  { %1010 = vmatmul.mubr.bf16.gmra.mrb[28].mxu0 %v1567_v2  ;;  %v2455_v2 = vld [vmem:[%s2553_s2] ss:$0 sm:$0xff] }
  0x5c   :  { %1107 = vmatmul.mubr.bf16.gmra.mrb[28].mxu1 %v1569_v3  ;;  %1147 = vmatprep.mubr.bf16.mxu0 %v1516_v4 }
  0x5d   :  { %1244 = vmatprep.mubr.bf16.mxu1 %v1518_v5 }
  0x63   :  { %1148 = vmatmul.mubr.bf16.vlgmr.msra.gmra.mrb[32].mxu0 %v1515_v10 }
  0x64   :  { %1245 = vmatmul.mubr.bf16.vlgmr.msra.gmra.mrb[32].mxu1 %v1517_v11  ;;  %1155 = vmatprep.mubr.bf16.mxu0 %v1524_v12 }
  0x65   :  { %1252 = vmatprep.mubr.bf16.mxu1 %v1526_v13 }
  0x6b   :  { %1156 = vmatmul.mubr.bf16.gmra.mrb[36].mxu0 %v1523_v18 }
  0x6c   :  { %1253 = vmatmul.mubr.bf16.gmra.mrb[36].mxu1 %v1525_v19  ;;  %1163 = vmatprep.mubr.bf16.mxu0 %v1532_v20 }
  0x6d   :  { %1260 = vmatprep.mubr.bf16.mxu1 %v1534_v21 }
  0x73   :  { %1164 = vmatmul.mubr.bf16.gmra.mrb[40].mxu0 %v1531_v26 }
  0x74   :  { %1261 = vmatmul.mubr.bf16.gmra.mrb[40].mxu1 %v1533_v27  ;;  %1171 = vmatprep.mubr.bf16.mxu0 %v1540_v28 }
  0x75   :  { %1268 = vmatprep.mubr.bf16.mxu1 %v1542_v29 }
  0x7b   :  { %1172 = vmatmul.mubr.bf16.gmra.mrb[44].mxu0 %v1539_v34 }
  0x7c   :  { %1269 = vmatmul.mubr.bf16.gmra.mrb[44].mxu1 %v1541_v35  ;;  %1179 = vmatprep.mubr.bf16.mxu0 %v1548_v36 }
  0x7d   :  { %1276 = vmatprep.mubr.bf16.mxu1 %v1550_v37 }
  0x83   :  { %1180 = vmatmul.mubr.bf16.gmra.mrb[48].mxu0 %v1547_v42 }
  0x84   :  { %1277 = vmatmul.mubr.bf16.gmra.mrb[48].mxu1 %v1549_v43  ;;  %1187 = vmatprep.mubr.bf16.mxu0 %v1556_v44 }
  0x85   :  { %1284 = vmatprep.mubr.bf16.mxu1 %v1558_v45 }
  0x8b   :  { %1188 = vmatmul.mubr.bf16.gmra.mrb[52].mxu0 %v1555_v50 }
  0x8c   :  { %1285 = vmatmul.mubr.bf16.gmra.mrb[52].mxu1 %v1557_v51  ;;  %1195 = vmatprep.mubr.bf16.mxu0 %v1564_v52 }
  0x8d   :  { %1292 = vmatprep.mubr.bf16.mxu1 %v1566_v53 }
  0x93   :  { %1196 = vmatmul.mubr.bf16.gmra.mrb[56].mxu0 %v1563_v58 }
  0x94   :  { %1293 = vmatmul.mubr.bf16.gmra.mrb[56].mxu1 %v1565_v59  ;;  %1203 = vmatprep.mubr.bf16.mxu0 %v1572_v60 }
  0x95   :  { %1300 = vmatprep.mubr.bf16.mxu1 %v1574_v61 }
  0x9b   :  { %1204 = vmatmul.mubr.bf16.gmra.mrb[60].mxu0 %v1571_v62 }
  0x9c   :  { %1301 = vmatmul.mubr.bf16.gmra.mrb[60].mxu1 %v1573_v63 }
  0xf6   :  { %v1734_v0 = vpop.f32.mrb[0].mxu0 }
  0xf7   :  { %v1798_v1 = vpop.f32.mrb[0].mxu1  ;;  %v1735_v3 = vpop.f32.mrb[1].mxu0 }
  0xf8   :  { %v1736_v4 = vadd.f32 %v1735_v3, %v1734_v0  ;;  %v1799_v5 = vpop.f32.mrb[1].mxu1  ;;  %v1737_v6 = vpop.f32.mrb[2].mxu0 }
  0xf9   :  { %v1800_v7 = vadd.f32 %v1799_v5, %v1798_v1  ;;  %v1801_v8 = vpop.f32.mrb[2].mxu1  ;;  %v1738_v9 = vpop.f32.mrb[3].mxu0 }
  0xfa   :  { %v956_v10 = vadd.f32 %v1736_v4, %v2455_v2  ;;  %v1739_v11 = vadd.f32 %v1738_v9, %v1737_v6  ;;  %v1802_v12 = vpop.f32.mrb[3].mxu1 }
  0xfb   :  { %v1803_v13 = vadd.f32 %v1802_v12, %v1801_v8 }
  0xfc   :  { %v2458_v14 = vadd.f32 %v1800_v7, %v956_v10  ;;  %v959_v15 = vadd.f32 %v1739_v11, %v2455_v2 }
  0xfe   :  { %v2461_v16 = vadd.f32 %v1803_v13, %v959_v15  ;;  %v1740_v17 = vpop.f32.mrb[4].mxu0 }
  0xff   :  { %v1804_v18 = vpop.f32.mrb[4].mxu1  ;;  %v1741_v19 = vpop.f32.mrb[5].mxu0 }
 0x100   :  { %v1742_v20 = vadd.f32 %v1741_v19, %v1740_v17  ;;  %v1805_v21 = vpop.f32.mrb[5].mxu1  ;;  %v1743_v22 = vpop.f32.mrb[6].mxu0 }
 0x101   :  { %v1806_v23 = vadd.f32 %v1805_v21, %v1804_v18  ;;  %v1807_v24 = vpop.f32.mrb[6].mxu1  ;;  %v1744_v25 = vpop.f32.mrb[7].mxu0 }
 0x102   :  { %v964_v26 = vadd.f32 %v1742_v20, %v2455_v2  ;;  %v1745_v27 = vadd.f32 %v1744_v25, %v1743_v22  ;;  %v1808_v28 = vpop.f32.mrb[7].mxu1 }
 0x103   :  { %v1809_v29 = vadd.f32 %v1808_v28, %v1807_v24 }
 0x104   :  { %v2464_v30 = vadd.f32 %v1806_v23, %v964_v26  ;;  %v967_v31 = vadd.f32 %v1745_v27, %v2455_v2 }
 0x106   :  { %v2467_v32 = vadd.f32 %v1809_v29, %v967_v31  ;;  %v1746_v33 = vpop.f32.mrb[8].mxu0 }
 0x107   :  { %v1810_v34 = vpop.f32.mrb[8].mxu1  ;;  %v1747_v35 = vpop.f32.mrb[9].mxu0 }
 0x108   :  { %v1748_v36 = vadd.f32 %v1747_v35, %v1746_v33  ;;  %v1811_v37 = vpop.f32.mrb[9].mxu1  ;;  %v1749_v38 = vpop.f32.mrb[10].mxu0 }
 0x109   :  { %v1812_v39 = vadd.f32 %v1811_v37, %v1810_v34  ;;  %v1813_v40 = vpop.f32.mrb[10].mxu1  ;;  %v1750_v41 = vpop.f32.mrb[11].mxu0 }
 0x10a   :  { %v972_v42 = vadd.f32 %v1748_v36, %v2455_v2  ;;  %v1751_v43 = vadd.f32 %v1750_v41, %v1749_v38  ;;  %v1814_v44 = vpop.f32.mrb[11].mxu1 }
 0x10b   :  { %v1815_v45 = vadd.f32 %v1814_v44, %v1813_v40 }
 0x10c   :  { %v2470_v46 = vadd.f32 %v1812_v39, %v972_v42  ;;  %v975_v47 = vadd.f32 %v1751_v43, %v2455_v2 }
 0x10e   :  { %v2473_v48 = vadd.f32 %v1815_v45, %v975_v47  ;;  %v1752_v49 = vpop.f32.mrb[12].mxu0 }
 0x10f   :  { %v1816_v50 = vpop.f32.mrb[12].mxu1  ;;  %v1753_v51 = vpop.f32.mrb[13].mxu0 }
 0x110   :  { %v1754_v52 = vadd.f32 %v1753_v51, %v1752_v49  ;;  %v1817_v53 = vpop.f32.mrb[13].mxu1  ;;  %v1755_v54 = vpop.f32.mrb[14].mxu0 }
 0x111   :  { %v1818_v55 = vadd.f32 %v1817_v53, %v1816_v50  ;;  %v1819_v56 = vpop.f32.mrb[14].mxu1  ;;  %v1756_v57 = vpop.f32.mrb[15].mxu0 }
 0x112   :  { %v980_v58 = vadd.f32 %v1754_v52, %v2455_v2  ;;  %v1757_v59 = vadd.f32 %v1756_v57, %v1755_v54  ;;  %v1820_v60 = vpop.f32.mrb[15].mxu1 }
 0x113   :  { %v1821_v61 = vadd.f32 %v1820_v60, %v1819_v56 }
 0x114   :  { %v2476_v62 = vadd.f32 %v1818_v55, %v980_v58  ;;  %v983_v63 = vadd.f32 %v1757_v59, %v2455_v2 }
 0x116   :  { %v2479_v0 = vadd.f32 %v1821_v61, %v983_v63  ;;  %v1758_v1 = vpop.f32.mrb[16].mxu0 }
 0x117   :  { %v1822_v3 = vpop.f32.mrb[16].mxu1  ;;  %v1759_v4 = vpop.f32.mrb[17].mxu0 }
 0x118   :  { %v1760_v5 = vadd.f32 %v1759_v4, %v1758_v1  ;;  %v1823_v6 = vpop.f32.mrb[17].mxu1  ;;  %v1761_v7 = vpop.f32.mrb[18].mxu0 }
 0x119   :  { %v1824_v8 = vadd.f32 %v1823_v6, %v1822_v3  ;;  %v1825_v9 = vpop.f32.mrb[18].mxu1  ;;  %v1762_v10 = vpop.f32.mrb[19].mxu0 }
 0x11a   :  { %v988_v11 = vadd.f32 %v1760_v5, %v2455_v2  ;;  %v1763_v12 = vadd.f32 %v1762_v10, %v1761_v7  ;;  %v1826_v13 = vpop.f32.mrb[19].mxu1 }
 0x11b   :  { %v1827_v15 = vadd.f32 %v1826_v13, %v1825_v9 }
 0x11c   :  { %v2482_v17 = vadd.f32 %v1824_v8, %v988_v11  ;;  %v991_v18 = vadd.f32 %v1763_v12, %v2455_v2 }
 0x11e   :  { %v2485_v19 = vadd.f32 %v1827_v15, %v991_v18  ;;  %v1764_v20 = vpop.f32.mrb[20].mxu0 }
 0x11f   :  { %v1828_v21 = vpop.f32.mrb[20].mxu1  ;;  %v1765_v22 = vpop.f32.mrb[21].mxu0 }
 0x120   :  { %v1766_v23 = vadd.f32 %v1765_v22, %v1764_v20  ;;  %v1829_v24 = vpop.f32.mrb[21].mxu1  ;;  %v1767_v25 = vpop.f32.mrb[22].mxu0 }
 0x121   :  { %v1830_v26 = vadd.f32 %v1829_v24, %v1828_v21  ;;  %v1831_v27 = vpop.f32.mrb[22].mxu1  ;;  %v1768_v28 = vpop.f32.mrb[23].mxu0 }
 0x122   :  { %v996_v29 = vadd.f32 %v1766_v23, %v2455_v2  ;;  %v1769_v31 = vadd.f32 %v1768_v28, %v1767_v25  ;;  %v1832_v33 = vpop.f32.mrb[23].mxu1 }
 0x123   :  { %v1833_v34 = vadd.f32 %v1832_v33, %v1831_v27 }
 0x124   :  { %v2488_v35 = vadd.f32 %v1830_v26, %v996_v29  ;;  %v999_v36 = vadd.f32 %v1769_v31, %v2455_v2 }
 0x126   :  { %v2491_v37 = vadd.f32 %v1833_v34, %v999_v36  ;;  %v1770_v38 = vpop.f32.mrb[24].mxu0 }
 0x127   :  { %v1834_v39 = vpop.f32.mrb[24].mxu1  ;;  %v1771_v40 = vpop.f32.mrb[25].mxu0 }
 0x128   :  { %v1772_v41 = vadd.f32 %v1771_v40, %v1770_v38  ;;  %v1835_v42 = vpop.f32.mrb[25].mxu1  ;;  %v1773_v43 = vpop.f32.mrb[26].mxu0 }
 0x129   :  { %v1836_v44 = vadd.f32 %v1835_v42, %v1834_v39  ;;  %v1837_v45 = vpop.f32.mrb[26].mxu1  ;;  %v1774_v47 = vpop.f32.mrb[27].mxu0 }
 0x12a   :  { %v1004_v49 = vadd.f32 %v1772_v41, %v2455_v2  ;;  %v1775_v50 = vadd.f32 %v1774_v47, %v1773_v43  ;;  %v1838_v51 = vpop.f32.mrb[27].mxu1 }
 0x12b   :  { %v1839_v52 = vadd.f32 %v1838_v51, %v1837_v45 }
 0x12c   :  { %v2494_v53 = vadd.f32 %v1836_v44, %v1004_v49  ;;  %v1007_v54 = vadd.f32 %v1775_v50, %v2455_v2 }
 0x12e   :  { %v2497_v55 = vadd.f32 %v1839_v52, %v1007_v54  ;;  %v1776_v56 = vpop.f32.mrb[28].mxu0 }
 0x12f   :  { %v1840_v57 = vpop.f32.mrb[28].mxu1  ;;  %v1777_v58 = vpop.f32.mrb[29].mxu0 }
 0x130   :  { %v1778_v59 = vadd.f32 %v1777_v58, %v1776_v56  ;;  %v1841_v60 = vpop.f32.mrb[29].mxu1  ;;  %v1779_v61 = vpop.f32.mrb[30].mxu0 }
 0x131   :  { %v1842_v63 = vadd.f32 %v1841_v60, %v1840_v57  ;;  %v1843_v1 = vpop.f32.mrb[30].mxu1  ;;  %v1780_v3 = vpop.f32.mrb[31].mxu0 }
 0x132   :  { %v1012_v4 = vadd.f32 %v1778_v59, %v2455_v2  ;;  %v1781_v5 = vadd.f32 %v1780_v3, %v1779_v61  ;;  %v1844_v6 = vpop.f32.mrb[31].mxu1 }
 0x133   :  { %v1845_v7 = vadd.f32 %v1844_v6, %v1843_v1 }
 0x134   :  { %v2500_v8 = vadd.f32 %v1842_v63, %v1012_v4  ;;  %v1015_v9 = vadd.f32 %v1781_v5, %v2455_v2 }
 0x136   :  { %v2503_v10 = vadd.f32 %v1845_v7, %v1015_v9  ;;  %v1862_v11 = vpop.f32.mrb[32].mxu0 }
 0x137   :  { %v1926_v12 = vpop.f32.mrb[32].mxu1  ;;  %v1863_v13 = vpop.f32.mrb[33].mxu0 }
 0x138   :  { %v1864_v15 = vadd.f32 %v1863_v13, %v1862_v11  ;;  %v1927_v18 = vpop.f32.mrb[33].mxu1  ;;  %v1865_v20 = vpop.f32.mrb[34].mxu0 }
 0x139   :  { %v1928_v21 = vadd.f32 %v1927_v18, %v1926_v12  ;;  %v1929_v22 = vpop.f32.mrb[34].mxu1  ;;  %v1866_v23 = vpop.f32.mrb[35].mxu0 }
 0x13a   :  { %v1150_v24 = vadd.f32 %v1864_v15, %v2458_v14  ;;  %v1867_v25 = vadd.f32 %v1866_v23, %v1865_v20  ;;  %v1930_v26 = vpop.f32.mrb[35].mxu1 }
 0x13b   :  { %v1931_v27 = vadd.f32 %v1930_v26, %v1929_v22 }
 0x13c   :  { %v1247_v28 = vadd.f32 %v1928_v21, %v1150_v24  ;;  %v1153_v29 = vadd.f32 %v1867_v25, %v2461_v16 }
 0x13e   :  { %v1250_v2 = vadd.f32 %v1931_v27, %v1153_v29  ;;  %v1868_v31 = vpop.f32.mrb[36].mxu0  ;;  %v1460_v33 = vmul.f32 %v1247_v28, %v1247_v28 }
 0x13f   :  { %v1932_v34 = vpop.f32.mrb[36].mxu1  ;;  %v1869_v36 = vpop.f32.mrb[37].mxu0 }
 0x140   :  { %v1674_v38 = vpack.c.bf16 %v1250_v2, %v1247_v28  ;;  %v1438_v39 = vadd.f32 %v1250_v2, %v1247_v28  ;;  %v1461_v40 = vmul.f32 %v1250_v2, %v1250_v2  ;;  %v1870_v41 = vadd.f32 %v1869_v36, %v1868_v31  ;;  %v1933_v42 = vpop.f32.mrb[37].mxu1  ;;  %v1871_v43 = vpop.f32.mrb[38].mxu0 }
 0x141   :  { %v1934_v44 = vadd.f32 %v1933_v42, %v1932_v34  ;;  %v1935_v45 = vpop.f32.mrb[38].mxu1  ;;  %v1872_v14 = vpop.f32.mrb[39].mxu0 }
 0x142   :  { %1675 = vst [vmem:[%s2554_s3] sm:$0xff] %v1674_v38   ;;  %v1476_v47 = vadd.f32 %v1461_v40, %v1460_v33  ;;  %v1158_v16 = vadd.f32 %v1870_v41, %v2464_v30  ;;  %v1873_v49 = vadd.f32 %v1872_v14, %v1871_v43  ;;  %v1936_v50 = vpop.f32.mrb[39].mxu1 }
 0x143   :  { %v1937_v51 = vadd.f32 %v1936_v50, %v1935_v45 }
 0x144   :  { %v1255_v52 = vadd.f32 %v1934_v44, %v1158_v16  ;;  %v1161_v54 = vadd.f32 %v1873_v49, %v2467_v32 }
 0x146   :  { %v1439_v56 = vadd.f32 %v1438_v39, %v1255_v52  ;;  %v1462_v57 = vmul.f32 %v1255_v52, %v1255_v52  ;;  %v1258_v58 = vadd.f32 %v1937_v51, %v1161_v54  ;;  %v1874_v59 = vpop.f32.mrb[40].mxu0 }
 0x147   :  { %v1938_v60 = vpop.f32.mrb[40].mxu1  ;;  %v1875_v61 = vpop.f32.mrb[41].mxu0 }
 0x148   :  { %v1477_v63 = vadd.f32 %v1476_v47, %v1462_v57  ;;  %v1679_v1 = vpack.c.bf16 %v1258_v58, %v1255_v52  ;;  %v1440_v3 = vadd.f32 %v1439_v56, %v1258_v58  ;;  %v1463_v4 = vmul.f32 %v1258_v58, %v1258_v58  ;;  %v1939_v5 = vpop.f32.mrb[41].mxu1  ;;  %v1877_v6 = vpop.f32.mrb[42].mxu0 }
 0x149   :  { %v1876_v7 = vadd.f32 %v1875_v61, %v1874_v59  ;;  %v1940_v30 = vadd.f32 %v1939_v5, %v1938_v60  ;;  %v1941_v9 = vpop.f32.mrb[42].mxu1  ;;  %v1878_v11 = vpop.f32.mrb[43].mxu0 }
 0x14a   :  { %1711 = vst [vmem:[%s2554_s3 + $0x8] sm:$0xff] %v1679_v1   ;;  %v1478_v32 = vadd.f32 %v1477_v63, %v1463_v4  ;;  %v1879_v12 = vadd.f32 %v1878_v11, %v1877_v6  ;;  %v1942_v13 = vpop.f32.mrb[43].mxu1 }
 0x14b   :  { %v1166_v15 = vadd.f32 %v1876_v7, %v2470_v46  ;;  %v1943_v18 = vadd.f32 %v1942_v13, %v1941_v9 }
 0x14c   :  { %v1169_v20 = vadd.f32 %v1879_v12, %v2473_v48 }
 0x14d   :  { %v1263_v21 = vadd.f32 %v1940_v30, %v1166_v15 }
 0x14e   :  { %v1266_v22 = vadd.f32 %v1943_v18, %v1169_v20  ;;  %v1880_v23 = vpop.f32.mrb[44].mxu0 }
 0x14f   :  { %v1441_v24 = vadd.f32 %v1440_v3, %v1263_v21  ;;  %v1464_v25 = vmul.f32 %v1263_v21, %v1263_v21  ;;  %v1944_v26 = vpop.f32.mrb[44].mxu1  ;;  %v1881_v27 = vpop.f32.mrb[45].mxu0 }
 0x150   :  { %v1684_v28 = vpack.c.bf16 %v1266_v22, %v1263_v21  ;;  %v1465_v29 = vmul.f32 %v1266_v22, %v1266_v22  ;;  %v1882_v2 = vadd.f32 %v1881_v27, %v1880_v23  ;;  %v1945_v31 = vpop.f32.mrb[45].mxu1  ;;  %v1883_v33 = vpop.f32.mrb[46].mxu0 }
 0x151   :  { %v1479_v34 = vadd.f32 %v1478_v32, %v1464_v25  ;;  %v1442_v36 = vadd.f32 %v1441_v24, %v1266_v22  ;;  %v1946_v38 = vadd.f32 %v1945_v31, %v1944_v26  ;;  %v1947_v39 = vpop.f32.mrb[46].mxu1  ;;  %v1884_v46 = vpop.f32.mrb[47].mxu0 }
 0x152   :  { %1712 = vst [vmem:[%s2554_s3 + $0x10] sm:$0xff] %v1684_v28   ;;  %v1174_v48 = vadd.f32 %v1882_v2, %v2476_v62  ;;  %v1885_v40 = vadd.f32 %v1884_v46, %v1883_v33  ;;  %v1948_v41 = vpop.f32.mrb[47].mxu1 }
 0x153   :  { %v1480_v42 = vadd.f32 %v1479_v34, %v1465_v29  ;;  %v1949_v43 = vadd.f32 %v1948_v41, %v1947_v39 }
 0x154   :  { %v1271_v44 = vadd.f32 %v1946_v38, %v1174_v48  ;;  %v1177_v45 = vadd.f32 %v1885_v40, %v2479_v0 }
 0x156   :  { %v1443_v14 = vadd.f32 %v1442_v36, %v1271_v44  ;;  %v1466_v47 = vmul.f32 %v1271_v44, %v1271_v44  ;;  %v1274_v16 = vadd.f32 %v1949_v43, %v1177_v45  ;;  %v1886_v49 = vpop.f32.mrb[48].mxu0 }
 0x157   :  { %v1950_v50 = vpop.f32.mrb[48].mxu1  ;;  %v1887_v51 = vpop.f32.mrb[49].mxu0 }
 0x158   :  { %v1481_v52 = vadd.f32 %v1480_v42, %v1466_v47  ;;  %v1689_v54 = vpack.c.bf16 %v1274_v16, %v1271_v44  ;;  %v1444_v56 = vadd.f32 %v1443_v14, %v1274_v16  ;;  %v1467_v57 = vmul.f32 %v1274_v16, %v1274_v16  ;;  %v1951_v58 = vpop.f32.mrb[49].mxu1  ;;  %v1889_v59 = vpop.f32.mrb[50].mxu0 }
 0x159   :  { %v1888_v62 = vadd.f32 %v1887_v51, %v1886_v49  ;;  %v1952_v60 = vadd.f32 %v1951_v58, %v1950_v50  ;;  %v1953_v61 = vpop.f32.mrb[50].mxu1  ;;  %v1890_v63 = vpop.f32.mrb[51].mxu0 }
 0x15a   :  { %1713 = vst [vmem:[%s2554_s3 + $0x18] sm:$0xff] %v1689_v54   ;;  %v1482_v0 = vadd.f32 %v1481_v52, %v1467_v57  ;;  %v1891_v1 = vadd.f32 %v1890_v63, %v1889_v59  ;;  %v1954_v3 = vpop.f32.mrb[51].mxu1 }
 0x15b   :  { %v1182_v4 = vadd.f32 %v1888_v62, %v2482_v17  ;;  %v1955_v5 = vadd.f32 %v1954_v3, %v1953_v61 }
 0x15c   :  { %v1185_v6 = vadd.f32 %v1891_v1, %v2485_v19 }
 0x15d   :  { %v1279_v7 = vadd.f32 %v1952_v60, %v1182_v4 }
 0x15e   :  { %v1282_v30 = vadd.f32 %v1955_v5, %v1185_v6  ;;  %v1892_v9 = vpop.f32.mrb[52].mxu0 }
 0x15f   :  { %v1445_v11 = vadd.f32 %v1444_v56, %v1279_v7  ;;  %v1468_v32 = vmul.f32 %v1279_v7, %v1279_v7  ;;  %v1956_v12 = vpop.f32.mrb[52].mxu1  ;;  %v1893_v13 = vpop.f32.mrb[53].mxu0 }
 0x160   :  { %v1694_v15 = vpack.c.bf16 %v1282_v30, %v1279_v7  ;;  %v1469_v18 = vmul.f32 %v1282_v30, %v1282_v30  ;;  %v1894_v20 = vadd.f32 %v1893_v13, %v1892_v9  ;;  %v1957_v21 = vpop.f32.mrb[53].mxu1  ;;  %v1895_v22 = vpop.f32.mrb[54].mxu0 }
 0x161   :  { %v1483_v23 = vadd.f32 %v1482_v0, %v1468_v32  ;;  %v1446_v24 = vadd.f32 %v1445_v11, %v1282_v30  ;;  %v1958_v25 = vadd.f32 %v1957_v21, %v1956_v12  ;;  %v1959_v26 = vpop.f32.mrb[54].mxu1  ;;  %v1896_v17 = vpop.f32.mrb[55].mxu0 }
 0x162   :  { %1714 = vst [vmem:[%s2554_s3 + $0x20] sm:$0xff] %v1694_v15   ;;  %v1190_v19 = vadd.f32 %v1894_v20, %v2488_v35  ;;  %v1897_v27 = vadd.f32 %v1896_v17, %v1895_v22  ;;  %v1960_v28 = vpop.f32.mrb[55].mxu1 }
 0x163   :  { %v1484_v29 = vadd.f32 %v1483_v23, %v1469_v18  ;;  %v1961_v2 = vadd.f32 %v1960_v28, %v1959_v26 }
 0x164   :  { %v1287_v31 = vadd.f32 %v1958_v25, %v1190_v19  ;;  %v1193_v33 = vadd.f32 %v1897_v27, %v2491_v37 }
 0x166   :  { %v1447_v34 = vadd.f32 %v1446_v24, %v1287_v31  ;;  %v1470_v36 = vmul.f32 %v1287_v31, %v1287_v31  ;;  %v1290_v38 = vadd.f32 %v1961_v2, %v1193_v33  ;;  %v1898_v39 = vpop.f32.mrb[56].mxu0 }
 0x167   :  { %v1962_v46 = vpop.f32.mrb[56].mxu1  ;;  %v1899_v48 = vpop.f32.mrb[57].mxu0 }
 0x168   :  { %v1485_v40 = vadd.f32 %v1484_v29, %v1470_v36  ;;  %v1699_v41 = vpack.c.bf16 %v1290_v38, %v1287_v31  ;;  %v1448_v42 = vadd.f32 %v1447_v34, %v1290_v38  ;;  %v1471_v43 = vmul.f32 %v1290_v38, %v1290_v38  ;;  %v1963_v44 = vpop.f32.mrb[57].mxu1  ;;  %v1901_v45 = vpop.f32.mrb[58].mxu0 }
 0x169   :  { %v1900_v35 = vadd.f32 %v1899_v48, %v1898_v39  ;;  %v1964_v14 = vadd.f32 %v1963_v44, %v1962_v46  ;;  %v1965_v47 = vpop.f32.mrb[58].mxu1  ;;  %v1902_v16 = vpop.f32.mrb[59].mxu0 }
 0x16a   :  { %1715 = vst [vmem:[%s2554_s3 + $0x28] sm:$0xff] %v1699_v41   ;;  %v1486_v37 = vadd.f32 %v1485_v40, %v1471_v43  ;;  %v1903_v49 = vadd.f32 %v1902_v16, %v1901_v45  ;;  %v1966_v50 = vpop.f32.mrb[59].mxu1 }
 0x16b   :  { %v1198_v51 = vadd.f32 %v1900_v35, %v2494_v53  ;;  %v1967_v52 = vadd.f32 %v1966_v50, %v1965_v47 }
 0x16c   :  { %v1201_v54 = vadd.f32 %v1903_v49, %v2497_v55 }
 0x16d   :  { %v1295_v56 = vadd.f32 %v1964_v14, %v1198_v51 }
 0x16e   :  { %v1298_v57 = vadd.f32 %v1967_v52, %v1201_v54  ;;  %v1904_v58 = vpop.f32.mrb[60].mxu0 }
 0x16f   :  { %v1449_v59 = vadd.f32 %v1448_v42, %v1295_v56  ;;  %v1472_v62 = vmul.f32 %v1295_v56, %v1295_v56  ;;  %v1968_v60 = vpop.f32.mrb[60].mxu1  ;;  %v1905_v61 = vpop.f32.mrb[61].mxu0 }
 0x170   :  { %v1704_v63 = vpack.c.bf16 %v1298_v57, %v1295_v56  ;;  %v1473_v0 = vmul.f32 %v1298_v57, %v1298_v57  ;;  %v1906_v1 = vadd.f32 %v1905_v61, %v1904_v58  ;;  %v1969_v3 = vpop.f32.mrb[61].mxu1  ;;  %v1907_v4 = vpop.f32.mrb[62].mxu0 }
 0x171   :  { %v1487_v5 = vadd.f32 %v1486_v37, %v1472_v62  ;;  %v1450_v6 = vadd.f32 %v1449_v59, %v1298_v57  ;;  %v1970_v7 = vadd.f32 %v1969_v3, %v1968_v60  ;;  %v1971_v30 = vpop.f32.mrb[62].mxu1  ;;  %v1908_v53 = vpop.f32.mrb[63].mxu0 }
 0x172   :  { %1716 = vst [vmem:[%s2554_s3 + $0x30] sm:$0xff] %v1704_v63   ;;  %v1206_v55 = vadd.f32 %v1906_v1, %v2500_v8  ;;  %v1909_v9 = vadd.f32 %v1908_v53, %v1907_v4  ;;  %v1972_v11 = vpop.f32.mrb[63].mxu1 }
 0x173   :  { %v1488_v32 = vadd.f32 %v1487_v5, %v1473_v0  ;;  %v1973_v12 = vadd.f32 %v1972_v11, %v1971_v30 }
 0x174   :  { %v1303_v13 = vadd.f32 %v1970_v7, %v1206_v55  ;;  %v1209_v15 = vadd.f32 %v1909_v9, %v2503_v10 }
 0x176   :  { %v1451_v18 = vadd.f32 %v1450_v6, %v1303_v13  ;;  %v1474_v20 = vmul.f32 %v1303_v13, %v1303_v13  ;;  %v1306_v21 = vadd.f32 %v1973_v12, %v1209_v15 }
 0x178   :  { %v1489_v22 = vadd.f32 %v1488_v32, %v1474_v20  ;;  %v1709_v23 = vpack.c.bf16 %v1306_v21, %v1303_v13  ;;  %v1452_v24 = vadd.f32 %v1451_v18, %v1306_v21  ;;  %v1475_v25 = vmul.f32 %v1306_v21, %v1306_v21 }
 0x17a   :  { %1717 = vst [vmem:[%s2554_s3 + $0x38] sm:$0xff] %v1709_v23   ;;  %v1453_v26 = vrot.slane %v1452_v24, 4  ;;  %v1490_v8 = vadd.f32 %v1489_v22, %v1475_v25 }
 0x17c   :  { %v1454_v17 = vadd.f32 %v1453_v26, %v1452_v24  ;;  %v1491_v19 = vrot.slane %v1490_v8, 4 }
 0x17e   :  { %v1455_v27 = vrot.slane %v1454_v17, 2  ;;  %v1492_v28 = vadd.f32 %v1491_v19, %v1490_v8 }
 0x180   :  { %v1456_v29 = vadd.f32 %v1455_v27, %v1454_v17  ;;  %v1493_v2 = vrot.slane %v1492_v28, 2 }
 0x182   :  { %v1457_v10 = vrot.slane %v1456_v29, 1  ;;  %v1494_v31 = vadd.f32 %v1493_v2, %v1492_v28 }
 0x184   :  { %v1458_v33 = vadd.f32 %v1457_v10, %v1456_v29  ;;  %v1495_v34 = vrot.slane %v1494_v31, 1 }
 0x186   :  { %1459 = vst [vmem:[%s2555_s4] sm:$0x1] %v1458_v33  ;;  %v1496_v36 = vadd.f32 %v1495_v34, %v1494_v31 }
 0x188   :  { %1497 = vst [vmem:[%s2556_s5] sm:$0x1] %v1496_v36 }

// kernel: d_forward.12
= control target key start
LH: loop header
LB: loop body
LE: loop exit
PB: predicated region body
PF: predicated region fallthrough
CT: control target
= control target key end

     0   :  { %v28_v0 = vlaneseq  ;;  %s180_s0 = inlined_call_operand.vmem [shape: bf16[32,256], index: 0, kind: input, shape index: {}]   ;;  %s181_s1 = inlined_call_operand.vmem [shape: f32[1,256], index: 1, kind: input, shape index: {}]   ;;  %s182_s2 = inlined_call_operand.vmem [shape: f32[1,256], index: 2, kind: input, shape index: {}]   ;;  %s183_s3 = inlined_call_operand.vmem [shape: bf16[32,256], index: 3, kind: output, shape index: {}]  }
   0x1   :  { %v14_v1 = vld [vmem:[%s180_s0] sm:$0xff]  ;;  %v15_v3 = vld [vmem:[%s180_s0 + $0x8] sm:$0xff]  ;;  %v16_v4 = vld [vmem:[%s180_s0 + $0x10] sm:$0xff] }
   0x2   :  { %v29_v2 = vshrl.u32 %v28_v0, 7  ;;  %v17_v5 = vld [vmem:[%s180_s0 + $0x18] sm:$0xff]  ;;  %v18_v6 = vunpack.c.l.bf16 %v14_v1  ;;  %v19_v7 = vunpack.c.h.bf16 %v14_v1  ;;  %v26_v8 = vld [vmem:[%s181_s1] sm:$0x3]  ;;  %v20_v12 = vunpack.c.l.bf16 %v15_v3 }
   0x3   :  { %v46_v9 = vld [vmem:[%s182_s2] sm:$0x3]  ;;  %v21_v13 = vunpack.c.h.bf16 %v15_v3  ;;  %v22_v14 = vunpack.c.l.bf16 %v16_v4  ;;  %v23_v15 = vunpack.c.h.bf16 %v16_v4  ;;  %v24_v16 = vunpack.c.l.bf16 %v17_v5 }
   0x4   :  { %v30_v10 = vsub.s32 0, %v29_v2  ;;  %v34_v11 = vsub.s32 1, %v29_v2  ;;  %v25_v17 = vunpack.c.h.bf16 %v17_v5 }
   0x6   :  { %v31_v18 = vrot.slane %v26_v8, %v30_v10  ;;  %v35_v19 = vrot.slane %v26_v8, %v34_v11  ;;  %v51_v20 = vrot.slane %v46_v9, %v30_v10  ;;  %v55_v21 = vrot.slane %v46_v9, %v34_v11 }
   0x8   :  { %v38_v22 = vmul.f32 %v31_v18, %v18_v6  ;;  %v39_v23 = vmul.f32 %v35_v19, %v19_v7  ;;  %v40_v24 = vmul.f32 %v31_v18, %v20_v12  ;;  %v41_v25 = vmul.f32 %v35_v19, %v21_v13 }
   0x9   :  { %v42_v26 = vmul.f32 %v31_v18, %v22_v14  ;;  %v43_v27 = vmul.f32 %v35_v19, %v23_v15  ;;  %v44_v28 = vmul.f32 %v31_v18, %v24_v16  ;;  %v45_v29 = vmul.f32 %v35_v19, %v25_v17 }
   0xa   :  { %v58_v30 = vadd.f32 %v51_v20, %v38_v22  ;;  %v59_v31 = vadd.f32 %v55_v21, %v39_v23  ;;  %v60_v32 = vadd.f32 %v51_v20, %v40_v24  ;;  %v61_v33 = vadd.f32 %v55_v21, %v41_v25 }
   0xb   :  { %v62_v34 = vadd.f32 %v51_v20, %v42_v26  ;;  %v63_v35 = vadd.f32 %v55_v21, %v43_v27  ;;  %v64_v36 = vadd.f32 %v51_v20, %v44_v28  ;;  %v65_v37 = vadd.f32 %v55_v21, %v45_v29 }
   0xc   :  { %vm66_vm0 = vcmp.gt.f32.partialorder %v58_v30, 0.0  ;;  %vm67_vm1 = vcmp.gt.f32.partialorder %v59_v31, 0.0  ;;  %v74_v38 = vmul.f32 0.3, %v58_v30  ;;  %v75_v39 = vmul.f32 0.3, %v59_v31 }
   0xd   :  { %vm68_vm2 = vcmp.gt.f32.partialorder %v60_v32, 0.0  ;;  %vm69_vm3 = vcmp.gt.f32.partialorder %v61_v33, 0.0  ;;  %v76_v40 = vmul.f32 0.3, %v60_v32  ;;  %v77_v41 = vmul.f32 0.3, %v61_v33 }
   0xe   :  { %v82_v42 = vsel %vm66_vm0, %v58_v30, %v74_v38  ;;  %v83_v43 = vsel %vm67_vm1, %v59_v31, %v75_v39  ;;  %vm70_vm4 = vcmp.gt.f32.partialorder %v62_v34, 0.0  ;;  %vm71_vm5 = vcmp.gt.f32.partialorder %v63_v35, 0.0 }
   0xf   :  { %v126_v44 = vpack.c.bf16 %v83_v43, %v82_v42  ;;  %v84_v45 = vsel %vm68_vm2, %v60_v32, %v76_v40  ;;  %v85_v46 = vsel %vm69_vm3, %v61_v33, %v77_v41  ;;  %v78_v47 = vmul.f32 0.3, %v62_v34 }
  0x10   :  { %v127_v48 = vpack.c.bf16 %v85_v46, %v84_v45  ;;  %v79_v49 = vmul.f32 0.3, %v63_v35  ;;  %vm72_vm6 = vcmp.gt.f32.partialorder %v64_v36, 0.0  ;;  %vm73_vm7 = vcmp.gt.f32.partialorder %v65_v37, 0.0 }
  0x11   :  { %114 = vst [vmem:[%s183_s3] sm:$0xff] %v126_v44  ;;  %v86_v50 = vsel %vm70_vm4, %v62_v34, %v78_v47  ;;  %v80_v51 = vmul.f32 0.3, %v64_v36  ;;  %v81_v52 = vmul.f32 0.3, %v65_v37 }
  0x12   :  { %115 = vst [vmem:[%s183_s3 + $0x8] sm:$0xff] %v127_v48  ;;  %v87_v53 = vsel %vm71_vm5, %v63_v35, %v79_v49 }
  0x13   :  { %v128_v54 = vpack.c.bf16 %v87_v53, %v86_v50  ;;  %v88_v55 = vsel %vm72_vm6, %v64_v36, %v80_v51  ;;  %v89_v56 = vsel %vm73_vm7, %v65_v37, %v81_v52 }
  0x14   :  { %v129_v57 = vpack.c.bf16 %v89_v56, %v88_v55 }
  0x15   :  { %116 = vst [vmem:[%s183_s3 + $0x10] sm:$0xff] %v128_v54 }
  0x16   :  { %117 = vst [vmem:[%s183_s3 + $0x18] sm:$0xff] %v129_v57 }

// kernel: d_forward.11
= control target key start
LH: loop header
LB: loop body
LE: loop exit
PB: predicated region body
PF: predicated region fallthrough
CT: control target
= control target key end

     0   :  { %s3782_s18 = smov 0   ;;  %s3784_s19 = smov 0   ;;  %s4628_s0 = inlined_call_operand.vmem [shape: bf16[32,2048], index: 0, kind: input, shape index: {}]   ;;  %s4629_s1 = inlined_call_operand.vmem [shape: bf16[2048,256], index: 1, kind: input, shape index: {}]   ;;  %s4630_s2 = inlined_call_operand.vmem [shape: f32[1,256], index: 2, kind: input, shape index: {}]   ;;  %s4631_s3 = inlined_call_operand.vmem [shape: bf16[32,256], index: 3, kind: output, shape index: {0}]   ;;  %s4632_s4 = inlined_call_operand.vmem [shape: f32[1,256], index: 4, kind: output, shape index: {1}]   ;;  %s4633_s5 = inlined_call_operand.vmem [shape: f32[1,256], index: 5, kind: output, shape index: {2}]  }
   0x1   :  { %s3786_s20 = smov 0  }
   0x2 LB: > { %s3798_s21 = sadd.s32 4294967295, %s3750_s20   ;;  %s3801_s22 = sadd.s32 1, %s3750_s20   ;;  %s3750_s20 = sphi %s3786_s20, %s4637_s20   ;;  %s3746_s19 = sphi %s3784_s19, %s4636_s19   ;;  %s3742_s18 = sphi %s3782_s18, %s4635_s18  }
   0x3   : > { %s41_s23 = ssub.s32 %s3750_s20, %s3801_s22  ;;  %s44_s24 = sadd.s32 1, %s3746_s19 }
   0x4   : > { %p42_p0 = scmp.eq.s32.totalorder %s41_s23, 0  ;;  %p51_p1 = scmp.ne.s32.totalorder %s3746_s19, %s3742_s18 }
   0x5   : > { %p52_p2 = scmp.eq.s32.totalorder %s3750_s20, 0  ;;  %p107_p3 = scmp.eq.s32.totalorder %s3798_s21, 1 }
   0x6   : > { %s3811_s25 = scalar_select %p42_p0, %s3746_s19, %s44_s24  }
   0x7   : > { %p53_p4 = por %p52_p2, %p51_p1  ;;  %p3813_p5 = por %p107_p3, %p51_p1 }
   0x8   : > { %p3162_p6 = scmp.ge.s32.totalorder %s3750_s20, 2 }
   0xa   : > { %184 = sbr.rel (%p3162_p6) target bundleno = 191 (0xbf), region = 20 }
  0x11   : > { %187 = sbr.rel (!%p53_p4) target bundleno = 191 (0xbf), region = 24  ;;  %s189_s27 = sand.u32 (%p53_p4), 1, %s3746_s19  }
  0x12   : > { %s3164_s28 = sshll.u32 (%p53_p4), %s3750_s20, 2  ;;  %s3163_s29 = sshll.u32 (%p53_p4), %s189_s27, 10 }
  0x13   : > { %s3823_s7 = scalar_lea.vmem (%p53_p4), %s4629_s1, %s3164_s28  ;;  %s3827_s8 = scalar_lea.vmem (%p53_p4), [#allocation2], %s3163_s29 }
  0x14   : > { %v209_v0 = vld [vmem:[%s3823_s7] sm:$0xf] (%p53_p4)  ;;  %v211_v1 = vld [vmem:[%s3823_s7 + $0x8] sm:$0xf] (%p53_p4)  ;;  %v213_v2 = vld [vmem:[%s3823_s7 + $0x10] sm:$0xf] (%p53_p4) }
  0x15   : > { %210 = vst [vmem:[%s3827_s8] sm:$0xf] (%p53_p4), %v209_v0  ;;  %212 = vst [vmem:[%s3827_s8 + $0x4] sm:$0xf] (%p53_p4), %v211_v1  ;;  %v215_v3 = vld [vmem:[%s3823_s7 + $0x18] sm:$0xf] (%p53_p4) }
  0x16   : > { %v217_v4 = vld [vmem:[%s3823_s7 + $0x20] sm:$0xf] (%p53_p4)  ;;  %214 = vst [vmem:[%s3827_s8 + $0x8] sm:$0xf] (%p53_p4), %v213_v2  ;;  %216 = vst [vmem:[%s3827_s8 + $0xc] sm:$0xf] (%p53_p4), %v215_v3 }
  0x17   : > { %218 = vst [vmem:[%s3827_s8 + $0x10] sm:$0xf] (%p53_p4), %v217_v4  ;;  %v219_v5 = vld [vmem:[%s3823_s7 + $0x28] sm:$0xf] (%p53_p4)  ;;  %v221_v6 = vld [vmem:[%s3823_s7 + $0x30] sm:$0xf] (%p53_p4) }
  0x18   : > { %v223_v7 = vld [vmem:[%s3823_s7 + $0x38] sm:$0xf]  ;;  %220 = vst [vmem:[%s3827_s8 + $0x14] sm:$0xf] %v219_v5  ;;  %222 = vst [vmem:[%s3827_s8 + $0x18] sm:$0xf] %v221_v6 }
  0x19   : > { %224 = vst [vmem:[%s3827_s8 + $0x1c] sm:$0xf] %v223_v7  ;;  %v225_v8 = vld [vmem:[%s3823_s7 + $0x40] sm:$0xf]  ;;  %v227_v9 = vld [vmem:[%s3823_s7 + $0x48] sm:$0xf] }
  0x1a   : > { %v229_v10 = vld [vmem:[%s3823_s7 + $0x50] sm:$0xf]  ;;  %226 = vst [vmem:[%s3827_s8 + $0x20] sm:$0xf] %v225_v8  ;;  %228 = vst [vmem:[%s3827_s8 + $0x24] sm:$0xf] %v227_v9 }
  0x1b   : > { %230 = vst [vmem:[%s3827_s8 + $0x28] sm:$0xf] %v229_v10  ;;  %v231_v11 = vld [vmem:[%s3823_s7 + $0x58] sm:$0xf]  ;;  %v233_v12 = vld [vmem:[%s3823_s7 + $0x60] sm:$0xf] }
  0x1c   : > { %v235_v13 = vld [vmem:[%s3823_s7 + $0x68] sm:$0xf]  ;;  %232 = vst [vmem:[%s3827_s8 + $0x2c] sm:$0xf] %v231_v11  ;;  %234 = vst [vmem:[%s3827_s8 + $0x30] sm:$0xf] %v233_v12 }
  0x1d   : > { %236 = vst [vmem:[%s3827_s8 + $0x34] sm:$0xf] %v235_v13  ;;  %v237_v14 = vld [vmem:[%s3823_s7 + $0x70] sm:$0xf]  ;;  %v239_v15 = vld [vmem:[%s3823_s7 + $0x78] sm:$0xf] }
  0x1e   : > { %v241_v16 = vld [vmem:[%s3823_s7 + $0x80] sm:$0xf]  ;;  %238 = vst [vmem:[%s3827_s8 + $0x38] sm:$0xf] %v237_v14  ;;  %240 = vst [vmem:[%s3827_s8 + $0x3c] sm:$0xf] %v239_v15 }
  0x1f   : > { %242 = vst [vmem:[%s3827_s8 + $0x40] sm:$0xf] %v241_v16  ;;  %v243_v17 = vld [vmem:[%s3823_s7 + $0x88] sm:$0xf]  ;;  %v245_v18 = vld [vmem:[%s3823_s7 + $0x90] sm:$0xf] }
  0x20   : > { %v247_v19 = vld [vmem:[%s3823_s7 + $0x98] sm:$0xf]  ;;  %244 = vst [vmem:[%s3827_s8 + $0x44] sm:$0xf] %v243_v17  ;;  %246 = vst [vmem:[%s3827_s8 + $0x48] sm:$0xf] %v245_v18 }
  0x21   : > { %248 = vst [vmem:[%s3827_s8 + $0x4c] sm:$0xf] %v247_v19  ;;  %v249_v20 = vld [vmem:[%s3823_s7 + $0xa0] sm:$0xf]  ;;  %v251_v21 = vld [vmem:[%s3823_s7 + $0xa8] sm:$0xf] }
  0x22   : > { %v253_v22 = vld [vmem:[%s3823_s7 + $0xb0] sm:$0xf]  ;;  %250 = vst [vmem:[%s3827_s8 + $0x50] sm:$0xf] %v249_v20  ;;  %252 = vst [vmem:[%s3827_s8 + $0x54] sm:$0xf] %v251_v21 }
  0x23   : > { %254 = vst [vmem:[%s3827_s8 + $0x58] sm:$0xf] %v253_v22  ;;  %v255_v23 = vld [vmem:[%s3823_s7 + $0xb8] sm:$0xf]  ;;  %v257_v24 = vld [vmem:[%s3823_s7 + $0xc0] sm:$0xf] }
  0x24   : > { %v259_v25 = vld [vmem:[%s3823_s7 + $0xc8] sm:$0xf]  ;;  %256 = vst [vmem:[%s3827_s8 + $0x5c] sm:$0xf] %v255_v23  ;;  %258 = vst [vmem:[%s3827_s8 + $0x60] sm:$0xf] %v257_v24 }
  0x25   : > { %260 = vst [vmem:[%s3827_s8 + $0x64] sm:$0xf] %v259_v25  ;;  %v261_v26 = vld [vmem:[%s3823_s7 + $0xd0] sm:$0xf]  ;;  %v263_v27 = vld [vmem:[%s3823_s7 + $0xd8] sm:$0xf] }
  0x26   : > { %v265_v28 = vld [vmem:[%s3823_s7 + $0xe0] sm:$0xf]  ;;  %262 = vst [vmem:[%s3827_s8 + $0x68] sm:$0xf] %v261_v26  ;;  %264 = vst [vmem:[%s3827_s8 + $0x6c] sm:$0xf] %v263_v27 }
  0x27   : > { %266 = vst [vmem:[%s3827_s8 + $0x70] sm:$0xf] %v265_v28  ;;  %v267_v29 = vld [vmem:[%s3823_s7 + $0xe8] sm:$0xf]  ;;  %v269_v30 = vld [vmem:[%s3823_s7 + $0xf0] sm:$0xf] }
  0x28   : > { %v271_v31 = vld [vmem:[%s3823_s7 + $0xf8] sm:$0xf]  ;;  %268 = vst [vmem:[%s3827_s8 + $0x74] sm:$0xf] %v267_v29  ;;  %270 = vst [vmem:[%s3827_s8 + $0x78] sm:$0xf] %v269_v30 }
  0x29   : > { %272 = vst [vmem:[%s3827_s8 + $0x7c] sm:$0xf] %v271_v31  ;;  %v273_v32 = vld [vmem:[%s3823_s7 + $0x100] sm:$0xf]  ;;  %v275_v33 = vld [vmem:[%s3823_s7 + $0x108] sm:$0xf] }
  0x2a   : > { %v277_v34 = vld [vmem:[%s3823_s7 + $0x110] sm:$0xf]  ;;  %274 = vst [vmem:[%s3827_s8 + $0x80] sm:$0xf] %v273_v32  ;;  %276 = vst [vmem:[%s3827_s8 + $0x84] sm:$0xf] %v275_v33 }
  0x2b   : > { %278 = vst [vmem:[%s3827_s8 + $0x88] sm:$0xf] %v277_v34  ;;  %v279_v35 = vld [vmem:[%s3823_s7 + $0x118] sm:$0xf]  ;;  %v281_v36 = vld [vmem:[%s3823_s7 + $0x120] sm:$0xf] }
  0x2c   : > { %v283_v37 = vld [vmem:[%s3823_s7 + $0x128] sm:$0xf]  ;;  %280 = vst [vmem:[%s3827_s8 + $0x8c] sm:$0xf] %v279_v35  ;;  %282 = vst [vmem:[%s3827_s8 + $0x90] sm:$0xf] %v281_v36 }
  0x2d   : > { %284 = vst [vmem:[%s3827_s8 + $0x94] sm:$0xf] %v283_v37  ;;  %v285_v38 = vld [vmem:[%s3823_s7 + $0x130] sm:$0xf]  ;;  %v287_v39 = vld [vmem:[%s3823_s7 + $0x138] sm:$0xf] }
  0x2e   : > { %v289_v40 = vld [vmem:[%s3823_s7 + $0x140] sm:$0xf]  ;;  %286 = vst [vmem:[%s3827_s8 + $0x98] sm:$0xf] %v285_v38  ;;  %288 = vst [vmem:[%s3827_s8 + $0x9c] sm:$0xf] %v287_v39 }
  0x2f   : > { %290 = vst [vmem:[%s3827_s8 + $0xa0] sm:$0xf] %v289_v40  ;;  %v291_v41 = vld [vmem:[%s3823_s7 + $0x148] sm:$0xf]  ;;  %v293_v42 = vld [vmem:[%s3823_s7 + $0x150] sm:$0xf] }
  0x30   : > { %v295_v43 = vld [vmem:[%s3823_s7 + $0x158] sm:$0xf]  ;;  %292 = vst [vmem:[%s3827_s8 + $0xa4] sm:$0xf] %v291_v41  ;;  %294 = vst [vmem:[%s3827_s8 + $0xa8] sm:$0xf] %v293_v42 }
  0x31   : > { %296 = vst [vmem:[%s3827_s8 + $0xac] sm:$0xf] %v295_v43  ;;  %v297_v44 = vld [vmem:[%s3823_s7 + $0x160] sm:$0xf]  ;;  %v299_v45 = vld [vmem:[%s3823_s7 + $0x168] sm:$0xf] }
  0x32   : > { %v301_v46 = vld [vmem:[%s3823_s7 + $0x170] sm:$0xf]  ;;  %298 = vst [vmem:[%s3827_s8 + $0xb0] sm:$0xf] %v297_v44  ;;  %300 = vst [vmem:[%s3827_s8 + $0xb4] sm:$0xf] %v299_v45 }
  0x33   : > { %302 = vst [vmem:[%s3827_s8 + $0xb8] sm:$0xf] %v301_v46  ;;  %v303_v47 = vld [vmem:[%s3823_s7 + $0x178] sm:$0xf]  ;;  %v305_v48 = vld [vmem:[%s3823_s7 + $0x180] sm:$0xf] }
  0x34   : > { %v307_v49 = vld [vmem:[%s3823_s7 + $0x188] sm:$0xf]  ;;  %304 = vst [vmem:[%s3827_s8 + $0xbc] sm:$0xf] %v303_v47  ;;  %306 = vst [vmem:[%s3827_s8 + $0xc0] sm:$0xf] %v305_v48 }
  0x35   : > { %308 = vst [vmem:[%s3827_s8 + $0xc4] sm:$0xf] %v307_v49  ;;  %v309_v50 = vld [vmem:[%s3823_s7 + $0x190] sm:$0xf]  ;;  %v311_v51 = vld [vmem:[%s3823_s7 + $0x198] sm:$0xf] }
  0x36   : > { %v313_v52 = vld [vmem:[%s3823_s7 + $0x1a0] sm:$0xf]  ;;  %310 = vst [vmem:[%s3827_s8 + $0xc8] sm:$0xf] %v309_v50  ;;  %312 = vst [vmem:[%s3827_s8 + $0xcc] sm:$0xf] %v311_v51 }
  0x37   : > { %314 = vst [vmem:[%s3827_s8 + $0xd0] sm:$0xf] %v313_v52  ;;  %v315_v53 = vld [vmem:[%s3823_s7 + $0x1a8] sm:$0xf]  ;;  %v317_v54 = vld [vmem:[%s3823_s7 + $0x1b0] sm:$0xf] }
  0x38   : > { %v319_v55 = vld [vmem:[%s3823_s7 + $0x1b8] sm:$0xf]  ;;  %316 = vst [vmem:[%s3827_s8 + $0xd4] sm:$0xf] %v315_v53  ;;  %318 = vst [vmem:[%s3827_s8 + $0xd8] sm:$0xf] %v317_v54 }
  0x39   : > { %320 = vst [vmem:[%s3827_s8 + $0xdc] sm:$0xf] %v319_v55  ;;  %v321_v56 = vld [vmem:[%s3823_s7 + $0x1c0] sm:$0xf]  ;;  %v323_v57 = vld [vmem:[%s3823_s7 + $0x1c8] sm:$0xf] }
  0x3a   : > { %v325_v58 = vld [vmem:[%s3823_s7 + $0x1d0] sm:$0xf]  ;;  %322 = vst [vmem:[%s3827_s8 + $0xe0] sm:$0xf] %v321_v56  ;;  %324 = vst [vmem:[%s3827_s8 + $0xe4] sm:$0xf] %v323_v57 }
  0x3b   : > { %326 = vst [vmem:[%s3827_s8 + $0xe8] sm:$0xf] %v325_v58  ;;  %v327_v59 = vld [vmem:[%s3823_s7 + $0x1d8] sm:$0xf]  ;;  %v329_v60 = vld [vmem:[%s3823_s7 + $0x1e0] sm:$0xf] }
  0x3c   : > { %v331_v61 = vld [vmem:[%s3823_s7 + $0x1e8] sm:$0xf]  ;;  %328 = vst [vmem:[%s3827_s8 + $0xec] sm:$0xf] %v327_v59  ;;  %330 = vst [vmem:[%s3827_s8 + $0xf0] sm:$0xf] %v329_v60 }
  0x3d   : > { %332 = vst [vmem:[%s3827_s8 + $0xf4] sm:$0xf] %v331_v61  ;;  %v333_v62 = vld [vmem:[%s3823_s7 + $0x1f0] sm:$0xf]  ;;  %v335_v63 = vld [vmem:[%s3823_s7 + $0x1f8] sm:$0xf] }
  0x3e   : > { %v337_v0 = vld [vmem:[%s3823_s7 + $0x200] sm:$0xf]  ;;  %334 = vst [vmem:[%s3827_s8 + $0xf8] sm:$0xf] %v333_v62  ;;  %336 = vst [vmem:[%s3827_s8 + $0xfc] sm:$0xf] %v335_v63 }
  0x3f   : > { %338 = vst [vmem:[%s3827_s8 + $0x100] sm:$0xf] %v337_v0  ;;  %v339_v1 = vld [vmem:[%s3823_s7 + $0x208] sm:$0xf]  ;;  %v341_v2 = vld [vmem:[%s3823_s7 + $0x210] sm:$0xf] }
  0x40   : > { %v343_v3 = vld [vmem:[%s3823_s7 + $0x218] sm:$0xf]  ;;  %340 = vst [vmem:[%s3827_s8 + $0x104] sm:$0xf] %v339_v1  ;;  %342 = vst [vmem:[%s3827_s8 + $0x108] sm:$0xf] %v341_v2 }
  0x41   : > { %344 = vst [vmem:[%s3827_s8 + $0x10c] sm:$0xf] %v343_v3  ;;  %v345_v4 = vld [vmem:[%s3823_s7 + $0x220] sm:$0xf]  ;;  %v347_v5 = vld [vmem:[%s3823_s7 + $0x228] sm:$0xf] }
  0x42   : > { %v349_v6 = vld [vmem:[%s3823_s7 + $0x230] sm:$0xf]  ;;  %346 = vst [vmem:[%s3827_s8 + $0x110] sm:$0xf] %v345_v4  ;;  %348 = vst [vmem:[%s3827_s8 + $0x114] sm:$0xf] %v347_v5 }
  0x43   : > { %350 = vst [vmem:[%s3827_s8 + $0x118] sm:$0xf] %v349_v6  ;;  %v351_v7 = vld [vmem:[%s3823_s7 + $0x238] sm:$0xf]  ;;  %v353_v8 = vld [vmem:[%s3823_s7 + $0x240] sm:$0xf] }
  0x44   : > { %v355_v9 = vld [vmem:[%s3823_s7 + $0x248] sm:$0xf]  ;;  %352 = vst [vmem:[%s3827_s8 + $0x11c] sm:$0xf] %v351_v7  ;;  %354 = vst [vmem:[%s3827_s8 + $0x120] sm:$0xf] %v353_v8 }
  0x45   : > { %356 = vst [vmem:[%s3827_s8 + $0x124] sm:$0xf] %v355_v9  ;;  %v357_v10 = vld [vmem:[%s3823_s7 + $0x250] sm:$0xf]  ;;  %v359_v11 = vld [vmem:[%s3823_s7 + $0x258] sm:$0xf] }
  0x46   : > { %v361_v12 = vld [vmem:[%s3823_s7 + $0x260] sm:$0xf]  ;;  %358 = vst [vmem:[%s3827_s8 + $0x128] sm:$0xf] %v357_v10  ;;  %360 = vst [vmem:[%s3827_s8 + $0x12c] sm:$0xf] %v359_v11 }
  0x47   : > { %362 = vst [vmem:[%s3827_s8 + $0x130] sm:$0xf] %v361_v12  ;;  %v363_v13 = vld [vmem:[%s3823_s7 + $0x268] sm:$0xf]  ;;  %v365_v14 = vld [vmem:[%s3823_s7 + $0x270] sm:$0xf] }
  0x48   : > { %v367_v15 = vld [vmem:[%s3823_s7 + $0x278] sm:$0xf]  ;;  %364 = vst [vmem:[%s3827_s8 + $0x134] sm:$0xf] %v363_v13  ;;  %366 = vst [vmem:[%s3827_s8 + $0x138] sm:$0xf] %v365_v14 }
  0x49   : > { %368 = vst [vmem:[%s3827_s8 + $0x13c] sm:$0xf] %v367_v15  ;;  %v369_v16 = vld [vmem:[%s3823_s7 + $0x280] sm:$0xf]  ;;  %v371_v17 = vld [vmem:[%s3823_s7 + $0x288] sm:$0xf] }
  0x4a   : > { %v373_v18 = vld [vmem:[%s3823_s7 + $0x290] sm:$0xf]  ;;  %370 = vst [vmem:[%s3827_s8 + $0x140] sm:$0xf] %v369_v16  ;;  %372 = vst [vmem:[%s3827_s8 + $0x144] sm:$0xf] %v371_v17 }
  0x4b   : > { %374 = vst [vmem:[%s3827_s8 + $0x148] sm:$0xf] %v373_v18  ;;  %v375_v19 = vld [vmem:[%s3823_s7 + $0x298] sm:$0xf]  ;;  %v377_v20 = vld [vmem:[%s3823_s7 + $0x2a0] sm:$0xf] }
  0x4c   : > { %v379_v21 = vld [vmem:[%s3823_s7 + $0x2a8] sm:$0xf]  ;;  %376 = vst [vmem:[%s3827_s8 + $0x14c] sm:$0xf] %v375_v19  ;;  %378 = vst [vmem:[%s3827_s8 + $0x150] sm:$0xf] %v377_v20 }
  0x4d   : > { %380 = vst [vmem:[%s3827_s8 + $0x154] sm:$0xf] %v379_v21  ;;  %v381_v22 = vld [vmem:[%s3823_s7 + $0x2b0] sm:$0xf]  ;;  %v383_v23 = vld [vmem:[%s3823_s7 + $0x2b8] sm:$0xf] }
  0x4e   : > { %v385_v24 = vld [vmem:[%s3823_s7 + $0x2c0] sm:$0xf]  ;;  %382 = vst [vmem:[%s3827_s8 + $0x158] sm:$0xf] %v381_v22  ;;  %384 = vst [vmem:[%s3827_s8 + $0x15c] sm:$0xf] %v383_v23 }
  0x4f   : > { %386 = vst [vmem:[%s3827_s8 + $0x160] sm:$0xf] %v385_v24  ;;  %v387_v25 = vld [vmem:[%s3823_s7 + $0x2c8] sm:$0xf]  ;;  %v389_v26 = vld [vmem:[%s3823_s7 + $0x2d0] sm:$0xf] }
  0x50   : > { %v391_v27 = vld [vmem:[%s3823_s7 + $0x2d8] sm:$0xf]  ;;  %388 = vst [vmem:[%s3827_s8 + $0x164] sm:$0xf] %v387_v25  ;;  %390 = vst [vmem:[%s3827_s8 + $0x168] sm:$0xf] %v389_v26 }
  0x51   : > { %392 = vst [vmem:[%s3827_s8 + $0x16c] sm:$0xf] %v391_v27  ;;  %v393_v28 = vld [vmem:[%s3823_s7 + $0x2e0] sm:$0xf]  ;;  %v395_v29 = vld [vmem:[%s3823_s7 + $0x2e8] sm:$0xf] }
  0x52   : > { %v397_v30 = vld [vmem:[%s3823_s7 + $0x2f0] sm:$0xf]  ;;  %394 = vst [vmem:[%s3827_s8 + $0x170] sm:$0xf] %v393_v28  ;;  %396 = vst [vmem:[%s3827_s8 + $0x174] sm:$0xf] %v395_v29 }
  0x53   : > { %398 = vst [vmem:[%s3827_s8 + $0x178] sm:$0xf] %v397_v30  ;;  %v399_v31 = vld [vmem:[%s3823_s7 + $0x2f8] sm:$0xf]  ;;  %v401_v32 = vld [vmem:[%s3823_s7 + $0x300] sm:$0xf] }
  0x54   : > { %v403_v33 = vld [vmem:[%s3823_s7 + $0x308] sm:$0xf]  ;;  %400 = vst [vmem:[%s3827_s8 + $0x17c] sm:$0xf] %v399_v31  ;;  %402 = vst [vmem:[%s3827_s8 + $0x180] sm:$0xf] %v401_v32 }
  0x55   : > { %404 = vst [vmem:[%s3827_s8 + $0x184] sm:$0xf] %v403_v33  ;;  %v405_v34 = vld [vmem:[%s3823_s7 + $0x310] sm:$0xf]  ;;  %v407_v35 = vld [vmem:[%s3823_s7 + $0x318] sm:$0xf] }
  0x56   : > { %v409_v36 = vld [vmem:[%s3823_s7 + $0x320] sm:$0xf]  ;;  %406 = vst [vmem:[%s3827_s8 + $0x188] sm:$0xf] %v405_v34  ;;  %408 = vst [vmem:[%s3827_s8 + $0x18c] sm:$0xf] %v407_v35 }
  0x57   : > { %410 = vst [vmem:[%s3827_s8 + $0x190] sm:$0xf] %v409_v36  ;;  %v411_v37 = vld [vmem:[%s3823_s7 + $0x328] sm:$0xf]  ;;  %v413_v38 = vld [vmem:[%s3823_s7 + $0x330] sm:$0xf] }
  0x58   : > { %v415_v39 = vld [vmem:[%s3823_s7 + $0x338] sm:$0xf]  ;;  %412 = vst [vmem:[%s3827_s8 + $0x194] sm:$0xf] %v411_v37  ;;  %414 = vst [vmem:[%s3827_s8 + $0x198] sm:$0xf] %v413_v38 }
  0x59   : > { %416 = vst [vmem:[%s3827_s8 + $0x19c] sm:$0xf] %v415_v39  ;;  %v417_v40 = vld [vmem:[%s3823_s7 + $0x340] sm:$0xf]  ;;  %v419_v41 = vld [vmem:[%s3823_s7 + $0x348] sm:$0xf] }
  0x5a   : > { %v421_v42 = vld [vmem:[%s3823_s7 + $0x350] sm:$0xf]  ;;  %418 = vst [vmem:[%s3827_s8 + $0x1a0] sm:$0xf] %v417_v40  ;;  %420 = vst [vmem:[%s3827_s8 + $0x1a4] sm:$0xf] %v419_v41 }
  0x5b   : > { %422 = vst [vmem:[%s3827_s8 + $0x1a8] sm:$0xf] %v421_v42  ;;  %v423_v43 = vld [vmem:[%s3823_s7 + $0x358] sm:$0xf]  ;;  %v425_v44 = vld [vmem:[%s3823_s7 + $0x360] sm:$0xf] }
  0x5c   : > { %v427_v45 = vld [vmem:[%s3823_s7 + $0x368] sm:$0xf]  ;;  %424 = vst [vmem:[%s3827_s8 + $0x1ac] sm:$0xf] %v423_v43  ;;  %426 = vst [vmem:[%s3827_s8 + $0x1b0] sm:$0xf] %v425_v44 }
  0x5d   : > { %428 = vst [vmem:[%s3827_s8 + $0x1b4] sm:$0xf] %v427_v45  ;;  %v429_v46 = vld [vmem:[%s3823_s7 + $0x370] sm:$0xf]  ;;  %v431_v47 = vld [vmem:[%s3823_s7 + $0x378] sm:$0xf] }
  0x5e   : > { %v433_v48 = vld [vmem:[%s3823_s7 + $0x380] sm:$0xf]  ;;  %430 = vst [vmem:[%s3827_s8 + $0x1b8] sm:$0xf] %v429_v46  ;;  %432 = vst [vmem:[%s3827_s8 + $0x1bc] sm:$0xf] %v431_v47 }
  0x5f   : > { %434 = vst [vmem:[%s3827_s8 + $0x1c0] sm:$0xf] %v433_v48  ;;  %v435_v49 = vld [vmem:[%s3823_s7 + $0x388] sm:$0xf]  ;;  %v437_v50 = vld [vmem:[%s3823_s7 + $0x390] sm:$0xf] }
  0x60   : > { %v439_v51 = vld [vmem:[%s3823_s7 + $0x398] sm:$0xf]  ;;  %436 = vst [vmem:[%s3827_s8 + $0x1c4] sm:$0xf] %v435_v49  ;;  %438 = vst [vmem:[%s3827_s8 + $0x1c8] sm:$0xf] %v437_v50 }
  0x61   : > { %440 = vst [vmem:[%s3827_s8 + $0x1cc] sm:$0xf] %v439_v51  ;;  %v441_v52 = vld [vmem:[%s3823_s7 + $0x3a0] sm:$0xf]  ;;  %v443_v53 = vld [vmem:[%s3823_s7 + $0x3a8] sm:$0xf] }
  0x62   : > { %v445_v54 = vld [vmem:[%s3823_s7 + $0x3b0] sm:$0xf]  ;;  %442 = vst [vmem:[%s3827_s8 + $0x1d0] sm:$0xf] %v441_v52  ;;  %444 = vst [vmem:[%s3827_s8 + $0x1d4] sm:$0xf] %v443_v53 }
  0x63   : > { %446 = vst [vmem:[%s3827_s8 + $0x1d8] sm:$0xf] %v445_v54  ;;  %v447_v55 = vld [vmem:[%s3823_s7 + $0x3b8] sm:$0xf]  ;;  %v449_v56 = vld [vmem:[%s3823_s7 + $0x3c0] sm:$0xf] }
  0x64   : > { %v451_v57 = vld [vmem:[%s3823_s7 + $0x3c8] sm:$0xf]  ;;  %448 = vst [vmem:[%s3827_s8 + $0x1dc] sm:$0xf] %v447_v55  ;;  %450 = vst [vmem:[%s3827_s8 + $0x1e0] sm:$0xf] %v449_v56 }
  0x65   : > { %452 = vst [vmem:[%s3827_s8 + $0x1e4] sm:$0xf] %v451_v57  ;;  %v453_v58 = vld [vmem:[%s3823_s7 + $0x3d0] sm:$0xf]  ;;  %v455_v59 = vld [vmem:[%s3823_s7 + $0x3d8] sm:$0xf] }
  0x66   : > { %v457_v60 = vld [vmem:[%s3823_s7 + $0x3e0] sm:$0xf]  ;;  %454 = vst [vmem:[%s3827_s8 + $0x1e8] sm:$0xf] %v453_v58  ;;  %456 = vst [vmem:[%s3827_s8 + $0x1ec] sm:$0xf] %v455_v59 }
  0x67   : > { %458 = vst [vmem:[%s3827_s8 + $0x1f0] sm:$0xf] %v457_v60  ;;  %v459_v61 = vld [vmem:[%s3823_s7 + $0x3e8] sm:$0xf]  ;;  %v461_v62 = vld [vmem:[%s3823_s7 + $0x3f0] sm:$0xf] }
  0x68   : > { %v463_v63 = vld [vmem:[%s3823_s7 + $0x3f8] sm:$0xf]  ;;  %460 = vst [vmem:[%s3827_s8 + $0x1f4] sm:$0xf] %v459_v61  ;;  %462 = vst [vmem:[%s3827_s8 + $0x1f8] sm:$0xf] %v461_v62 }
  0x69   : > { %464 = vst [vmem:[%s3827_s8 + $0x1fc] sm:$0xf] %v463_v63  ;;  %v465_v0 = vld [vmem:[%s3823_s7 + $0x400] sm:$0xf]  ;;  %v467_v1 = vld [vmem:[%s3823_s7 + $0x408] sm:$0xf] }
  0x6a   : > { %v469_v2 = vld [vmem:[%s3823_s7 + $0x410] sm:$0xf]  ;;  %466 = vst [vmem:[%s3827_s8 + $0x200] sm:$0xf] %v465_v0  ;;  %468 = vst [vmem:[%s3827_s8 + $0x204] sm:$0xf] %v467_v1 }
  0x6b   : > { %470 = vst [vmem:[%s3827_s8 + $0x208] sm:$0xf] %v469_v2  ;;  %v471_v3 = vld [vmem:[%s3823_s7 + $0x418] sm:$0xf]  ;;  %v473_v4 = vld [vmem:[%s3823_s7 + $0x420] sm:$0xf] }
  0x6c   : > { %v475_v5 = vld [vmem:[%s3823_s7 + $0x428] sm:$0xf]  ;;  %472 = vst [vmem:[%s3827_s8 + $0x20c] sm:$0xf] %v471_v3  ;;  %474 = vst [vmem:[%s3827_s8 + $0x210] sm:$0xf] %v473_v4 }
  0x6d   : > { %476 = vst [vmem:[%s3827_s8 + $0x214] sm:$0xf] %v475_v5  ;;  %v477_v6 = vld [vmem:[%s3823_s7 + $0x430] sm:$0xf]  ;;  %v479_v7 = vld [vmem:[%s3823_s7 + $0x438] sm:$0xf] }
  0x6e   : > { %v481_v8 = vld [vmem:[%s3823_s7 + $0x440] sm:$0xf]  ;;  %478 = vst [vmem:[%s3827_s8 + $0x218] sm:$0xf] %v477_v6  ;;  %480 = vst [vmem:[%s3827_s8 + $0x21c] sm:$0xf] %v479_v7 }
  0x6f   : > { %482 = vst [vmem:[%s3827_s8 + $0x220] sm:$0xf] %v481_v8  ;;  %v483_v9 = vld [vmem:[%s3823_s7 + $0x448] sm:$0xf]  ;;  %v485_v10 = vld [vmem:[%s3823_s7 + $0x450] sm:$0xf] }
  0x70   : > { %v487_v11 = vld [vmem:[%s3823_s7 + $0x458] sm:$0xf]  ;;  %484 = vst [vmem:[%s3827_s8 + $0x224] sm:$0xf] %v483_v9  ;;  %486 = vst [vmem:[%s3827_s8 + $0x228] sm:$0xf] %v485_v10 }
  0x71   : > { %488 = vst [vmem:[%s3827_s8 + $0x22c] sm:$0xf] %v487_v11  ;;  %v489_v12 = vld [vmem:[%s3823_s7 + $0x460] sm:$0xf]  ;;  %v491_v13 = vld [vmem:[%s3823_s7 + $0x468] sm:$0xf] }
  0x72   : > { %v493_v14 = vld [vmem:[%s3823_s7 + $0x470] sm:$0xf]  ;;  %490 = vst [vmem:[%s3827_s8 + $0x230] sm:$0xf] %v489_v12  ;;  %492 = vst [vmem:[%s3827_s8 + $0x234] sm:$0xf] %v491_v13 }
  0x73   : > { %494 = vst [vmem:[%s3827_s8 + $0x238] sm:$0xf] %v493_v14  ;;  %v495_v15 = vld [vmem:[%s3823_s7 + $0x478] sm:$0xf]  ;;  %v497_v16 = vld [vmem:[%s3823_s7 + $0x480] sm:$0xf] }
  0x74   : > { %v499_v17 = vld [vmem:[%s3823_s7 + $0x488] sm:$0xf]  ;;  %496 = vst [vmem:[%s3827_s8 + $0x23c] sm:$0xf] %v495_v15  ;;  %498 = vst [vmem:[%s3827_s8 + $0x240] sm:$0xf] %v497_v16 }
  0x75   : > { %500 = vst [vmem:[%s3827_s8 + $0x244] sm:$0xf] %v499_v17  ;;  %v501_v18 = vld [vmem:[%s3823_s7 + $0x490] sm:$0xf]  ;;  %v503_v19 = vld [vmem:[%s3823_s7 + $0x498] sm:$0xf] }
  0x76   : > { %v505_v20 = vld [vmem:[%s3823_s7 + $0x4a0] sm:$0xf]  ;;  %502 = vst [vmem:[%s3827_s8 + $0x248] sm:$0xf] %v501_v18  ;;  %504 = vst [vmem:[%s3827_s8 + $0x24c] sm:$0xf] %v503_v19 }
  0x77   : > { %506 = vst [vmem:[%s3827_s8 + $0x250] sm:$0xf] %v505_v20  ;;  %v507_v21 = vld [vmem:[%s3823_s7 + $0x4a8] sm:$0xf]  ;;  %v509_v22 = vld [vmem:[%s3823_s7 + $0x4b0] sm:$0xf] }
  0x78   : > { %v511_v23 = vld [vmem:[%s3823_s7 + $0x4b8] sm:$0xf]  ;;  %508 = vst [vmem:[%s3827_s8 + $0x254] sm:$0xf] %v507_v21  ;;  %510 = vst [vmem:[%s3827_s8 + $0x258] sm:$0xf] %v509_v22 }
  0x79   : > { %512 = vst [vmem:[%s3827_s8 + $0x25c] sm:$0xf] %v511_v23  ;;  %v513_v24 = vld [vmem:[%s3823_s7 + $0x4c0] sm:$0xf]  ;;  %v515_v25 = vld [vmem:[%s3823_s7 + $0x4c8] sm:$0xf] }
  0x7a   : > { %v517_v26 = vld [vmem:[%s3823_s7 + $0x4d0] sm:$0xf]  ;;  %514 = vst [vmem:[%s3827_s8 + $0x260] sm:$0xf] %v513_v24  ;;  %516 = vst [vmem:[%s3827_s8 + $0x264] sm:$0xf] %v515_v25 }
  0x7b   : > { %518 = vst [vmem:[%s3827_s8 + $0x268] sm:$0xf] %v517_v26  ;;  %v519_v27 = vld [vmem:[%s3823_s7 + $0x4d8] sm:$0xf]  ;;  %v521_v28 = vld [vmem:[%s3823_s7 + $0x4e0] sm:$0xf] }
  0x7c   : > { %v523_v29 = vld [vmem:[%s3823_s7 + $0x4e8] sm:$0xf]  ;;  %520 = vst [vmem:[%s3827_s8 + $0x26c] sm:$0xf] %v519_v27  ;;  %522 = vst [vmem:[%s3827_s8 + $0x270] sm:$0xf] %v521_v28 }
  0x7d   : > { %524 = vst [vmem:[%s3827_s8 + $0x274] sm:$0xf] %v523_v29  ;;  %v525_v30 = vld [vmem:[%s3823_s7 + $0x4f0] sm:$0xf]  ;;  %v527_v31 = vld [vmem:[%s3823_s7 + $0x4f8] sm:$0xf] }
  0x7e   : > { %v529_v32 = vld [vmem:[%s3823_s7 + $0x500] sm:$0xf]  ;;  %526 = vst [vmem:[%s3827_s8 + $0x278] sm:$0xf] %v525_v30  ;;  %528 = vst [vmem:[%s3827_s8 + $0x27c] sm:$0xf] %v527_v31 }
  0x7f   : > { %530 = vst [vmem:[%s3827_s8 + $0x280] sm:$0xf] %v529_v32  ;;  %v531_v33 = vld [vmem:[%s3823_s7 + $0x508] sm:$0xf]  ;;  %v533_v34 = vld [vmem:[%s3823_s7 + $0x510] sm:$0xf] }
  0x80   : > { %v535_v35 = vld [vmem:[%s3823_s7 + $0x518] sm:$0xf]  ;;  %532 = vst [vmem:[%s3827_s8 + $0x284] sm:$0xf] %v531_v33  ;;  %534 = vst [vmem:[%s3827_s8 + $0x288] sm:$0xf] %v533_v34 }
  0x81   : > { %536 = vst [vmem:[%s3827_s8 + $0x28c] sm:$0xf] %v535_v35  ;;  %v537_v36 = vld [vmem:[%s3823_s7 + $0x520] sm:$0xf]  ;;  %v539_v37 = vld [vmem:[%s3823_s7 + $0x528] sm:$0xf] }
  0x82   : > { %v541_v38 = vld [vmem:[%s3823_s7 + $0x530] sm:$0xf]  ;;  %538 = vst [vmem:[%s3827_s8 + $0x290] sm:$0xf] %v537_v36  ;;  %540 = vst [vmem:[%s3827_s8 + $0x294] sm:$0xf] %v539_v37 }
  0x83   : > { %542 = vst [vmem:[%s3827_s8 + $0x298] sm:$0xf] %v541_v38  ;;  %v543_v39 = vld [vmem:[%s3823_s7 + $0x538] sm:$0xf]  ;;  %v545_v40 = vld [vmem:[%s3823_s7 + $0x540] sm:$0xf] }
  0x84   : > { %v547_v41 = vld [vmem:[%s3823_s7 + $0x548] sm:$0xf]  ;;  %544 = vst [vmem:[%s3827_s8 + $0x29c] sm:$0xf] %v543_v39  ;;  %546 = vst [vmem:[%s3827_s8 + $0x2a0] sm:$0xf] %v545_v40 }
  0x85   : > { %548 = vst [vmem:[%s3827_s8 + $0x2a4] sm:$0xf] %v547_v41  ;;  %v549_v42 = vld [vmem:[%s3823_s7 + $0x550] sm:$0xf]  ;;  %v551_v43 = vld [vmem:[%s3823_s7 + $0x558] sm:$0xf] }
  0x86   : > { %v553_v44 = vld [vmem:[%s3823_s7 + $0x560] sm:$0xf]  ;;  %550 = vst [vmem:[%s3827_s8 + $0x2a8] sm:$0xf] %v549_v42  ;;  %552 = vst [vmem:[%s3827_s8 + $0x2ac] sm:$0xf] %v551_v43 }
  0x87   : > { %554 = vst [vmem:[%s3827_s8 + $0x2b0] sm:$0xf] %v553_v44  ;;  %v555_v45 = vld [vmem:[%s3823_s7 + $0x568] sm:$0xf]  ;;  %v557_v46 = vld [vmem:[%s3823_s7 + $0x570] sm:$0xf] }
  0x88   : > { %v559_v47 = vld [vmem:[%s3823_s7 + $0x578] sm:$0xf]  ;;  %556 = vst [vmem:[%s3827_s8 + $0x2b4] sm:$0xf] %v555_v45  ;;  %558 = vst [vmem:[%s3827_s8 + $0x2b8] sm:$0xf] %v557_v46 }
  0x89   : > { %560 = vst [vmem:[%s3827_s8 + $0x2bc] sm:$0xf] %v559_v47  ;;  %v561_v48 = vld [vmem:[%s3823_s7 + $0x580] sm:$0xf]  ;;  %v563_v49 = vld [vmem:[%s3823_s7 + $0x588] sm:$0xf] }
  0x8a   : > { %v565_v50 = vld [vmem:[%s3823_s7 + $0x590] sm:$0xf]  ;;  %562 = vst [vmem:[%s3827_s8 + $0x2c0] sm:$0xf] %v561_v48  ;;  %564 = vst [vmem:[%s3827_s8 + $0x2c4] sm:$0xf] %v563_v49 }
  0x8b   : > { %566 = vst [vmem:[%s3827_s8 + $0x2c8] sm:$0xf] %v565_v50  ;;  %v567_v51 = vld [vmem:[%s3823_s7 + $0x598] sm:$0xf]  ;;  %v569_v52 = vld [vmem:[%s3823_s7 + $0x5a0] sm:$0xf] }
  0x8c   : > { %v571_v53 = vld [vmem:[%s3823_s7 + $0x5a8] sm:$0xf]  ;;  %568 = vst [vmem:[%s3827_s8 + $0x2cc] sm:$0xf] %v567_v51  ;;  %570 = vst [vmem:[%s3827_s8 + $0x2d0] sm:$0xf] %v569_v52 }
  0x8d   : > { %572 = vst [vmem:[%s3827_s8 + $0x2d4] sm:$0xf] %v571_v53  ;;  %v573_v54 = vld [vmem:[%s3823_s7 + $0x5b0] sm:$0xf]  ;;  %v575_v55 = vld [vmem:[%s3823_s7 + $0x5b8] sm:$0xf] }
  0x8e   : > { %v577_v56 = vld [vmem:[%s3823_s7 + $0x5c0] sm:$0xf]  ;;  %574 = vst [vmem:[%s3827_s8 + $0x2d8] sm:$0xf] %v573_v54  ;;  %576 = vst [vmem:[%s3827_s8 + $0x2dc] sm:$0xf] %v575_v55 }
  0x8f   : > { %578 = vst [vmem:[%s3827_s8 + $0x2e0] sm:$0xf] %v577_v56  ;;  %v579_v57 = vld [vmem:[%s3823_s7 + $0x5c8] sm:$0xf]  ;;  %v581_v58 = vld [vmem:[%s3823_s7 + $0x5d0] sm:$0xf] }
  0x90   : > { %v583_v59 = vld [vmem:[%s3823_s7 + $0x5d8] sm:$0xf]  ;;  %580 = vst [vmem:[%s3827_s8 + $0x2e4] sm:$0xf] %v579_v57  ;;  %582 = vst [vmem:[%s3827_s8 + $0x2e8] sm:$0xf] %v581_v58 }
  0x91   : > { %584 = vst [vmem:[%s3827_s8 + $0x2ec] sm:$0xf] %v583_v59  ;;  %v585_v60 = vld [vmem:[%s3823_s7 + $0x5e0] sm:$0xf]  ;;  %v587_v61 = vld [vmem:[%s3823_s7 + $0x5e8] sm:$0xf] }
  0x92   : > { %v589_v62 = vld [vmem:[%s3823_s7 + $0x5f0] sm:$0xf]  ;;  %586 = vst [vmem:[%s3827_s8 + $0x2f0] sm:$0xf] %v585_v60  ;;  %588 = vst [vmem:[%s3827_s8 + $0x2f4] sm:$0xf] %v587_v61 }
  0x93   : > { %590 = vst [vmem:[%s3827_s8 + $0x2f8] sm:$0xf] %v589_v62  ;;  %v591_v63 = vld [vmem:[%s3823_s7 + $0x5f8] sm:$0xf]  ;;  %v593_v0 = vld [vmem:[%s3823_s7 + $0x600] sm:$0xf] }
  0x94   : > { %v595_v1 = vld [vmem:[%s3823_s7 + $0x608] sm:$0xf]  ;;  %592 = vst [vmem:[%s3827_s8 + $0x2fc] sm:$0xf] %v591_v63  ;;  %594 = vst [vmem:[%s3827_s8 + $0x300] sm:$0xf] %v593_v0 }
  0x95   : > { %596 = vst [vmem:[%s3827_s8 + $0x304] sm:$0xf] %v595_v1  ;;  %v597_v2 = vld [vmem:[%s3823_s7 + $0x610] sm:$0xf]  ;;  %v599_v3 = vld [vmem:[%s3823_s7 + $0x618] sm:$0xf] }
  0x96   : > { %v601_v4 = vld [vmem:[%s3823_s7 + $0x620] sm:$0xf]  ;;  %598 = vst [vmem:[%s3827_s8 + $0x308] sm:$0xf] %v597_v2  ;;  %600 = vst [vmem:[%s3827_s8 + $0x30c] sm:$0xf] %v599_v3 }
  0x97   : > { %602 = vst [vmem:[%s3827_s8 + $0x310] sm:$0xf] %v601_v4  ;;  %v603_v5 = vld [vmem:[%s3823_s7 + $0x628] sm:$0xf]  ;;  %v605_v6 = vld [vmem:[%s3823_s7 + $0x630] sm:$0xf] }
  0x98   : > { %v607_v7 = vld [vmem:[%s3823_s7 + $0x638] sm:$0xf]  ;;  %604 = vst [vmem:[%s3827_s8 + $0x314] sm:$0xf] %v603_v5  ;;  %606 = vst [vmem:[%s3827_s8 + $0x318] sm:$0xf] %v605_v6 }
  0x99   : > { %608 = vst [vmem:[%s3827_s8 + $0x31c] sm:$0xf] %v607_v7  ;;  %v609_v8 = vld [vmem:[%s3823_s7 + $0x640] sm:$0xf]  ;;  %v611_v9 = vld [vmem:[%s3823_s7 + $0x648] sm:$0xf] }
  0x9a   : > { %v613_v10 = vld [vmem:[%s3823_s7 + $0x650] sm:$0xf]  ;;  %610 = vst [vmem:[%s3827_s8 + $0x320] sm:$0xf] %v609_v8  ;;  %612 = vst [vmem:[%s3827_s8 + $0x324] sm:$0xf] %v611_v9 }
  0x9b   : > { %614 = vst [vmem:[%s3827_s8 + $0x328] sm:$0xf] %v613_v10  ;;  %v615_v11 = vld [vmem:[%s3823_s7 + $0x658] sm:$0xf]  ;;  %v617_v12 = vld [vmem:[%s3823_s7 + $0x660] sm:$0xf] }
  0x9c   : > { %v619_v13 = vld [vmem:[%s3823_s7 + $0x668] sm:$0xf]  ;;  %616 = vst [vmem:[%s3827_s8 + $0x32c] sm:$0xf] %v615_v11  ;;  %618 = vst [vmem:[%s3827_s8 + $0x330] sm:$0xf] %v617_v12 }
  0x9d   : > { %620 = vst [vmem:[%s3827_s8 + $0x334] sm:$0xf] %v619_v13  ;;  %v621_v14 = vld [vmem:[%s3823_s7 + $0x670] sm:$0xf]  ;;  %v623_v15 = vld [vmem:[%s3823_s7 + $0x678] sm:$0xf] }
  0x9e   : > { %v625_v16 = vld [vmem:[%s3823_s7 + $0x680] sm:$0xf]  ;;  %622 = vst [vmem:[%s3827_s8 + $0x338] sm:$0xf] %v621_v14  ;;  %624 = vst [vmem:[%s3827_s8 + $0x33c] sm:$0xf] %v623_v15 }
  0x9f   : > { %626 = vst [vmem:[%s3827_s8 + $0x340] sm:$0xf] %v625_v16  ;;  %v627_v17 = vld [vmem:[%s3823_s7 + $0x688] sm:$0xf]  ;;  %v629_v18 = vld [vmem:[%s3823_s7 + $0x690] sm:$0xf] }
  0xa0   : > { %v631_v19 = vld [vmem:[%s3823_s7 + $0x698] sm:$0xf]  ;;  %628 = vst [vmem:[%s3827_s8 + $0x344] sm:$0xf] %v627_v17  ;;  %630 = vst [vmem:[%s3827_s8 + $0x348] sm:$0xf] %v629_v18 }
  0xa1   : > { %632 = vst [vmem:[%s3827_s8 + $0x34c] sm:$0xf] %v631_v19  ;;  %v633_v20 = vld [vmem:[%s3823_s7 + $0x6a0] sm:$0xf]  ;;  %v635_v21 = vld [vmem:[%s3823_s7 + $0x6a8] sm:$0xf] }
  0xa2   : > { %v637_v22 = vld [vmem:[%s3823_s7 + $0x6b0] sm:$0xf]  ;;  %634 = vst [vmem:[%s3827_s8 + $0x350] sm:$0xf] %v633_v20  ;;  %636 = vst [vmem:[%s3827_s8 + $0x354] sm:$0xf] %v635_v21 }
  0xa3   : > { %638 = vst [vmem:[%s3827_s8 + $0x358] sm:$0xf] %v637_v22  ;;  %v639_v23 = vld [vmem:[%s3823_s7 + $0x6b8] sm:$0xf]  ;;  %v641_v24 = vld [vmem:[%s3823_s7 + $0x6c0] sm:$0xf] }
  0xa4   : > { %v643_v25 = vld [vmem:[%s3823_s7 + $0x6c8] sm:$0xf]  ;;  %640 = vst [vmem:[%s3827_s8 + $0x35c] sm:$0xf] %v639_v23  ;;  %642 = vst [vmem:[%s3827_s8 + $0x360] sm:$0xf] %v641_v24 }
  0xa5   : > { %644 = vst [vmem:[%s3827_s8 + $0x364] sm:$0xf] %v643_v25  ;;  %v645_v26 = vld [vmem:[%s3823_s7 + $0x6d0] sm:$0xf]  ;;  %v647_v27 = vld [vmem:[%s3823_s7 + $0x6d8] sm:$0xf] }
  0xa6   : > { %v649_v28 = vld [vmem:[%s3823_s7 + $0x6e0] sm:$0xf]  ;;  %646 = vst [vmem:[%s3827_s8 + $0x368] sm:$0xf] %v645_v26  ;;  %648 = vst [vmem:[%s3827_s8 + $0x36c] sm:$0xf] %v647_v27 }
  0xa7   : > { %650 = vst [vmem:[%s3827_s8 + $0x370] sm:$0xf] %v649_v28  ;;  %v651_v29 = vld [vmem:[%s3823_s7 + $0x6e8] sm:$0xf]  ;;  %v653_v30 = vld [vmem:[%s3823_s7 + $0x6f0] sm:$0xf] }
  0xa8   : > { %v655_v31 = vld [vmem:[%s3823_s7 + $0x6f8] sm:$0xf]  ;;  %652 = vst [vmem:[%s3827_s8 + $0x374] sm:$0xf] %v651_v29  ;;  %654 = vst [vmem:[%s3827_s8 + $0x378] sm:$0xf] %v653_v30 }
  0xa9   : > { %656 = vst [vmem:[%s3827_s8 + $0x37c] sm:$0xf] %v655_v31  ;;  %v657_v32 = vld [vmem:[%s3823_s7 + $0x700] sm:$0xf]  ;;  %v659_v33 = vld [vmem:[%s3823_s7 + $0x708] sm:$0xf] }
  0xaa   : > { %v661_v34 = vld [vmem:[%s3823_s7 + $0x710] sm:$0xf]  ;;  %658 = vst [vmem:[%s3827_s8 + $0x380] sm:$0xf] %v657_v32  ;;  %660 = vst [vmem:[%s3827_s8 + $0x384] sm:$0xf] %v659_v33 }
  0xab   : > { %662 = vst [vmem:[%s3827_s8 + $0x388] sm:$0xf] %v661_v34  ;;  %v663_v35 = vld [vmem:[%s3823_s7 + $0x718] sm:$0xf]  ;;  %v665_v36 = vld [vmem:[%s3823_s7 + $0x720] sm:$0xf] }
  0xac   : > { %v667_v37 = vld [vmem:[%s3823_s7 + $0x728] sm:$0xf]  ;;  %664 = vst [vmem:[%s3827_s8 + $0x38c] sm:$0xf] %v663_v35  ;;  %666 = vst [vmem:[%s3827_s8 + $0x390] sm:$0xf] %v665_v36 }
  0xad   : > { %668 = vst [vmem:[%s3827_s8 + $0x394] sm:$0xf] %v667_v37  ;;  %v669_v38 = vld [vmem:[%s3823_s7 + $0x730] sm:$0xf]  ;;  %v671_v39 = vld [vmem:[%s3823_s7 + $0x738] sm:$0xf] }
  0xae   : > { %v673_v40 = vld [vmem:[%s3823_s7 + $0x740] sm:$0xf]  ;;  %670 = vst [vmem:[%s3827_s8 + $0x398] sm:$0xf] %v669_v38  ;;  %672 = vst [vmem:[%s3827_s8 + $0x39c] sm:$0xf] %v671_v39 }
  0xaf   : > { %674 = vst [vmem:[%s3827_s8 + $0x3a0] sm:$0xf] %v673_v40  ;;  %v675_v41 = vld [vmem:[%s3823_s7 + $0x748] sm:$0xf]  ;;  %v677_v42 = vld [vmem:[%s3823_s7 + $0x750] sm:$0xf] }
  0xb0   : > { %v679_v43 = vld [vmem:[%s3823_s7 + $0x758] sm:$0xf]  ;;  %676 = vst [vmem:[%s3827_s8 + $0x3a4] sm:$0xf] %v675_v41  ;;  %678 = vst [vmem:[%s3827_s8 + $0x3a8] sm:$0xf] %v677_v42 }
  0xb1   : > { %680 = vst [vmem:[%s3827_s8 + $0x3ac] sm:$0xf] %v679_v43  ;;  %v681_v44 = vld [vmem:[%s3823_s7 + $0x760] sm:$0xf]  ;;  %v683_v45 = vld [vmem:[%s3823_s7 + $0x768] sm:$0xf] }
  0xb2   : > { %v685_v46 = vld [vmem:[%s3823_s7 + $0x770] sm:$0xf]  ;;  %682 = vst [vmem:[%s3827_s8 + $0x3b0] sm:$0xf] %v681_v44  ;;  %684 = vst [vmem:[%s3827_s8 + $0x3b4] sm:$0xf] %v683_v45 }
  0xb3   : > { %686 = vst [vmem:[%s3827_s8 + $0x3b8] sm:$0xf] %v685_v46  ;;  %v687_v47 = vld [vmem:[%s3823_s7 + $0x778] sm:$0xf]  ;;  %v689_v48 = vld [vmem:[%s3823_s7 + $0x780] sm:$0xf] }
  0xb4   : > { %v691_v49 = vld [vmem:[%s3823_s7 + $0x788] sm:$0xf]  ;;  %688 = vst [vmem:[%s3827_s8 + $0x3bc] sm:$0xf] %v687_v47  ;;  %690 = vst [vmem:[%s3827_s8 + $0x3c0] sm:$0xf] %v689_v48 }
  0xb5   : > { %692 = vst [vmem:[%s3827_s8 + $0x3c4] sm:$0xf] %v691_v49  ;;  %v693_v50 = vld [vmem:[%s3823_s7 + $0x790] sm:$0xf]  ;;  %v695_v51 = vld [vmem:[%s3823_s7 + $0x798] sm:$0xf] }
  0xb6   : > { %v697_v52 = vld [vmem:[%s3823_s7 + $0x7a0] sm:$0xf]  ;;  %694 = vst [vmem:[%s3827_s8 + $0x3c8] sm:$0xf] %v693_v50  ;;  %696 = vst [vmem:[%s3827_s8 + $0x3cc] sm:$0xf] %v695_v51 }
  0xb7   : > { %698 = vst [vmem:[%s3827_s8 + $0x3d0] sm:$0xf] %v697_v52  ;;  %v699_v53 = vld [vmem:[%s3823_s7 + $0x7a8] sm:$0xf]  ;;  %v701_v54 = vld [vmem:[%s3823_s7 + $0x7b0] sm:$0xf] }
  0xb8   : > { %v703_v55 = vld [vmem:[%s3823_s7 + $0x7b8] sm:$0xf]  ;;  %700 = vst [vmem:[%s3827_s8 + $0x3d4] sm:$0xf] %v699_v53  ;;  %702 = vst [vmem:[%s3827_s8 + $0x3d8] sm:$0xf] %v701_v54 }
  0xb9   : > { %704 = vst [vmem:[%s3827_s8 + $0x3dc] sm:$0xf] %v703_v55  ;;  %v705_v56 = vld [vmem:[%s3823_s7 + $0x7c0] sm:$0xf]  ;;  %v707_v57 = vld [vmem:[%s3823_s7 + $0x7c8] sm:$0xf] }
  0xba   : > { %v709_v58 = vld [vmem:[%s3823_s7 + $0x7d0] sm:$0xf]  ;;  %706 = vst [vmem:[%s3827_s8 + $0x3e0] sm:$0xf] %v705_v56  ;;  %708 = vst [vmem:[%s3827_s8 + $0x3e4] sm:$0xf] %v707_v57 }
  0xbb   : > { %710 = vst [vmem:[%s3827_s8 + $0x3e8] sm:$0xf] %v709_v58  ;;  %v711_v59 = vld [vmem:[%s3823_s7 + $0x7d8] sm:$0xf]  ;;  %v713_v60 = vld [vmem:[%s3823_s7 + $0x7e0] sm:$0xf] }
  0xbc   : > { %v715_v61 = vld [vmem:[%s3823_s7 + $0x7e8] sm:$0xf]  ;;  %712 = vst [vmem:[%s3827_s8 + $0x3ec] sm:$0xf] %v711_v59  ;;  %714 = vst [vmem:[%s3827_s8 + $0x3f0] sm:$0xf] %v713_v60 }
  0xbd   : > { %716 = vst [vmem:[%s3827_s8 + $0x3f4] sm:$0xf] %v715_v61  ;;  %v717_v62 = vld [vmem:[%s3823_s7 + $0x7f0] sm:$0xf]  ;;  %v719_v63 = vld [vmem:[%s3823_s7 + $0x7f8] sm:$0xf] }
  0xbe   : > { %718 = vst [vmem:[%s3827_s8 + $0x3f8] sm:$0xf] %v717_v62  ;;  %720 = vst [vmem:[%s3827_s8 + $0x3fc] sm:$0xf] %v719_v63 }
  0xbf PF: > { %p3165_p7 = scmp.ge.s32.totalorder %s3750_s20, 1  ;;  %p1260_p8 = scmp.lt.s32.totalorder %s3750_s20, 3 }
  0xc1   : > { %p1261_p9 = pnand %p3165_p7, %p1260_p8 }
  0xc2   : > { %s1267_s9 = sand.u32 (!%p1261_p9), 1, %s3742_s18   ;;  %v4345_v0 = vld [vmem:[%s4628_s0] sm:$0xff] (!%p1261_p9)  ;;  %v4355_v2 = vld [vmem:[%s4628_s0 + $0x8] sm:$0xff] (!%p1261_p9)  ;;  %p1302_p10 = scmp.lt.s32.totalorder (!%p1261_p9), %s3798_s21, 1 }
  0xc3   : > { %1264 = sbr.rel (%p1261_p9) target bundleno = 573 (0x23d), region = 69  ;;  %v4350_v1 = vld [vmem:[%s4628_s0 + $0x40] sm:$0xff] (!%p1261_p9)  ;;  %s3166_s16 = sshll.u32 (!%p1261_p9), %s1267_s9, 10  ;;  %v4364_v4 = vld [vmem:[%s4628_s0 + $0x48] sm:$0xff] (!%p1261_p9) }
  0xc4   : > { %v3170_v3 = vcombine.high (!%p1261_p9), %v4345_v0, %v4350_v1  ;;  %v3172_v5 = vcombine.high (!%p1261_p9), %v4355_v2, %v4364_v4  ;;  %s4368_s23 = scalar_lea.vmem (!%p1261_p9), [#allocation2], %s3166_s16  ;;  %v1328_v35 = vld [vmem:[%s4628_s0 + $0x80] sm:$0xff] (!%p1261_p9)  ;;  %v1329_v38 = vld [vmem:[%s4628_s0 + $0x88] sm:$0xff] (!%p1261_p9)  ;;  %v3169_v42 = vcombine.low (!%p1261_p9), %v4345_v0, %v4350_v1  ;;  %v3171_v43 = vcombine.low (!%p1261_p9), %v4355_v2, %v4364_v4  ;;  %s3167_s10 = sshll.u32 (!%p1261_p9), %s1267_s9, 4 }
  0xc5   : > { %v3600_v6 = vld [vmem:[%s4368_s23 + $0x40] sm:$0xff] (!%p1261_p9)   ;;  %v3604_v10 = vld [vmem:[%s4368_s23 + $0x48] sm:$0xff] (!%p1261_p9)   ;;  %v3608_v14 = vld [vmem:[%s4368_s23 + $0x50] sm:$0xff] (!%p1261_p9)   ;;  %s4596_s11 = scalar_lea.vmem (!%p1261_p9), [#allocation3], %s3167_s10 }
  0xc6   : > { %2567 = vmatprep.mubr.bf16.mxu0 (!%p1261_p9), %v3170_v3  ;;  %v3601_v7 = vld [vmem:[%s4368_s23 + $0xc0] sm:$0xff] (!%p1261_p9)   ;;  %2616 = vmatprep.mubr.bf16.mxu1 (!%p1261_p9), %v3172_v5  ;;  %v3605_v11 = vld [vmem:[%s4368_s23 + $0xc8] sm:$0xff] (!%p1261_p9)   ;;  %v3609_v15 = vld [vmem:[%s4368_s23 + $0xd0] sm:$0xff] (!%p1261_p9)  }
  0xc7   : > { %3352 = vmatprep.subr.bf16.mxu0 (!%p1261_p9), %v3600_v6  ;;  %v3602_v8 = vld [vmem:[%s4368_s23] sm:$0xff] (!%p1261_p9)   ;;  %3380 = vmatprep.subr.bf16.mxu1 (!%p1261_p9), %v3601_v7  ;;  %v3606_v12 = vld [vmem:[%s4368_s23 + $0x8] sm:$0xff] (!%p1261_p9)   ;;  %v3610_v16 = vld [vmem:[%s4368_s23 + $0x10] sm:$0xff] (!%p1261_p9)  }
  0xc8   : > { %v3603_v9 = vld [vmem:[%s4368_s23 + $0x80] sm:$0xff] (!%p1261_p9)   ;;  %3353 = vmatpush3.bf16.msra.mxu0 (!%p1261_p9), %v3602_v8  ;;  %v3607_v13 = vld [vmem:[%s4368_s23 + $0x88] sm:$0xff] (!%p1261_p9)   ;;  %v3611_v17 = vld [vmem:[%s4368_s23 + $0x90] sm:$0xff] (!%p1261_p9)  }
  0xc9   : > { %3381 = vmatpush3.bf16.msra.mxu1 (!%p1261_p9), %v3603_v9  ;;  %3354 = vmatprep.subr.bf16.mxu0 (!%p1261_p9), %v3604_v10  ;;  %v3612_v18 = vld [vmem:[%s4368_s23 + $0x58] sm:$0xff] (!%p1261_p9)   ;;  %v3616_v22 = vld [vmem:[%s4368_s23 + $0x60] sm:$0xff] (!%p1261_p9)   ;;  %v3620_v26 = vld [vmem:[%s4368_s23 + $0x68] sm:$0xff] (!%p1261_p9)  }
  0xca   : > { %3382 = vmatprep.subr.bf16.mxu1 %v3605_v11  ;;  %v3613_v19 = vld [vmem:[%s4368_s23 + $0xd8] sm:$0xff]   ;;  %v3617_v23 = vld [vmem:[%s4368_s23 + $0xe0] sm:$0xff]   ;;  %v3621_v27 = vld [vmem:[%s4368_s23 + $0xe8] sm:$0xff]   ;;  %s4588_s30 = scalar_select %p1302_p10, %s3798_s21, 1 }
  0xcb   : > { %v3614_v20 = vld [vmem:[%s4368_s23 + $0x18] sm:$0xff]   ;;  %v3618_v24 = vld [vmem:[%s4368_s23 + $0x20] sm:$0xff]   ;;  %v3622_v28 = vld [vmem:[%s4368_s23 + $0x28] sm:$0xff]  }
  0xcc   : > { %3355 = vmatpush3.bf16.msra.mxu0 %v3606_v12  ;;  %v3615_v21 = vld [vmem:[%s4368_s23 + $0x98] sm:$0xff]   ;;  %v3619_v25 = vld [vmem:[%s4368_s23 + $0xa0] sm:$0xff]   ;;  %v3623_v29 = vld [vmem:[%s4368_s23 + $0xa8] sm:$0xff]   ;;  %s1304_s8 = scalar_lea.vmem %s4630_s2, %s4588_s30  ;;  %s1307_s12 = scalar_lea.vmem %s4632_s4, %s4588_s30 }
  0xcd   : > { %3383 = vmatpush3.bf16.msra.mxu1 %v3607_v13  ;;  %3356 = vmatprep.subr.bf16.mxu0 %v3608_v14  ;;  %v3624_v30 = vld [vmem:[%s4368_s23 + $0x70] sm:$0xff]   ;;  %v3628_v34 = vld [vmem:[%s4368_s23 + $0x78] sm:$0xff]   ;;  %v1336_v36 = vld [vmem:[%s4628_s0 + $0xc0] sm:$0xff]  ;;  %s1310_s15 = scalar_lea.vmem %s4633_s5, %s4588_s30 }
  0xce   : > { %3384 = vmatprep.subr.bf16.mxu1 %v3609_v15  ;;  %v3625_v31 = vld [vmem:[%s4368_s23 + $0xf0] sm:$0xff]   ;;  %v3629_v37 = vld [vmem:[%s4368_s23 + $0xf8] sm:$0xff]   ;;  %v1337_v39 = vld [vmem:[%s4628_s0 + $0xc8] sm:$0xff]  ;;  %v3186_v46 = vcombine.high %v1328_v35, %v1336_v36  ;;  %v3185_v54 = vcombine.low %v1328_v35, %v1336_v36 }
  0xcf   : > { %v3626_v32 = vld [vmem:[%s4368_s23 + $0x30] sm:$0xff]   ;;  %v3630_v40 = vld [vmem:[%s4368_s23 + $0x38] sm:$0xff]   ;;  %v3632_v44 = vld [vmem:[%s4368_s23 + $0x140] sm:$0xff]   ;;  %v3188_v48 = vcombine.high %v1329_v38, %v1337_v39  ;;  %v3187_v56 = vcombine.low %v1329_v38, %v1337_v39 }
  0xd0   : > { %3357 = vmatpush3.bf16.msra.mxu0 %v3610_v16  ;;  %v3627_v33 = vld [vmem:[%s4368_s23 + $0xb0] sm:$0xff]   ;;  %v3631_v41 = vld [vmem:[%s4368_s23 + $0xb8] sm:$0xff]   ;;  %v3633_v45 = vld [vmem:[%s4368_s23 + $0x1c0] sm:$0xff]  }
  0xd1   : > { %3385 = vmatpush3.bf16.msra.mxu1 %v3611_v17  ;;  %3358 = vmatprep.subr.bf16.mxu0 %v3612_v18  ;;  %v3634_v47 = vld [vmem:[%s4368_s23 + $0x100] sm:$0xff]   ;;  %v3636_v50 = vld [vmem:[%s4368_s23 + $0x148] sm:$0xff]   ;;  %v3640_v55 = vld [vmem:[%s4368_s23 + $0x150] sm:$0xff]  }
  0xd2   : > { %3386 = vmatprep.subr.bf16.mxu1 %v3613_v19  ;;  %v3635_v49 = vld [vmem:[%s4368_s23 + $0x180] sm:$0xff]   ;;  %v3637_v51 = vld [vmem:[%s4368_s23 + $0x1c8] sm:$0xff]   ;;  %v3641_v57 = vld [vmem:[%s4368_s23 + $0x1d0] sm:$0xff]  }
  0xd3   : > { %v3638_v52 = vld [vmem:[%s4368_s23 + $0x108] sm:$0xff]   ;;  %v3642_v58 = vld [vmem:[%s4368_s23 + $0x110] sm:$0xff]   ;;  %v3644_v60 = vld [vmem:[%s4368_s23 + $0x158] sm:$0xff]  }
  0xd4   : > { %3359 = vmatpush3.bf16.msra.mxu0 %v3614_v20  ;;  %v3639_v53 = vld [vmem:[%s4368_s23 + $0x188] sm:$0xff]   ;;  %v3643_v59 = vld [vmem:[%s4368_s23 + $0x190] sm:$0xff]   ;;  %v3645_v61 = vld [vmem:[%s4368_s23 + $0x1d8] sm:$0xff]  }
  0xd5   : > { %3387 = vmatpush3.bf16.msra.mxu1 %v3615_v21  ;;  %3360 = vmatprep.subr.bf16.mxu0 %v3616_v22  ;;  %v3646_v62 = vld [vmem:[%s4368_s23 + $0x118] sm:$0xff]   ;;  %v3648_v0 = vld [vmem:[%s4368_s23 + $0x160] sm:$0xff]   ;;  %v3652_v4 = vld [vmem:[%s4368_s23 + $0x168] sm:$0xff]  }
  0xd6   : > { %3388 = vmatprep.subr.bf16.mxu1 %v3617_v23  ;;  %v3647_v63 = vld [vmem:[%s4368_s23 + $0x198] sm:$0xff]   ;;  %v3649_v1 = vld [vmem:[%s4368_s23 + $0x1e0] sm:$0xff]   ;;  %v3653_v5 = vld [vmem:[%s4368_s23 + $0x1e8] sm:$0xff]  }
  0xd7   : > { %v3650_v2 = vld [vmem:[%s4368_s23 + $0x120] sm:$0xff]   ;;  %v3654_v6 = vld [vmem:[%s4368_s23 + $0x128] sm:$0xff]   ;;  %v3656_v8 = vld [vmem:[%s4368_s23 + $0x170] sm:$0xff]  }
  0xd8   : > { %3361 = vmatpush3.bf16.msra.mxu0 %v3618_v24  ;;  %v3651_v3 = vld [vmem:[%s4368_s23 + $0x1a0] sm:$0xff]   ;;  %v3655_v7 = vld [vmem:[%s4368_s23 + $0x1a8] sm:$0xff]   ;;  %v3657_v9 = vld [vmem:[%s4368_s23 + $0x1f0] sm:$0xff]  }
  0xd9   : > { %3389 = vmatpush3.bf16.msra.mxu1 %v3619_v25  ;;  %3362 = vmatprep.subr.bf16.mxu0 %v3620_v26  ;;  %v3658_v10 = vld [vmem:[%s4368_s23 + $0x130] sm:$0xff]   ;;  %v3660_v12 = vld [vmem:[%s4368_s23 + $0x178] sm:$0xff]   ;;  %v3664_v24 = vld [vmem:[%s4368_s23 + $0x240] sm:$0xff]  }
  0xda   : > { %3390 = vmatprep.subr.bf16.mxu1 %v3621_v27  ;;  %v3659_v11 = vld [vmem:[%s4368_s23 + $0x1b0] sm:$0xff]   ;;  %v3661_v14 = vld [vmem:[%s4368_s23 + $0x1f8] sm:$0xff]   ;;  %v3665_v25 = vld [vmem:[%s4368_s23 + $0x2c0] sm:$0xff]  }
  0xdb   : > { %v1314_v13 = vld [vmem:[%s4628_s0 + $0x10] sm:$0xff]  ;;  %v3662_v15 = vld [vmem:[%s4368_s23 + $0x138] sm:$0xff]   ;;  %v3666_v26 = vld [vmem:[%s4368_s23 + $0x200] sm:$0xff]  }
  0xdc   : > { %3363 = vmatpush3.bf16.msra.mxu0 %v3622_v28  ;;  %v3663_v16 = vld [vmem:[%s4368_s23 + $0x1b8] sm:$0xff]   ;;  %v1322_v17 = vld [vmem:[%s4628_s0 + $0x50] sm:$0xff]  ;;  %v3667_v27 = vld [vmem:[%s4368_s23 + $0x280] sm:$0xff]  }
  0xdd   : > { %3391 = vmatpush3.bf16.msra.mxu1 %v3623_v29  ;;  %3364 = vmatprep.subr.bf16.mxu0 %v3624_v30  ;;  %v1315_v18 = vld [vmem:[%s4628_s0 + $0x18] sm:$0xff]  ;;  %v3173_v20 = vcombine.low %v1314_v13, %v1322_v17  ;;  %v3174_v21 = vcombine.high %v1314_v13, %v1322_v17  ;;  %v3668_v28 = vld [vmem:[%s4368_s23 + $0x248] sm:$0xff]   ;;  %v3672_v36 = vld [vmem:[%s4368_s23 + $0x250] sm:$0xff]  }
  0xde   : > { %3392 = vmatprep.subr.bf16.mxu1 %v3625_v31  ;;  %v1323_v19 = vld [vmem:[%s4628_s0 + $0x58] sm:$0xff]  ;;  %v3669_v29 = vld [vmem:[%s4368_s23 + $0x2c8] sm:$0xff]   ;;  %v1340_v17 = vld [vmem:[%s4628_s0 + $0xe0] sm:$0xff] }
  0xdf   : > { %v3175_v22 = vcombine.low %v1315_v18, %v1323_v19  ;;  %v3176_v23 = vcombine.high %v1315_v18, %v1323_v19  ;;  %v3670_v30 = vld [vmem:[%s4368_s23 + $0x208] sm:$0xff]   ;;  %v1331_v38 = vld [vmem:[%s4628_s0 + $0x98] sm:$0xff] }
  0xe0   : > { %3365 = vmatpush3.bf16.msra.mxu0 %v3626_v32  ;;  %v3671_v31 = vld [vmem:[%s4368_s23 + $0x288] sm:$0xff]   ;;  %v1330_v32 = vld [vmem:[%s4628_s0 + $0x90] sm:$0xff]  ;;  %v1339_v39 = vld [vmem:[%s4628_s0 + $0xd8] sm:$0xff] }
  0xe1   : > { %3393 = vmatpush3.bf16.msra.mxu1 %v3627_v33  ;;  %3366 = vmatprep.subr.bf16.mxu0 %v3628_v34  ;;  %v1338_v33 = vld [vmem:[%s4628_s0 + $0xd0] sm:$0xff]  ;;  %v3701_v13 = vld [vmem:[%s4368_s23 + $0x3c8] sm:$0xff]  }
  0xe2   : > { %3394 = vmatprep.subr.bf16.mxu1 %v3629_v37  ;;  %v3190_v34 = vcombine.high %v1330_v32, %v1338_v33  ;;  %v3189_v35 = vcombine.low %v1330_v32, %v1338_v33  ;;  %v3673_v37 = vld [vmem:[%s4368_s23 + $0x2d0] sm:$0xff]   ;;  %v3712_v32 = vld [vmem:[%s4368_s23 + $0x360] sm:$0xff]  }
  0xe3   : > { %v3713_v33 = vld [vmem:[%s4368_s23 + $0x3e0] sm:$0xff]  }
  0xe4   : > { %3367 = vmatpush3.bf16.msra.mxu0 %v3630_v40  ;;  %v3192_v40 = vcombine.high %v1331_v38, %v1339_v39 }
  0xe5   : > { %3395 = vmatpush3.bf16.msra.mxu1 %v3631_v41  ;;  %3408 = vmatprep.subr.bf16.mxu0 %v3632_v44  ;;  %v3674_v41 = vld [vmem:[%s4368_s23 + $0x210] sm:$0xff]   ;;  %v3676_v44 = vld [vmem:[%s4368_s23 + $0x258] sm:$0xff]  }
  0xe6   : > { %3436 = vmatprep.subr.bf16.mxu1 %v3633_v45  ;;  %v3677_v45 = vld [vmem:[%s4368_s23 + $0x2d8] sm:$0xff]  }
  0xe7   : > { %2568 = vmatmul.mubr.bf16.vlgmr.msra.gmra.mrb[0].mxu0 %v3169_v42  ;;  %v3191_v42 = vcombine.low %v1331_v38, %v1339_v39  ;;  %v3718_v38 = vld [vmem:[%s4368_s23 + $0x328] sm:$0xff]  }
  0xe8   : > { %2617 = vmatmul.mubr.bf16.vlgmr.msra.gmra.mrb[0].mxu1 %v3171_v43  ;;  %3409 = vmatpush3.bf16.msra.mxu0 %v3634_v47  ;;  %v3675_v43 = vld [vmem:[%s4368_s23 + $0x290] sm:$0xff]   ;;  %v3679_v47 = vld [vmem:[%s4368_s23 + $0x298] sm:$0xff]   ;;  %v3719_v39 = vld [vmem:[%s4368_s23 + $0x3a8] sm:$0xff]  }
  0xe9   : > { %3437 = vmatpush3.bf16.msra.mxu1 %v3635_v49  ;;  %2575 = vmatprep.mubr.bf16.mxu0 %v3186_v46  ;;  %v3678_v46 = vld [vmem:[%s4368_s23 + $0x218] sm:$0xff]   ;;  %v3681_v49 = vld [vmem:[%s4368_s23 + $0x2e0] sm:$0xff]  }
  0xea   : > { %3410 = vmatprep.subr.bf16.mxu0 %v3636_v50  ;;  %2624 = vmatprep.mubr.bf16.mxu1 %v3188_v48  ;;  %v3680_v48 = vld [vmem:[%s4368_s23 + $0x260] sm:$0xff]  }
  0xeb   : > { %3438 = vmatprep.subr.bf16.mxu1 %v3637_v51  ;;  %v3682_v50 = vld [vmem:[%s4368_s23 + $0x220] sm:$0xff]  }
  0xec   : > { %3411 = vmatpush3.bf16.msra.mxu0 %v3638_v52  ;;  %v3683_v51 = vld [vmem:[%s4368_s23 + $0x2a0] sm:$0xff]   ;;  %v3684_v52 = vld [vmem:[%s4368_s23 + $0x268] sm:$0xff]  }
  0xed   : > { %3439 = vmatpush3.bf16.msra.mxu1 %v3639_v53  ;;  %3412 = vmatprep.subr.bf16.mxu0 %v3640_v55  ;;  %v3685_v53 = vld [vmem:[%s4368_s23 + $0x2e8] sm:$0xff]  }
  0xee   : > { %3440 = vmatprep.subr.bf16.mxu1 %v3641_v57  ;;  %v3687_v55 = vld [vmem:[%s4368_s23 + $0x2a8] sm:$0xff]   ;;  %v3689_v57 = vld [vmem:[%s4368_s23 + $0x2f0] sm:$0xff]  }
  0xef   : > { %2576 = vmatmul.mubr.bf16.gmra.mrb[4].mxu0 %v3185_v54  ;;  %v3686_v54 = vld [vmem:[%s4368_s23 + $0x228] sm:$0xff]  }
  0xf0   : > { %3413 = vmatpush3.bf16.msra.mxu0 %v3642_v58  ;;  %2625 = vmatmul.mubr.bf16.gmra.mrb[4].mxu1 %v3187_v56  ;;  %v3688_v56 = vld [vmem:[%s4368_s23 + $0x270] sm:$0xff]  }
  0xf1   : > { %3441 = vmatpush3.bf16.msra.mxu1 %v3643_v59  ;;  %3414 = vmatprep.subr.bf16.mxu0 %v3644_v60  ;;  %v3690_v58 = vld [vmem:[%s4368_s23 + $0x230] sm:$0xff]   ;;  %v3692_v60 = vld [vmem:[%s4368_s23 + $0x278] sm:$0xff]  }
  0xf2   : > { %3442 = vmatprep.subr.bf16.mxu1 %v3645_v61  ;;  %2665 = vmatprep.mubr.bf16.mxu0 %v3174_v21  ;;  %v3691_v59 = vld [vmem:[%s4368_s23 + $0x2b0] sm:$0xff]   ;;  %v3693_v61 = vld [vmem:[%s4368_s23 + $0x2f8] sm:$0xff]  }
  0xf3   : > { %2714 = vmatprep.mubr.bf16.mxu1 %v3176_v23  ;;  %v3705_v21 = vld [vmem:[%s4368_s23 + $0x3d0] sm:$0xff]   ;;  %v1341_v23 = vld [vmem:[%s4628_s0 + $0xe8] sm:$0xff] }
  0xf4   : > { %3415 = vmatpush3.bf16.msra.mxu0 %v3646_v62  ;;  %v3694_v62 = vld [vmem:[%s4368_s23 + $0x238] sm:$0xff]  }
  0xf5   : > { %3443 = vmatpush3.bf16.msra.mxu1 %v3647_v63  ;;  %3416 = vmatprep.subr.bf16.mxu0 %v3648_v0  ;;  %v3695_v63 = vld [vmem:[%s4368_s23 + $0x2b8] sm:$0xff]   ;;  %v1316_v0 = vld [vmem:[%s4628_s0 + $0x20] sm:$0xff] }
  0xf6   : > { %3444 = vmatprep.subr.bf16.mxu1 %v3649_v1  ;;  %v1324_v1 = vld [vmem:[%s4628_s0 + $0x60] sm:$0xff] }
  0xf8   : > { %3417 = vmatpush3.bf16.msra.mxu0 %v3650_v2  ;;  %v3177_v2 = vcombine.low %v1316_v0, %v1324_v1 }
  0xf9   : > { %3445 = vmatpush3.bf16.msra.mxu1 %v3651_v3  ;;  %3418 = vmatprep.subr.bf16.mxu0 %v3652_v4  ;;  %v3178_v3 = vcombine.high %v1316_v0, %v1324_v1  ;;  %v1317_v4 = vld [vmem:[%s4628_s0 + $0x28] sm:$0xff] }
  0xfa   : > { %3446 = vmatprep.subr.bf16.mxu1 %v3653_v5  ;;  %v1325_v5 = vld [vmem:[%s4628_s0 + $0x68] sm:$0xff] }
  0xfc   : > { %3419 = vmatpush3.bf16.msra.mxu0 %v3654_v6  ;;  %v3179_v6 = vcombine.low %v1317_v4, %v1325_v5 }
  0xfd   : > { %3447 = vmatpush3.bf16.msra.mxu1 %v3655_v7  ;;  %3420 = vmatprep.subr.bf16.mxu0 %v3656_v8  ;;  %v3180_v7 = vcombine.high %v1317_v4, %v1325_v5  ;;  %v3696_v8 = vld [vmem:[%s4368_s23 + $0x340] sm:$0xff]  }
  0xfe   : > { %3448 = vmatprep.subr.bf16.mxu1 %v3657_v9  ;;  %v3697_v9 = vld [vmem:[%s4368_s23 + $0x3c0] sm:$0xff]  }
 0x100   : > { %3421 = vmatpush3.bf16.msra.mxu0 %v3658_v10  ;;  %v3698_v10 = vld [vmem:[%s4368_s23 + $0x300] sm:$0xff]  }
 0x101   : > { %3449 = vmatpush3.bf16.msra.mxu1 %v3659_v11  ;;  %3422 = vmatprep.subr.bf16.mxu0 %v3660_v12  ;;  %v3699_v11 = vld [vmem:[%s4368_s23 + $0x380] sm:$0xff]   ;;  %v3700_v12 = vld [vmem:[%s4368_s23 + $0x348] sm:$0xff]  }
 0x102   : > { %3450 = vmatprep.subr.bf16.mxu1 %v3661_v14  ;;  %v3702_v14 = vld [vmem:[%s4368_s23 + $0x308] sm:$0xff]  }
 0x104   : > { %3423 = vmatpush3.bf16.msra.mxu0 %v3662_v15  ;;  %v3703_v15 = vld [vmem:[%s4368_s23 + $0x388] sm:$0xff]  }
 0x105   : > { %3451 = vmatpush3.bf16.msra.mxu1 %v3663_v16  ;;  %3464 = vmatprep.subr.bf16.mxu0 %v3664_v24  ;;  %v1332_v16 = vld [vmem:[%s4628_s0 + $0xa0] sm:$0xff] }
 0x106   : > { %3492 = vmatprep.subr.bf16.mxu1 %v3665_v25  ;;  %v3194_v18 = vcombine.high %v1332_v16, %v1340_v17  ;;  %v3193_v19 = vcombine.low %v1332_v16, %v1340_v17  ;;  %v3706_v25 = vld [vmem:[%s4368_s23 + $0x310] sm:$0xff]  }
 0x107   : > { %2666 = vmatmul.mubr.bf16.vlgmr.msra.gmra.mrb[8].mxu0 %v3173_v20  ;;  %v3704_v20 = vld [vmem:[%s4368_s23 + $0x350] sm:$0xff]  }
 0x108   : > { %2715 = vmatmul.mubr.bf16.vlgmr.msra.gmra.mrb[8].mxu1 %v3175_v22  ;;  %3465 = vmatpush3.bf16.msra.mxu0 %v3666_v26  ;;  %v1333_v22 = vld [vmem:[%s4628_s0 + $0xa8] sm:$0xff] }
 0x109   : > { %3493 = vmatpush3.bf16.msra.mxu1 %v3667_v27  ;;  %3466 = vmatprep.subr.bf16.mxu0 %v3668_v28  ;;  %v3196_v24 = vcombine.high %v1333_v22, %v1341_v23  ;;  %v3195_v26 = vcombine.low %v1333_v22, %v1341_v23  ;;  %v3707_v27 = vld [vmem:[%s4368_s23 + $0x390] sm:$0xff]   ;;  %v3708_v28 = vld [vmem:[%s4368_s23 + $0x358] sm:$0xff]  }
 0x10a   : > { %3494 = vmatprep.subr.bf16.mxu1 %v3669_v29  ;;  %2673 = vmatprep.mubr.bf16.mxu0 %v3190_v34  ;;  %v3709_v29 = vld [vmem:[%s4368_s23 + $0x3d8] sm:$0xff]   ;;  %v3714_v34 = vld [vmem:[%s4368_s23 + $0x320] sm:$0xff]  }
 0x10b   : > { %2722 = vmatprep.mubr.bf16.mxu1 %v3192_v40  ;;  %v3720_v40 = vld [vmem:[%s4368_s23 + $0x370] sm:$0xff]  }
 0x10c   : > { %3467 = vmatpush3.bf16.msra.mxu0 %v3670_v30  ;;  %v3710_v30 = vld [vmem:[%s4368_s23 + $0x318] sm:$0xff]  }
 0x10d   : > { %3495 = vmatpush3.bf16.msra.mxu1 %v3671_v31  ;;  %3468 = vmatprep.subr.bf16.mxu0 %v3672_v36  ;;  %v3711_v31 = vld [vmem:[%s4368_s23 + $0x398] sm:$0xff]   ;;  %v3716_v36 = vld [vmem:[%s4368_s23 + $0x368] sm:$0xff]  }
 0x10e   : > { %3496 = vmatprep.subr.bf16.mxu1 %v3673_v37  ;;  %v3717_v37 = vld [vmem:[%s4368_s23 + $0x3e8] sm:$0xff]  }
 0x10f   : > { %2674 = vmatmul.mubr.bf16.gmra.mrb[12].mxu0 %v3189_v35  ;;  %v3715_v35 = vld [vmem:[%s4368_s23 + $0x3a0] sm:$0xff]  }
 0x110   : > { %3469 = vmatpush3.bf16.msra.mxu0 %v3674_v41  ;;  %2723 = vmatmul.mubr.bf16.gmra.mrb[12].mxu1 %v3191_v42  ;;  %v3721_v41 = vld [vmem:[%s4368_s23 + $0x3f0] sm:$0xff]  }
 0x111   : > { %3497 = vmatpush3.bf16.msra.mxu1 %v3675_v43  ;;  %3470 = vmatprep.subr.bf16.mxu0 %v3676_v44  ;;  %v3722_v42 = vld [vmem:[%s4368_s23 + $0x330] sm:$0xff]   ;;  %v3724_v44 = vld [vmem:[%s4368_s23 + $0x378] sm:$0xff]  }
 0x112   : > { %3498 = vmatprep.subr.bf16.mxu1 %v3677_v45  ;;  %2763 = vmatprep.mubr.bf16.mxu0 %v3178_v3  ;;  %v3723_v43 = vld [vmem:[%s4368_s23 + $0x3b0] sm:$0xff]   ;;  %v3725_v45 = vld [vmem:[%s4368_s23 + $0x3f8] sm:$0xff]  }
 0x113   : > { %2812 = vmatprep.mubr.bf16.mxu1 %v3180_v7 }
 0x114   : > { %3471 = vmatpush3.bf16.msra.mxu0 %v3678_v46  ;;  %v3726_v46 = vld [vmem:[%s4368_s23 + $0x338] sm:$0xff]  }
 0x115   : > { %3499 = vmatpush3.bf16.msra.mxu1 %v3679_v47  ;;  %3472 = vmatprep.subr.bf16.mxu0 %v3680_v48  ;;  %v3727_v47 = vld [vmem:[%s4368_s23 + $0x3b8] sm:$0xff]   ;;  %v1318_v48 = vld [vmem:[%s4628_s0 + $0x30] sm:$0xff]  ;;  %s3334_s23 = sshll.u32 (%p3813_p5), %s3798_s21, 2 }
 0x116   : > { %3500 = vmatprep.subr.bf16.mxu1 %v3681_v49  ;;  %v1326_v49 = vld [vmem:[%s4628_s0 + $0x70] sm:$0xff]  ;;  %s2998_s20 = scalar_lea.vmem (%p3813_p5), %s4631_s3, %s3334_s23 }
 0x118   : > { %3473 = vmatpush3.bf16.msra.mxu0 %v3682_v50  ;;  %v1319_v50 = vld [vmem:[%s4628_s0 + $0x38] sm:$0xff] }
 0x119   : > { %3501 = vmatpush3.bf16.msra.mxu1 %v3683_v51  ;;  %3474 = vmatprep.subr.bf16.mxu0 %v3684_v52  ;;  %v3181_v51 = vcombine.low %v1318_v48, %v1326_v49  ;;  %v3182_v52 = vcombine.high %v1318_v48, %v1326_v49 }
 0x11a   : > { %3502 = vmatprep.subr.bf16.mxu1 %v3685_v53  ;;  %v1327_v53 = vld [vmem:[%s4628_s0 + $0x78] sm:$0xff] }
 0x11c   : > { %3475 = vmatpush3.bf16.msra.mxu0 %v3686_v54  ;;  %v1334_v54 = vld [vmem:[%s4628_s0 + $0xb0] sm:$0xff] }
 0x11d   : > { %3503 = vmatpush3.bf16.msra.mxu1 %v3687_v55  ;;  %3476 = vmatprep.subr.bf16.mxu0 %v3688_v56  ;;  %v1342_v55 = vld [vmem:[%s4628_s0 + $0xf0] sm:$0xff]  ;;  %v3183_v56 = vcombine.low %v1319_v50, %v1327_v53 }
 0x11e   : > { %3504 = vmatprep.subr.bf16.mxu1 %v3689_v57  ;;  %v3184_v57 = vcombine.high %v1319_v50, %v1327_v53 }
 0x120   : > { %3477 = vmatpush3.bf16.msra.mxu0 %v3690_v58  ;;  %v3198_v58 = vcombine.high %v1334_v54, %v1342_v55 }
 0x121   : > { %3505 = vmatpush3.bf16.msra.mxu1 %v3691_v59  ;;  %3478 = vmatprep.subr.bf16.mxu0 %v3692_v60  ;;  %v1335_v59 = vld [vmem:[%s4628_s0 + $0xb8] sm:$0xff] }
 0x122   : > { %3506 = vmatprep.subr.bf16.mxu1 %v3693_v61  ;;  %v1343_v60 = vld [vmem:[%s4628_s0 + $0xf8] sm:$0xff] }
 0x123   : > { %v3200_v61 = vcombine.high %v1335_v59, %v1343_v60 }
 0x124   : > { %3479 = vmatpush3.bf16.msra.mxu0 %v3694_v62  ;;  %v3197_v62 = vcombine.low %v1334_v54, %v1342_v55 }
 0x125   : > { %3507 = vmatpush3.bf16.msra.mxu1 %v3695_v63  ;;  %3520 = vmatprep.subr.bf16.mxu0 %v3696_v8  ;;  %v3199_v63 = vcombine.low %v1335_v59, %v1343_v60 }
 0x126   : > { %3548 = vmatprep.subr.bf16.mxu1 %v3697_v9 }
 0x127   : > { %2764 = vmatmul.mubr.bf16.vlgmr.msra.gmra.mrb[16].mxu0 %v3177_v2  ;;  %v3168_v2 = vld [vmem:[%s1304_s8] ss:$0 sm:$0xff] }
 0x128   : > { %2813 = vmatmul.mubr.bf16.vlgmr.msra.gmra.mrb[16].mxu1 %v3179_v6  ;;  %3521 = vmatpush3.bf16.msra.mxu0 %v3698_v10 }
 0x129   : > { %3549 = vmatpush3.bf16.msra.mxu1 %v3699_v11  ;;  %3522 = vmatprep.subr.bf16.mxu0 %v3700_v12 }
 0x12a   : > { %3550 = vmatprep.subr.bf16.mxu1 %v3701_v13  ;;  %2771 = vmatprep.mubr.bf16.mxu0 %v3194_v18 }
 0x12b   : > { %2820 = vmatprep.mubr.bf16.mxu1 %v3196_v24 }
 0x12c   : > { %3523 = vmatpush3.bf16.msra.mxu0 %v3702_v14 }
 0x12d   : > { %3551 = vmatpush3.bf16.msra.mxu1 %v3703_v15  ;;  %3524 = vmatprep.subr.bf16.mxu0 %v3704_v20 }
 0x12e   : > { %3552 = vmatprep.subr.bf16.mxu1 %v3705_v21 }
 0x12f   : > { %2772 = vmatmul.mubr.bf16.gmra.mrb[20].mxu0 %v3193_v19 }
 0x130   : > { %3525 = vmatpush3.bf16.msra.mxu0 %v3706_v25  ;;  %2821 = vmatmul.mubr.bf16.gmra.mrb[20].mxu1 %v3195_v26 }
 0x131   : > { %3553 = vmatpush3.bf16.msra.mxu1 %v3707_v27  ;;  %3526 = vmatprep.subr.bf16.mxu0 %v3708_v28 }
 0x132   : > { %3554 = vmatprep.subr.bf16.mxu1 %v3709_v29  ;;  %2861 = vmatprep.mubr.bf16.mxu0 %v3182_v52 }
 0x133   : > { %2910 = vmatprep.mubr.bf16.mxu1 %v3184_v57 }
 0x134   : > { %3527 = vmatpush3.bf16.msra.mxu0 %v3710_v30 }
 0x135   : > { %3555 = vmatpush3.bf16.msra.mxu1 %v3711_v31  ;;  %3528 = vmatprep.subr.bf16.mxu0 %v3712_v32 }
 0x136   : > { %3556 = vmatprep.subr.bf16.mxu1 %v3713_v33 }
 0x138   : > { %3529 = vmatpush3.bf16.msra.mxu0 %v3714_v34 }
 0x139   : > { %3557 = vmatpush3.bf16.msra.mxu1 %v3715_v35  ;;  %3530 = vmatprep.subr.bf16.mxu0 %v3716_v36 }
 0x13a   : > { %3558 = vmatprep.subr.bf16.mxu1 %v3717_v37 }
 0x13c   : > { %3531 = vmatpush3.bf16.msra.mxu0 %v3718_v38 }
 0x13d   : > { %3559 = vmatpush3.bf16.msra.mxu1 %v3719_v39  ;;  %3532 = vmatprep.subr.bf16.mxu0 %v3720_v40 }
 0x13e   : > { %3560 = vmatprep.subr.bf16.mxu1 %v3721_v41 }
 0x140   : > { %3533 = vmatpush3.bf16.msra.mxu0 %v3722_v42 }
 0x141   : > { %3561 = vmatpush3.bf16.msra.mxu1 %v3723_v43  ;;  %3534 = vmatprep.subr.bf16.mxu0 %v3724_v44 }
 0x142   : > { %3562 = vmatprep.subr.bf16.mxu1 %v3725_v45 }
 0x144   : > { %3535 = vmatpush3.bf16.msra.mxu0 %v3726_v46 }
 0x145   : > { %3563 = vmatpush3.bf16.msra.mxu1 %v3727_v47 }
 0x147   : > { %2862 = vmatmul.mubr.bf16.vlgmr.msra.gmra.mrb[24].mxu0 %v3181_v51 }
 0x148   : > { %2911 = vmatmul.mubr.bf16.vlgmr.msra.gmra.mrb[24].mxu1 %v3183_v56  ;;  %2869 = vmatprep.mubr.bf16.mxu0 %v3198_v58 }
 0x149   : > { %2918 = vmatprep.mubr.bf16.mxu1 %v3200_v61 }
 0x14f   : > { %2870 = vmatmul.mubr.bf16.gmra.mrb[28].mxu0 %v3197_v62 }
 0x150   : > { %2919 = vmatmul.mubr.bf16.gmra.mrb[28].mxu1 %v3199_v63 }
 0x1ba   : > { %v3368_v0 = vpop.f32.mrb[0].mxu0 }
 0x1bb   : > { %v3396_v1 = vpop.f32.mrb[0].mxu1  ;;  %v3369_v3 = vpop.f32.mrb[1].mxu0 }
 0x1bc   : > { %v3370_v4 = vadd.f32 %v3369_v3, %v3368_v0  ;;  %v3397_v5 = vpop.f32.mrb[1].mxu1  ;;  %v3371_v6 = vpop.f32.mrb[2].mxu0 }
 0x1bd   : > { %v3398_v7 = vadd.f32 %v3397_v5, %v3396_v1  ;;  %v3399_v8 = vpop.f32.mrb[2].mxu1  ;;  %v3372_v9 = vpop.f32.mrb[3].mxu0 }
 0x1be   : > { %v2570_v10 = vadd.f32 %v3370_v4, %v3168_v2  ;;  %v3373_v11 = vadd.f32 %v3372_v9, %v3371_v6  ;;  %v3400_v12 = vpop.f32.mrb[3].mxu1 }
 0x1bf   : > { %v3401_v13 = vadd.f32 %v3400_v12, %v3399_v8 }
 0x1c0   : > { %v2619_v14 = vadd.f32 %v3398_v7, %v2570_v10  ;;  %v2573_v15 = vadd.f32 %v3373_v11, %v3168_v2 }
 0x1c2   : > { %v2622_v16 = vadd.f32 %v3401_v13, %v2573_v15  ;;  %v3374_v17 = vpop.f32.mrb[4].mxu0 }
 0x1c3   : > { %v3375_v18 = vpop.f32.mrb[5].mxu0  ;;  %v3402_v19 = vpop.f32.mrb[4].mxu1 }
 0x1c4   : > { %v3376_v20 = vadd.f32 %v3375_v18, %v3374_v17  ;;  %v3377_v21 = vpop.f32.mrb[6].mxu0  ;;  %v3403_v22 = vpop.f32.mrb[5].mxu1 }
 0x1c5   : > { %v3378_v23 = vpop.f32.mrb[7].mxu0  ;;  %v3404_v24 = vadd.f32 %v3403_v22, %v3402_v19  ;;  %v3405_v25 = vpop.f32.mrb[6].mxu1 }
 0x1c6   : > { %v2578_v26 = vadd.f32 %v3376_v20, %v3168_v2  ;;  %v3379_v27 = vadd.f32 %v3378_v23, %v3377_v21  ;;  %v3406_v28 = vpop.f32.mrb[7].mxu1 }
 0x1c7   : > { %v3407_v29 = vadd.f32 %v3406_v28, %v3405_v25 }
 0x1c8   : > { %v2581_v30 = vadd.f32 %v3379_v27, %v3168_v2  ;;  %v2627_v31 = vadd.f32 %v3404_v24, %v2578_v26 }
 0x1ca   : > { %v2630_v32 = vadd.f32 %v3407_v29, %v2581_v30 }
 0x1da   : > { %v3424_v33 = vpop.f32.mrb[8].mxu0 }
 0x1db   : > { %v3452_v34 = vpop.f32.mrb[8].mxu1  ;;  %v3425_v35 = vpop.f32.mrb[9].mxu0 }
 0x1dc   : > { %v3453_v36 = vpop.f32.mrb[9].mxu1  ;;  %v3426_v37 = vadd.f32 %v3425_v35, %v3424_v33  ;;  %v3427_v39 = vpop.f32.mrb[10].mxu0 }
 0x1dd   : > { %v3454_v38 = vadd.f32 %v3453_v36, %v3452_v34  ;;  %v3455_v40 = vpop.f32.mrb[10].mxu1  ;;  %v3428_v41 = vpop.f32.mrb[11].mxu0 }
 0x1de   : > { %v3456_v42 = vpop.f32.mrb[11].mxu1  ;;  %v2668_v43 = vadd.f32 %v3426_v37, %v2619_v14  ;;  %v3429_v44 = vadd.f32 %v3428_v41, %v3427_v39 }
 0x1df   : > { %v3457_v45 = vadd.f32 %v3456_v42, %v3455_v40 }
 0x1e0   : > { %v2717_v46 = vadd.f32 %v3454_v38, %v2668_v43  ;;  %v2671_v47 = vadd.f32 %v3429_v44, %v2622_v16 }
 0x1e2   : > { %v2720_v48 = vadd.f32 %v3457_v45, %v2671_v47  ;;  %v3430_v49 = vpop.f32.mrb[12].mxu0 }
 0x1e3   : > { %v3431_v50 = vpop.f32.mrb[13].mxu0  ;;  %v3458_v55 = vpop.f32.mrb[12].mxu1 }
 0x1e4   : > { %v3432_v51 = vadd.f32 %v3431_v50, %v3430_v49  ;;  %v3433_v52 = vpop.f32.mrb[14].mxu0  ;;  %v3459_v57 = vpop.f32.mrb[13].mxu1 }
 0x1e5   : > { %v3434_v53 = vpop.f32.mrb[15].mxu0  ;;  %v3460_v59 = vadd.f32 %v3459_v57, %v3458_v55  ;;  %v3461_v60 = vpop.f32.mrb[14].mxu1 }
 0x1e6   : > { %v2676_v54 = vadd.f32 %v3432_v51, %v2627_v31  ;;  %v3435_v56 = vadd.f32 %v3434_v53, %v3433_v52  ;;  %v3462_v61 = vpop.f32.mrb[15].mxu1 }
 0x1e7   : > { %v3463_v63 = vadd.f32 %v3462_v61, %v3461_v60 }
 0x1e8   : > { %v2679_v58 = vadd.f32 %v3435_v56, %v2630_v32  ;;  %v2725_v62 = vadd.f32 %v3460_v59, %v2676_v54 }
 0x1ea   : > { %v2728_v0 = vadd.f32 %v3463_v63, %v2679_v58 }
 0x1fa   : > { %v3480_v1 = vpop.f32.mrb[16].mxu0 }
 0x1fb   : > { %v3508_v2 = vpop.f32.mrb[16].mxu1  ;;  %v3481_v3 = vpop.f32.mrb[17].mxu0 }
 0x1fc   : > { %v3482_v4 = vadd.f32 %v3481_v3, %v3480_v1  ;;  %v3509_v5 = vpop.f32.mrb[17].mxu1  ;;  %v3483_v6 = vpop.f32.mrb[18].mxu0 }
 0x1fd   : > { %v3510_v7 = vadd.f32 %v3509_v5, %v3508_v2  ;;  %v3511_v8 = vpop.f32.mrb[18].mxu1  ;;  %v3484_v9 = vpop.f32.mrb[19].mxu0 }
 0x1fe   : > { %v2766_v10 = vadd.f32 %v3482_v4, %v2717_v46  ;;  %v3485_v11 = vadd.f32 %v3484_v9, %v3483_v6  ;;  %v3512_v12 = vpop.f32.mrb[19].mxu1 }
 0x1ff   : > { %v3513_v13 = vadd.f32 %v3512_v12, %v3511_v8 }
 0x200   : > { %v2815_v14 = vadd.f32 %v3510_v7, %v2766_v10  ;;  %v2769_v15 = vadd.f32 %v3485_v11, %v2720_v48 }
 0x202   : > { %v2818_v16 = vadd.f32 %v3513_v13, %v2769_v15  ;;  %v3486_v17 = vpop.f32.mrb[20].mxu0 }
 0x203   : > { %v3487_v18 = vpop.f32.mrb[21].mxu0  ;;  %v3514_v21 = vpop.f32.mrb[20].mxu1 }
 0x204   : > { %v3488_v19 = vadd.f32 %v3487_v18, %v3486_v17  ;;  %v3489_v20 = vpop.f32.mrb[22].mxu0  ;;  %v3515_v25 = vpop.f32.mrb[21].mxu1 }
 0x205   : > { %v3490_v22 = vpop.f32.mrb[23].mxu0  ;;  %v3516_v26 = vadd.f32 %v3515_v25, %v3514_v21  ;;  %v3517_v27 = vpop.f32.mrb[22].mxu1 }
 0x206   : > { %v2774_v23 = vadd.f32 %v3488_v19, %v2725_v62  ;;  %v3491_v24 = vadd.f32 %v3490_v22, %v3489_v20  ;;  %v3518_v29 = vpop.f32.mrb[23].mxu1 }
 0x207   : > { %v3519_v31 = vadd.f32 %v3518_v29, %v3517_v27 }
 0x208   : > { %v2777_v28 = vadd.f32 %v3491_v24, %v2728_v0  ;;  %v2823_v30 = vadd.f32 %v3516_v26, %v2774_v23 }
 0x20a   : > { %v2826_v32 = vadd.f32 %v3519_v31, %v2777_v28 }
 0x21a   : > { %v3536_v33 = vpop.f32.mrb[24].mxu0 }
 0x21b   : > { %v3564_v34 = vpop.f32.mrb[24].mxu1  ;;  %v3537_v35 = vpop.f32.mrb[25].mxu0 }
 0x21c   : > { %v3538_v36 = vadd.f32 %v3537_v35, %v3536_v33  ;;  %v3565_v37 = vpop.f32.mrb[25].mxu1  ;;  %v3539_v38 = vpop.f32.mrb[26].mxu0 }
 0x21d   : > { %v3566_v39 = vadd.f32 %v3565_v37, %v3564_v34  ;;  %v3567_v40 = vpop.f32.mrb[26].mxu1  ;;  %v3540_v41 = vpop.f32.mrb[27].mxu0 }
 0x21e   : > { %v2864_v42 = vadd.f32 %v3538_v36, %v2815_v14  ;;  %v3541_v43 = vadd.f32 %v3540_v41, %v3539_v38  ;;  %v3568_v44 = vpop.f32.mrb[27].mxu1 }
 0x21f   : > { %v3569_v45 = vadd.f32 %v3568_v44, %v3567_v40 }
 0x220   : > { %v2913_v46 = vadd.f32 %v3566_v39, %v2864_v42  ;;  %v2867_v47 = vadd.f32 %v3541_v43, %v2818_v16 }
 0x222   : > { %v2916_v48 = vadd.f32 %v3569_v45, %v2867_v47  ;;  %v3542_v49 = vpop.f32.mrb[28].mxu0  ;;  %v2970_v50 = vmul.f32 %v2913_v46, %v2913_v46 }
 0x223   : > { %v3570_v51 = vpop.f32.mrb[28].mxu1  ;;  %v3543_v52 = vpop.f32.mrb[29].mxu0 }
 0x224   : > { %v3344_v53 = vpack.c.bf16 %v2916_v48, %v2913_v46  ;;  %v2960_v54 = vadd.f32 %v2916_v48, %v2913_v46  ;;  %v2971_v55 = vmul.f32 %v2916_v48, %v2916_v48  ;;  %v3544_v56 = vadd.f32 %v3543_v52, %v3542_v49  ;;  %v3571_v57 = vpop.f32.mrb[29].mxu1  ;;  %v3545_v58 = vpop.f32.mrb[30].mxu0 }
 0x225   : > { %v3572_v59 = vadd.f32 %v3571_v57, %v3570_v51  ;;  %v3573_v60 = vpop.f32.mrb[30].mxu1  ;;  %v3546_v61 = vpop.f32.mrb[31].mxu0 }
 0x226   : > { %3345 = vst [vmem:[%s4596_s11] sm:$0xff] %v3344_v53   ;;  %v2974_v62 = vadd.f32 %v2971_v55, %v2970_v50  ;;  %v2872_v63 = vadd.f32 %v3544_v56, %v2823_v30  ;;  %v3547_v0 = vadd.f32 %v3546_v61, %v3545_v58  ;;  %v3574_v1 = vpop.f32.mrb[31].mxu1 }
 0x227   : > { %v3575_v2 = vadd.f32 %v3574_v1, %v3573_v60 }
 0x228   : > { %v2921_v3 = vadd.f32 %v3572_v59, %v2872_v63  ;;  %v2875_v4 = vadd.f32 %v3547_v0, %v2826_v32 }
 0x22a   : > { %v2961_v5 = vadd.f32 %v2960_v54, %v2921_v3  ;;  %v2972_v6 = vmul.f32 %v2921_v3, %v2921_v3  ;;  %v2924_v7 = vadd.f32 %v3575_v2, %v2875_v4 }
 0x22c   : > { %v2975_v8 = vadd.f32 %v2974_v62, %v2972_v6  ;;  %v3349_v9 = vpack.c.bf16 %v2924_v7, %v2921_v3  ;;  %v2962_v10 = vadd.f32 %v2961_v5, %v2924_v7  ;;  %v2973_v11 = vmul.f32 %v2924_v7, %v2924_v7 }
 0x22d   : > { %v3014_v25 = vld [vmem:[%s4596_s11] sm:$0xf] (%p3813_p5)  ;;  %v3016_v26 = vld [vmem:[%s4596_s11 + $0x4] sm:$0xf] (%p3813_p5) }
 0x22e   : > { %3351 = vst [vmem:[%s4596_s11 + $0x8] sm:$0xff] %v3349_v9   ;;  %v2963_v12 = vrot.slane %v2962_v10, 4  ;;  %v2976_v13 = vadd.f32 %v2975_v8, %v2973_v11  ;;  %3015 = vst [vmem:[%s2998_s20] sm:$0xf] (%p3813_p5), %v3014_v25 }
 0x22f   : > { %3017 = vst [vmem:[%s2998_s20 + $0x8] sm:$0xf] (%p3813_p5), %v3016_v26 }
 0x230   : > { %v2964_v14 = vadd.f32 %v2963_v12, %v2962_v10  ;;  %v2977_v15 = vrot.slane %v2976_v13, 4 }
 0x232   : > { %v2965_v16 = vrot.slane %v2964_v14, 2  ;;  %v2978_v17 = vadd.f32 %v2977_v15, %v2976_v13 }
 0x234   : > { %v2966_v18 = vadd.f32 %v2965_v16, %v2964_v14  ;;  %v2979_v19 = vrot.slane %v2978_v17, 2 }
 0x235   : > { %v3018_v27 = vld [vmem:[%s4596_s11 + $0x8] sm:$0xf] (%p3813_p5)  ;;  %v3020_v28 = vld [vmem:[%s4596_s11 + $0xc] sm:$0xf] (%p3813_p5) }
 0x236   : > { %v2967_v20 = vrot.slane %v2966_v18, 1  ;;  %v2980_v21 = vadd.f32 %v2979_v19, %v2978_v17  ;;  %2996 = sbr.rel (!%p3813_p5) target bundleno = 573 (0x23d), region = 77  ;;  %3019 = vst [vmem:[%s2998_s20 + $0x10] sm:$0xf] (%p3813_p5), %v3018_v27  ;;  %3021 = vst [vmem:[%s2998_s20 + $0x18] sm:$0xf] (%p3813_p5), %v3020_v28 }
 0x238   : > { %v2968_v22 = vadd.f32 %v2967_v20, %v2966_v18  ;;  %v2981_v23 = vrot.slane %v2980_v21, 1 }
 0x23a   : > { %2969 = vst [vmem:[%s1307_s12] sm:$0x1] %v2968_v22  ;;  %v2982_v24 = vadd.f32 %v2981_v23, %v2980_v21 }
 0x23c   : > { %2983 = vst [vmem:[%s1310_s15] sm:$0x1] %v2982_v24 }
 0x23d PF: > { %p13_p11 = scmp.ge.s32.totalorder %s3801_s22, 4   ;;  %s4635_s18 = smov %s3746_s19 }
 0x23e   : > { %s4636_s19 = smov %s3811_s25  ;;  %s4637_s20 = smov %s3801_s22 }
 0x23f   :  { %15 = sbr.rel (!%p13_p11) target bundleno = 2 (0x2), region = 176 }

// kernel: d_forward.14
= control target key start
LH: loop header
LB: loop body
LE: loop exit
PB: predicated region body
PF: predicated region fallthrough
CT: control target
= control target key end

     0   :  { %v34_v0 = vlaneseq  ;;  %s275_s0 = inlined_call_operand.vmem [shape: bf16[24,512], index: 0, kind: input, shape index: {}]   ;;  %s276_s1 = inlined_call_operand.vmem [shape: f32[1,512], index: 1, kind: input, shape index: {}]   ;;  %s277_s2 = inlined_call_operand.vmem [shape: f32[1,512], index: 2, kind: input, shape index: {}]   ;;  %s278_s3 = inlined_call_operand.vmem [shape: bf16[24,512], index: 3, kind: output, shape index: {}]  }
   0x1   :  { %v14_v1 = vld [vmem:[%s275_s0] sm:$0xff]  ;;  %v15_v5 = vld [vmem:[%s275_s0 + $0x8] sm:$0xff]  ;;  %v16_v6 = vld [vmem:[%s275_s0 + $0x10] sm:$0xff] }
   0x2   :  { %v20_v2 = vunpack.c.l.bf16 %v14_v1  ;;  %v21_v3 = vunpack.c.h.bf16 %v14_v1  ;;  %v35_v4 = vshrl.u32 %v34_v0, 7  ;;  %v17_v7 = vld [vmem:[%s275_s0 + $0x18] sm:$0xff]  ;;  %v32_v8 = vld [vmem:[%s276_s1] sm:$0xf]  ;;  %v22_v10 = vunpack.c.l.bf16 %v15_v5  ;;  %v19_v57 = vld [vmem:[%s275_s0 + $0x28] sm:$0xff] }
   0x3   :  { %v66_v9 = vld [vmem:[%s277_s2] sm:$0xf]  ;;  %v23_v11 = vunpack.c.h.bf16 %v15_v5  ;;  %v24_v12 = vunpack.c.l.bf16 %v16_v6  ;;  %v25_v13 = vunpack.c.h.bf16 %v16_v6  ;;  %v26_v19 = vunpack.c.l.bf16 %v17_v7 }
   0x4   :  { %v239_v14 = vld [vmem:[%s275_s0 + $0x20] sm:$0xff]  ;;  %v36_v15 = vsub.s32 0, %v35_v4  ;;  %v40_v16 = vsub.s32 1, %v35_v4  ;;  %v44_v17 = vsub.s32 2, %v35_v4  ;;  %v48_v18 = vsub.s32 3, %v35_v4 }
   0x5   :  { %v27_v20 = vunpack.c.h.bf16 %v17_v7  ;;  %v28_v21 = vunpack.c.l.bf16 %v239_v14  ;;  %v29_v22 = vunpack.c.h.bf16 %v239_v14 }
   0x6   :  { %v37_v23 = vrot.slane %v32_v8, %v36_v15  ;;  %v41_v24 = vrot.slane %v32_v8, %v40_v16  ;;  %v71_v25 = vrot.slane %v66_v9, %v36_v15  ;;  %v75_v26 = vrot.slane %v66_v9, %v40_v16 }
   0x7   :  { %v45_v27 = vrot.slane %v32_v8, %v44_v17  ;;  %v49_v28 = vrot.slane %v32_v8, %v48_v18  ;;  %v243_v29 = vrot.slane %v66_v9, %v44_v17  ;;  %v245_v30 = vrot.slane %v66_v9, %v48_v18 }
   0x8   :  { %v54_v31 = vmul.f32 %v37_v23, %v20_v2  ;;  %v55_v32 = vmul.f32 %v41_v24, %v21_v3  ;;  %v58_v33 = vmul.f32 %v37_v23, %v24_v12  ;;  %v59_v34 = vmul.f32 %v41_v24, %v25_v13 }
   0x9   :  { %v56_v35 = vmul.f32 %v45_v27, %v22_v10  ;;  %v57_v36 = vmul.f32 %v49_v28, %v23_v11  ;;  %v60_v37 = vmul.f32 %v45_v27, %v26_v19  ;;  %v61_v38 = vmul.f32 %v49_v28, %v27_v20 }
   0xa   :  { %v88_v39 = vadd.f32 %v71_v25, %v54_v31  ;;  %v89_v40 = vadd.f32 %v75_v26, %v55_v32  ;;  %v92_v41 = vadd.f32 %v71_v25, %v58_v33  ;;  %v93_v42 = vadd.f32 %v75_v26, %v59_v34 }
   0xb   :  { %v90_v43 = vadd.f32 %v243_v29, %v56_v35  ;;  %v91_v44 = vadd.f32 %v245_v30, %v57_v36  ;;  %v94_v45 = vadd.f32 %v243_v29, %v60_v37  ;;  %v95_v46 = vadd.f32 %v245_v30, %v61_v38 }
   0xc   :  { %vm100_vm0 = vcmp.gt.f32.partialorder %v88_v39, 0.0  ;;  %vm101_vm1 = vcmp.gt.f32.partialorder %v89_v40, 0.0  ;;  %v112_v47 = vmul.f32 0.3, %v88_v39  ;;  %v113_v48 = vmul.f32 0.3, %v89_v40 }
   0xd   :  { %vm102_vm2 = vcmp.gt.f32.partialorder %v90_v43, 0.0  ;;  %vm103_vm3 = vcmp.gt.f32.partialorder %v91_v44, 0.0  ;;  %v114_v49 = vmul.f32 0.3, %v90_v43  ;;  %v115_v50 = vmul.f32 0.3, %v91_v44 }
   0xe   :  { %v124_v51 = vsel %vm100_vm0, %v88_v39, %v112_v47  ;;  %v125_v52 = vsel %vm101_vm1, %v89_v40, %v113_v48  ;;  %vm104_vm4 = vcmp.gt.f32.partialorder %v92_v41, 0.0  ;;  %vm105_vm5 = vcmp.gt.f32.partialorder %v93_v42, 0.0 }
   0xf   :  { %v192_v53 = vpack.c.bf16 %v125_v52, %v124_v51  ;;  %v126_v54 = vsel %vm102_vm2, %v90_v43, %v114_v49  ;;  %v127_v55 = vsel %vm103_vm3, %v91_v44, %v115_v50  ;;  %v116_v56 = vmul.f32 0.3, %v92_v41 }
  0x10   :  { %v193_v58 = vpack.c.bf16 %v127_v55, %v126_v54  ;;  %v117_v59 = vmul.f32 0.3, %v93_v42  ;;  %vm106_vm6 = vcmp.gt.f32.partialorder %v94_v45, 0.0  ;;  %vm107_vm7 = vcmp.gt.f32.partialorder %v95_v46, 0.0 }
  0x11   :  { %176 = vst [vmem:[%s278_s3] sm:$0xff] %v192_v53  ;;  %v128_v60 = vsel %vm104_vm4, %v92_v41, %v116_v56  ;;  %v118_v61 = vmul.f32 0.3, %v94_v45  ;;  %v119_v62 = vmul.f32 0.3, %v95_v46  ;;  %v62_v63 = vmul.f32 %v37_v23, %v28_v21 }
  0x12   :  { %177 = vst [vmem:[%s278_s3 + $0x8] sm:$0xff] %v193_v58  ;;  %v129_v0 = vsel %vm105_vm5, %v93_v42, %v117_v59  ;;  %v63_v1 = vmul.f32 %v41_v24, %v29_v22  ;;  %v30_v2 = vunpack.c.l.bf16 %v19_v57  ;;  %v31_v3 = vunpack.c.h.bf16 %v19_v57 }
  0x13   :  { %v194_v4 = vpack.c.bf16 %v129_v0, %v128_v60  ;;  %v130_v5 = vsel %vm106_vm6, %v94_v45, %v118_v61  ;;  %v131_v6 = vsel %vm107_vm7, %v95_v46, %v119_v62  ;;  %v96_v7 = vadd.f32 %v71_v25, %v62_v63 }
  0x14   :  { %v195_v8 = vpack.c.bf16 %v131_v6, %v130_v5  ;;  %v97_v9 = vadd.f32 %v75_v26, %v63_v1  ;;  %v64_v10 = vmul.f32 %v45_v27, %v30_v2  ;;  %v65_v11 = vmul.f32 %v49_v28, %v31_v3 }
  0x15   :  { %178 = vst [vmem:[%s278_s3 + $0x10] sm:$0xff] %v194_v4  ;;  %vm108_vm8 = vcmp.gt.f32.partialorder %v96_v7, 0.0  ;;  %v120_v12 = vmul.f32 0.3, %v96_v7 }
  0x16   :  { %179 = vst [vmem:[%s278_s3 + $0x18] sm:$0xff] %v195_v8  ;;  %vm109_vm9 = vcmp.gt.f32.partialorder %v97_v9, 0.0  ;;  %v121_v13 = vmul.f32 0.3, %v97_v9  ;;  %v98_v14 = vadd.f32 %v243_v29, %v64_v10  ;;  %v99_v15 = vadd.f32 %v245_v30, %v65_v11 }
  0x17   :  { %v132_v16 = vsel %vm108_vm8, %v96_v7, %v120_v12 }
  0x18   :  { %v133_v17 = vsel %vm109_vm9, %v97_v9, %v121_v13  ;;  %vm110_vm10 = vcmp.gt.f32.partialorder %v98_v14, 0.0  ;;  %vm111_vm11 = vcmp.gt.f32.partialorder %v99_v15, 0.0  ;;  %v122_v18 = vmul.f32 0.3, %v98_v14 }
  0x19   :  { %v196_v19 = vpack.c.bf16 %v133_v17, %v132_v16  ;;  %v123_v20 = vmul.f32 0.3, %v99_v15 }
  0x1a   :  { %v134_v21 = vsel %vm110_vm10, %v98_v14, %v122_v18 }
  0x1b   :  { %180 = vst [vmem:[%s278_s3 + $0x20] sm:$0xff] %v196_v19  ;;  %v135_v22 = vsel %vm111_vm11, %v99_v15, %v123_v20 }
  0x1c   :  { %v197_v23 = vpack.c.bf16 %v135_v22, %v134_v21 }
  0x1e   :  { %181 = vst [vmem:[%s278_s3 + $0x28] sm:$0xff] %v197_v23 }

// kernel: d_forward.13
= control target key start
LH: loop header
LB: loop body
LE: loop exit
PB: predicated region body
PF: predicated region fallthrough
CT: control target
= control target key end

     0   :  { %s10550_s18 = smov 0   ;;  %s10552_s19 = smov 0   ;;  %s12465_s0 = inlined_call_operand.vmem [shape: bf16[24,4096], index: 0, kind: input, shape index: {}]   ;;  %s12466_s1 = inlined_call_operand.vmem [shape: bf16[4096,512], index: 1, kind: input, shape index: {}]   ;;  %s12467_s2 = inlined_call_operand.vmem [shape: f32[1,512], index: 2, kind: input, shape index: {}]   ;;  %s12468_s3 = inlined_call_operand.vmem [shape: bf16[24,512], index: 3, kind: output, shape index: {0}]   ;;  %s12469_s4 = inlined_call_operand.vmem [shape: f32[1,512], index: 4, kind: output, shape index: {1}]   ;;  %s12470_s5 = inlined_call_operand.vmem [shape: f32[1,512], index: 5, kind: output, shape index: {2}]  }
   0x1   :  { %s10554_s20 = smov 0  }
   0x2 LB: > { %s10566_s21 = sadd.s32 4294967295, %s10517_s20   ;;  %s10569_s22 = sadd.s32 1, %s10517_s20   ;;  %s10517_s20 = sphi %s10554_s20, %s12474_s20   ;;  %s10513_s19 = sphi %s10552_s19, %s12473_s19   ;;  %s10509_s18 = sphi %s10550_s18, %s12472_s18  }
   0x3   : > { %s41_s23 = ssub.s32 %s10517_s20, %s10569_s22  ;;  %s44_s24 = sadd.s32 1, %s10513_s19 }
   0x4   : > { %p42_p0 = scmp.eq.s32.totalorder %s41_s23, 0  ;;  %p51_p1 = scmp.ne.s32.totalorder %s10513_s19, %s10509_s18 }
   0x5   : > { %p52_p2 = scmp.eq.s32.totalorder %s10517_s20, 0  ;;  %p107_p3 = scmp.eq.s32.totalorder %s10566_s21, 1 }
   0x6   : > { %s10579_s25 = scalar_select %p42_p0, %s10513_s19, %s44_s24  }
   0x7   : > { %p53_p4 = por %p52_p2, %p51_p1  ;;  %p10581_p5 = por %p107_p3, %p51_p1 }
   0x8   : > { %p8948_p6 = scmp.ge.s32.totalorder %s10517_s20, 2 }
   0xa   : > { %184 = sbr.rel (%p8948_p6) target bundleno = 277 (0x115), region = 20 }
  0x11   : > { %187 = sbr.rel (!%p53_p4) target bundleno = 277 (0x115), region = 24  ;;  %s189_s27 = sand.u32 (%p53_p4), 1, %s10513_s19  }
  0x12   : > { %s9540_s28 = sshll.u32 (%p53_p4), %s10517_s20, 3  ;;  %s8949_s29 = sshll.u32 (%p53_p4), %s189_s27, 12 }
  0x13   : > { %s10591_s7 = scalar_lea.vmem (%p53_p4), %s12466_s1, %s9540_s28  ;;  %s10596_s8 = scalar_lea.vmem (%p53_p4), [#allocation2], %s8949_s29 }
  0x14   : > { %v1247_v0 = vld [vmem:[%s10591_s7] sm:$0xff] (%p53_p4)  ;;  %v1249_v1 = vld [vmem:[%s10591_s7 + $0x10] sm:$0xff] (%p53_p4) }
  0x15   : > { %v1251_v2 = vld [vmem:[%s10591_s7 + $0x20] sm:$0xff] (%p53_p4)  ;;  %1248 = vst [vmem:[%s10596_s8] sm:$0xff] (%p53_p4), %v1247_v0  ;;  %1250 = vst [vmem:[%s10596_s8 + $0x8] sm:$0xff] (%p53_p4), %v1249_v1  ;;  %v1253_v3 = vld [vmem:[%s10591_s7 + $0x30] sm:$0xff] (%p53_p4) }
  0x16   : > { %1252 = vst [vmem:[%s10596_s8 + $0x10] sm:$0xff] (%p53_p4), %v1251_v2  ;;  %v1255_v4 = vld [vmem:[%s10591_s7 + $0x40] sm:$0xff] (%p53_p4)  ;;  %v1257_v5 = vld [vmem:[%s10591_s7 + $0x50] sm:$0xff] (%p53_p4)  ;;  %1254 = vst [vmem:[%s10596_s8 + $0x18] sm:$0xff] (%p53_p4), %v1253_v3 }
  0x17   : > { %1256 = vst [vmem:[%s10596_s8 + $0x20] sm:$0xff] (%p53_p4), %v1255_v4  ;;  %1258 = vst [vmem:[%s10596_s8 + $0x28] sm:$0xff] (%p53_p4), %v1257_v5  ;;  %v1259_v6 = vld [vmem:[%s10591_s7 + $0x60] sm:$0xff] (%p53_p4)  ;;  %v1261_v7 = vld [vmem:[%s10591_s7 + $0x70] sm:$0xff] (%p53_p4) }
  0x18   : > { %v1263_v8 = vld [vmem:[%s10591_s7 + $0x80] sm:$0xff]  ;;  %1260 = vst [vmem:[%s10596_s8 + $0x30] sm:$0xff] %v1259_v6  ;;  %1262 = vst [vmem:[%s10596_s8 + $0x38] sm:$0xff] %v1261_v7  ;;  %v1265_v9 = vld [vmem:[%s10591_s7 + $0x90] sm:$0xff] }
  0x19   : > { %1264 = vst [vmem:[%s10596_s8 + $0x40] sm:$0xff] %v1263_v8  ;;  %v1267_v10 = vld [vmem:[%s10591_s7 + $0xa0] sm:$0xff]  ;;  %v1269_v11 = vld [vmem:[%s10591_s7 + $0xb0] sm:$0xff]  ;;  %1266 = vst [vmem:[%s10596_s8 + $0x48] sm:$0xff] %v1265_v9 }
  0x1a   : > { %1268 = vst [vmem:[%s10596_s8 + $0x50] sm:$0xff] %v1267_v10  ;;  %1270 = vst [vmem:[%s10596_s8 + $0x58] sm:$0xff] %v1269_v11  ;;  %v1271_v12 = vld [vmem:[%s10591_s7 + $0xc0] sm:$0xff]  ;;  %v1273_v13 = vld [vmem:[%s10591_s7 + $0xd0] sm:$0xff] }
  0x1b   : > { %v1275_v14 = vld [vmem:[%s10591_s7 + $0xe0] sm:$0xff]  ;;  %1272 = vst [vmem:[%s10596_s8 + $0x60] sm:$0xff] %v1271_v12  ;;  %1274 = vst [vmem:[%s10596_s8 + $0x68] sm:$0xff] %v1273_v13  ;;  %v1277_v15 = vld [vmem:[%s10591_s7 + $0xf0] sm:$0xff] }
  0x1c   : > { %1276 = vst [vmem:[%s10596_s8 + $0x70] sm:$0xff] %v1275_v14  ;;  %v1279_v16 = vld [vmem:[%s10591_s7 + $0x100] sm:$0xff]  ;;  %v1281_v17 = vld [vmem:[%s10591_s7 + $0x110] sm:$0xff]  ;;  %1278 = vst [vmem:[%s10596_s8 + $0x78] sm:$0xff] %v1277_v15 }
  0x1d   : > { %1280 = vst [vmem:[%s10596_s8 + $0x80] sm:$0xff] %v1279_v16  ;;  %1282 = vst [vmem:[%s10596_s8 + $0x88] sm:$0xff] %v1281_v17  ;;  %v1283_v18 = vld [vmem:[%s10591_s7 + $0x120] sm:$0xff]  ;;  %v1285_v19 = vld [vmem:[%s10591_s7 + $0x130] sm:$0xff] }
  0x1e   : > { %v1287_v20 = vld [vmem:[%s10591_s7 + $0x140] sm:$0xff]  ;;  %1284 = vst [vmem:[%s10596_s8 + $0x90] sm:$0xff] %v1283_v18  ;;  %1286 = vst [vmem:[%s10596_s8 + $0x98] sm:$0xff] %v1285_v19  ;;  %v1289_v21 = vld [vmem:[%s10591_s7 + $0x150] sm:$0xff] }
  0x1f   : > { %1288 = vst [vmem:[%s10596_s8 + $0xa0] sm:$0xff] %v1287_v20  ;;  %v1291_v22 = vld [vmem:[%s10591_s7 + $0x160] sm:$0xff]  ;;  %v1293_v23 = vld [vmem:[%s10591_s7 + $0x170] sm:$0xff]  ;;  %1290 = vst [vmem:[%s10596_s8 + $0xa8] sm:$0xff] %v1289_v21 }
  0x20   : > { %1292 = vst [vmem:[%s10596_s8 + $0xb0] sm:$0xff] %v1291_v22  ;;  %1294 = vst [vmem:[%s10596_s8 + $0xb8] sm:$0xff] %v1293_v23  ;;  %v1295_v24 = vld [vmem:[%s10591_s7 + $0x180] sm:$0xff]  ;;  %v1297_v25 = vld [vmem:[%s10591_s7 + $0x190] sm:$0xff] }
  0x21   : > { %v1299_v26 = vld [vmem:[%s10591_s7 + $0x1a0] sm:$0xff]  ;;  %1296 = vst [vmem:[%s10596_s8 + $0xc0] sm:$0xff] %v1295_v24  ;;  %1298 = vst [vmem:[%s10596_s8 + $0xc8] sm:$0xff] %v1297_v25  ;;  %v1301_v27 = vld [vmem:[%s10591_s7 + $0x1b0] sm:$0xff] }
  0x22   : > { %1300 = vst [vmem:[%s10596_s8 + $0xd0] sm:$0xff] %v1299_v26  ;;  %v1303_v28 = vld [vmem:[%s10591_s7 + $0x1c0] sm:$0xff]  ;;  %v1305_v29 = vld [vmem:[%s10591_s7 + $0x1d0] sm:$0xff]  ;;  %1302 = vst [vmem:[%s10596_s8 + $0xd8] sm:$0xff] %v1301_v27 }
  0x23   : > { %1304 = vst [vmem:[%s10596_s8 + $0xe0] sm:$0xff] %v1303_v28  ;;  %1306 = vst [vmem:[%s10596_s8 + $0xe8] sm:$0xff] %v1305_v29  ;;  %v1307_v30 = vld [vmem:[%s10591_s7 + $0x1e0] sm:$0xff]  ;;  %v1309_v31 = vld [vmem:[%s10591_s7 + $0x1f0] sm:$0xff] }
  0x24   : > { %v1311_v32 = vld [vmem:[%s10591_s7 + $0x200] sm:$0xff]  ;;  %1308 = vst [vmem:[%s10596_s8 + $0xf0] sm:$0xff] %v1307_v30  ;;  %1310 = vst [vmem:[%s10596_s8 + $0xf8] sm:$0xff] %v1309_v31  ;;  %v1313_v33 = vld [vmem:[%s10591_s7 + $0x210] sm:$0xff] }
  0x25   : > { %1312 = vst [vmem:[%s10596_s8 + $0x100] sm:$0xff] %v1311_v32  ;;  %v1315_v34 = vld [vmem:[%s10591_s7 + $0x220] sm:$0xff]  ;;  %v1317_v35 = vld [vmem:[%s10591_s7 + $0x230] sm:$0xff]  ;;  %1314 = vst [vmem:[%s10596_s8 + $0x108] sm:$0xff] %v1313_v33 }
  0x26   : > { %1316 = vst [vmem:[%s10596_s8 + $0x110] sm:$0xff] %v1315_v34  ;;  %1318 = vst [vmem:[%s10596_s8 + $0x118] sm:$0xff] %v1317_v35  ;;  %v1319_v36 = vld [vmem:[%s10591_s7 + $0x240] sm:$0xff]  ;;  %v1321_v37 = vld [vmem:[%s10591_s7 + $0x250] sm:$0xff] }
  0x27   : > { %v1323_v38 = vld [vmem:[%s10591_s7 + $0x260] sm:$0xff]  ;;  %1320 = vst [vmem:[%s10596_s8 + $0x120] sm:$0xff] %v1319_v36  ;;  %1322 = vst [vmem:[%s10596_s8 + $0x128] sm:$0xff] %v1321_v37  ;;  %v1325_v39 = vld [vmem:[%s10591_s7 + $0x270] sm:$0xff] }
  0x28   : > { %1324 = vst [vmem:[%s10596_s8 + $0x130] sm:$0xff] %v1323_v38  ;;  %v1327_v40 = vld [vmem:[%s10591_s7 + $0x280] sm:$0xff]  ;;  %v1329_v41 = vld [vmem:[%s10591_s7 + $0x290] sm:$0xff]  ;;  %1326 = vst [vmem:[%s10596_s8 + $0x138] sm:$0xff] %v1325_v39 }
  0x29   : > { %1328 = vst [vmem:[%s10596_s8 + $0x140] sm:$0xff] %v1327_v40  ;;  %1330 = vst [vmem:[%s10596_s8 + $0x148] sm:$0xff] %v1329_v41  ;;  %v1331_v42 = vld [vmem:[%s10591_s7 + $0x2a0] sm:$0xff]  ;;  %v1333_v43 = vld [vmem:[%s10591_s7 + $0x2b0] sm:$0xff] }
  0x2a   : > { %v1335_v44 = vld [vmem:[%s10591_s7 + $0x2c0] sm:$0xff]  ;;  %1332 = vst [vmem:[%s10596_s8 + $0x150] sm:$0xff] %v1331_v42  ;;  %1334 = vst [vmem:[%s10596_s8 + $0x158] sm:$0xff] %v1333_v43  ;;  %v1337_v45 = vld [vmem:[%s10591_s7 + $0x2d0] sm:$0xff] }
  0x2b   : > { %1336 = vst [vmem:[%s10596_s8 + $0x160] sm:$0xff] %v1335_v44  ;;  %v1339_v46 = vld [vmem:[%s10591_s7 + $0x2e0] sm:$0xff]  ;;  %v1341_v47 = vld [vmem:[%s10591_s7 + $0x2f0] sm:$0xff]  ;;  %1338 = vst [vmem:[%s10596_s8 + $0x168] sm:$0xff] %v1337_v45 }
  0x2c   : > { %1340 = vst [vmem:[%s10596_s8 + $0x170] sm:$0xff] %v1339_v46  ;;  %1342 = vst [vmem:[%s10596_s8 + $0x178] sm:$0xff] %v1341_v47  ;;  %v1343_v48 = vld [vmem:[%s10591_s7 + $0x300] sm:$0xff]  ;;  %v1345_v49 = vld [vmem:[%s10591_s7 + $0x310] sm:$0xff] }
  0x2d   : > { %v1347_v50 = vld [vmem:[%s10591_s7 + $0x320] sm:$0xff]  ;;  %1344 = vst [vmem:[%s10596_s8 + $0x180] sm:$0xff] %v1343_v48  ;;  %1346 = vst [vmem:[%s10596_s8 + $0x188] sm:$0xff] %v1345_v49  ;;  %v1349_v51 = vld [vmem:[%s10591_s7 + $0x330] sm:$0xff] }
  0x2e   : > { %1348 = vst [vmem:[%s10596_s8 + $0x190] sm:$0xff] %v1347_v50  ;;  %v1351_v52 = vld [vmem:[%s10591_s7 + $0x340] sm:$0xff]  ;;  %v1353_v53 = vld [vmem:[%s10591_s7 + $0x350] sm:$0xff]  ;;  %1350 = vst [vmem:[%s10596_s8 + $0x198] sm:$0xff] %v1349_v51 }
  0x2f   : > { %1352 = vst [vmem:[%s10596_s8 + $0x1a0] sm:$0xff] %v1351_v52  ;;  %1354 = vst [vmem:[%s10596_s8 + $0x1a8] sm:$0xff] %v1353_v53  ;;  %v1355_v54 = vld [vmem:[%s10591_s7 + $0x360] sm:$0xff]  ;;  %v1357_v55 = vld [vmem:[%s10591_s7 + $0x370] sm:$0xff] }
  0x30   : > { %v1359_v56 = vld [vmem:[%s10591_s7 + $0x380] sm:$0xff]  ;;  %1356 = vst [vmem:[%s10596_s8 + $0x1b0] sm:$0xff] %v1355_v54  ;;  %1358 = vst [vmem:[%s10596_s8 + $0x1b8] sm:$0xff] %v1357_v55  ;;  %v1361_v57 = vld [vmem:[%s10591_s7 + $0x390] sm:$0xff] }
  0x31   : > { %1360 = vst [vmem:[%s10596_s8 + $0x1c0] sm:$0xff] %v1359_v56  ;;  %v1363_v58 = vld [vmem:[%s10591_s7 + $0x3a0] sm:$0xff]  ;;  %v1365_v59 = vld [vmem:[%s10591_s7 + $0x3b0] sm:$0xff]  ;;  %1362 = vst [vmem:[%s10596_s8 + $0x1c8] sm:$0xff] %v1361_v57 }
  0x32   : > { %1364 = vst [vmem:[%s10596_s8 + $0x1d0] sm:$0xff] %v1363_v58  ;;  %1366 = vst [vmem:[%s10596_s8 + $0x1d8] sm:$0xff] %v1365_v59  ;;  %v1367_v60 = vld [vmem:[%s10591_s7 + $0x3c0] sm:$0xff]  ;;  %v1369_v61 = vld [vmem:[%s10591_s7 + $0x3d0] sm:$0xff] }
  0x33   : > { %v1371_v62 = vld [vmem:[%s10591_s7 + $0x3e0] sm:$0xff]  ;;  %1368 = vst [vmem:[%s10596_s8 + $0x1e0] sm:$0xff] %v1367_v60  ;;  %1370 = vst [vmem:[%s10596_s8 + $0x1e8] sm:$0xff] %v1369_v61  ;;  %v1373_v63 = vld [vmem:[%s10591_s7 + $0x3f0] sm:$0xff] }
  0x34   : > { %1372 = vst [vmem:[%s10596_s8 + $0x1f0] sm:$0xff] %v1371_v62  ;;  %v1375_v0 = vld [vmem:[%s10591_s7 + $0x400] sm:$0xff]  ;;  %v1377_v1 = vld [vmem:[%s10591_s7 + $0x410] sm:$0xff]  ;;  %1374 = vst [vmem:[%s10596_s8 + $0x1f8] sm:$0xff] %v1373_v63 }
  0x35   : > { %1376 = vst [vmem:[%s10596_s8 + $0x200] sm:$0xff] %v1375_v0  ;;  %1378 = vst [vmem:[%s10596_s8 + $0x208] sm:$0xff] %v1377_v1  ;;  %v1379_v2 = vld [vmem:[%s10591_s7 + $0x420] sm:$0xff]  ;;  %v1381_v3 = vld [vmem:[%s10591_s7 + $0x430] sm:$0xff] }
  0x36   : > { %v1383_v4 = vld [vmem:[%s10591_s7 + $0x440] sm:$0xff]  ;;  %1380 = vst [vmem:[%s10596_s8 + $0x210] sm:$0xff] %v1379_v2  ;;  %1382 = vst [vmem:[%s10596_s8 + $0x218] sm:$0xff] %v1381_v3  ;;  %v1385_v5 = vld [vmem:[%s10591_s7 + $0x450] sm:$0xff] }
  0x37   : > { %1384 = vst [vmem:[%s10596_s8 + $0x220] sm:$0xff] %v1383_v4  ;;  %v1387_v6 = vld [vmem:[%s10591_s7 + $0x460] sm:$0xff]  ;;  %v1389_v7 = vld [vmem:[%s10591_s7 + $0x470] sm:$0xff]  ;;  %1386 = vst [vmem:[%s10596_s8 + $0x228] sm:$0xff] %v1385_v5 }
  0x38   : > { %1388 = vst [vmem:[%s10596_s8 + $0x230] sm:$0xff] %v1387_v6  ;;  %1390 = vst [vmem:[%s10596_s8 + $0x238] sm:$0xff] %v1389_v7  ;;  %v1391_v8 = vld [vmem:[%s10591_s7 + $0x480] sm:$0xff]  ;;  %v1393_v9 = vld [vmem:[%s10591_s7 + $0x490] sm:$0xff] }
  0x39   : > { %v1395_v10 = vld [vmem:[%s10591_s7 + $0x4a0] sm:$0xff]  ;;  %1392 = vst [vmem:[%s10596_s8 + $0x240] sm:$0xff] %v1391_v8  ;;  %1394 = vst [vmem:[%s10596_s8 + $0x248] sm:$0xff] %v1393_v9  ;;  %v1397_v11 = vld [vmem:[%s10591_s7 + $0x4b0] sm:$0xff] }
  0x3a   : > { %1396 = vst [vmem:[%s10596_s8 + $0x250] sm:$0xff] %v1395_v10  ;;  %v1399_v12 = vld [vmem:[%s10591_s7 + $0x4c0] sm:$0xff]  ;;  %v1401_v13 = vld [vmem:[%s10591_s7 + $0x4d0] sm:$0xff]  ;;  %1398 = vst [vmem:[%s10596_s8 + $0x258] sm:$0xff] %v1397_v11 }
  0x3b   : > { %1400 = vst [vmem:[%s10596_s8 + $0x260] sm:$0xff] %v1399_v12  ;;  %1402 = vst [vmem:[%s10596_s8 + $0x268] sm:$0xff] %v1401_v13  ;;  %v1403_v14 = vld [vmem:[%s10591_s7 + $0x4e0] sm:$0xff]  ;;  %v1405_v15 = vld [vmem:[%s10591_s7 + $0x4f0] sm:$0xff] }
  0x3c   : > { %v1407_v16 = vld [vmem:[%s10591_s7 + $0x500] sm:$0xff]  ;;  %1404 = vst [vmem:[%s10596_s8 + $0x270] sm:$0xff] %v1403_v14  ;;  %1406 = vst [vmem:[%s10596_s8 + $0x278] sm:$0xff] %v1405_v15  ;;  %v1409_v17 = vld [vmem:[%s10591_s7 + $0x510] sm:$0xff] }
  0x3d   : > { %1408 = vst [vmem:[%s10596_s8 + $0x280] sm:$0xff] %v1407_v16  ;;  %v1411_v18 = vld [vmem:[%s10591_s7 + $0x520] sm:$0xff]  ;;  %v1413_v19 = vld [vmem:[%s10591_s7 + $0x530] sm:$0xff]  ;;  %1410 = vst [vmem:[%s10596_s8 + $0x288] sm:$0xff] %v1409_v17 }
  0x3e   : > { %1412 = vst [vmem:[%s10596_s8 + $0x290] sm:$0xff] %v1411_v18  ;;  %1414 = vst [vmem:[%s10596_s8 + $0x298] sm:$0xff] %v1413_v19  ;;  %v1415_v20 = vld [vmem:[%s10591_s7 + $0x540] sm:$0xff]  ;;  %v1417_v21 = vld [vmem:[%s10591_s7 + $0x550] sm:$0xff] }
  0x3f   : > { %v1419_v22 = vld [vmem:[%s10591_s7 + $0x560] sm:$0xff]  ;;  %1416 = vst [vmem:[%s10596_s8 + $0x2a0] sm:$0xff] %v1415_v20  ;;  %1418 = vst [vmem:[%s10596_s8 + $0x2a8] sm:$0xff] %v1417_v21  ;;  %v1421_v23 = vld [vmem:[%s10591_s7 + $0x570] sm:$0xff] }
  0x40   : > { %1420 = vst [vmem:[%s10596_s8 + $0x2b0] sm:$0xff] %v1419_v22  ;;  %v1423_v24 = vld [vmem:[%s10591_s7 + $0x580] sm:$0xff]  ;;  %v1425_v25 = vld [vmem:[%s10591_s7 + $0x590] sm:$0xff]  ;;  %1422 = vst [vmem:[%s10596_s8 + $0x2b8] sm:$0xff] %v1421_v23 }
  0x41   : > { %1424 = vst [vmem:[%s10596_s8 + $0x2c0] sm:$0xff] %v1423_v24  ;;  %1426 = vst [vmem:[%s10596_s8 + $0x2c8] sm:$0xff] %v1425_v25  ;;  %v1427_v26 = vld [vmem:[%s10591_s7 + $0x5a0] sm:$0xff]  ;;  %v1429_v27 = vld [vmem:[%s10591_s7 + $0x5b0] sm:$0xff] }
  0x42   : > { %v1431_v28 = vld [vmem:[%s10591_s7 + $0x5c0] sm:$0xff]  ;;  %1428 = vst [vmem:[%s10596_s8 + $0x2d0] sm:$0xff] %v1427_v26  ;;  %1430 = vst [vmem:[%s10596_s8 + $0x2d8] sm:$0xff] %v1429_v27  ;;  %v1433_v29 = vld [vmem:[%s10591_s7 + $0x5d0] sm:$0xff] }
  0x43   : > { %1432 = vst [vmem:[%s10596_s8 + $0x2e0] sm:$0xff] %v1431_v28  ;;  %v1435_v30 = vld [vmem:[%s10591_s7 + $0x5e0] sm:$0xff]  ;;  %v1437_v31 = vld [vmem:[%s10591_s7 + $0x5f0] sm:$0xff]  ;;  %1434 = vst [vmem:[%s10596_s8 + $0x2e8] sm:$0xff] %v1433_v29 }
  0x44   : > { %1436 = vst [vmem:[%s10596_s8 + $0x2f0] sm:$0xff] %v1435_v30  ;;  %1438 = vst [vmem:[%s10596_s8 + $0x2f8] sm:$0xff] %v1437_v31  ;;  %v1439_v32 = vld [vmem:[%s10591_s7 + $0x600] sm:$0xff]  ;;  %v1441_v33 = vld [vmem:[%s10591_s7 + $0x610] sm:$0xff] }
  0x45   : > { %v1443_v34 = vld [vmem:[%s10591_s7 + $0x620] sm:$0xff]  ;;  %1440 = vst [vmem:[%s10596_s8 + $0x300] sm:$0xff] %v1439_v32  ;;  %1442 = vst [vmem:[%s10596_s8 + $0x308] sm:$0xff] %v1441_v33  ;;  %v1445_v35 = vld [vmem:[%s10591_s7 + $0x630] sm:$0xff] }
  0x46   : > { %1444 = vst [vmem:[%s10596_s8 + $0x310] sm:$0xff] %v1443_v34  ;;  %v1447_v36 = vld [vmem:[%s10591_s7 + $0x640] sm:$0xff]  ;;  %v1449_v37 = vld [vmem:[%s10591_s7 + $0x650] sm:$0xff]  ;;  %1446 = vst [vmem:[%s10596_s8 + $0x318] sm:$0xff] %v1445_v35 }
  0x47   : > { %1448 = vst [vmem:[%s10596_s8 + $0x320] sm:$0xff] %v1447_v36  ;;  %1450 = vst [vmem:[%s10596_s8 + $0x328] sm:$0xff] %v1449_v37  ;;  %v1451_v38 = vld [vmem:[%s10591_s7 + $0x660] sm:$0xff]  ;;  %v1453_v39 = vld [vmem:[%s10591_s7 + $0x670] sm:$0xff] }
  0x48   : > { %v1455_v40 = vld [vmem:[%s10591_s7 + $0x680] sm:$0xff]  ;;  %1452 = vst [vmem:[%s10596_s8 + $0x330] sm:$0xff] %v1451_v38  ;;  %1454 = vst [vmem:[%s10596_s8 + $0x338] sm:$0xff] %v1453_v39  ;;  %v1457_v41 = vld [vmem:[%s10591_s7 + $0x690] sm:$0xff] }
  0x49   : > { %1456 = vst [vmem:[%s10596_s8 + $0x340] sm:$0xff] %v1455_v40  ;;  %v1459_v42 = vld [vmem:[%s10591_s7 + $0x6a0] sm:$0xff]  ;;  %v1461_v43 = vld [vmem:[%s10591_s7 + $0x6b0] sm:$0xff]  ;;  %1458 = vst [vmem:[%s10596_s8 + $0x348] sm:$0xff] %v1457_v41 }
  0x4a   : > { %1460 = vst [vmem:[%s10596_s8 + $0x350] sm:$0xff] %v1459_v42  ;;  %1462 = vst [vmem:[%s10596_s8 + $0x358] sm:$0xff] %v1461_v43  ;;  %v1463_v44 = vld [vmem:[%s10591_s7 + $0x6c0] sm:$0xff]  ;;  %v1465_v45 = vld [vmem:[%s10591_s7 + $0x6d0] sm:$0xff] }
  0x4b   : > { %v1467_v46 = vld [vmem:[%s10591_s7 + $0x6e0] sm:$0xff]  ;;  %1464 = vst [vmem:[%s10596_s8 + $0x360] sm:$0xff] %v1463_v44  ;;  %1466 = vst [vmem:[%s10596_s8 + $0x368] sm:$0xff] %v1465_v45  ;;  %v1469_v47 = vld [vmem:[%s10591_s7 + $0x6f0] sm:$0xff] }
  0x4c   : > { %1468 = vst [vmem:[%s10596_s8 + $0x370] sm:$0xff] %v1467_v46  ;;  %v1471_v48 = vld [vmem:[%s10591_s7 + $0x700] sm:$0xff]  ;;  %v1473_v49 = vld [vmem:[%s10591_s7 + $0x710] sm:$0xff]  ;;  %1470 = vst [vmem:[%s10596_s8 + $0x378] sm:$0xff] %v1469_v47 }
  0x4d   : > { %1472 = vst [vmem:[%s10596_s8 + $0x380] sm:$0xff] %v1471_v48  ;;  %1474 = vst [vmem:[%s10596_s8 + $0x388] sm:$0xff] %v1473_v49  ;;  %v1475_v50 = vld [vmem:[%s10591_s7 + $0x720] sm:$0xff]  ;;  %v1477_v51 = vld [vmem:[%s10591_s7 + $0x730] sm:$0xff] }
  0x4e   : > { %v1479_v52 = vld [vmem:[%s10591_s7 + $0x740] sm:$0xff]  ;;  %1476 = vst [vmem:[%s10596_s8 + $0x390] sm:$0xff] %v1475_v50  ;;  %1478 = vst [vmem:[%s10596_s8 + $0x398] sm:$0xff] %v1477_v51  ;;  %v1481_v53 = vld [vmem:[%s10591_s7 + $0x750] sm:$0xff] }
  0x4f   : > { %1480 = vst [vmem:[%s10596_s8 + $0x3a0] sm:$0xff] %v1479_v52  ;;  %v1483_v54 = vld [vmem:[%s10591_s7 + $0x760] sm:$0xff]  ;;  %v1485_v55 = vld [vmem:[%s10591_s7 + $0x770] sm:$0xff]  ;;  %1482 = vst [vmem:[%s10596_s8 + $0x3a8] sm:$0xff] %v1481_v53 }
  0x50   : > { %1484 = vst [vmem:[%s10596_s8 + $0x3b0] sm:$0xff] %v1483_v54  ;;  %1486 = vst [vmem:[%s10596_s8 + $0x3b8] sm:$0xff] %v1485_v55  ;;  %v1487_v56 = vld [vmem:[%s10591_s7 + $0x780] sm:$0xff]  ;;  %v1489_v57 = vld [vmem:[%s10591_s7 + $0x790] sm:$0xff] }
  0x51   : > { %v1491_v58 = vld [vmem:[%s10591_s7 + $0x7a0] sm:$0xff]  ;;  %1488 = vst [vmem:[%s10596_s8 + $0x3c0] sm:$0xff] %v1487_v56  ;;  %1490 = vst [vmem:[%s10596_s8 + $0x3c8] sm:$0xff] %v1489_v57  ;;  %v1493_v59 = vld [vmem:[%s10591_s7 + $0x7b0] sm:$0xff] }
  0x52   : > { %1492 = vst [vmem:[%s10596_s8 + $0x3d0] sm:$0xff] %v1491_v58  ;;  %v1495_v60 = vld [vmem:[%s10591_s7 + $0x7c0] sm:$0xff]  ;;  %v1497_v61 = vld [vmem:[%s10591_s7 + $0x7d0] sm:$0xff]  ;;  %1494 = vst [vmem:[%s10596_s8 + $0x3d8] sm:$0xff] %v1493_v59 }
  0x53   : > { %1496 = vst [vmem:[%s10596_s8 + $0x3e0] sm:$0xff] %v1495_v60  ;;  %1498 = vst [vmem:[%s10596_s8 + $0x3e8] sm:$0xff] %v1497_v61  ;;  %v1499_v62 = vld [vmem:[%s10591_s7 + $0x7e0] sm:$0xff]  ;;  %v1501_v63 = vld [vmem:[%s10591_s7 + $0x7f0] sm:$0xff] }
  0x54   : > { %v1503_v0 = vld [vmem:[%s10591_s7 + $0x800] sm:$0xff]  ;;  %1500 = vst [vmem:[%s10596_s8 + $0x3f0] sm:$0xff] %v1499_v62  ;;  %1502 = vst [vmem:[%s10596_s8 + $0x3f8] sm:$0xff] %v1501_v63  ;;  %v1505_v1 = vld [vmem:[%s10591_s7 + $0x810] sm:$0xff] }
  0x55   : > { %1504 = vst [vmem:[%s10596_s8 + $0x400] sm:$0xff] %v1503_v0  ;;  %v1507_v2 = vld [vmem:[%s10591_s7 + $0x820] sm:$0xff]  ;;  %v1509_v3 = vld [vmem:[%s10591_s7 + $0x830] sm:$0xff]  ;;  %1506 = vst [vmem:[%s10596_s8 + $0x408] sm:$0xff] %v1505_v1 }
  0x56   : > { %1508 = vst [vmem:[%s10596_s8 + $0x410] sm:$0xff] %v1507_v2  ;;  %1510 = vst [vmem:[%s10596_s8 + $0x418] sm:$0xff] %v1509_v3  ;;  %v1511_v4 = vld [vmem:[%s10591_s7 + $0x840] sm:$0xff]  ;;  %v1513_v5 = vld [vmem:[%s10591_s7 + $0x850] sm:$0xff] }
  0x57   : > { %v1515_v6 = vld [vmem:[%s10591_s7 + $0x860] sm:$0xff]  ;;  %1512 = vst [vmem:[%s10596_s8 + $0x420] sm:$0xff] %v1511_v4  ;;  %1514 = vst [vmem:[%s10596_s8 + $0x428] sm:$0xff] %v1513_v5  ;;  %v1517_v7 = vld [vmem:[%s10591_s7 + $0x870] sm:$0xff] }
  0x58   : > { %1516 = vst [vmem:[%s10596_s8 + $0x430] sm:$0xff] %v1515_v6  ;;  %v1519_v8 = vld [vmem:[%s10591_s7 + $0x880] sm:$0xff]  ;;  %v1521_v9 = vld [vmem:[%s10591_s7 + $0x890] sm:$0xff]  ;;  %1518 = vst [vmem:[%s10596_s8 + $0x438] sm:$0xff] %v1517_v7 }
  0x59   : > { %1520 = vst [vmem:[%s10596_s8 + $0x440] sm:$0xff] %v1519_v8  ;;  %1522 = vst [vmem:[%s10596_s8 + $0x448] sm:$0xff] %v1521_v9  ;;  %v1523_v10 = vld [vmem:[%s10591_s7 + $0x8a0] sm:$0xff]  ;;  %v1525_v11 = vld [vmem:[%s10591_s7 + $0x8b0] sm:$0xff] }
  0x5a   : > { %v1527_v12 = vld [vmem:[%s10591_s7 + $0x8c0] sm:$0xff]  ;;  %1524 = vst [vmem:[%s10596_s8 + $0x450] sm:$0xff] %v1523_v10  ;;  %1526 = vst [vmem:[%s10596_s8 + $0x458] sm:$0xff] %v1525_v11  ;;  %v1529_v13 = vld [vmem:[%s10591_s7 + $0x8d0] sm:$0xff] }
  0x5b   : > { %1528 = vst [vmem:[%s10596_s8 + $0x460] sm:$0xff] %v1527_v12  ;;  %v1531_v14 = vld [vmem:[%s10591_s7 + $0x8e0] sm:$0xff]  ;;  %v1533_v15 = vld [vmem:[%s10591_s7 + $0x8f0] sm:$0xff]  ;;  %1530 = vst [vmem:[%s10596_s8 + $0x468] sm:$0xff] %v1529_v13 }
  0x5c   : > { %1532 = vst [vmem:[%s10596_s8 + $0x470] sm:$0xff] %v1531_v14  ;;  %1534 = vst [vmem:[%s10596_s8 + $0x478] sm:$0xff] %v1533_v15  ;;  %v1535_v16 = vld [vmem:[%s10591_s7 + $0x900] sm:$0xff]  ;;  %v1537_v17 = vld [vmem:[%s10591_s7 + $0x910] sm:$0xff] }
  0x5d   : > { %v1539_v18 = vld [vmem:[%s10591_s7 + $0x920] sm:$0xff]  ;;  %1536 = vst [vmem:[%s10596_s8 + $0x480] sm:$0xff] %v1535_v16  ;;  %1538 = vst [vmem:[%s10596_s8 + $0x488] sm:$0xff] %v1537_v17  ;;  %v1541_v19 = vld [vmem:[%s10591_s7 + $0x930] sm:$0xff] }
  0x5e   : > { %1540 = vst [vmem:[%s10596_s8 + $0x490] sm:$0xff] %v1539_v18  ;;  %v1543_v20 = vld [vmem:[%s10591_s7 + $0x940] sm:$0xff]  ;;  %v1545_v21 = vld [vmem:[%s10591_s7 + $0x950] sm:$0xff]  ;;  %1542 = vst [vmem:[%s10596_s8 + $0x498] sm:$0xff] %v1541_v19 }
  0x5f   : > { %1544 = vst [vmem:[%s10596_s8 + $0x4a0] sm:$0xff] %v1543_v20  ;;  %1546 = vst [vmem:[%s10596_s8 + $0x4a8] sm:$0xff] %v1545_v21  ;;  %v1547_v22 = vld [vmem:[%s10591_s7 + $0x960] sm:$0xff]  ;;  %v1549_v23 = vld [vmem:[%s10591_s7 + $0x970] sm:$0xff] }
  0x60   : > { %v1551_v24 = vld [vmem:[%s10591_s7 + $0x980] sm:$0xff]  ;;  %1548 = vst [vmem:[%s10596_s8 + $0x4b0] sm:$0xff] %v1547_v22  ;;  %1550 = vst [vmem:[%s10596_s8 + $0x4b8] sm:$0xff] %v1549_v23  ;;  %v1553_v25 = vld [vmem:[%s10591_s7 + $0x990] sm:$0xff] }
  0x61   : > { %1552 = vst [vmem:[%s10596_s8 + $0x4c0] sm:$0xff] %v1551_v24  ;;  %v1555_v26 = vld [vmem:[%s10591_s7 + $0x9a0] sm:$0xff]  ;;  %v1557_v27 = vld [vmem:[%s10591_s7 + $0x9b0] sm:$0xff]  ;;  %1554 = vst [vmem:[%s10596_s8 + $0x4c8] sm:$0xff] %v1553_v25 }
  0x62   : > { %1556 = vst [vmem:[%s10596_s8 + $0x4d0] sm:$0xff] %v1555_v26  ;;  %1558 = vst [vmem:[%s10596_s8 + $0x4d8] sm:$0xff] %v1557_v27  ;;  %v1559_v28 = vld [vmem:[%s10591_s7 + $0x9c0] sm:$0xff]  ;;  %v1561_v29 = vld [vmem:[%s10591_s7 + $0x9d0] sm:$0xff] }
  0x63   : > { %v1563_v30 = vld [vmem:[%s10591_s7 + $0x9e0] sm:$0xff]  ;;  %1560 = vst [vmem:[%s10596_s8 + $0x4e0] sm:$0xff] %v1559_v28  ;;  %1562 = vst [vmem:[%s10596_s8 + $0x4e8] sm:$0xff] %v1561_v29  ;;  %v1565_v31 = vld [vmem:[%s10591_s7 + $0x9f0] sm:$0xff] }
  0x64   : > { %1564 = vst [vmem:[%s10596_s8 + $0x4f0] sm:$0xff] %v1563_v30  ;;  %v1567_v32 = vld [vmem:[%s10591_s7 + $0xa00] sm:$0xff]  ;;  %v1569_v33 = vld [vmem:[%s10591_s7 + $0xa10] sm:$0xff]  ;;  %1566 = vst [vmem:[%s10596_s8 + $0x4f8] sm:$0xff] %v1565_v31 }
  0x65   : > { %1568 = vst [vmem:[%s10596_s8 + $0x500] sm:$0xff] %v1567_v32  ;;  %1570 = vst [vmem:[%s10596_s8 + $0x508] sm:$0xff] %v1569_v33  ;;  %v1571_v34 = vld [vmem:[%s10591_s7 + $0xa20] sm:$0xff]  ;;  %v1573_v35 = vld [vmem:[%s10591_s7 + $0xa30] sm:$0xff] }
  0x66   : > { %v1575_v36 = vld [vmem:[%s10591_s7 + $0xa40] sm:$0xff]  ;;  %1572 = vst [vmem:[%s10596_s8 + $0x510] sm:$0xff] %v1571_v34  ;;  %1574 = vst [vmem:[%s10596_s8 + $0x518] sm:$0xff] %v1573_v35  ;;  %v1577_v37 = vld [vmem:[%s10591_s7 + $0xa50] sm:$0xff] }
  0x67   : > { %1576 = vst [vmem:[%s10596_s8 + $0x520] sm:$0xff] %v1575_v36  ;;  %v1579_v38 = vld [vmem:[%s10591_s7 + $0xa60] sm:$0xff]  ;;  %v1581_v39 = vld [vmem:[%s10591_s7 + $0xa70] sm:$0xff]  ;;  %1578 = vst [vmem:[%s10596_s8 + $0x528] sm:$0xff] %v1577_v37 }
  0x68   : > { %1580 = vst [vmem:[%s10596_s8 + $0x530] sm:$0xff] %v1579_v38  ;;  %1582 = vst [vmem:[%s10596_s8 + $0x538] sm:$0xff] %v1581_v39  ;;  %v1583_v40 = vld [vmem:[%s10591_s7 + $0xa80] sm:$0xff]  ;;  %v1585_v41 = vld [vmem:[%s10591_s7 + $0xa90] sm:$0xff] }
  0x69   : > { %v1587_v42 = vld [vmem:[%s10591_s7 + $0xaa0] sm:$0xff]  ;;  %1584 = vst [vmem:[%s10596_s8 + $0x540] sm:$0xff] %v1583_v40  ;;  %1586 = vst [vmem:[%s10596_s8 + $0x548] sm:$0xff] %v1585_v41  ;;  %v1589_v43 = vld [vmem:[%s10591_s7 + $0xab0] sm:$0xff] }
  0x6a   : > { %1588 = vst [vmem:[%s10596_s8 + $0x550] sm:$0xff] %v1587_v42  ;;  %v1591_v44 = vld [vmem:[%s10591_s7 + $0xac0] sm:$0xff]  ;;  %v1593_v45 = vld [vmem:[%s10591_s7 + $0xad0] sm:$0xff]  ;;  %1590 = vst [vmem:[%s10596_s8 + $0x558] sm:$0xff] %v1589_v43 }
  0x6b   : > { %1592 = vst [vmem:[%s10596_s8 + $0x560] sm:$0xff] %v1591_v44  ;;  %1594 = vst [vmem:[%s10596_s8 + $0x568] sm:$0xff] %v1593_v45  ;;  %v1595_v46 = vld [vmem:[%s10591_s7 + $0xae0] sm:$0xff]  ;;  %v1597_v47 = vld [vmem:[%s10591_s7 + $0xaf0] sm:$0xff] }
  0x6c   : > { %v1599_v48 = vld [vmem:[%s10591_s7 + $0xb00] sm:$0xff]  ;;  %1596 = vst [vmem:[%s10596_s8 + $0x570] sm:$0xff] %v1595_v46  ;;  %1598 = vst [vmem:[%s10596_s8 + $0x578] sm:$0xff] %v1597_v47  ;;  %v1601_v49 = vld [vmem:[%s10591_s7 + $0xb10] sm:$0xff] }
  0x6d   : > { %1600 = vst [vmem:[%s10596_s8 + $0x580] sm:$0xff] %v1599_v48  ;;  %v1603_v50 = vld [vmem:[%s10591_s7 + $0xb20] sm:$0xff]  ;;  %v1605_v51 = vld [vmem:[%s10591_s7 + $0xb30] sm:$0xff]  ;;  %1602 = vst [vmem:[%s10596_s8 + $0x588] sm:$0xff] %v1601_v49 }
  0x6e   : > { %1604 = vst [vmem:[%s10596_s8 + $0x590] sm:$0xff] %v1603_v50  ;;  %1606 = vst [vmem:[%s10596_s8 + $0x598] sm:$0xff] %v1605_v51  ;;  %v1607_v52 = vld [vmem:[%s10591_s7 + $0xb40] sm:$0xff]  ;;  %v1609_v53 = vld [vmem:[%s10591_s7 + $0xb50] sm:$0xff] }
  0x6f   : > { %v1611_v54 = vld [vmem:[%s10591_s7 + $0xb60] sm:$0xff]  ;;  %1608 = vst [vmem:[%s10596_s8 + $0x5a0] sm:$0xff] %v1607_v52  ;;  %1610 = vst [vmem:[%s10596_s8 + $0x5a8] sm:$0xff] %v1609_v53  ;;  %v1613_v55 = vld [vmem:[%s10591_s7 + $0xb70] sm:$0xff] }
  0x70   : > { %1612 = vst [vmem:[%s10596_s8 + $0x5b0] sm:$0xff] %v1611_v54  ;;  %v1615_v56 = vld [vmem:[%s10591_s7 + $0xb80] sm:$0xff]  ;;  %v1617_v57 = vld [vmem:[%s10591_s7 + $0xb90] sm:$0xff]  ;;  %1614 = vst [vmem:[%s10596_s8 + $0x5b8] sm:$0xff] %v1613_v55 }
  0x71   : > { %1616 = vst [vmem:[%s10596_s8 + $0x5c0] sm:$0xff] %v1615_v56  ;;  %1618 = vst [vmem:[%s10596_s8 + $0x5c8] sm:$0xff] %v1617_v57  ;;  %v1619_v58 = vld [vmem:[%s10591_s7 + $0xba0] sm:$0xff]  ;;  %v1621_v59 = vld [vmem:[%s10591_s7 + $0xbb0] sm:$0xff] }
  0x72   : > { %v1623_v60 = vld [vmem:[%s10591_s7 + $0xbc0] sm:$0xff]  ;;  %1620 = vst [vmem:[%s10596_s8 + $0x5d0] sm:$0xff] %v1619_v58  ;;  %1622 = vst [vmem:[%s10596_s8 + $0x5d8] sm:$0xff] %v1621_v59  ;;  %v1625_v61 = vld [vmem:[%s10591_s7 + $0xbd0] sm:$0xff] }
  0x73   : > { %1624 = vst [vmem:[%s10596_s8 + $0x5e0] sm:$0xff] %v1623_v60  ;;  %v1627_v62 = vld [vmem:[%s10591_s7 + $0xbe0] sm:$0xff]  ;;  %v1629_v63 = vld [vmem:[%s10591_s7 + $0xbf0] sm:$0xff]  ;;  %1626 = vst [vmem:[%s10596_s8 + $0x5e8] sm:$0xff] %v1625_v61 }
  0x74   : > { %1628 = vst [vmem:[%s10596_s8 + $0x5f0] sm:$0xff] %v1627_v62  ;;  %1630 = vst [vmem:[%s10596_s8 + $0x5f8] sm:$0xff] %v1629_v63  ;;  %v1631_v0 = vld [vmem:[%s10591_s7 + $0xc00] sm:$0xff]  ;;  %v1633_v1 = vld [vmem:[%s10591_s7 + $0xc10] sm:$0xff] }
  0x75   : > { %v1635_v2 = vld [vmem:[%s10591_s7 + $0xc20] sm:$0xff]  ;;  %1632 = vst [vmem:[%s10596_s8 + $0x600] sm:$0xff] %v1631_v0  ;;  %1634 = vst [vmem:[%s10596_s8 + $0x608] sm:$0xff] %v1633_v1  ;;  %v1637_v3 = vld [vmem:[%s10591_s7 + $0xc30] sm:$0xff] }
  0x76   : > { %1636 = vst [vmem:[%s10596_s8 + $0x610] sm:$0xff] %v1635_v2  ;;  %v1639_v4 = vld [vmem:[%s10591_s7 + $0xc40] sm:$0xff]  ;;  %v1641_v5 = vld [vmem:[%s10591_s7 + $0xc50] sm:$0xff]  ;;  %1638 = vst [vmem:[%s10596_s8 + $0x618] sm:$0xff] %v1637_v3 }
  0x77   : > { %1640 = vst [vmem:[%s10596_s8 + $0x620] sm:$0xff] %v1639_v4  ;;  %1642 = vst [vmem:[%s10596_s8 + $0x628] sm:$0xff] %v1641_v5  ;;  %v1643_v6 = vld [vmem:[%s10591_s7 + $0xc60] sm:$0xff]  ;;  %v1645_v7 = vld [vmem:[%s10591_s7 + $0xc70] sm:$0xff] }
  0x78   : > { %v1647_v8 = vld [vmem:[%s10591_s7 + $0xc80] sm:$0xff]  ;;  %1644 = vst [vmem:[%s10596_s8 + $0x630] sm:$0xff] %v1643_v6  ;;  %1646 = vst [vmem:[%s10596_s8 + $0x638] sm:$0xff] %v1645_v7  ;;  %v1649_v9 = vld [vmem:[%s10591_s7 + $0xc90] sm:$0xff] }
  0x79   : > { %1648 = vst [vmem:[%s10596_s8 + $0x640] sm:$0xff] %v1647_v8  ;;  %v1651_v10 = vld [vmem:[%s10591_s7 + $0xca0] sm:$0xff]  ;;  %v1653_v11 = vld [vmem:[%s10591_s7 + $0xcb0] sm:$0xff]  ;;  %1650 = vst [vmem:[%s10596_s8 + $0x648] sm:$0xff] %v1649_v9 }
  0x7a   : > { %1652 = vst [vmem:[%s10596_s8 + $0x650] sm:$0xff] %v1651_v10  ;;  %1654 = vst [vmem:[%s10596_s8 + $0x658] sm:$0xff] %v1653_v11  ;;  %v1655_v12 = vld [vmem:[%s10591_s7 + $0xcc0] sm:$0xff]  ;;  %v1657_v13 = vld [vmem:[%s10591_s7 + $0xcd0] sm:$0xff] }
  0x7b   : > { %v1659_v14 = vld [vmem:[%s10591_s7 + $0xce0] sm:$0xff]  ;;  %1656 = vst [vmem:[%s10596_s8 + $0x660] sm:$0xff] %v1655_v12  ;;  %1658 = vst [vmem:[%s10596_s8 + $0x668] sm:$0xff] %v1657_v13  ;;  %v1661_v15 = vld [vmem:[%s10591_s7 + $0xcf0] sm:$0xff] }
  0x7c   : > { %1660 = vst [vmem:[%s10596_s8 + $0x670] sm:$0xff] %v1659_v14  ;;  %v1663_v16 = vld [vmem:[%s10591_s7 + $0xd00] sm:$0xff]  ;;  %v1665_v17 = vld [vmem:[%s10591_s7 + $0xd10] sm:$0xff]  ;;  %1662 = vst [vmem:[%s10596_s8 + $0x678] sm:$0xff] %v1661_v15 }
  0x7d   : > { %1664 = vst [vmem:[%s10596_s8 + $0x680] sm:$0xff] %v1663_v16  ;;  %1666 = vst [vmem:[%s10596_s8 + $0x688] sm:$0xff] %v1665_v17  ;;  %v1667_v18 = vld [vmem:[%s10591_s7 + $0xd20] sm:$0xff]  ;;  %v1669_v19 = vld [vmem:[%s10591_s7 + $0xd30] sm:$0xff] }
  0x7e   : > { %v1671_v20 = vld [vmem:[%s10591_s7 + $0xd40] sm:$0xff]  ;;  %1668 = vst [vmem:[%s10596_s8 + $0x690] sm:$0xff] %v1667_v18  ;;  %1670 = vst [vmem:[%s10596_s8 + $0x698] sm:$0xff] %v1669_v19  ;;  %v1673_v21 = vld [vmem:[%s10591_s7 + $0xd50] sm:$0xff] }
  0x7f   : > { %1672 = vst [vmem:[%s10596_s8 + $0x6a0] sm:$0xff] %v1671_v20  ;;  %v1675_v22 = vld [vmem:[%s10591_s7 + $0xd60] sm:$0xff]  ;;  %v1677_v23 = vld [vmem:[%s10591_s7 + $0xd70] sm:$0xff]  ;;  %1674 = vst [vmem:[%s10596_s8 + $0x6a8] sm:$0xff] %v1673_v21 }
  0x80   : > { %1676 = vst [vmem:[%s10596_s8 + $0x6b0] sm:$0xff] %v1675_v22  ;;  %1678 = vst [vmem:[%s10596_s8 + $0x6b8] sm:$0xff] %v1677_v23  ;;  %v1679_v24 = vld [vmem:[%s10591_s7 + $0xd80] sm:$0xff]  ;;  %v1681_v25 = vld [vmem:[%s10591_s7 + $0xd90] sm:$0xff] }
  0x81   : > { %v1683_v26 = vld [vmem:[%s10591_s7 + $0xda0] sm:$0xff]  ;;  %1680 = vst [vmem:[%s10596_s8 + $0x6c0] sm:$0xff] %v1679_v24  ;;  %1682 = vst [vmem:[%s10596_s8 + $0x6c8] sm:$0xff] %v1681_v25  ;;  %v1685_v27 = vld [vmem:[%s10591_s7 + $0xdb0] sm:$0xff] }
  0x82   : > { %1684 = vst [vmem:[%s10596_s8 + $0x6d0] sm:$0xff] %v1683_v26  ;;  %v1687_v28 = vld [vmem:[%s10591_s7 + $0xdc0] sm:$0xff]  ;;  %v1689_v29 = vld [vmem:[%s10591_s7 + $0xdd0] sm:$0xff]  ;;  %1686 = vst [vmem:[%s10596_s8 + $0x6d8] sm:$0xff] %v1685_v27 }
  0x83   : > { %1688 = vst [vmem:[%s10596_s8 + $0x6e0] sm:$0xff] %v1687_v28  ;;  %1690 = vst [vmem:[%s10596_s8 + $0x6e8] sm:$0xff] %v1689_v29  ;;  %v1691_v30 = vld [vmem:[%s10591_s7 + $0xde0] sm:$0xff]  ;;  %v1693_v31 = vld [vmem:[%s10591_s7 + $0xdf0] sm:$0xff] }
  0x84   : > { %v1695_v32 = vld [vmem:[%s10591_s7 + $0xe00] sm:$0xff]  ;;  %1692 = vst [vmem:[%s10596_s8 + $0x6f0] sm:$0xff] %v1691_v30  ;;  %1694 = vst [vmem:[%s10596_s8 + $0x6f8] sm:$0xff] %v1693_v31  ;;  %v1697_v33 = vld [vmem:[%s10591_s7 + $0xe10] sm:$0xff] }
  0x85   : > { %1696 = vst [vmem:[%s10596_s8 + $0x700] sm:$0xff] %v1695_v32  ;;  %v1699_v34 = vld [vmem:[%s10591_s7 + $0xe20] sm:$0xff]  ;;  %v1701_v35 = vld [vmem:[%s10591_s7 + $0xe30] sm:$0xff]  ;;  %1698 = vst [vmem:[%s10596_s8 + $0x708] sm:$0xff] %v1697_v33 }
  0x86   : > { %1700 = vst [vmem:[%s10596_s8 + $0x710] sm:$0xff] %v1699_v34  ;;  %1702 = vst [vmem:[%s10596_s8 + $0x718] sm:$0xff] %v1701_v35  ;;  %v1703_v36 = vld [vmem:[%s10591_s7 + $0xe40] sm:$0xff]  ;;  %v1705_v37 = vld [vmem:[%s10591_s7 + $0xe50] sm:$0xff] }
  0x87   : > { %v1707_v38 = vld [vmem:[%s10591_s7 + $0xe60] sm:$0xff]  ;;  %1704 = vst [vmem:[%s10596_s8 + $0x720] sm:$0xff] %v1703_v36  ;;  %1706 = vst [vmem:[%s10596_s8 + $0x728] sm:$0xff] %v1705_v37  ;;  %v1709_v39 = vld [vmem:[%s10591_s7 + $0xe70] sm:$0xff] }
  0x88   : > { %1708 = vst [vmem:[%s10596_s8 + $0x730] sm:$0xff] %v1707_v38  ;;  %v1711_v40 = vld [vmem:[%s10591_s7 + $0xe80] sm:$0xff]  ;;  %v1713_v41 = vld [vmem:[%s10591_s7 + $0xe90] sm:$0xff]  ;;  %1710 = vst [vmem:[%s10596_s8 + $0x738] sm:$0xff] %v1709_v39 }
  0x89   : > { %1712 = vst [vmem:[%s10596_s8 + $0x740] sm:$0xff] %v1711_v40  ;;  %1714 = vst [vmem:[%s10596_s8 + $0x748] sm:$0xff] %v1713_v41  ;;  %v1715_v42 = vld [vmem:[%s10591_s7 + $0xea0] sm:$0xff]  ;;  %v1717_v43 = vld [vmem:[%s10591_s7 + $0xeb0] sm:$0xff] }
  0x8a   : > { %v1719_v44 = vld [vmem:[%s10591_s7 + $0xec0] sm:$0xff]  ;;  %1716 = vst [vmem:[%s10596_s8 + $0x750] sm:$0xff] %v1715_v42  ;;  %1718 = vst [vmem:[%s10596_s8 + $0x758] sm:$0xff] %v1717_v43  ;;  %v1721_v45 = vld [vmem:[%s10591_s7 + $0xed0] sm:$0xff] }
  0x8b   : > { %1720 = vst [vmem:[%s10596_s8 + $0x760] sm:$0xff] %v1719_v44  ;;  %v1723_v46 = vld [vmem:[%s10591_s7 + $0xee0] sm:$0xff]  ;;  %v1725_v47 = vld [vmem:[%s10591_s7 + $0xef0] sm:$0xff]  ;;  %1722 = vst [vmem:[%s10596_s8 + $0x768] sm:$0xff] %v1721_v45 }
  0x8c   : > { %1724 = vst [vmem:[%s10596_s8 + $0x770] sm:$0xff] %v1723_v46  ;;  %1726 = vst [vmem:[%s10596_s8 + $0x778] sm:$0xff] %v1725_v47  ;;  %v1727_v48 = vld [vmem:[%s10591_s7 + $0xf00] sm:$0xff]  ;;  %v1729_v49 = vld [vmem:[%s10591_s7 + $0xf10] sm:$0xff] }
  0x8d   : > { %v1731_v50 = vld [vmem:[%s10591_s7 + $0xf20] sm:$0xff]  ;;  %1728 = vst [vmem:[%s10596_s8 + $0x780] sm:$0xff] %v1727_v48  ;;  %1730 = vst [vmem:[%s10596_s8 + $0x788] sm:$0xff] %v1729_v49  ;;  %v1733_v51 = vld [vmem:[%s10591_s7 + $0xf30] sm:$0xff] }
  0x8e   : > { %1732 = vst [vmem:[%s10596_s8 + $0x790] sm:$0xff] %v1731_v50  ;;  %v1735_v52 = vld [vmem:[%s10591_s7 + $0xf40] sm:$0xff]  ;;  %v1737_v53 = vld [vmem:[%s10591_s7 + $0xf50] sm:$0xff]  ;;  %1734 = vst [vmem:[%s10596_s8 + $0x798] sm:$0xff] %v1733_v51 }
  0x8f   : > { %1736 = vst [vmem:[%s10596_s8 + $0x7a0] sm:$0xff] %v1735_v52  ;;  %1738 = vst [vmem:[%s10596_s8 + $0x7a8] sm:$0xff] %v1737_v53  ;;  %v1739_v54 = vld [vmem:[%s10591_s7 + $0xf60] sm:$0xff]  ;;  %v1741_v55 = vld [vmem:[%s10591_s7 + $0xf70] sm:$0xff] }
  0x90   : > { %v1743_v56 = vld [vmem:[%s10591_s7 + $0xf80] sm:$0xff]  ;;  %1740 = vst [vmem:[%s10596_s8 + $0x7b0] sm:$0xff] %v1739_v54  ;;  %1742 = vst [vmem:[%s10596_s8 + $0x7b8] sm:$0xff] %v1741_v55  ;;  %v1745_v57 = vld [vmem:[%s10591_s7 + $0xf90] sm:$0xff] }
  0x91   : > { %1744 = vst [vmem:[%s10596_s8 + $0x7c0] sm:$0xff] %v1743_v56  ;;  %v1747_v58 = vld [vmem:[%s10591_s7 + $0xfa0] sm:$0xff]  ;;  %v1749_v59 = vld [vmem:[%s10591_s7 + $0xfb0] sm:$0xff]  ;;  %1746 = vst [vmem:[%s10596_s8 + $0x7c8] sm:$0xff] %v1745_v57 }
  0x92   : > { %1748 = vst [vmem:[%s10596_s8 + $0x7d0] sm:$0xff] %v1747_v58  ;;  %1750 = vst [vmem:[%s10596_s8 + $0x7d8] sm:$0xff] %v1749_v59  ;;  %v1751_v60 = vld [vmem:[%s10591_s7 + $0xfc0] sm:$0xff]  ;;  %v1753_v61 = vld [vmem:[%s10591_s7 + $0xfd0] sm:$0xff] }
  0x93   : > { %v1755_v62 = vld [vmem:[%s10591_s7 + $0xfe0] sm:$0xff]  ;;  %1752 = vst [vmem:[%s10596_s8 + $0x7e0] sm:$0xff] %v1751_v60  ;;  %1754 = vst [vmem:[%s10596_s8 + $0x7e8] sm:$0xff] %v1753_v61  ;;  %v1757_v63 = vld [vmem:[%s10591_s7 + $0xff0] sm:$0xff] }
  0x94   : > { %1756 = vst [vmem:[%s10596_s8 + $0x7f0] sm:$0xff] %v1755_v62  ;;  %v1759_v0 = vld [vmem:[%s10591_s7 + $0x1000] sm:$0xff]  ;;  %v1761_v1 = vld [vmem:[%s10591_s7 + $0x1010] sm:$0xff]  ;;  %1758 = vst [vmem:[%s10596_s8 + $0x7f8] sm:$0xff] %v1757_v63 }
  0x95   : > { %1760 = vst [vmem:[%s10596_s8 + $0x800] sm:$0xff] %v1759_v0  ;;  %1762 = vst [vmem:[%s10596_s8 + $0x808] sm:$0xff] %v1761_v1  ;;  %v1763_v2 = vld [vmem:[%s10591_s7 + $0x1020] sm:$0xff]  ;;  %v1765_v3 = vld [vmem:[%s10591_s7 + $0x1030] sm:$0xff] }
  0x96   : > { %v1767_v4 = vld [vmem:[%s10591_s7 + $0x1040] sm:$0xff]  ;;  %1764 = vst [vmem:[%s10596_s8 + $0x810] sm:$0xff] %v1763_v2  ;;  %1766 = vst [vmem:[%s10596_s8 + $0x818] sm:$0xff] %v1765_v3  ;;  %v1769_v5 = vld [vmem:[%s10591_s7 + $0x1050] sm:$0xff] }
  0x97   : > { %1768 = vst [vmem:[%s10596_s8 + $0x820] sm:$0xff] %v1767_v4  ;;  %v1771_v6 = vld [vmem:[%s10591_s7 + $0x1060] sm:$0xff]  ;;  %v1773_v7 = vld [vmem:[%s10591_s7 + $0x1070] sm:$0xff]  ;;  %1770 = vst [vmem:[%s10596_s8 + $0x828] sm:$0xff] %v1769_v5 }
  0x98   : > { %1772 = vst [vmem:[%s10596_s8 + $0x830] sm:$0xff] %v1771_v6  ;;  %1774 = vst [vmem:[%s10596_s8 + $0x838] sm:$0xff] %v1773_v7  ;;  %v1775_v8 = vld [vmem:[%s10591_s7 + $0x1080] sm:$0xff]  ;;  %v1777_v9 = vld [vmem:[%s10591_s7 + $0x1090] sm:$0xff] }
  0x99   : > { %v1779_v10 = vld [vmem:[%s10591_s7 + $0x10a0] sm:$0xff]  ;;  %1776 = vst [vmem:[%s10596_s8 + $0x840] sm:$0xff] %v1775_v8  ;;  %1778 = vst [vmem:[%s10596_s8 + $0x848] sm:$0xff] %v1777_v9  ;;  %v1781_v11 = vld [vmem:[%s10591_s7 + $0x10b0] sm:$0xff] }
  0x9a   : > { %1780 = vst [vmem:[%s10596_s8 + $0x850] sm:$0xff] %v1779_v10  ;;  %v1783_v12 = vld [vmem:[%s10591_s7 + $0x10c0] sm:$0xff]  ;;  %v1785_v13 = vld [vmem:[%s10591_s7 + $0x10d0] sm:$0xff]  ;;  %1782 = vst [vmem:[%s10596_s8 + $0x858] sm:$0xff] %v1781_v11 }
  0x9b   : > { %1784 = vst [vmem:[%s10596_s8 + $0x860] sm:$0xff] %v1783_v12  ;;  %1786 = vst [vmem:[%s10596_s8 + $0x868] sm:$0xff] %v1785_v13  ;;  %v1787_v14 = vld [vmem:[%s10591_s7 + $0x10e0] sm:$0xff]  ;;  %v1789_v15 = vld [vmem:[%s10591_s7 + $0x10f0] sm:$0xff] }
  0x9c   : > { %v1791_v16 = vld [vmem:[%s10591_s7 + $0x1100] sm:$0xff]  ;;  %1788 = vst [vmem:[%s10596_s8 + $0x870] sm:$0xff] %v1787_v14  ;;  %1790 = vst [vmem:[%s10596_s8 + $0x878] sm:$0xff] %v1789_v15  ;;  %v1793_v17 = vld [vmem:[%s10591_s7 + $0x1110] sm:$0xff] }
  0x9d   : > { %1792 = vst [vmem:[%s10596_s8 + $0x880] sm:$0xff] %v1791_v16  ;;  %v1795_v18 = vld [vmem:[%s10591_s7 + $0x1120] sm:$0xff]  ;;  %v1797_v19 = vld [vmem:[%s10591_s7 + $0x1130] sm:$0xff]  ;;  %1794 = vst [vmem:[%s10596_s8 + $0x888] sm:$0xff] %v1793_v17 }
  0x9e   : > { %1796 = vst [vmem:[%s10596_s8 + $0x890] sm:$0xff] %v1795_v18  ;;  %1798 = vst [vmem:[%s10596_s8 + $0x898] sm:$0xff] %v1797_v19  ;;  %v1799_v20 = vld [vmem:[%s10591_s7 + $0x1140] sm:$0xff]  ;;  %v1801_v21 = vld [vmem:[%s10591_s7 + $0x1150] sm:$0xff] }
  0x9f   : > { %v1803_v22 = vld [vmem:[%s10591_s7 + $0x1160] sm:$0xff]  ;;  %1800 = vst [vmem:[%s10596_s8 + $0x8a0] sm:$0xff] %v1799_v20  ;;  %1802 = vst [vmem:[%s10596_s8 + $0x8a8] sm:$0xff] %v1801_v21  ;;  %v1805_v23 = vld [vmem:[%s10591_s7 + $0x1170] sm:$0xff] }
  0xa0   : > { %1804 = vst [vmem:[%s10596_s8 + $0x8b0] sm:$0xff] %v1803_v22  ;;  %v1807_v24 = vld [vmem:[%s10591_s7 + $0x1180] sm:$0xff]  ;;  %v1809_v25 = vld [vmem:[%s10591_s7 + $0x1190] sm:$0xff]  ;;  %1806 = vst [vmem:[%s10596_s8 + $0x8b8] sm:$0xff] %v1805_v23 }
  0xa1   : > { %1808 = vst [vmem:[%s10596_s8 + $0x8c0] sm:$0xff] %v1807_v24  ;;  %1810 = vst [vmem:[%s10596_s8 + $0x8c8] sm:$0xff] %v1809_v25  ;;  %v1811_v26 = vld [vmem:[%s10591_s7 + $0x11a0] sm:$0xff]  ;;  %v1813_v27 = vld [vmem:[%s10591_s7 + $0x11b0] sm:$0xff] }
  0xa2   : > { %v1815_v28 = vld [vmem:[%s10591_s7 + $0x11c0] sm:$0xff]  ;;  %1812 = vst [vmem:[%s10596_s8 + $0x8d0] sm:$0xff] %v1811_v26  ;;  %1814 = vst [vmem:[%s10596_s8 + $0x8d8] sm:$0xff] %v1813_v27  ;;  %v1817_v29 = vld [vmem:[%s10591_s7 + $0x11d0] sm:$0xff] }
  0xa3   : > { %1816 = vst [vmem:[%s10596_s8 + $0x8e0] sm:$0xff] %v1815_v28  ;;  %v1819_v30 = vld [vmem:[%s10591_s7 + $0x11e0] sm:$0xff]  ;;  %v1821_v31 = vld [vmem:[%s10591_s7 + $0x11f0] sm:$0xff]  ;;  %1818 = vst [vmem:[%s10596_s8 + $0x8e8] sm:$0xff] %v1817_v29 }
  0xa4   : > { %1820 = vst [vmem:[%s10596_s8 + $0x8f0] sm:$0xff] %v1819_v30  ;;  %1822 = vst [vmem:[%s10596_s8 + $0x8f8] sm:$0xff] %v1821_v31  ;;  %v1823_v32 = vld [vmem:[%s10591_s7 + $0x1200] sm:$0xff]  ;;  %v1825_v33 = vld [vmem:[%s10591_s7 + $0x1210] sm:$0xff] }
  0xa5   : > { %v1827_v34 = vld [vmem:[%s10591_s7 + $0x1220] sm:$0xff]  ;;  %1824 = vst [vmem:[%s10596_s8 + $0x900] sm:$0xff] %v1823_v32  ;;  %1826 = vst [vmem:[%s10596_s8 + $0x908] sm:$0xff] %v1825_v33  ;;  %v1829_v35 = vld [vmem:[%s10591_s7 + $0x1230] sm:$0xff] }
  0xa6   : > { %1828 = vst [vmem:[%s10596_s8 + $0x910] sm:$0xff] %v1827_v34  ;;  %v1831_v36 = vld [vmem:[%s10591_s7 + $0x1240] sm:$0xff]  ;;  %v1833_v37 = vld [vmem:[%s10591_s7 + $0x1250] sm:$0xff]  ;;  %1830 = vst [vmem:[%s10596_s8 + $0x918] sm:$0xff] %v1829_v35 }
  0xa7   : > { %1832 = vst [vmem:[%s10596_s8 + $0x920] sm:$0xff] %v1831_v36  ;;  %1834 = vst [vmem:[%s10596_s8 + $0x928] sm:$0xff] %v1833_v37  ;;  %v1835_v38 = vld [vmem:[%s10591_s7 + $0x1260] sm:$0xff]  ;;  %v1837_v39 = vld [vmem:[%s10591_s7 + $0x1270] sm:$0xff] }
  0xa8   : > { %v1839_v40 = vld [vmem:[%s10591_s7 + $0x1280] sm:$0xff]  ;;  %1836 = vst [vmem:[%s10596_s8 + $0x930] sm:$0xff] %v1835_v38  ;;  %1838 = vst [vmem:[%s10596_s8 + $0x938] sm:$0xff] %v1837_v39  ;;  %v1841_v41 = vld [vmem:[%s10591_s7 + $0x1290] sm:$0xff] }
  0xa9   : > { %1840 = vst [vmem:[%s10596_s8 + $0x940] sm:$0xff] %v1839_v40  ;;  %v1843_v42 = vld [vmem:[%s10591_s7 + $0x12a0] sm:$0xff]  ;;  %v1845_v43 = vld [vmem:[%s10591_s7 + $0x12b0] sm:$0xff]  ;;  %1842 = vst [vmem:[%s10596_s8 + $0x948] sm:$0xff] %v1841_v41 }
  0xaa   : > { %1844 = vst [vmem:[%s10596_s8 + $0x950] sm:$0xff] %v1843_v42  ;;  %1846 = vst [vmem:[%s10596_s8 + $0x958] sm:$0xff] %v1845_v43  ;;  %v1847_v44 = vld [vmem:[%s10591_s7 + $0x12c0] sm:$0xff]  ;;  %v1849_v45 = vld [vmem:[%s10591_s7 + $0x12d0] sm:$0xff] }
  0xab   : > { %v1851_v46 = vld [vmem:[%s10591_s7 + $0x12e0] sm:$0xff]  ;;  %1848 = vst [vmem:[%s10596_s8 + $0x960] sm:$0xff] %v1847_v44  ;;  %1850 = vst [vmem:[%s10596_s8 + $0x968] sm:$0xff] %v1849_v45  ;;  %v1853_v47 = vld [vmem:[%s10591_s7 + $0x12f0] sm:$0xff] }
  0xac   : > { %1852 = vst [vmem:[%s10596_s8 + $0x970] sm:$0xff] %v1851_v46  ;;  %v1855_v48 = vld [vmem:[%s10591_s7 + $0x1300] sm:$0xff]  ;;  %v1857_v49 = vld [vmem:[%s10591_s7 + $0x1310] sm:$0xff]  ;;  %1854 = vst [vmem:[%s10596_s8 + $0x978] sm:$0xff] %v1853_v47 }
  0xad   : > { %1856 = vst [vmem:[%s10596_s8 + $0x980] sm:$0xff] %v1855_v48  ;;  %1858 = vst [vmem:[%s10596_s8 + $0x988] sm:$0xff] %v1857_v49  ;;  %v1859_v50 = vld [vmem:[%s10591_s7 + $0x1320] sm:$0xff]  ;;  %v1861_v51 = vld [vmem:[%s10591_s7 + $0x1330] sm:$0xff] }
  0xae   : > { %v1863_v52 = vld [vmem:[%s10591_s7 + $0x1340] sm:$0xff]  ;;  %1860 = vst [vmem:[%s10596_s8 + $0x990] sm:$0xff] %v1859_v50  ;;  %1862 = vst [vmem:[%s10596_s8 + $0x998] sm:$0xff] %v1861_v51  ;;  %v1865_v53 = vld [vmem:[%s10591_s7 + $0x1350] sm:$0xff] }
  0xaf   : > { %1864 = vst [vmem:[%s10596_s8 + $0x9a0] sm:$0xff] %v1863_v52  ;;  %v1867_v54 = vld [vmem:[%s10591_s7 + $0x1360] sm:$0xff]  ;;  %v1869_v55 = vld [vmem:[%s10591_s7 + $0x1370] sm:$0xff]  ;;  %1866 = vst [vmem:[%s10596_s8 + $0x9a8] sm:$0xff] %v1865_v53 }
  0xb0   : > { %1868 = vst [vmem:[%s10596_s8 + $0x9b0] sm:$0xff] %v1867_v54  ;;  %1870 = vst [vmem:[%s10596_s8 + $0x9b8] sm:$0xff] %v1869_v55  ;;  %v1871_v56 = vld [vmem:[%s10591_s7 + $0x1380] sm:$0xff]  ;;  %v1873_v57 = vld [vmem:[%s10591_s7 + $0x1390] sm:$0xff] }
  0xb1   : > { %v1875_v58 = vld [vmem:[%s10591_s7 + $0x13a0] sm:$0xff]  ;;  %1872 = vst [vmem:[%s10596_s8 + $0x9c0] sm:$0xff] %v1871_v56  ;;  %1874 = vst [vmem:[%s10596_s8 + $0x9c8] sm:$0xff] %v1873_v57  ;;  %v1877_v59 = vld [vmem:[%s10591_s7 + $0x13b0] sm:$0xff] }
  0xb2   : > { %1876 = vst [vmem:[%s10596_s8 + $0x9d0] sm:$0xff] %v1875_v58  ;;  %v1879_v60 = vld [vmem:[%s10591_s7 + $0x13c0] sm:$0xff]  ;;  %v1881_v61 = vld [vmem:[%s10591_s7 + $0x13d0] sm:$0xff]  ;;  %1878 = vst [vmem:[%s10596_s8 + $0x9d8] sm:$0xff] %v1877_v59 }
  0xb3   : > { %1880 = vst [vmem:[%s10596_s8 + $0x9e0] sm:$0xff] %v1879_v60  ;;  %1882 = vst [vmem:[%s10596_s8 + $0x9e8] sm:$0xff] %v1881_v61  ;;  %v1883_v62 = vld [vmem:[%s10591_s7 + $0x13e0] sm:$0xff]  ;;  %v1885_v63 = vld [vmem:[%s10591_s7 + $0x13f0] sm:$0xff] }
  0xb4   : > { %v1887_v0 = vld [vmem:[%s10591_s7 + $0x1400] sm:$0xff]  ;;  %1884 = vst [vmem:[%s10596_s8 + $0x9f0] sm:$0xff] %v1883_v62  ;;  %1886 = vst [vmem:[%s10596_s8 + $0x9f8] sm:$0xff] %v1885_v63  ;;  %v1889_v1 = vld [vmem:[%s10591_s7 + $0x1410] sm:$0xff] }
  0xb5   : > { %1888 = vst [vmem:[%s10596_s8 + $0xa00] sm:$0xff] %v1887_v0  ;;  %v1891_v2 = vld [vmem:[%s10591_s7 + $0x1420] sm:$0xff]  ;;  %v1893_v3 = vld [vmem:[%s10591_s7 + $0x1430] sm:$0xff]  ;;  %1890 = vst [vmem:[%s10596_s8 + $0xa08] sm:$0xff] %v1889_v1 }
  0xb6   : > { %1892 = vst [vmem:[%s10596_s8 + $0xa10] sm:$0xff] %v1891_v2  ;;  %1894 = vst [vmem:[%s10596_s8 + $0xa18] sm:$0xff] %v1893_v3  ;;  %v1895_v4 = vld [vmem:[%s10591_s7 + $0x1440] sm:$0xff]  ;;  %v1897_v5 = vld [vmem:[%s10591_s7 + $0x1450] sm:$0xff] }
  0xb7   : > { %v1899_v6 = vld [vmem:[%s10591_s7 + $0x1460] sm:$0xff]  ;;  %1896 = vst [vmem:[%s10596_s8 + $0xa20] sm:$0xff] %v1895_v4  ;;  %1898 = vst [vmem:[%s10596_s8 + $0xa28] sm:$0xff] %v1897_v5  ;;  %v1901_v7 = vld [vmem:[%s10591_s7 + $0x1470] sm:$0xff] }
  0xb8   : > { %1900 = vst [vmem:[%s10596_s8 + $0xa30] sm:$0xff] %v1899_v6  ;;  %v1903_v8 = vld [vmem:[%s10591_s7 + $0x1480] sm:$0xff]  ;;  %v1905_v9 = vld [vmem:[%s10591_s7 + $0x1490] sm:$0xff]  ;;  %1902 = vst [vmem:[%s10596_s8 + $0xa38] sm:$0xff] %v1901_v7 }
  0xb9   : > { %1904 = vst [vmem:[%s10596_s8 + $0xa40] sm:$0xff] %v1903_v8  ;;  %1906 = vst [vmem:[%s10596_s8 + $0xa48] sm:$0xff] %v1905_v9  ;;  %v1907_v10 = vld [vmem:[%s10591_s7 + $0x14a0] sm:$0xff]  ;;  %v1909_v11 = vld [vmem:[%s10591_s7 + $0x14b0] sm:$0xff] }
  0xba   : > { %v1911_v12 = vld [vmem:[%s10591_s7 + $0x14c0] sm:$0xff]  ;;  %1908 = vst [vmem:[%s10596_s8 + $0xa50] sm:$0xff] %v1907_v10  ;;  %1910 = vst [vmem:[%s10596_s8 + $0xa58] sm:$0xff] %v1909_v11  ;;  %v1913_v13 = vld [vmem:[%s10591_s7 + $0x14d0] sm:$0xff] }
  0xbb   : > { %1912 = vst [vmem:[%s10596_s8 + $0xa60] sm:$0xff] %v1911_v12  ;;  %v1915_v14 = vld [vmem:[%s10591_s7 + $0x14e0] sm:$0xff]  ;;  %v1917_v15 = vld [vmem:[%s10591_s7 + $0x14f0] sm:$0xff]  ;;  %1914 = vst [vmem:[%s10596_s8 + $0xa68] sm:$0xff] %v1913_v13 }
  0xbc   : > { %1916 = vst [vmem:[%s10596_s8 + $0xa70] sm:$0xff] %v1915_v14  ;;  %1918 = vst [vmem:[%s10596_s8 + $0xa78] sm:$0xff] %v1917_v15  ;;  %v1919_v16 = vld [vmem:[%s10591_s7 + $0x1500] sm:$0xff]  ;;  %v1921_v17 = vld [vmem:[%s10591_s7 + $0x1510] sm:$0xff] }
  0xbd   : > { %v1923_v18 = vld [vmem:[%s10591_s7 + $0x1520] sm:$0xff]  ;;  %1920 = vst [vmem:[%s10596_s8 + $0xa80] sm:$0xff] %v1919_v16  ;;  %1922 = vst [vmem:[%s10596_s8 + $0xa88] sm:$0xff] %v1921_v17  ;;  %v1925_v19 = vld [vmem:[%s10591_s7 + $0x1530] sm:$0xff] }
  0xbe   : > { %1924 = vst [vmem:[%s10596_s8 + $0xa90] sm:$0xff] %v1923_v18  ;;  %v1927_v20 = vld [vmem:[%s10591_s7 + $0x1540] sm:$0xff]  ;;  %v1929_v21 = vld [vmem:[%s10591_s7 + $0x1550] sm:$0xff]  ;;  %1926 = vst [vmem:[%s10596_s8 + $0xa98] sm:$0xff] %v1925_v19 }
  0xbf   : > { %1928 = vst [vmem:[%s10596_s8 + $0xaa0] sm:$0xff] %v1927_v20  ;;  %1930 = vst [vmem:[%s10596_s8 + $0xaa8] sm:$0xff] %v1929_v21  ;;  %v1931_v22 = vld [vmem:[%s10591_s7 + $0x1560] sm:$0xff]  ;;  %v1933_v23 = vld [vmem:[%s10591_s7 + $0x1570] sm:$0xff] }
  0xc0   : > { %v1935_v24 = vld [vmem:[%s10591_s7 + $0x1580] sm:$0xff]  ;;  %1932 = vst [vmem:[%s10596_s8 + $0xab0] sm:$0xff] %v1931_v22  ;;  %1934 = vst [vmem:[%s10596_s8 + $0xab8] sm:$0xff] %v1933_v23  ;;  %v1937_v25 = vld [vmem:[%s10591_s7 + $0x1590] sm:$0xff] }
  0xc1   : > { %1936 = vst [vmem:[%s10596_s8 + $0xac0] sm:$0xff] %v1935_v24  ;;  %v1939_v26 = vld [vmem:[%s10591_s7 + $0x15a0] sm:$0xff]  ;;  %v1941_v27 = vld [vmem:[%s10591_s7 + $0x15b0] sm:$0xff]  ;;  %1938 = vst [vmem:[%s10596_s8 + $0xac8] sm:$0xff] %v1937_v25 }
  0xc2   : > { %1940 = vst [vmem:[%s10596_s8 + $0xad0] sm:$0xff] %v1939_v26  ;;  %1942 = vst [vmem:[%s10596_s8 + $0xad8] sm:$0xff] %v1941_v27  ;;  %v1943_v28 = vld [vmem:[%s10591_s7 + $0x15c0] sm:$0xff]  ;;  %v1945_v29 = vld [vmem:[%s10591_s7 + $0x15d0] sm:$0xff] }
  0xc3   : > { %v1947_v30 = vld [vmem:[%s10591_s7 + $0x15e0] sm:$0xff]  ;;  %1944 = vst [vmem:[%s10596_s8 + $0xae0] sm:$0xff] %v1943_v28  ;;  %1946 = vst [vmem:[%s10596_s8 + $0xae8] sm:$0xff] %v1945_v29  ;;  %v1949_v31 = vld [vmem:[%s10591_s7 + $0x15f0] sm:$0xff] }
  0xc4   : > { %1948 = vst [vmem:[%s10596_s8 + $0xaf0] sm:$0xff] %v1947_v30  ;;  %v1951_v32 = vld [vmem:[%s10591_s7 + $0x1600] sm:$0xff]  ;;  %v1953_v33 = vld [vmem:[%s10591_s7 + $0x1610] sm:$0xff]  ;;  %1950 = vst [vmem:[%s10596_s8 + $0xaf8] sm:$0xff] %v1949_v31 }
  0xc5   : > { %1952 = vst [vmem:[%s10596_s8 + $0xb00] sm:$0xff] %v1951_v32  ;;  %1954 = vst [vmem:[%s10596_s8 + $0xb08] sm:$0xff] %v1953_v33  ;;  %v1955_v34 = vld [vmem:[%s10591_s7 + $0x1620] sm:$0xff]  ;;  %v1957_v35 = vld [vmem:[%s10591_s7 + $0x1630] sm:$0xff] }
  0xc6   : > { %v1959_v36 = vld [vmem:[%s10591_s7 + $0x1640] sm:$0xff]  ;;  %1956 = vst [vmem:[%s10596_s8 + $0xb10] sm:$0xff] %v1955_v34  ;;  %1958 = vst [vmem:[%s10596_s8 + $0xb18] sm:$0xff] %v1957_v35  ;;  %v1961_v37 = vld [vmem:[%s10591_s7 + $0x1650] sm:$0xff] }
  0xc7   : > { %1960 = vst [vmem:[%s10596_s8 + $0xb20] sm:$0xff] %v1959_v36  ;;  %v1963_v38 = vld [vmem:[%s10591_s7 + $0x1660] sm:$0xff]  ;;  %v1965_v39 = vld [vmem:[%s10591_s7 + $0x1670] sm:$0xff]  ;;  %1962 = vst [vmem:[%s10596_s8 + $0xb28] sm:$0xff] %v1961_v37 }
  0xc8   : > { %1964 = vst [vmem:[%s10596_s8 + $0xb30] sm:$0xff] %v1963_v38  ;;  %1966 = vst [vmem:[%s10596_s8 + $0xb38] sm:$0xff] %v1965_v39  ;;  %v1967_v40 = vld [vmem:[%s10591_s7 + $0x1680] sm:$0xff]  ;;  %v1969_v41 = vld [vmem:[%s10591_s7 + $0x1690] sm:$0xff] }
  0xc9   : > { %v1971_v42 = vld [vmem:[%s10591_s7 + $0x16a0] sm:$0xff]  ;;  %1968 = vst [vmem:[%s10596_s8 + $0xb40] sm:$0xff] %v1967_v40  ;;  %1970 = vst [vmem:[%s10596_s8 + $0xb48] sm:$0xff] %v1969_v41  ;;  %v1973_v43 = vld [vmem:[%s10591_s7 + $0x16b0] sm:$0xff] }
  0xca   : > { %1972 = vst [vmem:[%s10596_s8 + $0xb50] sm:$0xff] %v1971_v42  ;;  %v1975_v44 = vld [vmem:[%s10591_s7 + $0x16c0] sm:$0xff]  ;;  %v1977_v45 = vld [vmem:[%s10591_s7 + $0x16d0] sm:$0xff]  ;;  %1974 = vst [vmem:[%s10596_s8 + $0xb58] sm:$0xff] %v1973_v43 }
  0xcb   : > { %1976 = vst [vmem:[%s10596_s8 + $0xb60] sm:$0xff] %v1975_v44  ;;  %1978 = vst [vmem:[%s10596_s8 + $0xb68] sm:$0xff] %v1977_v45  ;;  %v1979_v46 = vld [vmem:[%s10591_s7 + $0x16e0] sm:$0xff]  ;;  %v1981_v47 = vld [vmem:[%s10591_s7 + $0x16f0] sm:$0xff] }
  0xcc   : > { %v1983_v48 = vld [vmem:[%s10591_s7 + $0x1700] sm:$0xff]  ;;  %1980 = vst [vmem:[%s10596_s8 + $0xb70] sm:$0xff] %v1979_v46  ;;  %1982 = vst [vmem:[%s10596_s8 + $0xb78] sm:$0xff] %v1981_v47  ;;  %v1985_v49 = vld [vmem:[%s10591_s7 + $0x1710] sm:$0xff] }
  0xcd   : > { %1984 = vst [vmem:[%s10596_s8 + $0xb80] sm:$0xff] %v1983_v48  ;;  %v1987_v50 = vld [vmem:[%s10591_s7 + $0x1720] sm:$0xff]  ;;  %v1989_v51 = vld [vmem:[%s10591_s7 + $0x1730] sm:$0xff]  ;;  %1986 = vst [vmem:[%s10596_s8 + $0xb88] sm:$0xff] %v1985_v49 }
  0xce   : > { %1988 = vst [vmem:[%s10596_s8 + $0xb90] sm:$0xff] %v1987_v50  ;;  %1990 = vst [vmem:[%s10596_s8 + $0xb98] sm:$0xff] %v1989_v51  ;;  %v1991_v52 = vld [vmem:[%s10591_s7 + $0x1740] sm:$0xff]  ;;  %v1993_v53 = vld [vmem:[%s10591_s7 + $0x1750] sm:$0xff] }
  0xcf   : > { %v1995_v54 = vld [vmem:[%s10591_s7 + $0x1760] sm:$0xff]  ;;  %1992 = vst [vmem:[%s10596_s8 + $0xba0] sm:$0xff] %v1991_v52  ;;  %1994 = vst [vmem:[%s10596_s8 + $0xba8] sm:$0xff] %v1993_v53  ;;  %v1997_v55 = vld [vmem:[%s10591_s7 + $0x1770] sm:$0xff] }
  0xd0   : > { %1996 = vst [vmem:[%s10596_s8 + $0xbb0] sm:$0xff] %v1995_v54  ;;  %v1999_v56 = vld [vmem:[%s10591_s7 + $0x1780] sm:$0xff]  ;;  %v2001_v57 = vld [vmem:[%s10591_s7 + $0x1790] sm:$0xff]  ;;  %1998 = vst [vmem:[%s10596_s8 + $0xbb8] sm:$0xff] %v1997_v55 }
  0xd1   : > { %2000 = vst [vmem:[%s10596_s8 + $0xbc0] sm:$0xff] %v1999_v56  ;;  %2002 = vst [vmem:[%s10596_s8 + $0xbc8] sm:$0xff] %v2001_v57  ;;  %v2003_v58 = vld [vmem:[%s10591_s7 + $0x17a0] sm:$0xff]  ;;  %v2005_v59 = vld [vmem:[%s10591_s7 + $0x17b0] sm:$0xff] }
  0xd2   : > { %v2007_v60 = vld [vmem:[%s10591_s7 + $0x17c0] sm:$0xff]  ;;  %2004 = vst [vmem:[%s10596_s8 + $0xbd0] sm:$0xff] %v2003_v58  ;;  %2006 = vst [vmem:[%s10596_s8 + $0xbd8] sm:$0xff] %v2005_v59  ;;  %v2009_v61 = vld [vmem:[%s10591_s7 + $0x17d0] sm:$0xff] }
  0xd3   : > { %2008 = vst [vmem:[%s10596_s8 + $0xbe0] sm:$0xff] %v2007_v60  ;;  %v2011_v62 = vld [vmem:[%s10591_s7 + $0x17e0] sm:$0xff]  ;;  %v2013_v63 = vld [vmem:[%s10591_s7 + $0x17f0] sm:$0xff]  ;;  %2010 = vst [vmem:[%s10596_s8 + $0xbe8] sm:$0xff] %v2009_v61 }
  0xd4   : > { %2012 = vst [vmem:[%s10596_s8 + $0xbf0] sm:$0xff] %v2011_v62  ;;  %2014 = vst [vmem:[%s10596_s8 + $0xbf8] sm:$0xff] %v2013_v63  ;;  %v2015_v0 = vld [vmem:[%s10591_s7 + $0x1800] sm:$0xff]  ;;  %v2017_v1 = vld [vmem:[%s10591_s7 + $0x1810] sm:$0xff] }
  0xd5   : > { %v2019_v2 = vld [vmem:[%s10591_s7 + $0x1820] sm:$0xff]  ;;  %2016 = vst [vmem:[%s10596_s8 + $0xc00] sm:$0xff] %v2015_v0  ;;  %2018 = vst [vmem:[%s10596_s8 + $0xc08] sm:$0xff] %v2017_v1  ;;  %v2021_v3 = vld [vmem:[%s10591_s7 + $0x1830] sm:$0xff] }
  0xd6   : > { %2020 = vst [vmem:[%s10596_s8 + $0xc10] sm:$0xff] %v2019_v2  ;;  %v2023_v4 = vld [vmem:[%s10591_s7 + $0x1840] sm:$0xff]  ;;  %v2025_v5 = vld [vmem:[%s10591_s7 + $0x1850] sm:$0xff]  ;;  %2022 = vst [vmem:[%s10596_s8 + $0xc18] sm:$0xff] %v2021_v3 }
  0xd7   : > { %2024 = vst [vmem:[%s10596_s8 + $0xc20] sm:$0xff] %v2023_v4  ;;  %2026 = vst [vmem:[%s10596_s8 + $0xc28] sm:$0xff] %v2025_v5  ;;  %v2027_v6 = vld [vmem:[%s10591_s7 + $0x1860] sm:$0xff]  ;;  %v2029_v7 = vld [vmem:[%s10591_s7 + $0x1870] sm:$0xff] }
  0xd8   : > { %v2031_v8 = vld [vmem:[%s10591_s7 + $0x1880] sm:$0xff]  ;;  %2028 = vst [vmem:[%s10596_s8 + $0xc30] sm:$0xff] %v2027_v6  ;;  %2030 = vst [vmem:[%s10596_s8 + $0xc38] sm:$0xff] %v2029_v7  ;;  %v2033_v9 = vld [vmem:[%s10591_s7 + $0x1890] sm:$0xff] }
  0xd9   : > { %2032 = vst [vmem:[%s10596_s8 + $0xc40] sm:$0xff] %v2031_v8  ;;  %v2035_v10 = vld [vmem:[%s10591_s7 + $0x18a0] sm:$0xff]  ;;  %v2037_v11 = vld [vmem:[%s10591_s7 + $0x18b0] sm:$0xff]  ;;  %2034 = vst [vmem:[%s10596_s8 + $0xc48] sm:$0xff] %v2033_v9 }
  0xda   : > { %2036 = vst [vmem:[%s10596_s8 + $0xc50] sm:$0xff] %v2035_v10  ;;  %2038 = vst [vmem:[%s10596_s8 + $0xc58] sm:$0xff] %v2037_v11  ;;  %v2039_v12 = vld [vmem:[%s10591_s7 + $0x18c0] sm:$0xff]  ;;  %v2041_v13 = vld [vmem:[%s10591_s7 + $0x18d0] sm:$0xff] }
  0xdb   : > { %v2043_v14 = vld [vmem:[%s10591_s7 + $0x18e0] sm:$0xff]  ;;  %2040 = vst [vmem:[%s10596_s8 + $0xc60] sm:$0xff] %v2039_v12  ;;  %2042 = vst [vmem:[%s10596_s8 + $0xc68] sm:$0xff] %v2041_v13  ;;  %v2045_v15 = vld [vmem:[%s10591_s7 + $0x18f0] sm:$0xff] }
  0xdc   : > { %2044 = vst [vmem:[%s10596_s8 + $0xc70] sm:$0xff] %v2043_v14  ;;  %v2047_v16 = vld [vmem:[%s10591_s7 + $0x1900] sm:$0xff]  ;;  %v2049_v17 = vld [vmem:[%s10591_s7 + $0x1910] sm:$0xff]  ;;  %2046 = vst [vmem:[%s10596_s8 + $0xc78] sm:$0xff] %v2045_v15 }
  0xdd   : > { %2048 = vst [vmem:[%s10596_s8 + $0xc80] sm:$0xff] %v2047_v16  ;;  %2050 = vst [vmem:[%s10596_s8 + $0xc88] sm:$0xff] %v2049_v17  ;;  %v2051_v18 = vld [vmem:[%s10591_s7 + $0x1920] sm:$0xff]  ;;  %v2053_v19 = vld [vmem:[%s10591_s7 + $0x1930] sm:$0xff] }
  0xde   : > { %v2055_v20 = vld [vmem:[%s10591_s7 + $0x1940] sm:$0xff]  ;;  %2052 = vst [vmem:[%s10596_s8 + $0xc90] sm:$0xff] %v2051_v18  ;;  %2054 = vst [vmem:[%s10596_s8 + $0xc98] sm:$0xff] %v2053_v19  ;;  %v2057_v21 = vld [vmem:[%s10591_s7 + $0x1950] sm:$0xff] }
  0xdf   : > { %2056 = vst [vmem:[%s10596_s8 + $0xca0] sm:$0xff] %v2055_v20  ;;  %v2059_v22 = vld [vmem:[%s10591_s7 + $0x1960] sm:$0xff]  ;;  %v2061_v23 = vld [vmem:[%s10591_s7 + $0x1970] sm:$0xff]  ;;  %2058 = vst [vmem:[%s10596_s8 + $0xca8] sm:$0xff] %v2057_v21 }
  0xe0   : > { %2060 = vst [vmem:[%s10596_s8 + $0xcb0] sm:$0xff] %v2059_v22  ;;  %2062 = vst [vmem:[%s10596_s8 + $0xcb8] sm:$0xff] %v2061_v23  ;;  %v2063_v24 = vld [vmem:[%s10591_s7 + $0x1980] sm:$0xff]  ;;  %v2065_v25 = vld [vmem:[%s10591_s7 + $0x1990] sm:$0xff] }
  0xe1   : > { %v2067_v26 = vld [vmem:[%s10591_s7 + $0x19a0] sm:$0xff]  ;;  %2064 = vst [vmem:[%s10596_s8 + $0xcc0] sm:$0xff] %v2063_v24  ;;  %2066 = vst [vmem:[%s10596_s8 + $0xcc8] sm:$0xff] %v2065_v25  ;;  %v2069_v27 = vld [vmem:[%s10591_s7 + $0x19b0] sm:$0xff] }
  0xe2   : > { %2068 = vst [vmem:[%s10596_s8 + $0xcd0] sm:$0xff] %v2067_v26  ;;  %v2071_v28 = vld [vmem:[%s10591_s7 + $0x19c0] sm:$0xff]  ;;  %v2073_v29 = vld [vmem:[%s10591_s7 + $0x19d0] sm:$0xff]  ;;  %2070 = vst [vmem:[%s10596_s8 + $0xcd8] sm:$0xff] %v2069_v27 }
  0xe3   : > { %2072 = vst [vmem:[%s10596_s8 + $0xce0] sm:$0xff] %v2071_v28  ;;  %2074 = vst [vmem:[%s10596_s8 + $0xce8] sm:$0xff] %v2073_v29  ;;  %v2075_v30 = vld [vmem:[%s10591_s7 + $0x19e0] sm:$0xff]  ;;  %v2077_v31 = vld [vmem:[%s10591_s7 + $0x19f0] sm:$0xff] }
  0xe4   : > { %v2079_v32 = vld [vmem:[%s10591_s7 + $0x1a00] sm:$0xff]  ;;  %2076 = vst [vmem:[%s10596_s8 + $0xcf0] sm:$0xff] %v2075_v30  ;;  %2078 = vst [vmem:[%s10596_s8 + $0xcf8] sm:$0xff] %v2077_v31  ;;  %v2081_v33 = vld [vmem:[%s10591_s7 + $0x1a10] sm:$0xff] }
  0xe5   : > { %2080 = vst [vmem:[%s10596_s8 + $0xd00] sm:$0xff] %v2079_v32  ;;  %v2083_v34 = vld [vmem:[%s10591_s7 + $0x1a20] sm:$0xff]  ;;  %v2085_v35 = vld [vmem:[%s10591_s7 + $0x1a30] sm:$0xff]  ;;  %2082 = vst [vmem:[%s10596_s8 + $0xd08] sm:$0xff] %v2081_v33 }
  0xe6   : > { %2084 = vst [vmem:[%s10596_s8 + $0xd10] sm:$0xff] %v2083_v34  ;;  %2086 = vst [vmem:[%s10596_s8 + $0xd18] sm:$0xff] %v2085_v35  ;;  %v2087_v36 = vld [vmem:[%s10591_s7 + $0x1a40] sm:$0xff]  ;;  %v2089_v37 = vld [vmem:[%s10591_s7 + $0x1a50] sm:$0xff] }
  0xe7   : > { %v2091_v38 = vld [vmem:[%s10591_s7 + $0x1a60] sm:$0xff]  ;;  %2088 = vst [vmem:[%s10596_s8 + $0xd20] sm:$0xff] %v2087_v36  ;;  %2090 = vst [vmem:[%s10596_s8 + $0xd28] sm:$0xff] %v2089_v37  ;;  %v2093_v39 = vld [vmem:[%s10591_s7 + $0x1a70] sm:$0xff] }
  0xe8   : > { %2092 = vst [vmem:[%s10596_s8 + $0xd30] sm:$0xff] %v2091_v38  ;;  %v2095_v40 = vld [vmem:[%s10591_s7 + $0x1a80] sm:$0xff]  ;;  %v2097_v41 = vld [vmem:[%s10591_s7 + $0x1a90] sm:$0xff]  ;;  %2094 = vst [vmem:[%s10596_s8 + $0xd38] sm:$0xff] %v2093_v39 }
  0xe9   : > { %2096 = vst [vmem:[%s10596_s8 + $0xd40] sm:$0xff] %v2095_v40  ;;  %2098 = vst [vmem:[%s10596_s8 + $0xd48] sm:$0xff] %v2097_v41  ;;  %v2099_v42 = vld [vmem:[%s10591_s7 + $0x1aa0] sm:$0xff]  ;;  %v2101_v43 = vld [vmem:[%s10591_s7 + $0x1ab0] sm:$0xff] }
  0xea   : > { %v2103_v44 = vld [vmem:[%s10591_s7 + $0x1ac0] sm:$0xff]  ;;  %2100 = vst [vmem:[%s10596_s8 + $0xd50] sm:$0xff] %v2099_v42  ;;  %2102 = vst [vmem:[%s10596_s8 + $0xd58] sm:$0xff] %v2101_v43  ;;  %v2105_v45 = vld [vmem:[%s10591_s7 + $0x1ad0] sm:$0xff] }
  0xeb   : > { %2104 = vst [vmem:[%s10596_s8 + $0xd60] sm:$0xff] %v2103_v44  ;;  %v2107_v46 = vld [vmem:[%s10591_s7 + $0x1ae0] sm:$0xff]  ;;  %v2109_v47 = vld [vmem:[%s10591_s7 + $0x1af0] sm:$0xff]  ;;  %2106 = vst [vmem:[%s10596_s8 + $0xd68] sm:$0xff] %v2105_v45 }
  0xec   : > { %2108 = vst [vmem:[%s10596_s8 + $0xd70] sm:$0xff] %v2107_v46  ;;  %2110 = vst [vmem:[%s10596_s8 + $0xd78] sm:$0xff] %v2109_v47  ;;  %v2111_v48 = vld [vmem:[%s10591_s7 + $0x1b00] sm:$0xff]  ;;  %v2113_v49 = vld [vmem:[%s10591_s7 + $0x1b10] sm:$0xff] }
  0xed   : > { %v2115_v50 = vld [vmem:[%s10591_s7 + $0x1b20] sm:$0xff]  ;;  %2112 = vst [vmem:[%s10596_s8 + $0xd80] sm:$0xff] %v2111_v48  ;;  %2114 = vst [vmem:[%s10596_s8 + $0xd88] sm:$0xff] %v2113_v49  ;;  %v2117_v51 = vld [vmem:[%s10591_s7 + $0x1b30] sm:$0xff] }
  0xee   : > { %2116 = vst [vmem:[%s10596_s8 + $0xd90] sm:$0xff] %v2115_v50  ;;  %v2119_v52 = vld [vmem:[%s10591_s7 + $0x1b40] sm:$0xff]  ;;  %v2121_v53 = vld [vmem:[%s10591_s7 + $0x1b50] sm:$0xff]  ;;  %2118 = vst [vmem:[%s10596_s8 + $0xd98] sm:$0xff] %v2117_v51 }
  0xef   : > { %2120 = vst [vmem:[%s10596_s8 + $0xda0] sm:$0xff] %v2119_v52  ;;  %2122 = vst [vmem:[%s10596_s8 + $0xda8] sm:$0xff] %v2121_v53  ;;  %v2123_v54 = vld [vmem:[%s10591_s7 + $0x1b60] sm:$0xff]  ;;  %v2125_v55 = vld [vmem:[%s10591_s7 + $0x1b70] sm:$0xff] }
  0xf0   : > { %v2127_v56 = vld [vmem:[%s10591_s7 + $0x1b80] sm:$0xff]  ;;  %2124 = vst [vmem:[%s10596_s8 + $0xdb0] sm:$0xff] %v2123_v54  ;;  %2126 = vst [vmem:[%s10596_s8 + $0xdb8] sm:$0xff] %v2125_v55  ;;  %v2129_v57 = vld [vmem:[%s10591_s7 + $0x1b90] sm:$0xff] }
  0xf1   : > { %2128 = vst [vmem:[%s10596_s8 + $0xdc0] sm:$0xff] %v2127_v56  ;;  %v2131_v58 = vld [vmem:[%s10591_s7 + $0x1ba0] sm:$0xff]  ;;  %v2133_v59 = vld [vmem:[%s10591_s7 + $0x1bb0] sm:$0xff]  ;;  %2130 = vst [vmem:[%s10596_s8 + $0xdc8] sm:$0xff] %v2129_v57 }
  0xf2   : > { %2132 = vst [vmem:[%s10596_s8 + $0xdd0] sm:$0xff] %v2131_v58  ;;  %2134 = vst [vmem:[%s10596_s8 + $0xdd8] sm:$0xff] %v2133_v59  ;;  %v2135_v60 = vld [vmem:[%s10591_s7 + $0x1bc0] sm:$0xff]  ;;  %v2137_v61 = vld [vmem:[%s10591_s7 + $0x1bd0] sm:$0xff] }
  0xf3   : > { %v2139_v62 = vld [vmem:[%s10591_s7 + $0x1be0] sm:$0xff]  ;;  %2136 = vst [vmem:[%s10596_s8 + $0xde0] sm:$0xff] %v2135_v60  ;;  %2138 = vst [vmem:[%s10596_s8 + $0xde8] sm:$0xff] %v2137_v61  ;;  %v2141_v63 = vld [vmem:[%s10591_s7 + $0x1bf0] sm:$0xff] }
  0xf4   : > { %2140 = vst [vmem:[%s10596_s8 + $0xdf0] sm:$0xff] %v2139_v62  ;;  %v2143_v0 = vld [vmem:[%s10591_s7 + $0x1c00] sm:$0xff]  ;;  %v2145_v1 = vld [vmem:[%s10591_s7 + $0x1c10] sm:$0xff]  ;;  %2142 = vst [vmem:[%s10596_s8 + $0xdf8] sm:$0xff] %v2141_v63 }
  0xf5   : > { %2144 = vst [vmem:[%s10596_s8 + $0xe00] sm:$0xff] %v2143_v0  ;;  %2146 = vst [vmem:[%s10596_s8 + $0xe08] sm:$0xff] %v2145_v1  ;;  %v2147_v2 = vld [vmem:[%s10591_s7 + $0x1c20] sm:$0xff]  ;;  %v2149_v3 = vld [vmem:[%s10591_s7 + $0x1c30] sm:$0xff] }
  0xf6   : > { %v2151_v4 = vld [vmem:[%s10591_s7 + $0x1c40] sm:$0xff]  ;;  %2148 = vst [vmem:[%s10596_s8 + $0xe10] sm:$0xff] %v2147_v2  ;;  %2150 = vst [vmem:[%s10596_s8 + $0xe18] sm:$0xff] %v2149_v3  ;;  %v2153_v5 = vld [vmem:[%s10591_s7 + $0x1c50] sm:$0xff] }
  0xf7   : > { %2152 = vst [vmem:[%s10596_s8 + $0xe20] sm:$0xff] %v2151_v4  ;;  %v2155_v6 = vld [vmem:[%s10591_s7 + $0x1c60] sm:$0xff]  ;;  %v2157_v7 = vld [vmem:[%s10591_s7 + $0x1c70] sm:$0xff]  ;;  %2154 = vst [vmem:[%s10596_s8 + $0xe28] sm:$0xff] %v2153_v5 }
  0xf8   : > { %2156 = vst [vmem:[%s10596_s8 + $0xe30] sm:$0xff] %v2155_v6  ;;  %2158 = vst [vmem:[%s10596_s8 + $0xe38] sm:$0xff] %v2157_v7  ;;  %v2159_v8 = vld [vmem:[%s10591_s7 + $0x1c80] sm:$0xff]  ;;  %v2161_v9 = vld [vmem:[%s10591_s7 + $0x1c90] sm:$0xff] }
  0xf9   : > { %v2163_v10 = vld [vmem:[%s10591_s7 + $0x1ca0] sm:$0xff]  ;;  %2160 = vst [vmem:[%s10596_s8 + $0xe40] sm:$0xff] %v2159_v8  ;;  %2162 = vst [vmem:[%s10596_s8 + $0xe48] sm:$0xff] %v2161_v9  ;;  %v2165_v11 = vld [vmem:[%s10591_s7 + $0x1cb0] sm:$0xff] }
  0xfa   : > { %2164 = vst [vmem:[%s10596_s8 + $0xe50] sm:$0xff] %v2163_v10  ;;  %v2167_v12 = vld [vmem:[%s10591_s7 + $0x1cc0] sm:$0xff]  ;;  %v2169_v13 = vld [vmem:[%s10591_s7 + $0x1cd0] sm:$0xff]  ;;  %2166 = vst [vmem:[%s10596_s8 + $0xe58] sm:$0xff] %v2165_v11 }
  0xfb   : > { %2168 = vst [vmem:[%s10596_s8 + $0xe60] sm:$0xff] %v2167_v12  ;;  %2170 = vst [vmem:[%s10596_s8 + $0xe68] sm:$0xff] %v2169_v13  ;;  %v2171_v14 = vld [vmem:[%s10591_s7 + $0x1ce0] sm:$0xff]  ;;  %v2173_v15 = vld [vmem:[%s10591_s7 + $0x1cf0] sm:$0xff] }
  0xfc   : > { %v2175_v16 = vld [vmem:[%s10591_s7 + $0x1d00] sm:$0xff]  ;;  %2172 = vst [vmem:[%s10596_s8 + $0xe70] sm:$0xff] %v2171_v14  ;;  %2174 = vst [vmem:[%s10596_s8 + $0xe78] sm:$0xff] %v2173_v15  ;;  %v2177_v17 = vld [vmem:[%s10591_s7 + $0x1d10] sm:$0xff] }
  0xfd   : > { %2176 = vst [vmem:[%s10596_s8 + $0xe80] sm:$0xff] %v2175_v16  ;;  %v2179_v18 = vld [vmem:[%s10591_s7 + $0x1d20] sm:$0xff]  ;;  %v2181_v19 = vld [vmem:[%s10591_s7 + $0x1d30] sm:$0xff]  ;;  %2178 = vst [vmem:[%s10596_s8 + $0xe88] sm:$0xff] %v2177_v17 }
  0xfe   : > { %2180 = vst [vmem:[%s10596_s8 + $0xe90] sm:$0xff] %v2179_v18  ;;  %2182 = vst [vmem:[%s10596_s8 + $0xe98] sm:$0xff] %v2181_v19  ;;  %v2183_v20 = vld [vmem:[%s10591_s7 + $0x1d40] sm:$0xff]  ;;  %v2185_v21 = vld [vmem:[%s10591_s7 + $0x1d50] sm:$0xff] }
  0xff   : > { %v2187_v22 = vld [vmem:[%s10591_s7 + $0x1d60] sm:$0xff]  ;;  %2184 = vst [vmem:[%s10596_s8 + $0xea0] sm:$0xff] %v2183_v20  ;;  %2186 = vst [vmem:[%s10596_s8 + $0xea8] sm:$0xff] %v2185_v21  ;;  %v2189_v23 = vld [vmem:[%s10591_s7 + $0x1d70] sm:$0xff] }
 0x100   : > { %2188 = vst [vmem:[%s10596_s8 + $0xeb0] sm:$0xff] %v2187_v22  ;;  %v2191_v24 = vld [vmem:[%s10591_s7 + $0x1d80] sm:$0xff]  ;;  %v2193_v25 = vld [vmem:[%s10591_s7 + $0x1d90] sm:$0xff]  ;;  %2190 = vst [vmem:[%s10596_s8 + $0xeb8] sm:$0xff] %v2189_v23 }
 0x101   : > { %2192 = vst [vmem:[%s10596_s8 + $0xec0] sm:$0xff] %v2191_v24  ;;  %2194 = vst [vmem:[%s10596_s8 + $0xec8] sm:$0xff] %v2193_v25  ;;  %v2195_v26 = vld [vmem:[%s10591_s7 + $0x1da0] sm:$0xff]  ;;  %v2197_v27 = vld [vmem:[%s10591_s7 + $0x1db0] sm:$0xff] }
 0x102   : > { %v2199_v28 = vld [vmem:[%s10591_s7 + $0x1dc0] sm:$0xff]  ;;  %2196 = vst [vmem:[%s10596_s8 + $0xed0] sm:$0xff] %v2195_v26  ;;  %2198 = vst [vmem:[%s10596_s8 + $0xed8] sm:$0xff] %v2197_v27  ;;  %v2201_v29 = vld [vmem:[%s10591_s7 + $0x1dd0] sm:$0xff] }
 0x103   : > { %2200 = vst [vmem:[%s10596_s8 + $0xee0] sm:$0xff] %v2199_v28  ;;  %v2203_v30 = vld [vmem:[%s10591_s7 + $0x1de0] sm:$0xff]  ;;  %v2205_v31 = vld [vmem:[%s10591_s7 + $0x1df0] sm:$0xff]  ;;  %2202 = vst [vmem:[%s10596_s8 + $0xee8] sm:$0xff] %v2201_v29 }
 0x104   : > { %2204 = vst [vmem:[%s10596_s8 + $0xef0] sm:$0xff] %v2203_v30  ;;  %2206 = vst [vmem:[%s10596_s8 + $0xef8] sm:$0xff] %v2205_v31  ;;  %v2207_v32 = vld [vmem:[%s10591_s7 + $0x1e00] sm:$0xff]  ;;  %v2209_v33 = vld [vmem:[%s10591_s7 + $0x1e10] sm:$0xff] }
 0x105   : > { %v2211_v34 = vld [vmem:[%s10591_s7 + $0x1e20] sm:$0xff]  ;;  %2208 = vst [vmem:[%s10596_s8 + $0xf00] sm:$0xff] %v2207_v32  ;;  %2210 = vst [vmem:[%s10596_s8 + $0xf08] sm:$0xff] %v2209_v33  ;;  %v2213_v35 = vld [vmem:[%s10591_s7 + $0x1e30] sm:$0xff] }
 0x106   : > { %2212 = vst [vmem:[%s10596_s8 + $0xf10] sm:$0xff] %v2211_v34  ;;  %v2215_v36 = vld [vmem:[%s10591_s7 + $0x1e40] sm:$0xff]  ;;  %v2217_v37 = vld [vmem:[%s10591_s7 + $0x1e50] sm:$0xff]  ;;  %2214 = vst [vmem:[%s10596_s8 + $0xf18] sm:$0xff] %v2213_v35 }
 0x107   : > { %2216 = vst [vmem:[%s10596_s8 + $0xf20] sm:$0xff] %v2215_v36  ;;  %2218 = vst [vmem:[%s10596_s8 + $0xf28] sm:$0xff] %v2217_v37  ;;  %v2219_v38 = vld [vmem:[%s10591_s7 + $0x1e60] sm:$0xff]  ;;  %v2221_v39 = vld [vmem:[%s10591_s7 + $0x1e70] sm:$0xff] }
 0x108   : > { %v2223_v40 = vld [vmem:[%s10591_s7 + $0x1e80] sm:$0xff]  ;;  %2220 = vst [vmem:[%s10596_s8 + $0xf30] sm:$0xff] %v2219_v38  ;;  %2222 = vst [vmem:[%s10596_s8 + $0xf38] sm:$0xff] %v2221_v39  ;;  %v2225_v41 = vld [vmem:[%s10591_s7 + $0x1e90] sm:$0xff] }
 0x109   : > { %2224 = vst [vmem:[%s10596_s8 + $0xf40] sm:$0xff] %v2223_v40  ;;  %v2227_v42 = vld [vmem:[%s10591_s7 + $0x1ea0] sm:$0xff]  ;;  %v2229_v43 = vld [vmem:[%s10591_s7 + $0x1eb0] sm:$0xff]  ;;  %2226 = vst [vmem:[%s10596_s8 + $0xf48] sm:$0xff] %v2225_v41 }
 0x10a   : > { %2228 = vst [vmem:[%s10596_s8 + $0xf50] sm:$0xff] %v2227_v42  ;;  %2230 = vst [vmem:[%s10596_s8 + $0xf58] sm:$0xff] %v2229_v43  ;;  %v2231_v44 = vld [vmem:[%s10591_s7 + $0x1ec0] sm:$0xff]  ;;  %v2233_v45 = vld [vmem:[%s10591_s7 + $0x1ed0] sm:$0xff] }
 0x10b   : > { %v2235_v46 = vld [vmem:[%s10591_s7 + $0x1ee0] sm:$0xff]  ;;  %2232 = vst [vmem:[%s10596_s8 + $0xf60] sm:$0xff] %v2231_v44  ;;  %2234 = vst [vmem:[%s10596_s8 + $0xf68] sm:$0xff] %v2233_v45  ;;  %v2237_v47 = vld [vmem:[%s10591_s7 + $0x1ef0] sm:$0xff] }
 0x10c   : > { %2236 = vst [vmem:[%s10596_s8 + $0xf70] sm:$0xff] %v2235_v46  ;;  %v2239_v48 = vld [vmem:[%s10591_s7 + $0x1f00] sm:$0xff]  ;;  %v2241_v49 = vld [vmem:[%s10591_s7 + $0x1f10] sm:$0xff]  ;;  %2238 = vst [vmem:[%s10596_s8 + $0xf78] sm:$0xff] %v2237_v47 }
 0x10d   : > { %2240 = vst [vmem:[%s10596_s8 + $0xf80] sm:$0xff] %v2239_v48  ;;  %2242 = vst [vmem:[%s10596_s8 + $0xf88] sm:$0xff] %v2241_v49  ;;  %v2243_v50 = vld [vmem:[%s10591_s7 + $0x1f20] sm:$0xff]  ;;  %v2245_v51 = vld [vmem:[%s10591_s7 + $0x1f30] sm:$0xff] }
 0x10e   : > { %v2247_v52 = vld [vmem:[%s10591_s7 + $0x1f40] sm:$0xff]  ;;  %2244 = vst [vmem:[%s10596_s8 + $0xf90] sm:$0xff] %v2243_v50  ;;  %2246 = vst [vmem:[%s10596_s8 + $0xf98] sm:$0xff] %v2245_v51  ;;  %v2249_v53 = vld [vmem:[%s10591_s7 + $0x1f50] sm:$0xff] }
 0x10f   : > { %2248 = vst [vmem:[%s10596_s8 + $0xfa0] sm:$0xff] %v2247_v52  ;;  %v2251_v54 = vld [vmem:[%s10591_s7 + $0x1f60] sm:$0xff]  ;;  %v2253_v55 = vld [vmem:[%s10591_s7 + $0x1f70] sm:$0xff]  ;;  %2250 = vst [vmem:[%s10596_s8 + $0xfa8] sm:$0xff] %v2249_v53 }
 0x110   : > { %2252 = vst [vmem:[%s10596_s8 + $0xfb0] sm:$0xff] %v2251_v54  ;;  %2254 = vst [vmem:[%s10596_s8 + $0xfb8] sm:$0xff] %v2253_v55  ;;  %v2255_v56 = vld [vmem:[%s10591_s7 + $0x1f80] sm:$0xff]  ;;  %v2257_v57 = vld [vmem:[%s10591_s7 + $0x1f90] sm:$0xff] }
 0x111   : > { %v2259_v58 = vld [vmem:[%s10591_s7 + $0x1fa0] sm:$0xff]  ;;  %2256 = vst [vmem:[%s10596_s8 + $0xfc0] sm:$0xff] %v2255_v56  ;;  %2258 = vst [vmem:[%s10596_s8 + $0xfc8] sm:$0xff] %v2257_v57  ;;  %v2261_v59 = vld [vmem:[%s10591_s7 + $0x1fb0] sm:$0xff] }
 0x112   : > { %2260 = vst [vmem:[%s10596_s8 + $0xfd0] sm:$0xff] %v2259_v58  ;;  %v2263_v60 = vld [vmem:[%s10591_s7 + $0x1fc0] sm:$0xff]  ;;  %v2265_v61 = vld [vmem:[%s10591_s7 + $0x1fd0] sm:$0xff]  ;;  %2262 = vst [vmem:[%s10596_s8 + $0xfd8] sm:$0xff] %v2261_v59 }
 0x113   : > { %2264 = vst [vmem:[%s10596_s8 + $0xfe0] sm:$0xff] %v2263_v60  ;;  %2266 = vst [vmem:[%s10596_s8 + $0xfe8] sm:$0xff] %v2265_v61  ;;  %v2267_v62 = vld [vmem:[%s10591_s7 + $0x1fe0] sm:$0xff]  ;;  %v2269_v63 = vld [vmem:[%s10591_s7 + $0x1ff0] sm:$0xff] }
 0x114   : > { %2268 = vst [vmem:[%s10596_s8 + $0xff0] sm:$0xff] %v2267_v62  ;;  %2270 = vst [vmem:[%s10596_s8 + $0xff8] sm:$0xff] %v2269_v63 }
 0x115 PF: > { %p8952_p7 = scmp.ge.s32.totalorder %s10517_s20, 1  ;;  %p4367_p8 = scmp.lt.s32.totalorder %s10517_s20, 3 }
 0x117   : > { %p4368_p9 = pnand %p8952_p7, %p4367_p8 }
 0x118   : > { %s4374_s9 = sand.u32 (!%p4368_p9), 1, %s10509_s18   ;;  %v11625_v0 = vld [vmem:[%s12465_s0] sm:$0xff] (!%p4368_p9) }
 0x119   : > { %4371 = sbr.rel (%p4368_p9) target bundleno = 1047 (0x417), region = 80  ;;  %v11630_v1 = vld [vmem:[%s12465_s0 + $0x80] sm:$0xff] (!%p4368_p9)  ;;  %s8953_s16 = sshll.u32 (!%p4368_p9), %s4374_s9, 12 }
 0x11a   : > { %v11635_v2 = vld [vmem:[%s12465_s0 + $0x40] sm:$0xff] (!%p4368_p9)  ;;  %v8957_v3 = vcombine.low (!%p4368_p9), %v11625_v0, %v11630_v1  ;;  %v8958_v4 = vcombine.high (!%p4368_p9), %v11625_v0, %v11630_v1  ;;  %s11652_s23 = scalar_lea.vmem (!%p4368_p9), [#allocation2], %s8953_s16  ;;  %s9669_s7 = smul.u32 (!%p4368_p9), 24, %s4374_s9 }
 0x11b   : > { %v11646_v5 = vld [vmem:[%s12465_s0 + $0xc0] sm:$0xff] (!%p4368_p9)  ;;  %v9701_v12 = vld [vmem:[%s11652_s23 + $0x14] ss:$8 sps:$4 sm:$0xff] (!%p4368_p9)   ;;  %v9705_v14 = vld [vmem:[%s11652_s23 + $0x10] ss:$8 sps:$4 sm:$0xff] (!%p4368_p9)  }
 0x11c   : > { %v8973_v6 = vcombine.low (!%p4368_p9), %v11635_v2, %v11646_v5  ;;  %v8974_v7 = vcombine.high (!%p4368_p9), %v11635_v2, %v11646_v5  ;;  %v9695_v8 = vld [vmem:[%s11652_s23 + $0x4] ss:$8 sps:$4 sm:$0xff] (!%p4368_p9)   ;;  %7865 = vmatprep.mubr.bf16.mxu1 (!%p4368_p9), %v8958_v4  ;;  %v9699_v10 = vld [vmem:[%s11652_s23] ss:$8 sps:$4 sm:$0xff] (!%p4368_p9)   ;;  %v9703_v13 = vld [vmem:[%s11652_s23 + $0x814] ss:$8 sps:$4 sm:$0xff] (!%p4368_p9)  }
 0x11d   : > { %v9697_v9 = vld [vmem:[%s11652_s23 + $0x804] ss:$8 sps:$4 sm:$0xff] (!%p4368_p9)   ;;  %7833 = vmatprep.subr.bf16.mxu1 (!%p4368_p9), %v9695_v8  ;;  %v9700_v11 = vld [vmem:[%s11652_s23 + $0x800] ss:$8 sps:$4 sm:$0xff] (!%p4368_p9)   ;;  %v9706_v15 = vld [vmem:[%s11652_s23 + $0x810] ss:$8 sps:$4 sm:$0xff] (!%p4368_p9)  }
 0x11e   : > { %8273 = vmatprep.mubr.bf16.mxu0 (!%p4368_p9), %v8974_v7  ;;  %8241 = vmatprep.subr.bf16.mxu0 (!%p4368_p9), %v9697_v9  ;;  %v9707_v16 = vld [vmem:[%s11652_s23 + $0x24] ss:$8 sps:$4 sm:$0xff] (!%p4368_p9)   ;;  %v9711_v18 = vld [vmem:[%s11652_s23 + $0x20] ss:$8 sps:$4 sm:$0xff] (!%p4368_p9)   ;;  %v9713_v20 = vld [vmem:[%s11652_s23 + $0x34] ss:$8 sps:$4 sm:$0xff] (!%p4368_p9)  }
 0x11f   : > { %7834 = vmatpush1.bf16.msra.mxu1 (!%p4368_p9), %v9699_v10  ;;  %8242 = vmatpush1.bf16.msra.mxu0 (!%p4368_p9), %v9700_v11  ;;  %v9709_v17 = vld [vmem:[%s11652_s23 + $0x824] ss:$8 sps:$4 sm:$0xff] (!%p4368_p9)   ;;  %v9712_v19 = vld [vmem:[%s11652_s23 + $0x820] ss:$8 sps:$4 sm:$0xff] (!%p4368_p9)   ;;  %v9715_v21 = vld [vmem:[%s11652_s23 + $0x834] ss:$8 sps:$4 sm:$0xff] (!%p4368_p9)  }
 0x120   : > { %7835 = vmatprep.subr.bf16.mxu1 %v9701_v12  ;;  %8243 = vmatprep.subr.bf16.mxu0 %v9703_v13  ;;  %v9717_v22 = vld [vmem:[%s11652_s23 + $0x30] ss:$8 sps:$4 sm:$0xff]   ;;  %v9719_v24 = vld [vmem:[%s11652_s23 + $0x44] ss:$8 sps:$4 sm:$0xff]   ;;  %v9723_v26 = vld [vmem:[%s11652_s23 + $0x40] ss:$8 sps:$4 sm:$0xff]  }
 0x121   : > { %v9718_v23 = vld [vmem:[%s11652_s23 + $0x830] ss:$8 sps:$4 sm:$0xff]   ;;  %v9721_v25 = vld [vmem:[%s11652_s23 + $0x844] ss:$8 sps:$4 sm:$0xff]   ;;  %v9724_v27 = vld [vmem:[%s11652_s23 + $0x840] ss:$8 sps:$4 sm:$0xff]  }
 0x122   : > { %v9725_v28 = vld [vmem:[%s11652_s23 + $0x54] ss:$8 sps:$4 sm:$0xff]   ;;  %v9729_v30 = vld [vmem:[%s11652_s23 + $0x50] ss:$8 sps:$4 sm:$0xff]   ;;  %v9731_v32 = vld [vmem:[%s11652_s23 + $0x64] ss:$8 sps:$4 sm:$0xff]  }
 0x123   : > { %7836 = vmatpush1.bf16.msra.mxu1 %v9705_v14  ;;  %8244 = vmatpush1.bf16.msra.mxu0 %v9706_v15  ;;  %v9727_v29 = vld [vmem:[%s11652_s23 + $0x854] ss:$8 sps:$4 sm:$0xff]   ;;  %v9730_v31 = vld [vmem:[%s11652_s23 + $0x850] ss:$8 sps:$4 sm:$0xff]   ;;  %v9733_v33 = vld [vmem:[%s11652_s23 + $0x864] ss:$8 sps:$4 sm:$0xff]  }
 0x124   : > { %7837 = vmatprep.subr.bf16.mxu1 %v9707_v16  ;;  %8245 = vmatprep.subr.bf16.mxu0 %v9709_v17  ;;  %v9735_v34 = vld [vmem:[%s11652_s23 + $0x60] ss:$8 sps:$4 sm:$0xff]   ;;  %v9737_v36 = vld [vmem:[%s11652_s23 + $0x74] ss:$8 sps:$4 sm:$0xff]   ;;  %v9741_v38 = vld [vmem:[%s11652_s23 + $0x70] ss:$8 sps:$4 sm:$0xff]  }
 0x125   : > { %v9736_v35 = vld [vmem:[%s11652_s23 + $0x860] ss:$8 sps:$4 sm:$0xff]   ;;  %v9739_v37 = vld [vmem:[%s11652_s23 + $0x874] ss:$8 sps:$4 sm:$0xff]   ;;  %v9742_v39 = vld [vmem:[%s11652_s23 + $0x870] ss:$8 sps:$4 sm:$0xff]  }
 0x126   : > { %v9743_v40 = vld [vmem:[%s11652_s23 + $0x84] ss:$8 sps:$4 sm:$0xff]   ;;  %v9747_v42 = vld [vmem:[%s11652_s23 + $0x80] ss:$8 sps:$4 sm:$0xff]   ;;  %v9749_v44 = vld [vmem:[%s11652_s23 + $0x94] ss:$8 sps:$4 sm:$0xff]  }
 0x127   : > { %7838 = vmatpush1.bf16.msra.mxu1 %v9711_v18  ;;  %8246 = vmatpush1.bf16.msra.mxu0 %v9712_v19  ;;  %v9745_v41 = vld [vmem:[%s11652_s23 + $0x884] ss:$8 sps:$4 sm:$0xff]   ;;  %v9748_v43 = vld [vmem:[%s11652_s23 + $0x880] ss:$8 sps:$4 sm:$0xff]   ;;  %v9751_v45 = vld [vmem:[%s11652_s23 + $0x894] ss:$8 sps:$4 sm:$0xff]  }
 0x128   : > { %7839 = vmatprep.subr.bf16.mxu1 %v9713_v20  ;;  %8247 = vmatprep.subr.bf16.mxu0 %v9715_v21  ;;  %v9753_v46 = vld [vmem:[%s11652_s23 + $0x90] ss:$8 sps:$4 sm:$0xff]   ;;  %v9755_v48 = vld [vmem:[%s11652_s23 + $0xa4] ss:$8 sps:$4 sm:$0xff]   ;;  %v9759_v50 = vld [vmem:[%s11652_s23 + $0xa0] ss:$8 sps:$4 sm:$0xff]  }
 0x129   : > { %v9754_v47 = vld [vmem:[%s11652_s23 + $0x890] ss:$8 sps:$4 sm:$0xff]   ;;  %v9757_v49 = vld [vmem:[%s11652_s23 + $0x8a4] ss:$8 sps:$4 sm:$0xff]   ;;  %v9760_v51 = vld [vmem:[%s11652_s23 + $0x8a0] ss:$8 sps:$4 sm:$0xff]  }
 0x12a   : > { %v9761_v52 = vld [vmem:[%s11652_s23 + $0xb4] ss:$8 sps:$4 sm:$0xff]   ;;  %v9765_v54 = vld [vmem:[%s11652_s23 + $0xb0] ss:$8 sps:$4 sm:$0xff]   ;;  %v9767_v56 = vld [vmem:[%s11652_s23 + $0xc4] ss:$8 sps:$4 sm:$0xff]  }
 0x12b   : > { %7840 = vmatpush1.bf16.msra.mxu1 %v9717_v22  ;;  %8248 = vmatpush1.bf16.msra.mxu0 %v9718_v23  ;;  %v9763_v53 = vld [vmem:[%s11652_s23 + $0x8b4] ss:$8 sps:$4 sm:$0xff]   ;;  %v9766_v55 = vld [vmem:[%s11652_s23 + $0x8b0] ss:$8 sps:$4 sm:$0xff]   ;;  %v9769_v57 = vld [vmem:[%s11652_s23 + $0x8c4] ss:$8 sps:$4 sm:$0xff]  }
 0x12c   : > { %7841 = vmatprep.subr.bf16.mxu1 %v9719_v24  ;;  %8249 = vmatprep.subr.bf16.mxu0 %v9721_v25  ;;  %v9771_v58 = vld [vmem:[%s11652_s23 + $0xc0] ss:$8 sps:$4 sm:$0xff]   ;;  %v9773_v60 = vld [vmem:[%s11652_s23 + $0xd4] ss:$8 sps:$4 sm:$0xff]   ;;  %v9777_v62 = vld [vmem:[%s11652_s23 + $0xd0] ss:$8 sps:$4 sm:$0xff]  }
 0x12d   : > { %v9772_v59 = vld [vmem:[%s11652_s23 + $0x8c0] ss:$8 sps:$4 sm:$0xff]   ;;  %v9775_v61 = vld [vmem:[%s11652_s23 + $0x8d4] ss:$8 sps:$4 sm:$0xff]   ;;  %v9778_v63 = vld [vmem:[%s11652_s23 + $0x8d0] ss:$8 sps:$4 sm:$0xff]  }
 0x12e   : > { %v9779_v4 = vld [vmem:[%s11652_s23 + $0xe4] ss:$8 sps:$4 sm:$0xff]   ;;  %v9783_v8 = vld [vmem:[%s11652_s23 + $0xe0] ss:$8 sps:$4 sm:$0xff]   ;;  %v9785_v10 = vld [vmem:[%s11652_s23 + $0xf4] ss:$8 sps:$4 sm:$0xff]  }
 0x12f   : > { %7842 = vmatpush1.bf16.msra.mxu1 %v9723_v26  ;;  %8250 = vmatpush1.bf16.msra.mxu0 %v9724_v27  ;;  %v9781_v7 = vld [vmem:[%s11652_s23 + $0x8e4] ss:$8 sps:$4 sm:$0xff]   ;;  %v9784_v9 = vld [vmem:[%s11652_s23 + $0x8e0] ss:$8 sps:$4 sm:$0xff]   ;;  %v9787_v11 = vld [vmem:[%s11652_s23 + $0x8f4] ss:$8 sps:$4 sm:$0xff]  }
 0x130   : > { %7843 = vmatprep.subr.bf16.mxu1 %v9725_v28  ;;  %8251 = vmatprep.subr.bf16.mxu0 %v9727_v29  ;;  %v9789_v12 = vld [vmem:[%s11652_s23 + $0xf0] ss:$8 sps:$4 sm:$0xff]   ;;  %v9793_v14 = vld [vmem:[%s11652_s23 + $0x104] ss:$8 sps:$4 sm:$0xff]   ;;  %v9791_v18 = vld [vmem:[%s11652_s23 + $0x100] ss:$8 sps:$4 sm:$0xff]  }
 0x131   : > { %v9790_v13 = vld [vmem:[%s11652_s23 + $0x8f0] ss:$8 sps:$4 sm:$0xff]   ;;  %v9796_v15 = vld [vmem:[%s11652_s23 + $0x904] ss:$8 sps:$4 sm:$0xff]   ;;  %v9794_v19 = vld [vmem:[%s11652_s23 + $0x900] ss:$8 sps:$4 sm:$0xff]  }
 0x132   : > { %v4461_v16 = vld [vmem:[%s12465_s0 + $0x100] sm:$0xff]  ;;  %v9799_v20 = vld [vmem:[%s11652_s23 + $0x114] ss:$8 sps:$4 sm:$0xff]   ;;  %v9797_v24 = vld [vmem:[%s11652_s23 + $0x110] ss:$8 sps:$4 sm:$0xff]   ;;  %s12431_s18 = scalar_lea.vmem [#allocation3], %s9669_s7 }
 0x133   : > { %7844 = vmatpush1.bf16.msra.mxu1 %v9729_v30  ;;  %8252 = vmatpush1.bf16.msra.mxu0 %v9730_v31  ;;  %v4469_v17 = vld [vmem:[%s12465_s0 + $0x140] sm:$0xff]  ;;  %v9802_v21 = vld [vmem:[%s11652_s23 + $0x914] ss:$8 sps:$4 sm:$0xff]   ;;  %v8990_v22 = vcombine.high %v4461_v16, %v4461_v16  ;;  %v9800_v25 = vld [vmem:[%s11652_s23 + $0x910] ss:$8 sps:$4 sm:$0xff]   ;;  %s9544_s14 = sshll.u32 (%p10581_p5), %s10566_s21, 3 }
 0x134   : > { %7845 = vmatprep.subr.bf16.mxu1 %v9731_v32  ;;  %8253 = vmatprep.subr.bf16.mxu0 %v9733_v33  ;;  %v9006_v23 = vcombine.high %v4469_v17, %v4469_v17  ;;  %v9805_v26 = vld [vmem:[%s11652_s23 + $0x124] ss:$8 sps:$4 sm:$0xff]   ;;  %v9803_v0 = vld [vmem:[%s11652_s23 + $0x120] ss:$8 sps:$4 sm:$0xff]   ;;  %v9005_v2 = vcombine.low %v4469_v17, %v4469_v17  ;;  %v9811_v5 = vld [vmem:[%s11652_s23 + $0x134] ss:$8 sps:$4 sm:$0xff]   ;;  %s8782_s17 = scalar_lea.vmem (%p10581_p5), %s12468_s3, %s9544_s14 }
 0x135   : > { %v9808_v27 = vld [vmem:[%s11652_s23 + $0x924] ss:$8 sps:$4 sm:$0xff]   ;;  %v9806_v1 = vld [vmem:[%s11652_s23 + $0x920] ss:$8 sps:$4 sm:$0xff]   ;;  %v9809_v28 = vld [vmem:[%s11652_s23 + $0x130] ss:$8 sps:$4 sm:$0xff]  }
 0x136   : > { %v9812_v29 = vld [vmem:[%s11652_s23 + $0x930] ss:$8 sps:$4 sm:$0xff]   ;;  %v9817_v30 = vld [vmem:[%s11652_s23 + $0x144] ss:$8 sps:$4 sm:$0xff]   ;;  %v9815_v32 = vld [vmem:[%s11652_s23 + $0x140] ss:$8 sps:$4 sm:$0xff]  }
 0x137   : > { %7846 = vmatpush1.bf16.msra.mxu1 %v9735_v34  ;;  %8254 = vmatpush1.bf16.msra.mxu0 %v9736_v35  ;;  %v9820_v31 = vld [vmem:[%s11652_s23 + $0x944] ss:$8 sps:$4 sm:$0xff]   ;;  %v9818_v33 = vld [vmem:[%s11652_s23 + $0x940] ss:$8 sps:$4 sm:$0xff]   ;;  %v9823_v34 = vld [vmem:[%s11652_s23 + $0x154] ss:$8 sps:$4 sm:$0xff]  }
 0x138   : > { %7847 = vmatprep.subr.bf16.mxu1 %v9737_v36  ;;  %8255 = vmatprep.subr.bf16.mxu0 %v9739_v37  ;;  %v9826_v35 = vld [vmem:[%s11652_s23 + $0x954] ss:$8 sps:$4 sm:$0xff]   ;;  %v9821_v36 = vld [vmem:[%s11652_s23 + $0x150] ss:$8 sps:$4 sm:$0xff]  }
 0x139   : > { %v9824_v37 = vld [vmem:[%s11652_s23 + $0x950] ss:$8 sps:$4 sm:$0xff]  }
 0x13a   : > { %v9872_v17 = vld [vmem:[%s11652_s23 + $0x9d0] ss:$8 sps:$4 sm:$0xff]  }
 0x13b   : > { %7848 = vmatpush1.bf16.msra.mxu1 %v9741_v38  ;;  %8256 = vmatpush1.bf16.msra.mxu0 %v9742_v39  ;;  %v9829_v38 = vld [vmem:[%s11652_s23 + $0x164] ss:$8 sps:$4 sm:$0xff]  }
 0x13c   : > { %7849 = vmatprep.subr.bf16.mxu1 %v9743_v40  ;;  %8257 = vmatprep.subr.bf16.mxu0 %v9745_v41  ;;  %v9832_v39 = vld [vmem:[%s11652_s23 + $0x964] ss:$8 sps:$4 sm:$0xff]  }
 0x13d   : > { %v11759_v40 = vld [vmem:[%s12465_s0 + $0x8] sm:$0xff] }
 0x13e   : > { %v11764_v41 = vld [vmem:[%s12465_s0 + $0x88] sm:$0xff] }
 0x13f   : > { %7850 = vmatpush1.bf16.msra.mxu1 %v9747_v42  ;;  %8258 = vmatpush1.bf16.msra.mxu0 %v9748_v43  ;;  %v9827_v42 = vld [vmem:[%s11652_s23 + $0x160] ss:$8 sps:$4 sm:$0xff]   ;;  %v8960_v43 = vcombine.high %v11759_v40, %v11764_v41 }
 0x140   : > { %7851 = vmatprep.subr.bf16.mxu1 %v9749_v44  ;;  %8259 = vmatprep.subr.bf16.mxu0 %v9751_v45  ;;  %v9830_v44 = vld [vmem:[%s11652_s23 + $0x960] ss:$8 sps:$4 sm:$0xff]  }
 0x141   : > { %v11773_v45 = vld [vmem:[%s12465_s0 + $0x48] sm:$0xff] }
 0x143   : > { %7852 = vmatpush1.bf16.msra.mxu1 %v9753_v46  ;;  %8260 = vmatpush1.bf16.msra.mxu0 %v9754_v47  ;;  %v11778_v46 = vld [vmem:[%s12465_s0 + $0xc8] sm:$0xff]  ;;  %v9835_v47 = vld [vmem:[%s11652_s23 + $0x174] ss:$8 sps:$4 sm:$0xff]  }
 0x144   : > { %7853 = vmatprep.subr.bf16.mxu1 %v9755_v48  ;;  %8261 = vmatprep.subr.bf16.mxu0 %v9757_v49  ;;  %v8976_v48 = vcombine.high %v11773_v45, %v11778_v46  ;;  %v9838_v49 = vld [vmem:[%s11652_s23 + $0x974] ss:$8 sps:$4 sm:$0xff]  }
 0x147   : > { %7854 = vmatpush1.bf16.msra.mxu1 %v9759_v50  ;;  %8262 = vmatpush1.bf16.msra.mxu0 %v9760_v51  ;;  %v9833_v50 = vld [vmem:[%s11652_s23 + $0x170] ss:$8 sps:$4 sm:$0xff]  }
 0x148   : > { %7855 = vmatprep.subr.bf16.mxu1 %v9761_v52  ;;  %8263 = vmatprep.subr.bf16.mxu0 %v9763_v53  ;;  %v9836_v51 = vld [vmem:[%s11652_s23 + $0x970] ss:$8 sps:$4 sm:$0xff]   ;;  %v9841_v52 = vld [vmem:[%s11652_s23 + $0x184] ss:$8 sps:$4 sm:$0xff]  }
 0x149   : > { %v9844_v53 = vld [vmem:[%s11652_s23 + $0x984] ss:$8 sps:$4 sm:$0xff]  }
 0x14b   : > { %7856 = vmatpush1.bf16.msra.mxu1 %v9765_v54  ;;  %8264 = vmatpush1.bf16.msra.mxu0 %v9766_v55  ;;  %v9839_v54 = vld [vmem:[%s11652_s23 + $0x180] ss:$8 sps:$4 sm:$0xff]  }
 0x14c   : > { %7857 = vmatprep.subr.bf16.mxu1 %v9767_v56  ;;  %8265 = vmatprep.subr.bf16.mxu0 %v9769_v57  ;;  %v9842_v55 = vld [vmem:[%s11652_s23 + $0x980] ss:$8 sps:$4 sm:$0xff]   ;;  %v9847_v56 = vld [vmem:[%s11652_s23 + $0x194] ss:$8 sps:$4 sm:$0xff]  }
 0x14d   : > { %v9850_v57 = vld [vmem:[%s11652_s23 + $0x994] ss:$8 sps:$4 sm:$0xff]  }
 0x14f   : > { %7858 = vmatpush1.bf16.msra.mxu1 %v9771_v58  ;;  %8266 = vmatpush1.bf16.msra.mxu0 %v9772_v59  ;;  %v9845_v58 = vld [vmem:[%s11652_s23 + $0x190] ss:$8 sps:$4 sm:$0xff]  }
 0x150   : > { %7859 = vmatprep.subr.bf16.mxu1 %v9773_v60  ;;  %8267 = vmatprep.subr.bf16.mxu0 %v9775_v61  ;;  %v9848_v59 = vld [vmem:[%s11652_s23 + $0x990] ss:$8 sps:$4 sm:$0xff]   ;;  %v9853_v60 = vld [vmem:[%s11652_s23 + $0x1a4] ss:$8 sps:$4 sm:$0xff]  }
 0x151   : > { %v9856_v61 = vld [vmem:[%s11652_s23 + $0x9a4] ss:$8 sps:$4 sm:$0xff]  }
 0x153   : > { %7860 = vmatpush1.bf16.msra.mxu1 %v9777_v62  ;;  %8268 = vmatpush1.bf16.msra.mxu0 %v9778_v63  ;;  %v9851_v62 = vld [vmem:[%s11652_s23 + $0x1a0] ss:$8 sps:$4 sm:$0xff]  }
 0x154   : > { %7861 = vmatprep.subr.bf16.mxu1 %v9779_v4  ;;  %8269 = vmatprep.subr.bf16.mxu0 %v9781_v7  ;;  %v9854_v63 = vld [vmem:[%s11652_s23 + $0x9a0] ss:$8 sps:$4 sm:$0xff]   ;;  %v9859_v4 = vld [vmem:[%s11652_s23 + $0x1b4] ss:$8 sps:$4 sm:$0xff]  }
 0x155   : > { %v9862_v7 = vld [vmem:[%s11652_s23 + $0x9b4] ss:$8 sps:$4 sm:$0xff]  }
 0x157   : > { %7862 = vmatpush1.bf16.msra.mxu1 %v9783_v8  ;;  %8270 = vmatpush1.bf16.msra.mxu0 %v9784_v9  ;;  %v9857_v8 = vld [vmem:[%s11652_s23 + $0x1b0] ss:$8 sps:$4 sm:$0xff]  }
 0x158   : > { %7863 = vmatprep.subr.bf16.mxu1 %v9785_v10  ;;  %8271 = vmatprep.subr.bf16.mxu0 %v9787_v11  ;;  %v9860_v9 = vld [vmem:[%s11652_s23 + $0x9b0] ss:$8 sps:$4 sm:$0xff]   ;;  %v9865_v10 = vld [vmem:[%s11652_s23 + $0x1c4] ss:$8 sps:$4 sm:$0xff]  }
 0x159   : > { %v9868_v11 = vld [vmem:[%s11652_s23 + $0x9c4] ss:$8 sps:$4 sm:$0xff]  }
 0x15b   : > { %7864 = vmatpush1.bf16.msra.mxu1 %v9789_v12  ;;  %8272 = vmatpush1.bf16.msra.mxu0 %v9790_v13  ;;  %v9863_v12 = vld [vmem:[%s11652_s23 + $0x1c0] ss:$8 sps:$4 sm:$0xff]  }
 0x15c   : > { %7884 = vmatprep.subr.bf16.mxu1 %v9793_v14  ;;  %8292 = vmatprep.subr.bf16.mxu0 %v9796_v15  ;;  %v9866_v13 = vld [vmem:[%s11652_s23 + $0x9c0] ss:$8 sps:$4 sm:$0xff]   ;;  %v9871_v14 = vld [vmem:[%s11652_s23 + $0x1d4] ss:$8 sps:$4 sm:$0xff]  }
 0x15d   : > { %v9874_v15 = vld [vmem:[%s11652_s23 + $0x9d4] ss:$8 sps:$4 sm:$0xff]  }
 0x15e   : > { %7866 = vmatmul.mubr.bf16.vlgmr.msra.gmra.mrb[0].mxu1 %v8957_v3  ;;  %8274 = vmatmul.mubr.bf16.vlgmr.msra.gmra.mrb[0].mxu0 %v8973_v6  ;;  %v8989_v3 = vcombine.low %v4461_v16, %v4461_v16  ;;  %v9814_v6 = vld [vmem:[%s11652_s23 + $0x934] ss:$8 sps:$4 sm:$0xff]   ;;  %v9869_v16 = vld [vmem:[%s11652_s23 + $0x1d0] ss:$8 sps:$4 sm:$0xff]  }
 0x15f   : > { %7885 = vmatpush1.bf16.msra.mxu1 %v9791_v18  ;;  %8293 = vmatpush1.bf16.msra.mxu0 %v9794_v19  ;;  %v9878_v18 = vld [vmem:[%s11652_s23 + $0x1e4] ss:$8 sps:$4 sm:$0xff]  }
 0x160   : > { %7886 = vmatprep.subr.bf16.mxu1 %v9799_v20  ;;  %8294 = vmatprep.subr.bf16.mxu0 %v9802_v21  ;;  %v9882_v19 = vld [vmem:[%s11652_s23 + $0x9e4] ss:$8 sps:$4 sm:$0xff]   ;;  %v9876_v20 = vld [vmem:[%s11652_s23 + $0x1e0] ss:$8 sps:$4 sm:$0xff]  }
 0x161   : > { %7875 = vmatprep.mubr.bf16.mxu1 %v8990_v22  ;;  %8283 = vmatprep.mubr.bf16.mxu0 %v9006_v23  ;;  %v9880_v21 = vld [vmem:[%s11652_s23 + $0x9e0] ss:$8 sps:$4 sm:$0xff]   ;;  %v9887_v22 = vld [vmem:[%s11652_s23 + $0x1f4] ss:$8 sps:$4 sm:$0xff]  }
 0x162   : > { %v9890_v23 = vld [vmem:[%s11652_s23 + $0x9f4] ss:$8 sps:$4 sm:$0xff]  }
 0x163   : > { %7887 = vmatpush1.bf16.msra.mxu1 %v9797_v24  ;;  %8295 = vmatpush1.bf16.msra.mxu0 %v9800_v25  ;;  %v9885_v24 = vld [vmem:[%s11652_s23 + $0x1f0] ss:$8 sps:$4 sm:$0xff]  }
 0x164   : > { %7888 = vmatprep.subr.bf16.mxu1 %v9805_v26  ;;  %8296 = vmatprep.subr.bf16.mxu0 %v9808_v27  ;;  %v9888_v25 = vld [vmem:[%s11652_s23 + $0x9f0] ss:$8 sps:$4 sm:$0xff]   ;;  %v9893_v26 = vld [vmem:[%s11652_s23 + $0x204] ss:$8 sps:$4 sm:$0xff]  }
 0x165   : > { %v9896_v27 = vld [vmem:[%s11652_s23 + $0xa04] ss:$8 sps:$4 sm:$0xff]  }
 0x166   : > { %7876 = vmatmul.mubr.bf16.gmra.mrb[4].mxu1 %v8989_v3  ;;  %8284 = vmatmul.mubr.bf16.gmra.mrb[4].mxu0 %v9005_v2  ;;  %v8975_v3 = vcombine.low %v11773_v45, %v11778_v46  ;;  %v4470_v2 = vld [vmem:[%s12465_s0 + $0x148] sm:$0xff]  ;;  %v9914_v45 = vld [vmem:[%s11652_s23 + $0xa34] ss:$8 sps:$4 sm:$0xff]  }
 0x167   : > { %7889 = vmatpush1.bf16.msra.mxu1 %v9803_v0  ;;  %8297 = vmatpush1.bf16.msra.mxu0 %v9806_v1  ;;  %v4462_v0 = vld [vmem:[%s12465_s0 + $0x108] sm:$0xff]  ;;  %v8959_v1 = vcombine.low %v11759_v40, %v11764_v41  ;;  %v9007_v40 = vcombine.low %v4470_v2, %v4470_v2  ;;  %v11856_v41 = vld [vmem:[%s12465_s0 + $0xd0] sm:$0xff] }
 0x168   : > { %7890 = vmatprep.subr.bf16.mxu1 %v9811_v5  ;;  %8298 = vmatprep.subr.bf16.mxu0 %v9814_v6  ;;  %v9891_v5 = vld [vmem:[%s11652_s23 + $0x200] ss:$8 sps:$4 sm:$0xff]  }
 0x169   : > { %7916 = vmatprep.mubr.bf16.mxu1 %v8960_v43  ;;  %8324 = vmatprep.mubr.bf16.mxu0 %v8976_v48  ;;  %v9894_v6 = vld [vmem:[%s11652_s23 + $0xa00] ss:$8 sps:$4 sm:$0xff]   ;;  %v9909_v48 = vld [vmem:[%s11652_s23 + $0x230] ss:$8 sps:$4 sm:$0xff]  }
 0x16a   : > { %v9906_v43 = vld [vmem:[%s11652_s23 + $0xa20] ss:$8 sps:$4 sm:$0xff]  }
 0x16b   : > { %7891 = vmatpush1.bf16.msra.mxu1 %v9809_v28  ;;  %8299 = vmatpush1.bf16.msra.mxu0 %v9812_v29  ;;  %v9899_v28 = vld [vmem:[%s11652_s23 + $0x214] ss:$8 sps:$4 sm:$0xff]  }
 0x16c   : > { %7892 = vmatprep.subr.bf16.mxu1 %v9817_v30  ;;  %8300 = vmatprep.subr.bf16.mxu0 %v9820_v31  ;;  %v9902_v29 = vld [vmem:[%s11652_s23 + $0xa14] ss:$8 sps:$4 sm:$0xff]   ;;  %v8992_v30 = vcombine.high %v4462_v0, %v4462_v0  ;;  %v9008_v31 = vcombine.high %v4470_v2, %v4470_v2  ;;  %v9972_v2 = vld [vmem:[%s11652_s23 + $0xad0] ss:$8 sps:$4 sm:$0xff]  }
 0x16f   : > { %7893 = vmatpush1.bf16.msra.mxu1 %v9815_v32  ;;  %8301 = vmatpush1.bf16.msra.mxu0 %v9818_v33  ;;  %v9897_v32 = vld [vmem:[%s11652_s23 + $0x210] ss:$8 sps:$4 sm:$0xff]  }
 0x170   : > { %7894 = vmatprep.subr.bf16.mxu1 %v9823_v34  ;;  %8302 = vmatprep.subr.bf16.mxu0 %v9826_v35  ;;  %v9900_v33 = vld [vmem:[%s11652_s23 + $0xa10] ss:$8 sps:$4 sm:$0xff]   ;;  %v9905_v34 = vld [vmem:[%s11652_s23 + $0x224] ss:$8 sps:$4 sm:$0xff]  }
 0x171   : > { %v9908_v35 = vld [vmem:[%s11652_s23 + $0xa24] ss:$8 sps:$4 sm:$0xff]  }
 0x173   : > { %7895 = vmatpush1.bf16.msra.mxu1 %v9821_v36  ;;  %8303 = vmatpush1.bf16.msra.mxu0 %v9824_v37  ;;  %v11841_v36 = vld [vmem:[%s12465_s0 + $0x10] sm:$0xff] }
 0x174   : > { %7896 = vmatprep.subr.bf16.mxu1 %v9829_v38  ;;  %8304 = vmatprep.subr.bf16.mxu0 %v9832_v39  ;;  %v11846_v37 = vld [vmem:[%s12465_s0 + $0x90] sm:$0xff]  ;;  %v8991_v39 = vcombine.low %v4462_v0, %v4462_v0 }
 0x175   : > { %v11851_v38 = vld [vmem:[%s12465_s0 + $0x50] sm:$0xff]  ;;  %v8962_v46 = vcombine.high %v11841_v36, %v11846_v37 }
 0x176   : > { %v9971_v0 = vld [vmem:[%s11652_s23 + $0x2d4] ss:$8 sps:$4 sm:$0xff]  }
 0x177   : > { %7897 = vmatpush1.bf16.msra.mxu1 %v9827_v42  ;;  %8305 = vmatpush1.bf16.msra.mxu0 %v9830_v44  ;;  %v9903_v42 = vld [vmem:[%s11652_s23 + $0x220] ss:$8 sps:$4 sm:$0xff]   ;;  %v9911_v44 = vld [vmem:[%s11652_s23 + $0x234] ss:$8 sps:$4 sm:$0xff]  }
 0x178   : > { %7898 = vmatprep.subr.bf16.mxu1 %v9835_v47  ;;  %8306 = vmatprep.subr.bf16.mxu0 %v9838_v49  ;;  %v8978_v47 = vcombine.high %v11851_v38, %v11856_v41  ;;  %v9912_v49 = vld [vmem:[%s11652_s23 + $0xa30] ss:$8 sps:$4 sm:$0xff]  }
 0x17b   : > { %7899 = vmatpush1.bf16.msra.mxu1 %v9833_v50  ;;  %8307 = vmatpush1.bf16.msra.mxu0 %v9836_v51  ;;  %v9917_v50 = vld [vmem:[%s11652_s23 + $0x244] ss:$8 sps:$4 sm:$0xff]  }
 0x17c   : > { %7900 = vmatprep.subr.bf16.mxu1 %v9841_v52  ;;  %8308 = vmatprep.subr.bf16.mxu0 %v9844_v53  ;;  %v9920_v51 = vld [vmem:[%s11652_s23 + $0xa44] ss:$8 sps:$4 sm:$0xff]   ;;  %v9915_v52 = vld [vmem:[%s11652_s23 + $0x240] ss:$8 sps:$4 sm:$0xff]  }
 0x17d   : > { %v9918_v53 = vld [vmem:[%s11652_s23 + $0xa40] ss:$8 sps:$4 sm:$0xff]  }
 0x17f   : > { %7901 = vmatpush1.bf16.msra.mxu1 %v9839_v54  ;;  %8309 = vmatpush1.bf16.msra.mxu0 %v9842_v55  ;;  %v9923_v54 = vld [vmem:[%s11652_s23 + $0x254] ss:$8 sps:$4 sm:$0xff]  }
 0x180   : > { %7902 = vmatprep.subr.bf16.mxu1 %v9847_v56  ;;  %8310 = vmatprep.subr.bf16.mxu0 %v9850_v57  ;;  %v9926_v55 = vld [vmem:[%s11652_s23 + $0xa54] ss:$8 sps:$4 sm:$0xff]   ;;  %v9921_v56 = vld [vmem:[%s11652_s23 + $0x250] ss:$8 sps:$4 sm:$0xff]  }
 0x181   : > { %v9924_v57 = vld [vmem:[%s11652_s23 + $0xa50] ss:$8 sps:$4 sm:$0xff]  }
 0x183   : > { %7903 = vmatpush1.bf16.msra.mxu1 %v9845_v58  ;;  %8311 = vmatpush1.bf16.msra.mxu0 %v9848_v59  ;;  %v9929_v58 = vld [vmem:[%s11652_s23 + $0x264] ss:$8 sps:$4 sm:$0xff]  }
 0x184   : > { %7904 = vmatprep.subr.bf16.mxu1 %v9853_v60  ;;  %8312 = vmatprep.subr.bf16.mxu0 %v9856_v61  ;;  %v9932_v59 = vld [vmem:[%s11652_s23 + $0xa64] ss:$8 sps:$4 sm:$0xff]   ;;  %v9927_v60 = vld [vmem:[%s11652_s23 + $0x260] ss:$8 sps:$4 sm:$0xff]  }
 0x185   : > { %v9930_v61 = vld [vmem:[%s11652_s23 + $0xa60] ss:$8 sps:$4 sm:$0xff]  }
 0x187   : > { %7905 = vmatpush1.bf16.msra.mxu1 %v9851_v62  ;;  %8313 = vmatpush1.bf16.msra.mxu0 %v9854_v63  ;;  %v9935_v62 = vld [vmem:[%s11652_s23 + $0x274] ss:$8 sps:$4 sm:$0xff]  }
 0x188   : > { %7906 = vmatprep.subr.bf16.mxu1 %v9859_v4  ;;  %8314 = vmatprep.subr.bf16.mxu0 %v9862_v7  ;;  %v9938_v63 = vld [vmem:[%s11652_s23 + $0xa74] ss:$8 sps:$4 sm:$0xff]   ;;  %v9933_v4 = vld [vmem:[%s11652_s23 + $0x270] ss:$8 sps:$4 sm:$0xff]  }
 0x189   : > { %v9936_v7 = vld [vmem:[%s11652_s23 + $0xa70] ss:$8 sps:$4 sm:$0xff]  }
 0x18b   : > { %7907 = vmatpush1.bf16.msra.mxu1 %v9857_v8  ;;  %8315 = vmatpush1.bf16.msra.mxu0 %v9860_v9  ;;  %v9941_v8 = vld [vmem:[%s11652_s23 + $0x284] ss:$8 sps:$4 sm:$0xff]  }
 0x18c   : > { %7908 = vmatprep.subr.bf16.mxu1 %v9865_v10  ;;  %8316 = vmatprep.subr.bf16.mxu0 %v9868_v11  ;;  %v9944_v9 = vld [vmem:[%s11652_s23 + $0xa84] ss:$8 sps:$4 sm:$0xff]   ;;  %v9939_v10 = vld [vmem:[%s11652_s23 + $0x280] ss:$8 sps:$4 sm:$0xff]  }
 0x18d   : > { %v9942_v11 = vld [vmem:[%s11652_s23 + $0xa80] ss:$8 sps:$4 sm:$0xff]  }
 0x18f   : > { %7909 = vmatpush1.bf16.msra.mxu1 %v9863_v12  ;;  %8317 = vmatpush1.bf16.msra.mxu0 %v9866_v13  ;;  %v9947_v12 = vld [vmem:[%s11652_s23 + $0x294] ss:$8 sps:$4 sm:$0xff]  }
 0x190   : > { %7910 = vmatprep.subr.bf16.mxu1 %v9871_v14  ;;  %8318 = vmatprep.subr.bf16.mxu0 %v9874_v15  ;;  %v9950_v13 = vld [vmem:[%s11652_s23 + $0xa94] ss:$8 sps:$4 sm:$0xff]   ;;  %v9945_v14 = vld [vmem:[%s11652_s23 + $0x290] ss:$8 sps:$4 sm:$0xff]  }
 0x191   : > { %v9948_v15 = vld [vmem:[%s11652_s23 + $0xa90] ss:$8 sps:$4 sm:$0xff]  }
 0x193   : > { %7911 = vmatpush1.bf16.msra.mxu1 %v9869_v16  ;;  %8319 = vmatpush1.bf16.msra.mxu0 %v9872_v17  ;;  %v9953_v16 = vld [vmem:[%s11652_s23 + $0x2a4] ss:$8 sps:$4 sm:$0xff]  }
 0x194   : > { %7912 = vmatprep.subr.bf16.mxu1 %v9878_v18  ;;  %8320 = vmatprep.subr.bf16.mxu0 %v9882_v19  ;;  %v9956_v17 = vld [vmem:[%s11652_s23 + $0xaa4] ss:$8 sps:$4 sm:$0xff]   ;;  %v9951_v18 = vld [vmem:[%s11652_s23 + $0x2a0] ss:$8 sps:$4 sm:$0xff]  }
 0x195   : > { %v9954_v19 = vld [vmem:[%s11652_s23 + $0xaa0] ss:$8 sps:$4 sm:$0xff]  }
 0x197   : > { %7913 = vmatpush1.bf16.msra.mxu1 %v9876_v20  ;;  %8321 = vmatpush1.bf16.msra.mxu0 %v9880_v21  ;;  %v9959_v20 = vld [vmem:[%s11652_s23 + $0x2b4] ss:$8 sps:$4 sm:$0xff]  }
 0x198   : > { %7914 = vmatprep.subr.bf16.mxu1 %v9887_v22  ;;  %8322 = vmatprep.subr.bf16.mxu0 %v9890_v23  ;;  %v9962_v21 = vld [vmem:[%s11652_s23 + $0xab4] ss:$8 sps:$4 sm:$0xff]   ;;  %v9957_v22 = vld [vmem:[%s11652_s23 + $0x2b0] ss:$8 sps:$4 sm:$0xff]  }
 0x199   : > { %v9960_v23 = vld [vmem:[%s11652_s23 + $0xab0] ss:$8 sps:$4 sm:$0xff]  }
 0x19b   : > { %7915 = vmatpush1.bf16.msra.mxu1 %v9885_v24  ;;  %8323 = vmatpush1.bf16.msra.mxu0 %v9888_v25  ;;  %v9965_v24 = vld [vmem:[%s11652_s23 + $0x2c4] ss:$8 sps:$4 sm:$0xff]  }
 0x19c   : > { %7935 = vmatprep.subr.bf16.mxu1 %v9893_v26  ;;  %8343 = vmatprep.subr.bf16.mxu0 %v9896_v27  ;;  %v9968_v25 = vld [vmem:[%s11652_s23 + $0xac4] ss:$8 sps:$4 sm:$0xff]   ;;  %v9963_v26 = vld [vmem:[%s11652_s23 + $0x2c0] ss:$8 sps:$4 sm:$0xff]  }
 0x19d   : > { %v9966_v27 = vld [vmem:[%s11652_s23 + $0xac0] ss:$8 sps:$4 sm:$0xff]  }
 0x19e   : > { %7917 = vmatmul.mubr.bf16.vlgmr.msra.gmra.mrb[0].mxu1 %v8959_v1  ;;  %8325 = vmatmul.mubr.bf16.vlgmr.msra.gmra.mrb[0].mxu0 %v8975_v3  ;;  %v9974_v1 = vld [vmem:[%s11652_s23 + $0xad4] ss:$8 sps:$4 sm:$0xff]   ;;  %v9969_v3 = vld [vmem:[%s11652_s23 + $0x2d0] ss:$8 sps:$4 sm:$0xff]  }
 0x19f   : > { %7936 = vmatpush1.bf16.msra.mxu1 %v9891_v5  ;;  %8344 = vmatpush1.bf16.msra.mxu0 %v9894_v6  ;;  %v9978_v5 = vld [vmem:[%s11652_s23 + $0x2e4] ss:$8 sps:$4 sm:$0xff]  }
 0x1a0   : > { %7937 = vmatprep.subr.bf16.mxu1 %v9899_v28  ;;  %8345 = vmatprep.subr.bf16.mxu0 %v9902_v29  ;;  %v9982_v6 = vld [vmem:[%s11652_s23 + $0xae4] ss:$8 sps:$4 sm:$0xff]   ;;  %v9976_v28 = vld [vmem:[%s11652_s23 + $0x2e0] ss:$8 sps:$4 sm:$0xff]  }
 0x1a1   : > { %7926 = vmatprep.mubr.bf16.mxu1 %v8992_v30  ;;  %8334 = vmatprep.mubr.bf16.mxu0 %v9008_v31  ;;  %v9980_v29 = vld [vmem:[%s11652_s23 + $0xae0] ss:$8 sps:$4 sm:$0xff]   ;;  %v9987_v30 = vld [vmem:[%s11652_s23 + $0x2f4] ss:$8 sps:$4 sm:$0xff]  }
 0x1a2   : > { %v9990_v31 = vld [vmem:[%s11652_s23 + $0xaf4] ss:$8 sps:$4 sm:$0xff]  }
 0x1a3   : > { %7938 = vmatpush1.bf16.msra.mxu1 %v9897_v32  ;;  %8346 = vmatpush1.bf16.msra.mxu0 %v9900_v33  ;;  %v9985_v32 = vld [vmem:[%s11652_s23 + $0x2f0] ss:$8 sps:$4 sm:$0xff]  }
 0x1a4   : > { %7939 = vmatprep.subr.bf16.mxu1 %v9905_v34  ;;  %8347 = vmatprep.subr.bf16.mxu0 %v9908_v35  ;;  %v9988_v33 = vld [vmem:[%s11652_s23 + $0xaf0] ss:$8 sps:$4 sm:$0xff]   ;;  %v9993_v34 = vld [vmem:[%s11652_s23 + $0x304] ss:$8 sps:$4 sm:$0xff]  }
 0x1a5   : > { %v9996_v35 = vld [vmem:[%s11652_s23 + $0xb04] ss:$8 sps:$4 sm:$0xff]  }
 0x1a6   : > { %7927 = vmatmul.mubr.bf16.gmra.mrb[4].mxu1 %v8991_v39  ;;  %8335 = vmatmul.mubr.bf16.gmra.mrb[4].mxu0 %v9007_v40  ;;  %v9991_v39 = vld [vmem:[%s11652_s23 + $0x300] ss:$8 sps:$4 sm:$0xff]  }
 0x1a7   : > { %7940 = vmatpush1.bf16.msra.mxu1 %v9903_v42  ;;  %8348 = vmatpush1.bf16.msra.mxu0 %v9906_v43  ;;  %v9994_v40 = vld [vmem:[%s11652_s23 + $0xb00] ss:$8 sps:$4 sm:$0xff]   ;;  %v8961_v42 = vcombine.low %v11841_v36, %v11846_v37  ;;  %v8977_v43 = vcombine.low %v11851_v38, %v11856_v41  ;;  %v10002_v36 = vld [vmem:[%s11652_s23 + $0xb14] ss:$8 sps:$4 sm:$0xff]   ;;  %v9997_v41 = vld [vmem:[%s11652_s23 + $0x310] ss:$8 sps:$4 sm:$0xff]  }
 0x1a8   : > { %7941 = vmatprep.subr.bf16.mxu1 %v9911_v44  ;;  %8349 = vmatprep.subr.bf16.mxu0 %v9914_v45  ;;  %v4463_v44 = vld [vmem:[%s12465_s0 + $0x110] sm:$0xff] }
 0x1a9   : > { %7967 = vmatprep.mubr.bf16.mxu1 %v8962_v46  ;;  %8375 = vmatprep.mubr.bf16.mxu0 %v8978_v47  ;;  %v4471_v45 = vld [vmem:[%s12465_s0 + $0x150] sm:$0xff]  ;;  %v8994_v37 = vcombine.high %v4463_v44, %v4463_v44 }
 0x1aa   : > { %v9999_v46 = vld [vmem:[%s11652_s23 + $0x314] ss:$8 sps:$4 sm:$0xff]   ;;  %v9010_v38 = vcombine.high %v4471_v45, %v4471_v45  ;;  %v10000_v47 = vld [vmem:[%s11652_s23 + $0xb10] ss:$8 sps:$4 sm:$0xff]  }
 0x1ab   : > { %7942 = vmatpush1.bf16.msra.mxu1 %v9909_v48  ;;  %8350 = vmatpush1.bf16.msra.mxu0 %v9912_v49  ;;  %v10005_v48 = vld [vmem:[%s11652_s23 + $0x324] ss:$8 sps:$4 sm:$0xff]  }
 0x1ac   : > { %7943 = vmatprep.subr.bf16.mxu1 %v9917_v50  ;;  %8351 = vmatprep.subr.bf16.mxu0 %v9920_v51  ;;  %v10008_v49 = vld [vmem:[%s11652_s23 + $0xb24] ss:$8 sps:$4 sm:$0xff]   ;;  %v10003_v50 = vld [vmem:[%s11652_s23 + $0x320] ss:$8 sps:$4 sm:$0xff]  }
 0x1ad   : > { %v10006_v51 = vld [vmem:[%s11652_s23 + $0xb20] ss:$8 sps:$4 sm:$0xff]  }
 0x1af   : > { %7944 = vmatpush1.bf16.msra.mxu1 %v9915_v52  ;;  %8352 = vmatpush1.bf16.msra.mxu0 %v9918_v53  ;;  %v11941_v52 = vld [vmem:[%s12465_s0 + $0x18] sm:$0xff] }
 0x1b0   : > { %7945 = vmatprep.subr.bf16.mxu1 %v9923_v54  ;;  %8353 = vmatprep.subr.bf16.mxu0 %v9926_v55  ;;  %v11946_v53 = vld [vmem:[%s12465_s0 + $0x98] sm:$0xff]  ;;  %v8993_v54 = vcombine.low %v4463_v44, %v4463_v44  ;;  %v9009_v55 = vcombine.low %v4471_v45, %v4471_v45  ;;  %v10078_v44 = vld [vmem:[%s11652_s23 + $0x3e4] ss:$8 sps:$4 sm:$0xff]  }
 0x1b1   : > { %v10082_v45 = vld [vmem:[%s11652_s23 + $0xbe4] ss:$8 sps:$4 sm:$0xff]  }
 0x1b3   : > { %7946 = vmatpush1.bf16.msra.mxu1 %v9921_v56  ;;  %8354 = vmatpush1.bf16.msra.mxu0 %v9924_v57  ;;  %v11951_v56 = vld [vmem:[%s12465_s0 + $0x58] sm:$0xff] }
 0x1b4   : > { %7947 = vmatprep.subr.bf16.mxu1 %v9929_v58  ;;  %8355 = vmatprep.subr.bf16.mxu0 %v9932_v59  ;;  %v11956_v57 = vld [vmem:[%s12465_s0 + $0xd8] sm:$0xff] }
 0x1b5   : > { %v10011_v58 = vld [vmem:[%s11652_s23 + $0x334] ss:$8 sps:$4 sm:$0xff]  }
 0x1b6   : > { %v10014_v59 = vld [vmem:[%s11652_s23 + $0xb34] ss:$8 sps:$4 sm:$0xff]  }
 0x1b7   : > { %7948 = vmatpush1.bf16.msra.mxu1 %v9927_v60  ;;  %8356 = vmatpush1.bf16.msra.mxu0 %v9930_v61  ;;  %v8964_v60 = vcombine.high %v11941_v52, %v11946_v53  ;;  %v8980_v61 = vcombine.high %v11951_v56, %v11956_v57 }
 0x1b8   : > { %7949 = vmatprep.subr.bf16.mxu1 %v9935_v62  ;;  %8357 = vmatprep.subr.bf16.mxu0 %v9938_v63  ;;  %v10009_v62 = vld [vmem:[%s11652_s23 + $0x330] ss:$8 sps:$4 sm:$0xff]  }
 0x1b9   : > { %v10012_v63 = vld [vmem:[%s11652_s23 + $0xb30] ss:$8 sps:$4 sm:$0xff]  }
 0x1bb   : > { %7950 = vmatpush1.bf16.msra.mxu1 %v9933_v4  ;;  %8358 = vmatpush1.bf16.msra.mxu0 %v9936_v7  ;;  %v10017_v4 = vld [vmem:[%s11652_s23 + $0x344] ss:$8 sps:$4 sm:$0xff]  }
 0x1bc   : > { %7951 = vmatprep.subr.bf16.mxu1 %v9941_v8  ;;  %8359 = vmatprep.subr.bf16.mxu0 %v9944_v9  ;;  %v10020_v7 = vld [vmem:[%s11652_s23 + $0xb44] ss:$8 sps:$4 sm:$0xff]   ;;  %v10015_v8 = vld [vmem:[%s11652_s23 + $0x340] ss:$8 sps:$4 sm:$0xff]  }
 0x1bd   : > { %v10018_v9 = vld [vmem:[%s11652_s23 + $0xb40] ss:$8 sps:$4 sm:$0xff]  }
 0x1bf   : > { %7952 = vmatpush1.bf16.msra.mxu1 %v9939_v10  ;;  %8360 = vmatpush1.bf16.msra.mxu0 %v9942_v11  ;;  %v10023_v10 = vld [vmem:[%s11652_s23 + $0x354] ss:$8 sps:$4 sm:$0xff]  }
 0x1c0   : > { %7953 = vmatprep.subr.bf16.mxu1 %v9947_v12  ;;  %8361 = vmatprep.subr.bf16.mxu0 %v9950_v13  ;;  %v10026_v11 = vld [vmem:[%s11652_s23 + $0xb54] ss:$8 sps:$4 sm:$0xff]   ;;  %v10021_v12 = vld [vmem:[%s11652_s23 + $0x350] ss:$8 sps:$4 sm:$0xff]  }
 0x1c1   : > { %v10024_v13 = vld [vmem:[%s11652_s23 + $0xb50] ss:$8 sps:$4 sm:$0xff]  }
 0x1c3   : > { %7954 = vmatpush1.bf16.msra.mxu1 %v9945_v14  ;;  %8362 = vmatpush1.bf16.msra.mxu0 %v9948_v15  ;;  %v10029_v14 = vld [vmem:[%s11652_s23 + $0x364] ss:$8 sps:$4 sm:$0xff]  }
 0x1c4   : > { %7955 = vmatprep.subr.bf16.mxu1 %v9953_v16  ;;  %8363 = vmatprep.subr.bf16.mxu0 %v9956_v17  ;;  %v10032_v15 = vld [vmem:[%s11652_s23 + $0xb64] ss:$8 sps:$4 sm:$0xff]   ;;  %v10027_v16 = vld [vmem:[%s11652_s23 + $0x360] ss:$8 sps:$4 sm:$0xff]  }
 0x1c5   : > { %v10030_v17 = vld [vmem:[%s11652_s23 + $0xb60] ss:$8 sps:$4 sm:$0xff]  }
 0x1c7   : > { %7956 = vmatpush1.bf16.msra.mxu1 %v9951_v18  ;;  %8364 = vmatpush1.bf16.msra.mxu0 %v9954_v19  ;;  %v10035_v18 = vld [vmem:[%s11652_s23 + $0x374] ss:$8 sps:$4 sm:$0xff]  }
 0x1c8   : > { %7957 = vmatprep.subr.bf16.mxu1 %v9959_v20  ;;  %8365 = vmatprep.subr.bf16.mxu0 %v9962_v21  ;;  %v10038_v19 = vld [vmem:[%s11652_s23 + $0xb74] ss:$8 sps:$4 sm:$0xff]   ;;  %v10033_v20 = vld [vmem:[%s11652_s23 + $0x370] ss:$8 sps:$4 sm:$0xff]  }
 0x1c9   : > { %v10036_v21 = vld [vmem:[%s11652_s23 + $0xb70] ss:$8 sps:$4 sm:$0xff]  }
 0x1cb   : > { %7958 = vmatpush1.bf16.msra.mxu1 %v9957_v22  ;;  %8366 = vmatpush1.bf16.msra.mxu0 %v9960_v23  ;;  %v10041_v22 = vld [vmem:[%s11652_s23 + $0x384] ss:$8 sps:$4 sm:$0xff]  }
 0x1cc   : > { %7959 = vmatprep.subr.bf16.mxu1 %v9965_v24  ;;  %8367 = vmatprep.subr.bf16.mxu0 %v9968_v25  ;;  %v10044_v23 = vld [vmem:[%s11652_s23 + $0xb84] ss:$8 sps:$4 sm:$0xff]   ;;  %v10039_v24 = vld [vmem:[%s11652_s23 + $0x380] ss:$8 sps:$4 sm:$0xff]  }
 0x1cd   : > { %v10042_v25 = vld [vmem:[%s11652_s23 + $0xb80] ss:$8 sps:$4 sm:$0xff]  }
 0x1cf   : > { %7960 = vmatpush1.bf16.msra.mxu1 %v9963_v26  ;;  %8368 = vmatpush1.bf16.msra.mxu0 %v9966_v27  ;;  %v10047_v26 = vld [vmem:[%s11652_s23 + $0x394] ss:$8 sps:$4 sm:$0xff]  }
 0x1d0   : > { %7961 = vmatprep.subr.bf16.mxu1 %v9971_v0  ;;  %8369 = vmatprep.subr.bf16.mxu0 %v9974_v1  ;;  %v10050_v27 = vld [vmem:[%s11652_s23 + $0xb94] ss:$8 sps:$4 sm:$0xff]   ;;  %v10045_v0 = vld [vmem:[%s11652_s23 + $0x390] ss:$8 sps:$4 sm:$0xff]  }
 0x1d1   : > { %v10048_v1 = vld [vmem:[%s11652_s23 + $0xb90] ss:$8 sps:$4 sm:$0xff]  }
 0x1d3   : > { %7962 = vmatpush1.bf16.msra.mxu1 %v9969_v3  ;;  %8370 = vmatpush1.bf16.msra.mxu0 %v9972_v2  ;;  %v10053_v3 = vld [vmem:[%s11652_s23 + $0x3a4] ss:$8 sps:$4 sm:$0xff]  }
 0x1d4   : > { %7963 = vmatprep.subr.bf16.mxu1 %v9978_v5  ;;  %8371 = vmatprep.subr.bf16.mxu0 %v9982_v6  ;;  %v10056_v2 = vld [vmem:[%s11652_s23 + $0xba4] ss:$8 sps:$4 sm:$0xff]   ;;  %v10051_v5 = vld [vmem:[%s11652_s23 + $0x3a0] ss:$8 sps:$4 sm:$0xff]  }
 0x1d5   : > { %v10054_v6 = vld [vmem:[%s11652_s23 + $0xba0] ss:$8 sps:$4 sm:$0xff]  }
 0x1d7   : > { %7964 = vmatpush1.bf16.msra.mxu1 %v9976_v28  ;;  %8372 = vmatpush1.bf16.msra.mxu0 %v9980_v29  ;;  %v10059_v28 = vld [vmem:[%s11652_s23 + $0x3b4] ss:$8 sps:$4 sm:$0xff]  }
 0x1d8   : > { %7965 = vmatprep.subr.bf16.mxu1 %v9987_v30  ;;  %8373 = vmatprep.subr.bf16.mxu0 %v9990_v31  ;;  %v10062_v29 = vld [vmem:[%s11652_s23 + $0xbb4] ss:$8 sps:$4 sm:$0xff]   ;;  %v10057_v30 = vld [vmem:[%s11652_s23 + $0x3b0] ss:$8 sps:$4 sm:$0xff]  }
 0x1d9   : > { %v10060_v31 = vld [vmem:[%s11652_s23 + $0xbb0] ss:$8 sps:$4 sm:$0xff]  }
 0x1db   : > { %7966 = vmatpush1.bf16.msra.mxu1 %v9985_v32  ;;  %8374 = vmatpush1.bf16.msra.mxu0 %v9988_v33  ;;  %v10065_v32 = vld [vmem:[%s11652_s23 + $0x3c4] ss:$8 sps:$4 sm:$0xff]  }
 0x1dc   : > { %7986 = vmatprep.subr.bf16.mxu1 %v9993_v34  ;;  %8394 = vmatprep.subr.bf16.mxu0 %v9996_v35  ;;  %v10068_v33 = vld [vmem:[%s11652_s23 + $0xbc4] ss:$8 sps:$4 sm:$0xff]   ;;  %v10063_v34 = vld [vmem:[%s11652_s23 + $0x3c0] ss:$8 sps:$4 sm:$0xff]  }
 0x1dd   : > { %v10066_v35 = vld [vmem:[%s11652_s23 + $0xbc0] ss:$8 sps:$4 sm:$0xff]  }
 0x1de   : > { %7968 = vmatmul.mubr.bf16.vlgmr.msra.gmra.mrb[0].mxu1 %v8961_v42  ;;  %8376 = vmatmul.mubr.bf16.vlgmr.msra.gmra.mrb[0].mxu0 %v8977_v43  ;;  %v10069_v42 = vld [vmem:[%s11652_s23 + $0x3d0] ss:$8 sps:$4 sm:$0xff]  }
 0x1df   : > { %7987 = vmatpush1.bf16.msra.mxu1 %v9991_v39  ;;  %8395 = vmatpush1.bf16.msra.mxu0 %v9994_v40  ;;  %v10071_v39 = vld [vmem:[%s11652_s23 + $0x3d4] ss:$8 sps:$4 sm:$0xff]   ;;  %v10072_v43 = vld [vmem:[%s11652_s23 + $0xbd0] ss:$8 sps:$4 sm:$0xff]  }
 0x1e0   : > { %7988 = vmatprep.subr.bf16.mxu1 %v9999_v46  ;;  %8396 = vmatprep.subr.bf16.mxu0 %v10002_v36  ;;  %v10074_v40 = vld [vmem:[%s11652_s23 + $0xbd4] ss:$8 sps:$4 sm:$0xff]   ;;  %v10076_v46 = vld [vmem:[%s11652_s23 + $0x3e0] ss:$8 sps:$4 sm:$0xff]  }
 0x1e1   : > { %7977 = vmatprep.mubr.bf16.mxu1 %v8994_v37  ;;  %8385 = vmatprep.mubr.bf16.mxu0 %v9010_v38  ;;  %v10080_v36 = vld [vmem:[%s11652_s23 + $0xbe0] ss:$8 sps:$4 sm:$0xff]   ;;  %v10087_v37 = vld [vmem:[%s11652_s23 + $0x3f4] ss:$8 sps:$4 sm:$0xff]  }
 0x1e2   : > { %v10090_v38 = vld [vmem:[%s11652_s23 + $0xbf4] ss:$8 sps:$4 sm:$0xff]  }
 0x1e3   : > { %7989 = vmatpush1.bf16.msra.mxu1 %v9997_v41  ;;  %8397 = vmatpush1.bf16.msra.mxu0 %v10000_v47  ;;  %v10085_v41 = vld [vmem:[%s11652_s23 + $0x3f0] ss:$8 sps:$4 sm:$0xff]  }
 0x1e4   : > { %7990 = vmatprep.subr.bf16.mxu1 %v10005_v48  ;;  %8398 = vmatprep.subr.bf16.mxu0 %v10008_v49  ;;  %v10088_v47 = vld [vmem:[%s11652_s23 + $0xbf0] ss:$8 sps:$4 sm:$0xff]   ;;  %v10093_v48 = vld [vmem:[%s11652_s23 + $0x404] ss:$8 sps:$4 sm:$0xff]  }
 0x1e5   : > { %v10096_v49 = vld [vmem:[%s11652_s23 + $0xc04] ss:$8 sps:$4 sm:$0xff]  }
 0x1e6   : > { %7978 = vmatmul.mubr.bf16.gmra.mrb[4].mxu1 %v8993_v54  ;;  %8386 = vmatmul.mubr.bf16.gmra.mrb[4].mxu0 %v9009_v55  ;;  %v8979_v54 = vcombine.low %v11951_v56, %v11956_v57  ;;  %v4472_v55 = vld [vmem:[%s12465_s0 + $0x158] sm:$0xff]  ;;  %v10105_v57 = vld [vmem:[%s11652_s23 + $0x424] ss:$8 sps:$4 sm:$0xff]  }
 0x1e7   : > { %7991 = vmatpush1.bf16.msra.mxu1 %v10003_v50  ;;  %8399 = vmatpush1.bf16.msra.mxu0 %v10006_v51  ;;  %v4464_v50 = vld [vmem:[%s12465_s0 + $0x118] sm:$0xff]  ;;  %v8963_v51 = vcombine.low %v11941_v52, %v11946_v53  ;;  %v9012_v52 = vcombine.high %v4472_v55, %v4472_v55 }
 0x1e8   : > { %7992 = vmatprep.subr.bf16.mxu1 %v10011_v58  ;;  %8400 = vmatprep.subr.bf16.mxu0 %v10014_v59  ;;  %v10091_v58 = vld [vmem:[%s11652_s23 + $0x400] ss:$8 sps:$4 sm:$0xff]   ;;  %v10097_v53 = vld [vmem:[%s11652_s23 + $0x410] ss:$8 sps:$4 sm:$0xff]  }
 0x1e9   : > { %8018 = vmatprep.mubr.bf16.mxu1 %v8964_v60  ;;  %8426 = vmatprep.mubr.bf16.mxu0 %v8980_v61  ;;  %v10094_v59 = vld [vmem:[%s11652_s23 + $0xc00] ss:$8 sps:$4 sm:$0xff]   ;;  %v10099_v60 = vld [vmem:[%s11652_s23 + $0x414] ss:$8 sps:$4 sm:$0xff]   ;;  %v10100_v56 = vld [vmem:[%s11652_s23 + $0xc10] ss:$8 sps:$4 sm:$0xff]  }
 0x1ea   : > { %v10102_v61 = vld [vmem:[%s11652_s23 + $0xc14] ss:$8 sps:$4 sm:$0xff]  }
 0x1eb   : > { %7993 = vmatpush1.bf16.msra.mxu1 %v10009_v62  ;;  %8401 = vmatpush1.bf16.msra.mxu0 %v10012_v63  ;;  %v8996_v62 = vcombine.high %v4464_v50, %v4464_v50  ;;  %v10108_v63 = vld [vmem:[%s11652_s23 + $0xc24] ss:$8 sps:$4 sm:$0xff]  }
 0x1ec   : > { %7994 = vmatprep.subr.bf16.mxu1 %v10017_v4  ;;  %8402 = vmatprep.subr.bf16.mxu0 %v10020_v7  ;;  %v12037_v4 = vld [vmem:[%s12465_s0 + $0x20] sm:$0xff] }
 0x1ed   : > { %v12042_v7 = vld [vmem:[%s12465_s0 + $0xa0] sm:$0xff] }
 0x1ef   : > { %7995 = vmatpush1.bf16.msra.mxu1 %v10015_v8  ;;  %8403 = vmatpush1.bf16.msra.mxu0 %v10018_v9  ;;  %v8995_v8 = vcombine.low %v4464_v50, %v4464_v50  ;;  %v9011_v9 = vcombine.low %v4472_v55, %v4472_v55  ;;  %v10171_v50 = vld [vmem:[%s11652_s23 + $0x4d4] ss:$8 sps:$4 sm:$0xff]   ;;  %v10172_v55 = vld [vmem:[%s11652_s23 + $0xcd0] ss:$8 sps:$4 sm:$0xff]  }
 0x1f0   : > { %7996 = vmatprep.subr.bf16.mxu1 %v10023_v10  ;;  %8404 = vmatprep.subr.bf16.mxu0 %v10026_v11  ;;  %v12047_v10 = vld [vmem:[%s12465_s0 + $0x60] sm:$0xff] }
 0x1f1   : > { %v12052_v11 = vld [vmem:[%s12465_s0 + $0xe0] sm:$0xff] }
 0x1f3   : > { %7997 = vmatpush1.bf16.msra.mxu1 %v10021_v12  ;;  %8405 = vmatpush1.bf16.msra.mxu0 %v10024_v13  ;;  %v10103_v12 = vld [vmem:[%s11652_s23 + $0x420] ss:$8 sps:$4 sm:$0xff]  }
 0x1f4   : > { %7998 = vmatprep.subr.bf16.mxu1 %v10029_v14  ;;  %8406 = vmatprep.subr.bf16.mxu0 %v10032_v15  ;;  %v10106_v13 = vld [vmem:[%s11652_s23 + $0xc20] ss:$8 sps:$4 sm:$0xff]   ;;  %v10111_v14 = vld [vmem:[%s11652_s23 + $0x434] ss:$8 sps:$4 sm:$0xff]  }
 0x1f5   : > { %v10114_v15 = vld [vmem:[%s11652_s23 + $0xc34] ss:$8 sps:$4 sm:$0xff]  }
 0x1f7   : > { %7999 = vmatpush1.bf16.msra.mxu1 %v10027_v16  ;;  %8407 = vmatpush1.bf16.msra.mxu0 %v10030_v17  ;;  %v8966_v16 = vcombine.high %v12037_v4, %v12042_v7  ;;  %v8982_v17 = vcombine.high %v12047_v10, %v12052_v11 }
 0x1f8   : > { %8000 = vmatprep.subr.bf16.mxu1 %v10035_v18  ;;  %8408 = vmatprep.subr.bf16.mxu0 %v10038_v19  ;;  %v10109_v18 = vld [vmem:[%s11652_s23 + $0x430] ss:$8 sps:$4 sm:$0xff]  }
 0x1f9   : > { %v10112_v19 = vld [vmem:[%s11652_s23 + $0xc30] ss:$8 sps:$4 sm:$0xff]  }
 0x1fb   : > { %8001 = vmatpush1.bf16.msra.mxu1 %v10033_v20  ;;  %8409 = vmatpush1.bf16.msra.mxu0 %v10036_v21  ;;  %v10117_v20 = vld [vmem:[%s11652_s23 + $0x444] ss:$8 sps:$4 sm:$0xff]  }
 0x1fc   : > { %8002 = vmatprep.subr.bf16.mxu1 %v10041_v22  ;;  %8410 = vmatprep.subr.bf16.mxu0 %v10044_v23  ;;  %v10120_v21 = vld [vmem:[%s11652_s23 + $0xc44] ss:$8 sps:$4 sm:$0xff]   ;;  %v10115_v22 = vld [vmem:[%s11652_s23 + $0x440] ss:$8 sps:$4 sm:$0xff]  }
 0x1fd   : > { %v10118_v23 = vld [vmem:[%s11652_s23 + $0xc40] ss:$8 sps:$4 sm:$0xff]  }
 0x1ff   : > { %8003 = vmatpush1.bf16.msra.mxu1 %v10039_v24  ;;  %8411 = vmatpush1.bf16.msra.mxu0 %v10042_v25  ;;  %v10123_v24 = vld [vmem:[%s11652_s23 + $0x454] ss:$8 sps:$4 sm:$0xff]  }
 0x200   : > { %8004 = vmatprep.subr.bf16.mxu1 %v10047_v26  ;;  %8412 = vmatprep.subr.bf16.mxu0 %v10050_v27  ;;  %v10126_v25 = vld [vmem:[%s11652_s23 + $0xc54] ss:$8 sps:$4 sm:$0xff]   ;;  %v10121_v26 = vld [vmem:[%s11652_s23 + $0x450] ss:$8 sps:$4 sm:$0xff]  }
 0x201   : > { %v10124_v27 = vld [vmem:[%s11652_s23 + $0xc50] ss:$8 sps:$4 sm:$0xff]  }
 0x203   : > { %8005 = vmatpush1.bf16.msra.mxu1 %v10045_v0  ;;  %8413 = vmatpush1.bf16.msra.mxu0 %v10048_v1  ;;  %v10129_v0 = vld [vmem:[%s11652_s23 + $0x464] ss:$8 sps:$4 sm:$0xff]  }
 0x204   : > { %8006 = vmatprep.subr.bf16.mxu1 %v10053_v3  ;;  %8414 = vmatprep.subr.bf16.mxu0 %v10056_v2  ;;  %v10132_v1 = vld [vmem:[%s11652_s23 + $0xc64] ss:$8 sps:$4 sm:$0xff]   ;;  %v10127_v3 = vld [vmem:[%s11652_s23 + $0x460] ss:$8 sps:$4 sm:$0xff]  }
 0x205   : > { %v10130_v2 = vld [vmem:[%s11652_s23 + $0xc60] ss:$8 sps:$4 sm:$0xff]  }
 0x207   : > { %8007 = vmatpush1.bf16.msra.mxu1 %v10051_v5  ;;  %8415 = vmatpush1.bf16.msra.mxu0 %v10054_v6  ;;  %v10135_v5 = vld [vmem:[%s11652_s23 + $0x474] ss:$8 sps:$4 sm:$0xff]  }
 0x208   : > { %8008 = vmatprep.subr.bf16.mxu1 %v10059_v28  ;;  %8416 = vmatprep.subr.bf16.mxu0 %v10062_v29  ;;  %v10138_v6 = vld [vmem:[%s11652_s23 + $0xc74] ss:$8 sps:$4 sm:$0xff]   ;;  %v10133_v28 = vld [vmem:[%s11652_s23 + $0x470] ss:$8 sps:$4 sm:$0xff]  }
 0x209   : > { %v10136_v29 = vld [vmem:[%s11652_s23 + $0xc70] ss:$8 sps:$4 sm:$0xff]  }
 0x20b   : > { %8009 = vmatpush1.bf16.msra.mxu1 %v10057_v30  ;;  %8417 = vmatpush1.bf16.msra.mxu0 %v10060_v31  ;;  %v10141_v30 = vld [vmem:[%s11652_s23 + $0x484] ss:$8 sps:$4 sm:$0xff]  }
 0x20c   : > { %8010 = vmatprep.subr.bf16.mxu1 %v10065_v32  ;;  %8418 = vmatprep.subr.bf16.mxu0 %v10068_v33  ;;  %v10144_v31 = vld [vmem:[%s11652_s23 + $0xc84] ss:$8 sps:$4 sm:$0xff]   ;;  %v10139_v32 = vld [vmem:[%s11652_s23 + $0x480] ss:$8 sps:$4 sm:$0xff]  }
 0x20d   : > { %v10142_v33 = vld [vmem:[%s11652_s23 + $0xc80] ss:$8 sps:$4 sm:$0xff]  }
 0x20f   : > { %8011 = vmatpush1.bf16.msra.mxu1 %v10063_v34  ;;  %8419 = vmatpush1.bf16.msra.mxu0 %v10066_v35  ;;  %v10147_v34 = vld [vmem:[%s11652_s23 + $0x494] ss:$8 sps:$4 sm:$0xff]  }
 0x210   : > { %8012 = vmatprep.subr.bf16.mxu1 %v10071_v39  ;;  %8420 = vmatprep.subr.bf16.mxu0 %v10074_v40  ;;  %v10150_v35 = vld [vmem:[%s11652_s23 + $0xc94] ss:$8 sps:$4 sm:$0xff]   ;;  %v10145_v39 = vld [vmem:[%s11652_s23 + $0x490] ss:$8 sps:$4 sm:$0xff]  }
 0x211   : > { %v10148_v40 = vld [vmem:[%s11652_s23 + $0xc90] ss:$8 sps:$4 sm:$0xff]  }
 0x213   : > { %8013 = vmatpush1.bf16.msra.mxu1 %v10069_v42  ;;  %8421 = vmatpush1.bf16.msra.mxu0 %v10072_v43  ;;  %v10153_v42 = vld [vmem:[%s11652_s23 + $0x4a4] ss:$8 sps:$4 sm:$0xff]  }
 0x214   : > { %8014 = vmatprep.subr.bf16.mxu1 %v10078_v44  ;;  %8422 = vmatprep.subr.bf16.mxu0 %v10082_v45  ;;  %v10156_v43 = vld [vmem:[%s11652_s23 + $0xca4] ss:$8 sps:$4 sm:$0xff]   ;;  %v10151_v44 = vld [vmem:[%s11652_s23 + $0x4a0] ss:$8 sps:$4 sm:$0xff]  }
 0x215   : > { %v10154_v45 = vld [vmem:[%s11652_s23 + $0xca0] ss:$8 sps:$4 sm:$0xff]  }
 0x217   : > { %8015 = vmatpush1.bf16.msra.mxu1 %v10076_v46  ;;  %8423 = vmatpush1.bf16.msra.mxu0 %v10080_v36  ;;  %v10159_v46 = vld [vmem:[%s11652_s23 + $0x4b4] ss:$8 sps:$4 sm:$0xff]  }
 0x218   : > { %8016 = vmatprep.subr.bf16.mxu1 %v10087_v37  ;;  %8424 = vmatprep.subr.bf16.mxu0 %v10090_v38  ;;  %v10162_v36 = vld [vmem:[%s11652_s23 + $0xcb4] ss:$8 sps:$4 sm:$0xff]   ;;  %v10157_v37 = vld [vmem:[%s11652_s23 + $0x4b0] ss:$8 sps:$4 sm:$0xff]  }
 0x219   : > { %v10160_v38 = vld [vmem:[%s11652_s23 + $0xcb0] ss:$8 sps:$4 sm:$0xff]  }
 0x21b   : > { %8017 = vmatpush1.bf16.msra.mxu1 %v10085_v41  ;;  %8425 = vmatpush1.bf16.msra.mxu0 %v10088_v47  ;;  %v10165_v41 = vld [vmem:[%s11652_s23 + $0x4c4] ss:$8 sps:$4 sm:$0xff]  }
 0x21c   : > { %8037 = vmatprep.subr.bf16.mxu1 %v10093_v48  ;;  %8445 = vmatprep.subr.bf16.mxu0 %v10096_v49  ;;  %v10168_v47 = vld [vmem:[%s11652_s23 + $0xcc4] ss:$8 sps:$4 sm:$0xff]   ;;  %v10163_v48 = vld [vmem:[%s11652_s23 + $0x4c0] ss:$8 sps:$4 sm:$0xff]  }
 0x21d   : > { %v10166_v49 = vld [vmem:[%s11652_s23 + $0xcc0] ss:$8 sps:$4 sm:$0xff]  }
 0x21e   : > { %8019 = vmatmul.mubr.bf16.vlgmr.msra.gmra.mrb[0].mxu1 %v8963_v51  ;;  %8427 = vmatmul.mubr.bf16.vlgmr.msra.gmra.mrb[0].mxu0 %v8979_v54  ;;  %v10174_v51 = vld [vmem:[%s11652_s23 + $0xcd4] ss:$8 sps:$4 sm:$0xff]   ;;  %v10169_v54 = vld [vmem:[%s11652_s23 + $0x4d0] ss:$8 sps:$4 sm:$0xff]  }
 0x21f   : > { %8038 = vmatpush1.bf16.msra.mxu1 %v10091_v58  ;;  %8446 = vmatpush1.bf16.msra.mxu0 %v10094_v59  ;;  %v10178_v58 = vld [vmem:[%s11652_s23 + $0x4e4] ss:$8 sps:$4 sm:$0xff]  }
 0x220   : > { %8039 = vmatprep.subr.bf16.mxu1 %v10099_v60  ;;  %8447 = vmatprep.subr.bf16.mxu0 %v10102_v61  ;;  %v10182_v59 = vld [vmem:[%s11652_s23 + $0xce4] ss:$8 sps:$4 sm:$0xff]   ;;  %v10176_v60 = vld [vmem:[%s11652_s23 + $0x4e0] ss:$8 sps:$4 sm:$0xff]  }
 0x221   : > { %8028 = vmatprep.mubr.bf16.mxu1 %v8996_v62  ;;  %8436 = vmatprep.mubr.bf16.mxu0 %v9012_v52  ;;  %v10180_v61 = vld [vmem:[%s11652_s23 + $0xce0] ss:$8 sps:$4 sm:$0xff]   ;;  %v10187_v62 = vld [vmem:[%s11652_s23 + $0x4f4] ss:$8 sps:$4 sm:$0xff]  }
 0x222   : > { %v10190_v52 = vld [vmem:[%s11652_s23 + $0xcf4] ss:$8 sps:$4 sm:$0xff]  }
 0x223   : > { %8040 = vmatpush1.bf16.msra.mxu1 %v10097_v53  ;;  %8448 = vmatpush1.bf16.msra.mxu0 %v10100_v56  ;;  %v10185_v53 = vld [vmem:[%s11652_s23 + $0x4f0] ss:$8 sps:$4 sm:$0xff]  }
 0x224   : > { %8041 = vmatprep.subr.bf16.mxu1 %v10105_v57  ;;  %8449 = vmatprep.subr.bf16.mxu0 %v10108_v63  ;;  %v10188_v56 = vld [vmem:[%s11652_s23 + $0xcf0] ss:$8 sps:$4 sm:$0xff]   ;;  %v10193_v57 = vld [vmem:[%s11652_s23 + $0x504] ss:$8 sps:$4 sm:$0xff]  }
 0x225   : > { %v10196_v63 = vld [vmem:[%s11652_s23 + $0xd04] ss:$8 sps:$4 sm:$0xff]  }
 0x226   : > { %8029 = vmatmul.mubr.bf16.gmra.mrb[4].mxu1 %v8995_v8  ;;  %8437 = vmatmul.mubr.bf16.gmra.mrb[4].mxu0 %v9011_v9  ;;  %v4465_v8 = vld [vmem:[%s12465_s0 + $0x120] sm:$0xff] }
 0x227   : > { %8042 = vmatpush1.bf16.msra.mxu1 %v10103_v12  ;;  %8450 = vmatpush1.bf16.msra.mxu0 %v10106_v13  ;;  %v4473_v9 = vld [vmem:[%s12465_s0 + $0x160] sm:$0xff]  ;;  %v8965_v12 = vcombine.low %v12037_v4, %v12042_v7  ;;  %v8981_v13 = vcombine.low %v12047_v10, %v12052_v11  ;;  %v12135_v10 = vld [vmem:[%s12465_s0 + $0x28] sm:$0xff] }
 0x228   : > { %8043 = vmatprep.subr.bf16.mxu1 %v10111_v14  ;;  %8451 = vmatprep.subr.bf16.mxu0 %v10114_v15  ;;  %v10191_v14 = vld [vmem:[%s11652_s23 + $0x500] ss:$8 sps:$4 sm:$0xff]   ;;  %v10205_v4 = vld [vmem:[%s11652_s23 + $0x524] ss:$8 sps:$4 sm:$0xff]  }
 0x229   : > { %8069 = vmatprep.mubr.bf16.mxu1 %v8966_v16  ;;  %8477 = vmatprep.mubr.bf16.mxu0 %v8982_v17  ;;  %v10194_v15 = vld [vmem:[%s11652_s23 + $0xd00] ss:$8 sps:$4 sm:$0xff]   ;;  %v10199_v16 = vld [vmem:[%s11652_s23 + $0x514] ss:$8 sps:$4 sm:$0xff]   ;;  %v10208_v7 = vld [vmem:[%s11652_s23 + $0xd24] ss:$8 sps:$4 sm:$0xff]  }
 0x22a   : > { %v10202_v17 = vld [vmem:[%s11652_s23 + $0xd14] ss:$8 sps:$4 sm:$0xff]   ;;  %v12140_v11 = vld [vmem:[%s12465_s0 + $0xa8] sm:$0xff] }
 0x22b   : > { %8044 = vmatpush1.bf16.msra.mxu1 %v10109_v18  ;;  %8452 = vmatpush1.bf16.msra.mxu0 %v10112_v19  ;;  %v10197_v18 = vld [vmem:[%s11652_s23 + $0x510] ss:$8 sps:$4 sm:$0xff]  }
 0x22c   : > { %8045 = vmatprep.subr.bf16.mxu1 %v10117_v20  ;;  %8453 = vmatprep.subr.bf16.mxu0 %v10120_v21  ;;  %v10200_v19 = vld [vmem:[%s11652_s23 + $0xd10] ss:$8 sps:$4 sm:$0xff]   ;;  %v8998_v20 = vcombine.high %v4465_v8, %v4465_v8  ;;  %v9014_v21 = vcombine.high %v4473_v9, %v4473_v9 }
 0x22f   : > { %8046 = vmatpush1.bf16.msra.mxu1 %v10115_v22  ;;  %8454 = vmatpush1.bf16.msra.mxu0 %v10118_v23  ;;  %v12145_v22 = vld [vmem:[%s12465_s0 + $0x68] sm:$0xff] }
 0x230   : > { %8047 = vmatprep.subr.bf16.mxu1 %v10123_v24  ;;  %8455 = vmatprep.subr.bf16.mxu0 %v10126_v25  ;;  %v12150_v23 = vld [vmem:[%s12465_s0 + $0xe8] sm:$0xff]  ;;  %v8997_v24 = vcombine.low %v4465_v8, %v4465_v8  ;;  %v9013_v25 = vcombine.low %v4473_v9, %v4473_v9  ;;  %v10271_v8 = vld [vmem:[%s11652_s23 + $0x5d4] ss:$8 sps:$4 sm:$0xff]  }
 0x231   : > { %v10274_v9 = vld [vmem:[%s11652_s23 + $0xdd4] ss:$8 sps:$4 sm:$0xff]  }
 0x233   : > { %8048 = vmatpush1.bf16.msra.mxu1 %v10121_v26  ;;  %8456 = vmatpush1.bf16.msra.mxu0 %v10124_v27  ;;  %v10203_v26 = vld [vmem:[%s11652_s23 + $0x520] ss:$8 sps:$4 sm:$0xff]  }
 0x234   : > { %8049 = vmatprep.subr.bf16.mxu1 %v10129_v0  ;;  %8457 = vmatprep.subr.bf16.mxu0 %v10132_v1  ;;  %v10206_v27 = vld [vmem:[%s11652_s23 + $0xd20] ss:$8 sps:$4 sm:$0xff]   ;;  %v10211_v0 = vld [vmem:[%s11652_s23 + $0x534] ss:$8 sps:$4 sm:$0xff]  }
 0x235   : > { %v10214_v1 = vld [vmem:[%s11652_s23 + $0xd34] ss:$8 sps:$4 sm:$0xff]  }
 0x237   : > { %8050 = vmatpush1.bf16.msra.mxu1 %v10127_v3  ;;  %8458 = vmatpush1.bf16.msra.mxu0 %v10130_v2  ;;  %v8968_v3 = vcombine.high %v12135_v10, %v12140_v11  ;;  %v8984_v2 = vcombine.high %v12145_v22, %v12150_v23 }
 0x238   : > { %8051 = vmatprep.subr.bf16.mxu1 %v10135_v5  ;;  %8459 = vmatprep.subr.bf16.mxu0 %v10138_v6  ;;  %v10209_v5 = vld [vmem:[%s11652_s23 + $0x530] ss:$8 sps:$4 sm:$0xff]  }
 0x239   : > { %v10212_v6 = vld [vmem:[%s11652_s23 + $0xd30] ss:$8 sps:$4 sm:$0xff]  }
 0x23b   : > { %8052 = vmatpush1.bf16.msra.mxu1 %v10133_v28  ;;  %8460 = vmatpush1.bf16.msra.mxu0 %v10136_v29  ;;  %v10217_v28 = vld [vmem:[%s11652_s23 + $0x544] ss:$8 sps:$4 sm:$0xff]  }
 0x23c   : > { %8053 = vmatprep.subr.bf16.mxu1 %v10141_v30  ;;  %8461 = vmatprep.subr.bf16.mxu0 %v10144_v31  ;;  %v10220_v29 = vld [vmem:[%s11652_s23 + $0xd44] ss:$8 sps:$4 sm:$0xff]   ;;  %v10215_v30 = vld [vmem:[%s11652_s23 + $0x540] ss:$8 sps:$4 sm:$0xff]  }
 0x23d   : > { %v10218_v31 = vld [vmem:[%s11652_s23 + $0xd40] ss:$8 sps:$4 sm:$0xff]  }
 0x23f   : > { %8054 = vmatpush1.bf16.msra.mxu1 %v10139_v32  ;;  %8462 = vmatpush1.bf16.msra.mxu0 %v10142_v33  ;;  %v10223_v32 = vld [vmem:[%s11652_s23 + $0x554] ss:$8 sps:$4 sm:$0xff]  }
 0x240   : > { %8055 = vmatprep.subr.bf16.mxu1 %v10147_v34  ;;  %8463 = vmatprep.subr.bf16.mxu0 %v10150_v35  ;;  %v10226_v33 = vld [vmem:[%s11652_s23 + $0xd54] ss:$8 sps:$4 sm:$0xff]   ;;  %v10221_v34 = vld [vmem:[%s11652_s23 + $0x550] ss:$8 sps:$4 sm:$0xff]  }
 0x241   : > { %v10224_v35 = vld [vmem:[%s11652_s23 + $0xd50] ss:$8 sps:$4 sm:$0xff]  }
 0x243   : > { %8056 = vmatpush1.bf16.msra.mxu1 %v10145_v39  ;;  %8464 = vmatpush1.bf16.msra.mxu0 %v10148_v40  ;;  %v10229_v39 = vld [vmem:[%s11652_s23 + $0x564] ss:$8 sps:$4 sm:$0xff]  }
 0x244   : > { %8057 = vmatprep.subr.bf16.mxu1 %v10153_v42  ;;  %8465 = vmatprep.subr.bf16.mxu0 %v10156_v43  ;;  %v10232_v40 = vld [vmem:[%s11652_s23 + $0xd64] ss:$8 sps:$4 sm:$0xff]   ;;  %v10227_v42 = vld [vmem:[%s11652_s23 + $0x560] ss:$8 sps:$4 sm:$0xff]  }
 0x245   : > { %v10230_v43 = vld [vmem:[%s11652_s23 + $0xd60] ss:$8 sps:$4 sm:$0xff]  }
 0x247   : > { %8058 = vmatpush1.bf16.msra.mxu1 %v10151_v44  ;;  %8466 = vmatpush1.bf16.msra.mxu0 %v10154_v45  ;;  %v10235_v44 = vld [vmem:[%s11652_s23 + $0x574] ss:$8 sps:$4 sm:$0xff]  }
 0x248   : > { %8059 = vmatprep.subr.bf16.mxu1 %v10159_v46  ;;  %8467 = vmatprep.subr.bf16.mxu0 %v10162_v36  ;;  %v10238_v45 = vld [vmem:[%s11652_s23 + $0xd74] ss:$8 sps:$4 sm:$0xff]   ;;  %v10233_v46 = vld [vmem:[%s11652_s23 + $0x570] ss:$8 sps:$4 sm:$0xff]  }
 0x249   : > { %v10236_v36 = vld [vmem:[%s11652_s23 + $0xd70] ss:$8 sps:$4 sm:$0xff]  }
 0x24b   : > { %8060 = vmatpush1.bf16.msra.mxu1 %v10157_v37  ;;  %8468 = vmatpush1.bf16.msra.mxu0 %v10160_v38  ;;  %v10241_v37 = vld [vmem:[%s11652_s23 + $0x584] ss:$8 sps:$4 sm:$0xff]  }
 0x24c   : > { %8061 = vmatprep.subr.bf16.mxu1 %v10165_v41  ;;  %8469 = vmatprep.subr.bf16.mxu0 %v10168_v47  ;;  %v10244_v38 = vld [vmem:[%s11652_s23 + $0xd84] ss:$8 sps:$4 sm:$0xff]   ;;  %v10239_v41 = vld [vmem:[%s11652_s23 + $0x580] ss:$8 sps:$4 sm:$0xff]  }
 0x24d   : > { %v10242_v47 = vld [vmem:[%s11652_s23 + $0xd80] ss:$8 sps:$4 sm:$0xff]  }
 0x24f   : > { %8062 = vmatpush1.bf16.msra.mxu1 %v10163_v48  ;;  %8470 = vmatpush1.bf16.msra.mxu0 %v10166_v49  ;;  %v10247_v48 = vld [vmem:[%s11652_s23 + $0x594] ss:$8 sps:$4 sm:$0xff]  }
 0x250   : > { %8063 = vmatprep.subr.bf16.mxu1 %v10171_v50  ;;  %8471 = vmatprep.subr.bf16.mxu0 %v10174_v51  ;;  %v10250_v49 = vld [vmem:[%s11652_s23 + $0xd94] ss:$8 sps:$4 sm:$0xff]   ;;  %v10245_v50 = vld [vmem:[%s11652_s23 + $0x590] ss:$8 sps:$4 sm:$0xff]  }
 0x251   : > { %v10248_v51 = vld [vmem:[%s11652_s23 + $0xd90] ss:$8 sps:$4 sm:$0xff]  }
 0x253   : > { %8064 = vmatpush1.bf16.msra.mxu1 %v10169_v54  ;;  %8472 = vmatpush1.bf16.msra.mxu0 %v10172_v55  ;;  %v10253_v54 = vld [vmem:[%s11652_s23 + $0x5a4] ss:$8 sps:$4 sm:$0xff]  }
 0x254   : > { %8065 = vmatprep.subr.bf16.mxu1 %v10178_v58  ;;  %8473 = vmatprep.subr.bf16.mxu0 %v10182_v59  ;;  %v10256_v55 = vld [vmem:[%s11652_s23 + $0xda4] ss:$8 sps:$4 sm:$0xff]   ;;  %v10251_v58 = vld [vmem:[%s11652_s23 + $0x5a0] ss:$8 sps:$4 sm:$0xff]  }
 0x255   : > { %v10254_v59 = vld [vmem:[%s11652_s23 + $0xda0] ss:$8 sps:$4 sm:$0xff]  }
 0x257   : > { %8066 = vmatpush1.bf16.msra.mxu1 %v10176_v60  ;;  %8474 = vmatpush1.bf16.msra.mxu0 %v10180_v61  ;;  %v10259_v60 = vld [vmem:[%s11652_s23 + $0x5b4] ss:$8 sps:$4 sm:$0xff]  }
 0x258   : > { %8067 = vmatprep.subr.bf16.mxu1 %v10187_v62  ;;  %8475 = vmatprep.subr.bf16.mxu0 %v10190_v52  ;;  %v10262_v61 = vld [vmem:[%s11652_s23 + $0xdb4] ss:$8 sps:$4 sm:$0xff]   ;;  %v10257_v62 = vld [vmem:[%s11652_s23 + $0x5b0] ss:$8 sps:$4 sm:$0xff]  }
 0x259   : > { %v10260_v52 = vld [vmem:[%s11652_s23 + $0xdb0] ss:$8 sps:$4 sm:$0xff]  }
 0x25b   : > { %8068 = vmatpush1.bf16.msra.mxu1 %v10185_v53  ;;  %8476 = vmatpush1.bf16.msra.mxu0 %v10188_v56  ;;  %v10265_v53 = vld [vmem:[%s11652_s23 + $0x5c4] ss:$8 sps:$4 sm:$0xff]  }
 0x25c   : > { %8088 = vmatprep.subr.bf16.mxu1 %v10193_v57  ;;  %8496 = vmatprep.subr.bf16.mxu0 %v10196_v63  ;;  %v10268_v56 = vld [vmem:[%s11652_s23 + $0xdc4] ss:$8 sps:$4 sm:$0xff]   ;;  %v10263_v57 = vld [vmem:[%s11652_s23 + $0x5c0] ss:$8 sps:$4 sm:$0xff]  }
 0x25d   : > { %v10266_v63 = vld [vmem:[%s11652_s23 + $0xdc0] ss:$8 sps:$4 sm:$0xff]  }
 0x25e   : > { %8070 = vmatmul.mubr.bf16.vlgmr.msra.gmra.mrb[0].mxu1 %v8965_v12  ;;  %8478 = vmatmul.mubr.bf16.vlgmr.msra.gmra.mrb[0].mxu0 %v8981_v13  ;;  %v10269_v12 = vld [vmem:[%s11652_s23 + $0x5d0] ss:$8 sps:$4 sm:$0xff]  }
 0x25f   : > { %8089 = vmatpush1.bf16.msra.mxu1 %v10191_v14  ;;  %8497 = vmatpush1.bf16.msra.mxu0 %v10194_v15  ;;  %v10272_v13 = vld [vmem:[%s11652_s23 + $0xdd0] ss:$8 sps:$4 sm:$0xff]   ;;  %v10278_v14 = vld [vmem:[%s11652_s23 + $0x5e4] ss:$8 sps:$4 sm:$0xff]  }
 0x260   : > { %8090 = vmatprep.subr.bf16.mxu1 %v10199_v16  ;;  %8498 = vmatprep.subr.bf16.mxu0 %v10202_v17  ;;  %v10282_v15 = vld [vmem:[%s11652_s23 + $0xde4] ss:$8 sps:$4 sm:$0xff]   ;;  %v10276_v16 = vld [vmem:[%s11652_s23 + $0x5e0] ss:$8 sps:$4 sm:$0xff]  }
 0x261   : > { %8079 = vmatprep.mubr.bf16.mxu1 %v8998_v20  ;;  %8487 = vmatprep.mubr.bf16.mxu0 %v9014_v21  ;;  %v10280_v17 = vld [vmem:[%s11652_s23 + $0xde0] ss:$8 sps:$4 sm:$0xff]   ;;  %v10285_v20 = vld [vmem:[%s11652_s23 + $0x5f0] ss:$8 sps:$4 sm:$0xff]  }
 0x262   : > { %v10288_v21 = vld [vmem:[%s11652_s23 + $0xdf0] ss:$8 sps:$4 sm:$0xff]  }
 0x263   : > { %8091 = vmatpush1.bf16.msra.mxu1 %v10197_v18  ;;  %8499 = vmatpush1.bf16.msra.mxu0 %v10200_v19  ;;  %v10287_v18 = vld [vmem:[%s11652_s23 + $0x5f4] ss:$8 sps:$4 sm:$0xff]  }
 0x264   : > { %8092 = vmatprep.subr.bf16.mxu1 %v10205_v4  ;;  %8500 = vmatprep.subr.bf16.mxu0 %v10208_v7  ;;  %v10290_v19 = vld [vmem:[%s11652_s23 + $0xdf4] ss:$8 sps:$4 sm:$0xff]   ;;  %v10293_v4 = vld [vmem:[%s11652_s23 + $0x604] ss:$8 sps:$4 sm:$0xff]  }
 0x265   : > { %v10296_v7 = vld [vmem:[%s11652_s23 + $0xe04] ss:$8 sps:$4 sm:$0xff]  }
 0x266   : > { %8080 = vmatmul.mubr.bf16.gmra.mrb[4].mxu1 %v8997_v24  ;;  %8488 = vmatmul.mubr.bf16.gmra.mrb[4].mxu0 %v9013_v25  ;;  %v8967_v24 = vcombine.low %v12135_v10, %v12140_v11  ;;  %v8983_v25 = vcombine.low %v12145_v22, %v12150_v23  ;;  %v10299_v10 = vld [vmem:[%s11652_s23 + $0x614] ss:$8 sps:$4 sm:$0xff]  }
 0x267   : > { %8093 = vmatpush1.bf16.msra.mxu1 %v10203_v26  ;;  %8501 = vmatpush1.bf16.msra.mxu0 %v10206_v27  ;;  %v4466_v26 = vld [vmem:[%s12465_s0 + $0x128] sm:$0xff]  ;;  %v10302_v11 = vld [vmem:[%s11652_s23 + $0xe14] ss:$8 sps:$4 sm:$0xff]  }
 0x268   : > { %8094 = vmatprep.subr.bf16.mxu1 %v10211_v0  ;;  %8502 = vmatprep.subr.bf16.mxu0 %v10214_v1  ;;  %v4474_v27 = vld [vmem:[%s12465_s0 + $0x168] sm:$0xff]  ;;  %v9000_v22 = vcombine.high %v4466_v26, %v4466_v26 }
 0x269   : > { %8120 = vmatprep.mubr.bf16.mxu1 %v8968_v3  ;;  %8528 = vmatprep.mubr.bf16.mxu0 %v8984_v2  ;;  %v10291_v0 = vld [vmem:[%s11652_s23 + $0x600] ss:$8 sps:$4 sm:$0xff]   ;;  %v9016_v23 = vcombine.high %v4474_v27, %v4474_v27  ;;  %v10297_v3 = vld [vmem:[%s11652_s23 + $0x610] ss:$8 sps:$4 sm:$0xff]  }
 0x26a   : > { %v10294_v1 = vld [vmem:[%s11652_s23 + $0xe00] ss:$8 sps:$4 sm:$0xff]   ;;  %v10300_v2 = vld [vmem:[%s11652_s23 + $0xe10] ss:$8 sps:$4 sm:$0xff]  }
 0x26b   : > { %8095 = vmatpush1.bf16.msra.mxu1 %v10209_v5  ;;  %8503 = vmatpush1.bf16.msra.mxu0 %v10212_v6  ;;  %v10305_v5 = vld [vmem:[%s11652_s23 + $0x624] ss:$8 sps:$4 sm:$0xff]  }
 0x26c   : > { %8096 = vmatprep.subr.bf16.mxu1 %v10217_v28  ;;  %8504 = vmatprep.subr.bf16.mxu0 %v10220_v29  ;;  %v10308_v6 = vld [vmem:[%s11652_s23 + $0xe24] ss:$8 sps:$4 sm:$0xff]   ;;  %v12233_v28 = vld [vmem:[%s12465_s0 + $0x30] sm:$0xff]  ;;  %v8999_v29 = vcombine.low %v4466_v26, %v4466_v26 }
 0x26d   : > { %v10369_v26 = vld [vmem:[%s11652_s23 + $0x6d0] ss:$8 sps:$4 sm:$0xff]  }
 0x26f   : > { %8097 = vmatpush1.bf16.msra.mxu1 %v10215_v30  ;;  %8505 = vmatpush1.bf16.msra.mxu0 %v10218_v31  ;;  %v9015_v30 = vcombine.low %v4474_v27, %v4474_v27  ;;  %v12238_v31 = vld [vmem:[%s12465_s0 + $0xb0] sm:$0xff] }
 0x270   : > { %8098 = vmatprep.subr.bf16.mxu1 %v10223_v32  ;;  %8506 = vmatprep.subr.bf16.mxu0 %v10226_v33  ;;  %v12243_v32 = vld [vmem:[%s12465_s0 + $0x70] sm:$0xff] }
 0x271   : > { %v12248_v33 = vld [vmem:[%s12465_s0 + $0xf0] sm:$0xff] }
 0x272   : > { %v10372_v27 = vld [vmem:[%s11652_s23 + $0xed0] ss:$8 sps:$4 sm:$0xff]  }
 0x273   : > { %8099 = vmatpush1.bf16.msra.mxu1 %v10221_v34  ;;  %8507 = vmatpush1.bf16.msra.mxu0 %v10224_v35  ;;  %v10303_v34 = vld [vmem:[%s11652_s23 + $0x620] ss:$8 sps:$4 sm:$0xff]  }
 0x274   : > { %8100 = vmatprep.subr.bf16.mxu1 %v10229_v39  ;;  %8508 = vmatprep.subr.bf16.mxu0 %v10232_v40  ;;  %v10306_v35 = vld [vmem:[%s11652_s23 + $0xe20] ss:$8 sps:$4 sm:$0xff]   ;;  %v10311_v39 = vld [vmem:[%s11652_s23 + $0x634] ss:$8 sps:$4 sm:$0xff]  }
 0x275   : > { %v10314_v40 = vld [vmem:[%s11652_s23 + $0xe34] ss:$8 sps:$4 sm:$0xff]  }
 0x277   : > { %8101 = vmatpush1.bf16.msra.mxu1 %v10227_v42  ;;  %8509 = vmatpush1.bf16.msra.mxu0 %v10230_v43  ;;  %v8970_v42 = vcombine.high %v12233_v28, %v12238_v31  ;;  %v8986_v43 = vcombine.high %v12243_v32, %v12248_v33 }
 0x278   : > { %8102 = vmatprep.subr.bf16.mxu1 %v10235_v44  ;;  %8510 = vmatprep.subr.bf16.mxu0 %v10238_v45  ;;  %v10309_v44 = vld [vmem:[%s11652_s23 + $0x630] ss:$8 sps:$4 sm:$0xff]  }
 0x279   : > { %v10312_v45 = vld [vmem:[%s11652_s23 + $0xe30] ss:$8 sps:$4 sm:$0xff]  }
 0x27b   : > { %8103 = vmatpush1.bf16.msra.mxu1 %v10233_v46  ;;  %8511 = vmatpush1.bf16.msra.mxu0 %v10236_v36  ;;  %v10317_v46 = vld [vmem:[%s11652_s23 + $0x644] ss:$8 sps:$4 sm:$0xff]  }
 0x27c   : > { %8104 = vmatprep.subr.bf16.mxu1 %v10241_v37  ;;  %8512 = vmatprep.subr.bf16.mxu0 %v10244_v38  ;;  %v10320_v36 = vld [vmem:[%s11652_s23 + $0xe44] ss:$8 sps:$4 sm:$0xff]   ;;  %v10315_v37 = vld [vmem:[%s11652_s23 + $0x640] ss:$8 sps:$4 sm:$0xff]  }
 0x27d   : > { %v10318_v38 = vld [vmem:[%s11652_s23 + $0xe40] ss:$8 sps:$4 sm:$0xff]  }
 0x27f   : > { %8105 = vmatpush1.bf16.msra.mxu1 %v10239_v41  ;;  %8513 = vmatpush1.bf16.msra.mxu0 %v10242_v47  ;;  %v10323_v41 = vld [vmem:[%s11652_s23 + $0x654] ss:$8 sps:$4 sm:$0xff]  }
 0x280   : > { %8106 = vmatprep.subr.bf16.mxu1 %v10247_v48  ;;  %8514 = vmatprep.subr.bf16.mxu0 %v10250_v49  ;;  %v10326_v47 = vld [vmem:[%s11652_s23 + $0xe54] ss:$8 sps:$4 sm:$0xff]   ;;  %v10321_v48 = vld [vmem:[%s11652_s23 + $0x650] ss:$8 sps:$4 sm:$0xff]  }
 0x281   : > { %v10324_v49 = vld [vmem:[%s11652_s23 + $0xe50] ss:$8 sps:$4 sm:$0xff]  }
 0x283   : > { %8107 = vmatpush1.bf16.msra.mxu1 %v10245_v50  ;;  %8515 = vmatpush1.bf16.msra.mxu0 %v10248_v51  ;;  %v10329_v50 = vld [vmem:[%s11652_s23 + $0x664] ss:$8 sps:$4 sm:$0xff]  }
 0x284   : > { %8108 = vmatprep.subr.bf16.mxu1 %v10253_v54  ;;  %8516 = vmatprep.subr.bf16.mxu0 %v10256_v55  ;;  %v10332_v51 = vld [vmem:[%s11652_s23 + $0xe64] ss:$8 sps:$4 sm:$0xff]   ;;  %v10327_v54 = vld [vmem:[%s11652_s23 + $0x660] ss:$8 sps:$4 sm:$0xff]  }
 0x285   : > { %v10330_v55 = vld [vmem:[%s11652_s23 + $0xe60] ss:$8 sps:$4 sm:$0xff]  }
 0x287   : > { %8109 = vmatpush1.bf16.msra.mxu1 %v10251_v58  ;;  %8517 = vmatpush1.bf16.msra.mxu0 %v10254_v59  ;;  %v10335_v58 = vld [vmem:[%s11652_s23 + $0x674] ss:$8 sps:$4 sm:$0xff]  }
 0x288   : > { %8110 = vmatprep.subr.bf16.mxu1 %v10259_v60  ;;  %8518 = vmatprep.subr.bf16.mxu0 %v10262_v61  ;;  %v10338_v59 = vld [vmem:[%s11652_s23 + $0xe74] ss:$8 sps:$4 sm:$0xff]   ;;  %v10333_v60 = vld [vmem:[%s11652_s23 + $0x670] ss:$8 sps:$4 sm:$0xff]  }
 0x289   : > { %v10336_v61 = vld [vmem:[%s11652_s23 + $0xe70] ss:$8 sps:$4 sm:$0xff]  }
 0x28b   : > { %8111 = vmatpush1.bf16.msra.mxu1 %v10257_v62  ;;  %8519 = vmatpush1.bf16.msra.mxu0 %v10260_v52  ;;  %v10341_v62 = vld [vmem:[%s11652_s23 + $0x684] ss:$8 sps:$4 sm:$0xff]  }
 0x28c   : > { %8112 = vmatprep.subr.bf16.mxu1 %v10265_v53  ;;  %8520 = vmatprep.subr.bf16.mxu0 %v10268_v56  ;;  %v10344_v52 = vld [vmem:[%s11652_s23 + $0xe84] ss:$8 sps:$4 sm:$0xff]   ;;  %v10339_v53 = vld [vmem:[%s11652_s23 + $0x680] ss:$8 sps:$4 sm:$0xff]  }
 0x28d   : > { %v10342_v56 = vld [vmem:[%s11652_s23 + $0xe80] ss:$8 sps:$4 sm:$0xff]  }
 0x28f   : > { %8113 = vmatpush1.bf16.msra.mxu1 %v10263_v57  ;;  %8521 = vmatpush1.bf16.msra.mxu0 %v10266_v63  ;;  %v10347_v57 = vld [vmem:[%s11652_s23 + $0x694] ss:$8 sps:$4 sm:$0xff]  }
 0x290   : > { %8114 = vmatprep.subr.bf16.mxu1 %v10271_v8  ;;  %8522 = vmatprep.subr.bf16.mxu0 %v10274_v9  ;;  %v10350_v63 = vld [vmem:[%s11652_s23 + $0xe94] ss:$8 sps:$4 sm:$0xff]   ;;  %v10345_v8 = vld [vmem:[%s11652_s23 + $0x690] ss:$8 sps:$4 sm:$0xff]  }
 0x291   : > { %v10348_v9 = vld [vmem:[%s11652_s23 + $0xe90] ss:$8 sps:$4 sm:$0xff]  }
 0x293   : > { %8115 = vmatpush1.bf16.msra.mxu1 %v10269_v12  ;;  %8523 = vmatpush1.bf16.msra.mxu0 %v10272_v13  ;;  %v10353_v12 = vld [vmem:[%s11652_s23 + $0x6a4] ss:$8 sps:$4 sm:$0xff]  }
 0x294   : > { %8116 = vmatprep.subr.bf16.mxu1 %v10278_v14  ;;  %8524 = vmatprep.subr.bf16.mxu0 %v10282_v15  ;;  %v10356_v13 = vld [vmem:[%s11652_s23 + $0xea4] ss:$8 sps:$4 sm:$0xff]   ;;  %v10351_v14 = vld [vmem:[%s11652_s23 + $0x6a0] ss:$8 sps:$4 sm:$0xff]  }
 0x295   : > { %v10354_v15 = vld [vmem:[%s11652_s23 + $0xea0] ss:$8 sps:$4 sm:$0xff]  }
 0x297   : > { %8117 = vmatpush1.bf16.msra.mxu1 %v10276_v16  ;;  %8525 = vmatpush1.bf16.msra.mxu0 %v10280_v17  ;;  %v10359_v16 = vld [vmem:[%s11652_s23 + $0x6b4] ss:$8 sps:$4 sm:$0xff]  }
 0x298   : > { %8118 = vmatprep.subr.bf16.mxu1 %v10287_v18  ;;  %8526 = vmatprep.subr.bf16.mxu0 %v10290_v19  ;;  %v10362_v17 = vld [vmem:[%s11652_s23 + $0xeb4] ss:$8 sps:$4 sm:$0xff]   ;;  %v10357_v18 = vld [vmem:[%s11652_s23 + $0x6b0] ss:$8 sps:$4 sm:$0xff]  }
 0x299   : > { %v10360_v19 = vld [vmem:[%s11652_s23 + $0xeb0] ss:$8 sps:$4 sm:$0xff]  }
 0x29b   : > { %8119 = vmatpush1.bf16.msra.mxu1 %v10285_v20  ;;  %8527 = vmatpush1.bf16.msra.mxu0 %v10288_v21  ;;  %v10365_v20 = vld [vmem:[%s11652_s23 + $0x6c4] ss:$8 sps:$4 sm:$0xff]  }
 0x29c   : > { %8139 = vmatprep.subr.bf16.mxu1 %v10293_v4  ;;  %8547 = vmatprep.subr.bf16.mxu0 %v10296_v7  ;;  %v10368_v21 = vld [vmem:[%s11652_s23 + $0xec4] ss:$8 sps:$4 sm:$0xff]   ;;  %v10363_v4 = vld [vmem:[%s11652_s23 + $0x6c0] ss:$8 sps:$4 sm:$0xff]  }
 0x29d   : > { %v10366_v7 = vld [vmem:[%s11652_s23 + $0xec0] ss:$8 sps:$4 sm:$0xff]  }
 0x29e   : > { %8121 = vmatmul.mubr.bf16.vlgmr.msra.gmra.mrb[0].mxu1 %v8967_v24  ;;  %8529 = vmatmul.mubr.bf16.vlgmr.msra.gmra.mrb[0].mxu0 %v8983_v25  ;;  %v10371_v24 = vld [vmem:[%s11652_s23 + $0x6d4] ss:$8 sps:$4 sm:$0xff]  }
 0x29f   : > { %8140 = vmatpush1.bf16.msra.mxu1 %v10291_v0  ;;  %8548 = vmatpush1.bf16.msra.mxu0 %v10294_v1  ;;  %v10374_v25 = vld [vmem:[%s11652_s23 + $0xed4] ss:$8 sps:$4 sm:$0xff]   ;;  %v10378_v0 = vld [vmem:[%s11652_s23 + $0x6e4] ss:$8 sps:$4 sm:$0xff]  }
 0x2a0   : > { %8141 = vmatprep.subr.bf16.mxu1 %v10299_v10  ;;  %8549 = vmatprep.subr.bf16.mxu0 %v10302_v11  ;;  %v10382_v1 = vld [vmem:[%s11652_s23 + $0xee4] ss:$8 sps:$4 sm:$0xff]   ;;  %v10376_v10 = vld [vmem:[%s11652_s23 + $0x6e0] ss:$8 sps:$4 sm:$0xff]  }
 0x2a1   : > { %8130 = vmatprep.mubr.bf16.mxu1 %v9000_v22  ;;  %8538 = vmatprep.mubr.bf16.mxu0 %v9016_v23  ;;  %v10380_v11 = vld [vmem:[%s11652_s23 + $0xee0] ss:$8 sps:$4 sm:$0xff]   ;;  %v10387_v22 = vld [vmem:[%s11652_s23 + $0x6f4] ss:$8 sps:$4 sm:$0xff]  }
 0x2a2   : > { %v10390_v23 = vld [vmem:[%s11652_s23 + $0xef4] ss:$8 sps:$4 sm:$0xff]  }
 0x2a3   : > { %8142 = vmatpush1.bf16.msra.mxu1 %v10297_v3  ;;  %8550 = vmatpush1.bf16.msra.mxu0 %v10300_v2  ;;  %v10385_v3 = vld [vmem:[%s11652_s23 + $0x6f0] ss:$8 sps:$4 sm:$0xff]  }
 0x2a4   : > { %8143 = vmatprep.subr.bf16.mxu1 %v10305_v5  ;;  %8551 = vmatprep.subr.bf16.mxu0 %v10308_v6  ;;  %v10388_v2 = vld [vmem:[%s11652_s23 + $0xef0] ss:$8 sps:$4 sm:$0xff]   ;;  %v10393_v5 = vld [vmem:[%s11652_s23 + $0x704] ss:$8 sps:$4 sm:$0xff]  }
 0x2a5   : > { %v10396_v6 = vld [vmem:[%s11652_s23 + $0xf04] ss:$8 sps:$4 sm:$0xff]  }
 0x2a6   : > { %8131 = vmatmul.mubr.bf16.gmra.mrb[4].mxu1 %v8999_v29  ;;  %8539 = vmatmul.mubr.bf16.gmra.mrb[4].mxu0 %v9015_v30  ;;  %v8969_v29 = vcombine.low %v12233_v28, %v12238_v31  ;;  %v8985_v30 = vcombine.low %v12243_v32, %v12248_v33  ;;  %v10399_v28 = vld [vmem:[%s11652_s23 + $0x714] ss:$8 sps:$4 sm:$0xff]  }
 0x2a7   : > { %8144 = vmatpush1.bf16.msra.mxu1 %v10303_v34  ;;  %8552 = vmatpush1.bf16.msra.mxu0 %v10306_v35  ;;  %v4467_v34 = vld [vmem:[%s12465_s0 + $0x130] sm:$0xff] }
 0x2a8   : > { %8145 = vmatprep.subr.bf16.mxu1 %v10311_v39  ;;  %8553 = vmatprep.subr.bf16.mxu0 %v10314_v40  ;;  %v4475_v35 = vld [vmem:[%s12465_s0 + $0x170] sm:$0xff]  ;;  %v10391_v39 = vld [vmem:[%s11652_s23 + $0x700] ss:$8 sps:$4 sm:$0xff]   ;;  %v9002_v32 = vcombine.high %v4467_v34, %v4467_v34 }
 0x2a9   : > { %8171 = vmatprep.mubr.bf16.mxu1 %v8970_v42  ;;  %8579 = vmatprep.mubr.bf16.mxu0 %v8986_v43  ;;  %v10394_v40 = vld [vmem:[%s11652_s23 + $0xf00] ss:$8 sps:$4 sm:$0xff]   ;;  %v10402_v31 = vld [vmem:[%s11652_s23 + $0xf14] ss:$8 sps:$4 sm:$0xff]   ;;  %v9018_v33 = vcombine.high %v4475_v35, %v4475_v35  ;;  %v10397_v42 = vld [vmem:[%s11652_s23 + $0x710] ss:$8 sps:$4 sm:$0xff]  }
 0x2aa   : > { %v10400_v43 = vld [vmem:[%s11652_s23 + $0xf10] ss:$8 sps:$4 sm:$0xff]  }
 0x2ab   : > { %8146 = vmatpush1.bf16.msra.mxu1 %v10309_v44  ;;  %8554 = vmatpush1.bf16.msra.mxu0 %v10312_v45  ;;  %v10405_v44 = vld [vmem:[%s11652_s23 + $0x724] ss:$8 sps:$4 sm:$0xff]  }
 0x2ac   : > { %8147 = vmatprep.subr.bf16.mxu1 %v10317_v46  ;;  %8555 = vmatprep.subr.bf16.mxu0 %v10320_v36  ;;  %v10408_v45 = vld [vmem:[%s11652_s23 + $0xf24] ss:$8 sps:$4 sm:$0xff]   ;;  %v12331_v46 = vld [vmem:[%s12465_s0 + $0x38] sm:$0xff]  ;;  %v9001_v36 = vcombine.low %v4467_v34, %v4467_v34 }
 0x2ad   : > { %v10469_v34 = vld [vmem:[%s11652_s23 + $0x7d0] ss:$8 sps:$4 sm:$0xff]  }
 0x2af   : > { %8148 = vmatpush1.bf16.msra.mxu1 %v10315_v37  ;;  %8556 = vmatpush1.bf16.msra.mxu0 %v10318_v38  ;;  %v9017_v37 = vcombine.low %v4475_v35, %v4475_v35  ;;  %v12336_v38 = vld [vmem:[%s12465_s0 + $0xb8] sm:$0xff] }
 0x2b0   : > { %8149 = vmatprep.subr.bf16.mxu1 %v10323_v41  ;;  %8557 = vmatprep.subr.bf16.mxu0 %v10326_v47  ;;  %v12341_v41 = vld [vmem:[%s12465_s0 + $0x78] sm:$0xff] }
 0x2b1   : > { %v12346_v47 = vld [vmem:[%s12465_s0 + $0xf8] sm:$0xff] }
 0x2b2   : > { %v10472_v35 = vld [vmem:[%s11652_s23 + $0xfd0] ss:$8 sps:$4 sm:$0xff]  }
 0x2b3   : > { %8150 = vmatpush1.bf16.msra.mxu1 %v10321_v48  ;;  %8558 = vmatpush1.bf16.msra.mxu0 %v10324_v49  ;;  %v10403_v48 = vld [vmem:[%s11652_s23 + $0x720] ss:$8 sps:$4 sm:$0xff]  }
 0x2b4   : > { %8151 = vmatprep.subr.bf16.mxu1 %v10329_v50  ;;  %8559 = vmatprep.subr.bf16.mxu0 %v10332_v51  ;;  %v10406_v49 = vld [vmem:[%s11652_s23 + $0xf20] ss:$8 sps:$4 sm:$0xff]   ;;  %v10411_v50 = vld [vmem:[%s11652_s23 + $0x734] ss:$8 sps:$4 sm:$0xff]  }
 0x2b5   : > { %v10414_v51 = vld [vmem:[%s11652_s23 + $0xf34] ss:$8 sps:$4 sm:$0xff]  }
 0x2b7   : > { %8152 = vmatpush1.bf16.msra.mxu1 %v10327_v54  ;;  %8560 = vmatpush1.bf16.msra.mxu0 %v10330_v55  ;;  %v8972_v54 = vcombine.high %v12331_v46, %v12336_v38  ;;  %v8988_v55 = vcombine.high %v12341_v41, %v12346_v47 }
 0x2b8   : > { %8153 = vmatprep.subr.bf16.mxu1 %v10335_v58  ;;  %8561 = vmatprep.subr.bf16.mxu0 %v10338_v59  ;;  %v10409_v58 = vld [vmem:[%s11652_s23 + $0x730] ss:$8 sps:$4 sm:$0xff]  }
 0x2b9   : > { %v10412_v59 = vld [vmem:[%s11652_s23 + $0xf30] ss:$8 sps:$4 sm:$0xff]  }
 0x2bb   : > { %8154 = vmatpush1.bf16.msra.mxu1 %v10333_v60  ;;  %8562 = vmatpush1.bf16.msra.mxu0 %v10336_v61  ;;  %v10417_v60 = vld [vmem:[%s11652_s23 + $0x744] ss:$8 sps:$4 sm:$0xff]  }
 0x2bc   : > { %8155 = vmatprep.subr.bf16.mxu1 %v10341_v62  ;;  %8563 = vmatprep.subr.bf16.mxu0 %v10344_v52  ;;  %v10420_v61 = vld [vmem:[%s11652_s23 + $0xf44] ss:$8 sps:$4 sm:$0xff]   ;;  %v10415_v62 = vld [vmem:[%s11652_s23 + $0x740] ss:$8 sps:$4 sm:$0xff]  }
 0x2bd   : > { %v10418_v52 = vld [vmem:[%s11652_s23 + $0xf40] ss:$8 sps:$4 sm:$0xff]  }
 0x2bf   : > { %8156 = vmatpush1.bf16.msra.mxu1 %v10339_v53  ;;  %8564 = vmatpush1.bf16.msra.mxu0 %v10342_v56  ;;  %v10423_v53 = vld [vmem:[%s11652_s23 + $0x754] ss:$8 sps:$4 sm:$0xff]  }
 0x2c0   : > { %8157 = vmatprep.subr.bf16.mxu1 %v10347_v57  ;;  %8565 = vmatprep.subr.bf16.mxu0 %v10350_v63  ;;  %v10426_v56 = vld [vmem:[%s11652_s23 + $0xf54] ss:$8 sps:$4 sm:$0xff]   ;;  %v10421_v57 = vld [vmem:[%s11652_s23 + $0x750] ss:$8 sps:$4 sm:$0xff]  }
 0x2c1   : > { %v10424_v63 = vld [vmem:[%s11652_s23 + $0xf50] ss:$8 sps:$4 sm:$0xff]  }
 0x2c3   : > { %8158 = vmatpush1.bf16.msra.mxu1 %v10345_v8  ;;  %8566 = vmatpush1.bf16.msra.mxu0 %v10348_v9  ;;  %v10429_v8 = vld [vmem:[%s11652_s23 + $0x764] ss:$8 sps:$4 sm:$0xff]  }
 0x2c4   : > { %8159 = vmatprep.subr.bf16.mxu1 %v10353_v12  ;;  %8567 = vmatprep.subr.bf16.mxu0 %v10356_v13  ;;  %v10432_v9 = vld [vmem:[%s11652_s23 + $0xf64] ss:$8 sps:$4 sm:$0xff]   ;;  %v10427_v12 = vld [vmem:[%s11652_s23 + $0x760] ss:$8 sps:$4 sm:$0xff]  }
 0x2c5   : > { %v10430_v13 = vld [vmem:[%s11652_s23 + $0xf60] ss:$8 sps:$4 sm:$0xff]  }
 0x2c7   : > { %8160 = vmatpush1.bf16.msra.mxu1 %v10351_v14  ;;  %8568 = vmatpush1.bf16.msra.mxu0 %v10354_v15  ;;  %v10435_v14 = vld [vmem:[%s11652_s23 + $0x774] ss:$8 sps:$4 sm:$0xff]  }
 0x2c8   : > { %8161 = vmatprep.subr.bf16.mxu1 %v10359_v16  ;;  %8569 = vmatprep.subr.bf16.mxu0 %v10362_v17  ;;  %v10438_v15 = vld [vmem:[%s11652_s23 + $0xf74] ss:$8 sps:$4 sm:$0xff]   ;;  %v10433_v16 = vld [vmem:[%s11652_s23 + $0x770] ss:$8 sps:$4 sm:$0xff]  }
 0x2c9   : > { %v10436_v17 = vld [vmem:[%s11652_s23 + $0xf70] ss:$8 sps:$4 sm:$0xff]  }
 0x2cb   : > { %8162 = vmatpush1.bf16.msra.mxu1 %v10357_v18  ;;  %8570 = vmatpush1.bf16.msra.mxu0 %v10360_v19  ;;  %v10441_v18 = vld [vmem:[%s11652_s23 + $0x784] ss:$8 sps:$4 sm:$0xff]  }
 0x2cc   : > { %8163 = vmatprep.subr.bf16.mxu1 %v10365_v20  ;;  %8571 = vmatprep.subr.bf16.mxu0 %v10368_v21  ;;  %v10444_v19 = vld [vmem:[%s11652_s23 + $0xf84] ss:$8 sps:$4 sm:$0xff]   ;;  %v10439_v20 = vld [vmem:[%s11652_s23 + $0x780] ss:$8 sps:$4 sm:$0xff]  }
 0x2cd   : > { %v10442_v21 = vld [vmem:[%s11652_s23 + $0xf80] ss:$8 sps:$4 sm:$0xff]  }
 0x2cf   : > { %8164 = vmatpush1.bf16.msra.mxu1 %v10363_v4  ;;  %8572 = vmatpush1.bf16.msra.mxu0 %v10366_v7  ;;  %v10447_v4 = vld [vmem:[%s11652_s23 + $0x794] ss:$8 sps:$4 sm:$0xff]  }
 0x2d0   : > { %8165 = vmatprep.subr.bf16.mxu1 %v10371_v24  ;;  %8573 = vmatprep.subr.bf16.mxu0 %v10374_v25  ;;  %v10450_v7 = vld [vmem:[%s11652_s23 + $0xf94] ss:$8 sps:$4 sm:$0xff]   ;;  %v10445_v24 = vld [vmem:[%s11652_s23 + $0x790] ss:$8 sps:$4 sm:$0xff]  }
 0x2d1   : > { %v10448_v25 = vld [vmem:[%s11652_s23 + $0xf90] ss:$8 sps:$4 sm:$0xff]  }
 0x2d3   : > { %8166 = vmatpush1.bf16.msra.mxu1 %v10369_v26  ;;  %8574 = vmatpush1.bf16.msra.mxu0 %v10372_v27  ;;  %v10453_v26 = vld [vmem:[%s11652_s23 + $0x7a4] ss:$8 sps:$4 sm:$0xff]  }
 0x2d4   : > { %8167 = vmatprep.subr.bf16.mxu1 %v10378_v0  ;;  %8575 = vmatprep.subr.bf16.mxu0 %v10382_v1  ;;  %v10456_v27 = vld [vmem:[%s11652_s23 + $0xfa4] ss:$8 sps:$4 sm:$0xff]   ;;  %v10451_v0 = vld [vmem:[%s11652_s23 + $0x7a0] ss:$8 sps:$4 sm:$0xff]  }
 0x2d5   : > { %v10454_v1 = vld [vmem:[%s11652_s23 + $0xfa0] ss:$8 sps:$4 sm:$0xff]  }
 0x2d7   : > { %8168 = vmatpush1.bf16.msra.mxu1 %v10376_v10  ;;  %8576 = vmatpush1.bf16.msra.mxu0 %v10380_v11  ;;  %v10459_v10 = vld [vmem:[%s11652_s23 + $0x7b4] ss:$8 sps:$4 sm:$0xff]  }
 0x2d8   : > { %8169 = vmatprep.subr.bf16.mxu1 %v10387_v22  ;;  %8577 = vmatprep.subr.bf16.mxu0 %v10390_v23  ;;  %v10462_v11 = vld [vmem:[%s11652_s23 + $0xfb4] ss:$8 sps:$4 sm:$0xff]   ;;  %v10457_v22 = vld [vmem:[%s11652_s23 + $0x7b0] ss:$8 sps:$4 sm:$0xff]  }
 0x2d9   : > { %v10460_v23 = vld [vmem:[%s11652_s23 + $0xfb0] ss:$8 sps:$4 sm:$0xff]  }
 0x2db   : > { %8170 = vmatpush1.bf16.msra.mxu1 %v10385_v3  ;;  %8578 = vmatpush1.bf16.msra.mxu0 %v10388_v2  ;;  %v10465_v3 = vld [vmem:[%s11652_s23 + $0x7c4] ss:$8 sps:$4 sm:$0xff]  }
 0x2dc   : > { %8190 = vmatprep.subr.bf16.mxu1 %v10393_v5  ;;  %8598 = vmatprep.subr.bf16.mxu0 %v10396_v6  ;;  %v10468_v2 = vld [vmem:[%s11652_s23 + $0xfc4] ss:$8 sps:$4 sm:$0xff]   ;;  %v10463_v5 = vld [vmem:[%s11652_s23 + $0x7c0] ss:$8 sps:$4 sm:$0xff]  }
 0x2dd   : > { %v10466_v6 = vld [vmem:[%s11652_s23 + $0xfc0] ss:$8 sps:$4 sm:$0xff]  }
 0x2de   : > { %8172 = vmatmul.mubr.bf16.vlgmr.msra.gmra.mrb[0].mxu1 %v8969_v29  ;;  %8580 = vmatmul.mubr.bf16.vlgmr.msra.gmra.mrb[0].mxu0 %v8985_v30  ;;  %v10471_v29 = vld [vmem:[%s11652_s23 + $0x7d4] ss:$8 sps:$4 sm:$0xff]  }
 0x2df   : > { %8191 = vmatpush1.bf16.msra.mxu1 %v10391_v39  ;;  %8599 = vmatpush1.bf16.msra.mxu0 %v10394_v40  ;;  %v10474_v30 = vld [vmem:[%s11652_s23 + $0xfd4] ss:$8 sps:$4 sm:$0xff]   ;;  %v10480_v39 = vld [vmem:[%s11652_s23 + $0x7e4] ss:$8 sps:$4 sm:$0xff]  }
 0x2e0   : > { %8192 = vmatprep.subr.bf16.mxu1 %v10399_v28  ;;  %8600 = vmatprep.subr.bf16.mxu0 %v10402_v31  ;;  %v10484_v40 = vld [vmem:[%s11652_s23 + $0xfe4] ss:$8 sps:$4 sm:$0xff]   ;;  %v10478_v28 = vld [vmem:[%s11652_s23 + $0x7e0] ss:$8 sps:$4 sm:$0xff]  }
 0x2e1   : > { %8181 = vmatprep.mubr.bf16.mxu1 %v9002_v32  ;;  %8589 = vmatprep.mubr.bf16.mxu0 %v9018_v33  ;;  %v10482_v31 = vld [vmem:[%s11652_s23 + $0xfe0] ss:$8 sps:$4 sm:$0xff]   ;;  %v10487_v32 = vld [vmem:[%s11652_s23 + $0x7f4] ss:$8 sps:$4 sm:$0xff]  }
 0x2e2   : > { %v10490_v33 = vld [vmem:[%s11652_s23 + $0xff4] ss:$8 sps:$4 sm:$0xff]  }
 0x2e3   : > { %8193 = vmatpush1.bf16.msra.mxu1 %v10397_v42  ;;  %8601 = vmatpush1.bf16.msra.mxu0 %v10400_v43  ;;  %v10485_v42 = vld [vmem:[%s11652_s23 + $0x7f0] ss:$8 sps:$4 sm:$0xff]  }
 0x2e4   : > { %8194 = vmatprep.subr.bf16.mxu1 %v10405_v44  ;;  %8602 = vmatprep.subr.bf16.mxu0 %v10408_v45  ;;  %v10488_v43 = vld [vmem:[%s11652_s23 + $0xff0] ss:$8 sps:$4 sm:$0xff]   ;;  %s8954_s23 = sshll.u32 %s10566_s21, 1 }
 0x2e5   : > { %v4468_v44 = vld [vmem:[%s12465_s0 + $0x138] sm:$0xff]  ;;  %p4414_p10 = scmp.lt.s32.totalorder %s8954_s23, 3 }
 0x2e6   : > { %8182 = vmatmul.mubr.bf16.gmra.mrb[4].mxu1 %v9001_v36  ;;  %8590 = vmatmul.mubr.bf16.gmra.mrb[4].mxu0 %v9017_v37  ;;  %v4476_v45 = vld [vmem:[%s12465_s0 + $0x178] sm:$0xff]  ;;  %v8971_v36 = vcombine.low %v12331_v46, %v12336_v38  ;;  %v8987_v37 = vcombine.low %v12341_v41, %v12346_v47 }
 0x2e7   : > { %8195 = vmatpush1.bf16.msra.mxu1 %v10403_v48  ;;  %8603 = vmatpush1.bf16.msra.mxu0 %v10406_v49  ;;  %v9004_v48 = vcombine.high %v4468_v44, %v4468_v44  ;;  %v9020_v49 = vcombine.high %v4476_v45, %v4476_v45  ;;  %s12476_s23 = smov (!%p4414_p10, %s8954_s23), 3 }
 0x2e8   : > { %8196 = vmatprep.subr.bf16.mxu1 %v10411_v50  ;;  %8604 = vmatprep.subr.bf16.mxu0 %v10414_v51  ;;  %v9003_v50 = vcombine.low %v4468_v44, %v4468_v44  ;;  %v9019_v51 = vcombine.low %v4476_v45, %v4476_v45  ;;  %s4416_s6 = scalar_lea.vmem %s12467_s2, %s12476_s23  ;;  %s4422_s10 = scalar_lea.vmem %s12469_s4, %s12476_s23 }
 0x2e9   : > { %8222 = vmatprep.mubr.bf16.mxu1 %v8972_v54  ;;  %8630 = vmatprep.mubr.bf16.mxu0 %v8988_v55  ;;  %v4991_v54 = vlaneseq  ;;  %v4989_v41 = vld [vmem:[%s4416_s6] sm:$0x3]  ;;  %s4427_s13 = scalar_lea.vmem %s12470_s5, %s12476_s23 }
 0x2eb   : > { %8197 = vmatpush1.bf16.msra.mxu1 %v10409_v58  ;;  %8605 = vmatpush1.bf16.msra.mxu0 %v10412_v59  ;;  %v12420_v46 = vshrl.u32 %v4991_v54, 7  ;;  %vm8721_vm1 = vcmp.lt.s32.totalorder %v4991_v54, 256 }
 0x2ec   : > { %8198 = vmatprep.subr.bf16.mxu1 %v10417_v60  ;;  %8606 = vmatprep.subr.bf16.mxu0 %v10420_v61 }
 0x2ed   : > { %v4993_v38 = vsub.s32 0, %v12420_v46  ;;  %v4997_v47 = vsub.s32 1, %v12420_v46 }
 0x2ef   : > { %8199 = vmatpush1.bf16.msra.mxu1 %v10415_v62  ;;  %8607 = vmatpush1.bf16.msra.mxu0 %v10418_v52  ;;  %v4994_v55 = vrot.slane %v4989_v41, %v4993_v38  ;;  %v4998_v58 = vrot.slane %v4989_v41, %v4997_v47 }
 0x2f0   : > { %8200 = vmatprep.subr.bf16.mxu1 %v10423_v53  ;;  %8608 = vmatprep.subr.bf16.mxu0 %v10426_v56 }
 0x2f3   : > { %8201 = vmatpush1.bf16.msra.mxu1 %v10421_v57  ;;  %8609 = vmatpush1.bf16.msra.mxu0 %v10424_v63 }
 0x2f4   : > { %8202 = vmatprep.subr.bf16.mxu1 %v10429_v8  ;;  %8610 = vmatprep.subr.bf16.mxu0 %v10432_v9 }
 0x2f7   : > { %8203 = vmatpush1.bf16.msra.mxu1 %v10427_v12  ;;  %8611 = vmatpush1.bf16.msra.mxu0 %v10430_v13 }
 0x2f8   : > { %8204 = vmatprep.subr.bf16.mxu1 %v10435_v14  ;;  %8612 = vmatprep.subr.bf16.mxu0 %v10438_v15 }
 0x2fb   : > { %8205 = vmatpush1.bf16.msra.mxu1 %v10433_v16  ;;  %8613 = vmatpush1.bf16.msra.mxu0 %v10436_v17 }
 0x2fc   : > { %8206 = vmatprep.subr.bf16.mxu1 %v10441_v18  ;;  %8614 = vmatprep.subr.bf16.mxu0 %v10444_v19  ;;  %v8675_v18 = vadd.s32 16, %v12420_v46 }
 0x2fe   : > { %vm8678_vm0 = vcmp.lt.s32.totalorder %v8675_v18, 18 }
 0x2ff   : > { %8207 = vmatpush1.bf16.msra.mxu1 %v10439_v20  ;;  %8615 = vmatpush1.bf16.msra.mxu0 %v10442_v21 }
 0x300   : > { %8208 = vmatprep.subr.bf16.mxu1 %v10447_v4  ;;  %8616 = vmatprep.subr.bf16.mxu0 %v10450_v7 }
 0x303   : > { %8209 = vmatpush1.bf16.msra.mxu1 %v10445_v24  ;;  %8617 = vmatpush1.bf16.msra.mxu0 %v10448_v25 }
 0x304   : > { %8210 = vmatprep.subr.bf16.mxu1 %v10453_v26  ;;  %8618 = vmatprep.subr.bf16.mxu0 %v10456_v27 }
 0x307   : > { %8211 = vmatpush1.bf16.msra.mxu1 %v10451_v0  ;;  %8619 = vmatpush1.bf16.msra.mxu0 %v10454_v1 }
 0x308   : > { %8212 = vmatprep.subr.bf16.mxu1 %v10459_v10  ;;  %8620 = vmatprep.subr.bf16.mxu0 %v10462_v11 }
 0x30b   : > { %8213 = vmatpush1.bf16.msra.mxu1 %v10457_v22  ;;  %8621 = vmatpush1.bf16.msra.mxu0 %v10460_v23 }
 0x30c   : > { %8214 = vmatprep.subr.bf16.mxu1 %v10465_v3  ;;  %8622 = vmatprep.subr.bf16.mxu0 %v10468_v2 }
 0x30f   : > { %8215 = vmatpush1.bf16.msra.mxu1 %v10463_v5  ;;  %8623 = vmatpush1.bf16.msra.mxu0 %v10466_v6 }
 0x310   : > { %8216 = vmatprep.subr.bf16.mxu1 %v10471_v29  ;;  %8624 = vmatprep.subr.bf16.mxu0 %v10474_v30 }
 0x313   : > { %8217 = vmatpush1.bf16.msra.mxu1 %v10469_v34  ;;  %8625 = vmatpush1.bf16.msra.mxu0 %v10472_v35 }
 0x314   : > { %8218 = vmatprep.subr.bf16.mxu1 %v10480_v39  ;;  %8626 = vmatprep.subr.bf16.mxu0 %v10484_v40 }
 0x317   : > { %8219 = vmatpush1.bf16.msra.mxu1 %v10478_v28  ;;  %8627 = vmatpush1.bf16.msra.mxu0 %v10482_v31 }
 0x318   : > { %8220 = vmatprep.subr.bf16.mxu1 %v10487_v32  ;;  %8628 = vmatprep.subr.bf16.mxu0 %v10490_v33 }
 0x31b   : > { %8221 = vmatpush1.bf16.msra.mxu1 %v10485_v42  ;;  %8629 = vmatpush1.bf16.msra.mxu0 %v10488_v43 }
 0x31e   : > { %8223 = vmatmul.mubr.bf16.vlgmr.msra.gmra.mrb[0].mxu1 %v8971_v36  ;;  %8631 = vmatmul.mubr.bf16.vlgmr.msra.gmra.mrb[0].mxu0 %v8987_v37 }
 0x31f   : > { %8232 = vmatprep.mubr.bf16.mxu1 %v9004_v48  ;;  %8640 = vmatprep.mubr.bf16.mxu0 %v9020_v49  ;;  %v10519_v48 = vmov 1966171168  }
 0x320   : > { %v8705_v49 = vunpack.c.l.s4 %v10519_v48 }
 0x326   : > { %8233 = vmatmul.mubr.bf16.gmra.mrb[4].mxu1 %v9003_v50  ;;  %8641 = vmatmul.mubr.bf16.gmra.mrb[4].mxu0 %v9019_v51 }
 0x3f1   : > { %v8224_v59 = vpop.f32.mrb[0].mxu1  ;;  %v8632_v60 = vpop.f32.mrb[0].mxu0 }
 0x3f2   : > { %v9545_v61 = vadd.f32 %v8224_v59, %v4994_v55  ;;  %v8226_v62 = vpop.f32.mrb[1].mxu1  ;;  %v8634_v52 = vpop.f32.mrb[1].mxu0 }
 0x3f3   : > { %v9547_v53 = vadd.f32 %v8226_v62, %v4998_v58  ;;  %v8228_v56 = vpop.f32.mrb[2].mxu1  ;;  %v8636_v57 = vpop.f32.mrb[2].mxu0 }
 0x3f4   : > { %v9546_v63 = vadd.f32 %v9545_v61, %v8632_v60  ;;  %v9549_v8 = vadd.f32 %v8228_v56, %v4994_v55  ;;  %v8230_v9 = vpop.f32.mrb[3].mxu1  ;;  %v8638_v12 = vpop.f32.mrb[3].mxu0  ;;  %v8706_v60 = vunpack.c.0.s8 %v8705_v49 }
 0x3f5   : > { %v9548_v13 = vadd.f32 %v9547_v53, %v8634_v52  ;;  %v9551_v14 = vadd.f32 %v8230_v9, %v4998_v58 }
 0x3f6   : > { %v9550_v15 = vadd.f32 %v9549_v8, %v8636_v57  ;;  %v8724_v19 = vmul.f32 %v9546_v63, %v9546_v63  ;;  %v8709_v9 = vsub.s32 %v8706_v60, %v12420_v46 }
 0x3f7   : > { %v9541_v16 = vpack.c.bf16 %v9548_v13, %v9546_v63  ;;  %v9552_v17 = vadd.f32 %v9551_v14, %v8638_v12  ;;  %v8725_v4 = vmul.f32 %v9548_v13, %v9548_v13 }
 0x3f8   : > { %v8685_v20 = vadd.f32 %v9550_v15, %v9546_v63  ;;  %v8726_v21 = vmul.f32 %v9550_v15, %v9550_v15 }
 0x3f9   : > { %v9542_v7 = vpack.c.bf16 %v9552_v17, %v9550_v15  ;;  %v8693_v24 = vadd.f32 %v9552_v17, %v9548_v13  ;;  %v8727_v25 = vmul.f32 %v9552_v17, %v9552_v17  ;;  %v8234_v26 = vpop.f32.mrb[4].mxu1  ;;  %v8642_v27 = vpop.f32.mrb[4].mxu0  ;;  %8669 = vst [vmem:[%s12431_s18] sm:$0xff] %v9541_v16 }
 0x3fa   : > { %v8730_v0 = vadd.f32 %v8726_v21, %v8724_v19  ;;  %v9553_v1 = vadd.f32 %v8234_v26, %v4994_v55  ;;  %v8236_v10 = vpop.f32.mrb[5].mxu1  ;;  %v8644_v11 = vpop.f32.mrb[5].mxu0 }
 0x3fb   : > { %v8738_v22 = vadd.f32 %v8727_v25, %v8725_v4  ;;  %v9555_v23 = vadd.f32 %v8236_v10, %v4998_v58  ;;  %8670 = vst [vmem:[%s12431_s18 + $0x8] sm:$0xff] %v9542_v7  ;;  %v8238_v3 = vpop.f32.mrb[6].mxu1  ;;  %v8646_v2 = vpop.f32.mrb[6].mxu0 }
 0x3fc   : > { %v9554_v5 = vadd.f32 %v9553_v1, %v8642_v27  ;;  %v8239_v6 = vpop.f32.mrb[7].mxu1  ;;  %v8647_v29 = vpop.f32.mrb[7].mxu0 }
 0x3fd   : > { %v9556_v30 = vadd.f32 %v9555_v23, %v8644_v11 }
 0x3fe   : > { %v8683_v34 = vsel %vm8678_vm0, %v9554_v5, 0.0 }
 0x3ff   : > { %v8686_v35 = vadd.f32 %v8685_v20, %v8683_v34  ;;  %v8728_v39 = vmul.f32 %v8683_v34, %v8683_v34  ;;  %v9543_v40 = vpack.c.bf16 %v9556_v30, %v9554_v5  ;;  %v8684_v28 = vsel %vm8678_vm0, %v9556_v30, 0.0 }
 0x400   : > { %v8694_v31 = vadd.f32 %v8693_v24, %v8684_v28  ;;  %v8729_v32 = vmul.f32 %v8684_v28, %v8684_v28  ;;  %v8814_v20 = vld [vmem:[%s12431_s18] sm:$0xff] (%p10581_p5) }
 0x401   : > { %v8687_v33 = vrot.slane %v8686_v35, 4  ;;  %v8731_v42 = vadd.f32 %v8730_v0, %v8728_v39  ;;  %8671 = vst [vmem:[%s12431_s18 + $0x10] sm:$0xff] %v9543_v40  ;;  %8815 = vst [vmem:[%s8782_s17] sm:$0xff] (%p10581_p5), %v8814_v20 }
 0x402   : > { %v8695_v43 = vrot.slane %v8694_v31, 4  ;;  %v8739_v44 = vadd.f32 %v8738_v22, %v8729_v32  ;;  %v8816_v21 = vld [vmem:[%s12431_s18 + $0x8] sm:$0xff] (%p10581_p5) }
 0x403   : > { %v8688_v45 = vadd.f32 %v8687_v33, %v8686_v35  ;;  %v8732_v36 = vrot.slane %v8731_v42, 4  ;;  %8817 = vst [vmem:[%s8782_s17 + $0x10] sm:$0xff] (%p10581_p5), %v8816_v21 }
 0x404   : > { %v8696_v37 = vadd.f32 %v8695_v43, %v8694_v31  ;;  %v8740_v50 = vrot.slane %v8739_v44, 4 }
 0x405   : > { %v8689_v51 = vrot.slane %v8688_v45, 2  ;;  %v8733_v38 = vadd.f32 %v8732_v36, %v8731_v42 }
 0x406   : > { %v8697_v41 = vrot.slane %v8696_v37, 2  ;;  %v8741_v47 = vadd.f32 %v8740_v50, %v8739_v44 }
 0x407   : > { %v8690_v55 = vadd.f32 %v8689_v51, %v8688_v45  ;;  %v8734_v58 = vrot.slane %v8733_v38, 2 }
 0x408   : > { %v8698_v59 = vadd.f32 %v8697_v41, %v8696_v37  ;;  %v8742_v61 = vrot.slane %v8741_v47, 2  ;;  %v8818_v54 = vld [vmem:[%s12431_s18 + $0x10] sm:$0xff] (%p10581_p5) }
 0x409   : > { %v8691_v62 = vrot.slane %v8690_v55, 1  ;;  %v8735_v52 = vadd.f32 %v8734_v58, %v8733_v38  ;;  %8819 = vst [vmem:[%s8782_s17 + $0x20] sm:$0xff] (%p10581_p5), %v8818_v54 }
 0x40a   : > { %v8699_v53 = vrot.slane %v8698_v59, 1  ;;  %v8743_v56 = vadd.f32 %v8742_v61, %v8741_v47 }
 0x40b   : > { %v8692_v57 = vadd.f32 %v8691_v62, %v8690_v55  ;;  %v8736_v63 = vrot.slane %v8735_v52, 1 }
 0x40c   : > { %v8700_v8 = vadd.f32 %v8699_v53, %v8698_v59  ;;  %v8744_v12 = vrot.slane %v8743_v56, 1 }
 0x40d   : > { %v8737_v13 = vadd.f32 %v8736_v63, %v8735_v52 }
 0x40e   : > { %v8703_v14 = vcombine.low %v8692_v57, %v8700_v8  ;;  %v8745_v15 = vadd.f32 %v8744_v12, %v8743_v56 }
 0x410   : > { %v8710_v16 = vrot.slane %v8703_v14, %v8709_v9  ;;  %v8748_v17 = vcombine.low %v8737_v13, %v8745_v15  ;;  %8779 = sbr.rel (!%p10581_p5) target bundleno = 1047 (0x417), region = 88 }
 0x412   : > { %v8717_v18 = vrot.slane %v8710_v16, %v8709_v9  ;;  %v8755_v19 = vrot.slane %v8748_v17, %v8709_v9 }
 0x414   : > { %8723 = vst.msk [vmem:[%s4422_s10] sm:$0x3] %vm8721_vm1, %v8717_v18  ;;  %v8762_v46 = vrot.slane %v8755_v19, %v8709_v9 }
 0x416   : > { %8764 = vst.msk [vmem:[%s4427_s13] sm:$0x3] %vm8721_vm1, %v8762_v46 }
 0x417 PF: > { %p13_p11 = scmp.ge.s32.totalorder %s10569_s22, 4   ;;  %s12472_s18 = smov %s10513_s19 }
 0x418   : > { %s12473_s19 = smov %s10579_s25  ;;  %s12474_s20 = smov %s10569_s22 }
 0x419   :  { %15 = sbr.rel (!%p13_p11) target bundleno = 2 (0x2), region = 190 }

// kernel: d_forward.15
= control target key start
LH: loop header
LB: loop body
LE: loop exit
PB: predicated region body
PF: predicated region fallthrough
CT: control target
= control target key end

     0   :  { %s9198_s1 = inlined_call_operand.vmem [shape: bf16[8192,128], index: 1, kind: input, shape index: {}]   ;;  %s9199_s0 = inlined_call_operand.vmem [shape: bf16[8,8192], index: 0, kind: input, shape index: {}]   ;;  %s9200_s2 = inlined_call_operand.vmem [shape: f32[1,128], index: 2, kind: input, shape index: {}]   ;;  %s9201_s3 = inlined_call_operand.vmem [shape: f32[8,128], index: 3, kind: output, shape index: {}]  }
   0x1   :  { %v6940_v0 = vld [vmem:[%s9198_s1 + $0x40] sm:$0xff]   ;;  %v6944_v4 = vld [vmem:[%s9198_s1 + $0x48] sm:$0xff]   ;;  %v6948_v8 = vld [vmem:[%s9198_s1 + $0x50] sm:$0xff]  }
   0x2   :  { %v6941_v1 = vld [vmem:[%s9198_s1 + $0xc0] sm:$0xff]   ;;  %6236 = vmatprep.subr.bf16.mxu0 %v6940_v0  ;;  %v6945_v5 = vld [vmem:[%s9198_s1 + $0xc8] sm:$0xff]   ;;  %v6949_v9 = vld [vmem:[%s9198_s1 + $0xd0] sm:$0xff]  }
   0x3   :  { %v6942_v2 = vld [vmem:[%s9198_s1] sm:$0xff]   ;;  %6258 = vmatprep.subr.bf16.mxu1 %v6941_v1  ;;  %v6946_v6 = vld [vmem:[%s9198_s1 + $0x8] sm:$0xff]   ;;  %v6950_v10 = vld [vmem:[%s9198_s1 + $0x10] sm:$0xff]  }
   0x4   :  { %v6943_v3 = vld [vmem:[%s9198_s1 + $0x80] sm:$0xff]   ;;  %6237 = vmatpush3.bf16.msra.mxu0 %v6942_v2  ;;  %v6947_v7 = vld [vmem:[%s9198_s1 + $0x88] sm:$0xff]   ;;  %v6951_v11 = vld [vmem:[%s9198_s1 + $0x90] sm:$0xff]  }
   0x5   :  { %6259 = vmatpush3.bf16.msra.mxu1 %v6943_v3  ;;  %6238 = vmatprep.subr.bf16.mxu0 %v6944_v4  ;;  %v6952_v12 = vld [vmem:[%s9198_s1 + $0x58] sm:$0xff]   ;;  %v6956_v16 = vld [vmem:[%s9198_s1 + $0x60] sm:$0xff]   ;;  %v6960_v20 = vld [vmem:[%s9198_s1 + $0x68] sm:$0xff]  }
   0x6   :  { %6260 = vmatprep.subr.bf16.mxu1 %v6945_v5  ;;  %v6953_v13 = vld [vmem:[%s9198_s1 + $0xd8] sm:$0xff]   ;;  %v6957_v17 = vld [vmem:[%s9198_s1 + $0xe0] sm:$0xff]   ;;  %v6961_v21 = vld [vmem:[%s9198_s1 + $0xe8] sm:$0xff]  }
   0x7   :  { %v6954_v14 = vld [vmem:[%s9198_s1 + $0x18] sm:$0xff]   ;;  %v6958_v18 = vld [vmem:[%s9198_s1 + $0x20] sm:$0xff]   ;;  %v6962_v22 = vld [vmem:[%s9198_s1 + $0x28] sm:$0xff]  }
   0x8   :  { %6239 = vmatpush3.bf16.msra.mxu0 %v6946_v6  ;;  %v6955_v15 = vld [vmem:[%s9198_s1 + $0x98] sm:$0xff]   ;;  %v6959_v19 = vld [vmem:[%s9198_s1 + $0xa0] sm:$0xff]   ;;  %v6963_v23 = vld [vmem:[%s9198_s1 + $0xa8] sm:$0xff]  }
   0x9   :  { %6261 = vmatpush3.bf16.msra.mxu1 %v6947_v7  ;;  %6240 = vmatprep.subr.bf16.mxu0 %v6948_v8  ;;  %v6964_v24 = vld [vmem:[%s9198_s1 + $0x70] sm:$0xff]   ;;  %v6968_v28 = vld [vmem:[%s9198_s1 + $0x78] sm:$0xff]   ;;  %v15_v32 = vld [vmem:[%s9199_s0] sm:$0xff] }
   0xa   :  { %6262 = vmatprep.subr.bf16.mxu1 %v6949_v9  ;;  %v6965_v25 = vld [vmem:[%s9198_s1 + $0xf0] sm:$0xff]   ;;  %v6969_v29 = vld [vmem:[%s9198_s1 + $0xf8] sm:$0xff]   ;;  %v16_v33 = vld [vmem:[%s9199_s0 + $0x8] sm:$0xff]  ;;  %v5660_v34 = vcombine.low %v15_v32, %v15_v32  ;;  %v5661_v35 = vcombine.high %v15_v32, %v15_v32 }
   0xb   :  { %v6966_v26 = vld [vmem:[%s9198_s1 + $0x30] sm:$0xff]   ;;  %v6970_v30 = vld [vmem:[%s9198_s1 + $0x38] sm:$0xff]   ;;  %v5662_v36 = vcombine.low %v16_v33, %v16_v33  ;;  %v5663_v37 = vcombine.high %v16_v33, %v16_v33  ;;  %v6976_v38 = vld [vmem:[%s9198_s1 + $0x140] sm:$0xff]  }
   0xc   :  { %6241 = vmatpush3.bf16.msra.mxu0 %v6950_v10  ;;  %v6967_v27 = vld [vmem:[%s9198_s1 + $0xb0] sm:$0xff]   ;;  %v6971_v31 = vld [vmem:[%s9198_s1 + $0xb8] sm:$0xff]   ;;  %v6977_v39 = vld [vmem:[%s9198_s1 + $0x1c0] sm:$0xff]   ;;  %4406 = vmatprep.mubr.bf16.mxu0 %v5661_v35 }
   0xd   :  { %6263 = vmatpush3.bf16.msra.mxu1 %v6951_v11  ;;  %6242 = vmatprep.subr.bf16.mxu0 %v6952_v12  ;;  %v6978_v40 = vld [vmem:[%s9198_s1 + $0x100] sm:$0xff]   ;;  %v6980_v42 = vld [vmem:[%s9198_s1 + $0x148] sm:$0xff]   ;;  %v6984_v46 = vld [vmem:[%s9198_s1 + $0x150] sm:$0xff]  }
   0xe   :  { %6264 = vmatprep.subr.bf16.mxu1 %v6953_v13  ;;  %4446 = vmatprep.mubr.bf16.mxu1 %v5663_v37  ;;  %v6979_v41 = vld [vmem:[%s9198_s1 + $0x180] sm:$0xff]   ;;  %v6981_v43 = vld [vmem:[%s9198_s1 + $0x1c8] sm:$0xff]   ;;  %v6985_v47 = vld [vmem:[%s9198_s1 + $0x1d0] sm:$0xff]  }
   0xf   :  { %v6982_v44 = vld [vmem:[%s9198_s1 + $0x108] sm:$0xff]   ;;  %v6986_v48 = vld [vmem:[%s9198_s1 + $0x110] sm:$0xff]   ;;  %v6988_v50 = vld [vmem:[%s9198_s1 + $0x158] sm:$0xff]  }
  0x10   :  { %6243 = vmatpush3.bf16.msra.mxu0 %v6954_v14  ;;  %v6983_v45 = vld [vmem:[%s9198_s1 + $0x188] sm:$0xff]   ;;  %v6987_v49 = vld [vmem:[%s9198_s1 + $0x190] sm:$0xff]   ;;  %v6989_v51 = vld [vmem:[%s9198_s1 + $0x1d8] sm:$0xff]  }
  0x11   :  { %6265 = vmatpush3.bf16.msra.mxu1 %v6955_v15  ;;  %6244 = vmatprep.subr.bf16.mxu0 %v6956_v16  ;;  %v6990_v52 = vld [vmem:[%s9198_s1 + $0x118] sm:$0xff]   ;;  %v6992_v54 = vld [vmem:[%s9198_s1 + $0x160] sm:$0xff]   ;;  %v6996_v58 = vld [vmem:[%s9198_s1 + $0x168] sm:$0xff]  }
  0x12   :  { %6266 = vmatprep.subr.bf16.mxu1 %v6957_v17  ;;  %v6991_v53 = vld [vmem:[%s9198_s1 + $0x198] sm:$0xff]   ;;  %v6993_v55 = vld [vmem:[%s9198_s1 + $0x1e0] sm:$0xff]   ;;  %v6997_v59 = vld [vmem:[%s9198_s1 + $0x1e8] sm:$0xff]  }
  0x13   :  { %v6994_v56 = vld [vmem:[%s9198_s1 + $0x120] sm:$0xff]   ;;  %v6998_v60 = vld [vmem:[%s9198_s1 + $0x128] sm:$0xff]   ;;  %v7000_v62 = vld [vmem:[%s9198_s1 + $0x170] sm:$0xff]  }
  0x14   :  { %6245 = vmatpush3.bf16.msra.mxu0 %v6958_v18  ;;  %v6995_v57 = vld [vmem:[%s9198_s1 + $0x1a0] sm:$0xff]   ;;  %v6999_v61 = vld [vmem:[%s9198_s1 + $0x1a8] sm:$0xff]   ;;  %v7001_v63 = vld [vmem:[%s9198_s1 + $0x1f0] sm:$0xff]  }
  0x15   :  { %6267 = vmatpush3.bf16.msra.mxu1 %v6959_v19  ;;  %6246 = vmatprep.subr.bf16.mxu0 %v6960_v20  ;;  %v7002_v0 = vld [vmem:[%s9198_s1 + $0x130] sm:$0xff]   ;;  %v7004_v2 = vld [vmem:[%s9198_s1 + $0x178] sm:$0xff]   ;;  %v7012_v12 = vld [vmem:[%s9198_s1 + $0x240] sm:$0xff]  }
  0x16   :  { %6268 = vmatprep.subr.bf16.mxu1 %v6961_v21  ;;  %v7003_v1 = vld [vmem:[%s9198_s1 + $0x1b0] sm:$0xff]   ;;  %v7005_v3 = vld [vmem:[%s9198_s1 + $0x1f8] sm:$0xff]   ;;  %v7013_v13 = vld [vmem:[%s9198_s1 + $0x2c0] sm:$0xff]  }
  0x17   :  { %v7006_v4 = vld [vmem:[%s9198_s1 + $0x138] sm:$0xff]   ;;  %v17_v6 = vld [vmem:[%s9199_s0 + $0x10] sm:$0xff]  ;;  %v7014_v14 = vld [vmem:[%s9198_s1 + $0x200] sm:$0xff]  }
  0x18   :  { %6247 = vmatpush3.bf16.msra.mxu0 %v6962_v22  ;;  %v7007_v5 = vld [vmem:[%s9198_s1 + $0x1b8] sm:$0xff]   ;;  %v5664_v7 = vcombine.low %v17_v6, %v17_v6  ;;  %v5665_v8 = vcombine.high %v17_v6, %v17_v6  ;;  %v7015_v15 = vld [vmem:[%s9198_s1 + $0x280] sm:$0xff]   ;;  %v7016_v16 = vld [vmem:[%s9198_s1 + $0x248] sm:$0xff]  }
  0x19   :  { %6269 = vmatpush3.bf16.msra.mxu1 %v6963_v23  ;;  %6248 = vmatprep.subr.bf16.mxu0 %v6964_v24  ;;  %v18_v9 = vld [vmem:[%s9199_s0 + $0x18] sm:$0xff]  ;;  %v7017_v17 = vld [vmem:[%s9198_s1 + $0x2c8] sm:$0xff]   ;;  %v7020_v20 = vld [vmem:[%s9198_s1 + $0x250] sm:$0xff]  }
  0x1a   :  { %6270 = vmatprep.subr.bf16.mxu1 %v6965_v25  ;;  %v5666_v10 = vcombine.low %v18_v9, %v18_v9  ;;  %v5667_v11 = vcombine.high %v18_v9, %v18_v9  ;;  %v7018_v18 = vld [vmem:[%s9198_s1 + $0x208] sm:$0xff]   ;;  %v7021_v21 = vld [vmem:[%s9198_s1 + $0x2d0] sm:$0xff]   ;;  %v7024_v24 = vld [vmem:[%s9198_s1 + $0x258] sm:$0xff]  }
  0x1b   :  { %v7019_v19 = vld [vmem:[%s9198_s1 + $0x288] sm:$0xff]   ;;  %v7022_v22 = vld [vmem:[%s9198_s1 + $0x210] sm:$0xff]   ;;  %v7025_v25 = vld [vmem:[%s9198_s1 + $0x2d8] sm:$0xff]  }
  0x1c   :  { %6249 = vmatpush3.bf16.msra.mxu0 %v6966_v26  ;;  %v7023_v23 = vld [vmem:[%s9198_s1 + $0x290] sm:$0xff]   ;;  %v7026_v26 = vld [vmem:[%s9198_s1 + $0x218] sm:$0xff]   ;;  %v7032_v32 = vld [vmem:[%s9198_s1 + $0x268] sm:$0xff]  }
  0x1d   :  { %6271 = vmatpush3.bf16.msra.mxu1 %v6967_v27  ;;  %6250 = vmatprep.subr.bf16.mxu0 %v6968_v28  ;;  %v7027_v27 = vld [vmem:[%s9198_s1 + $0x298] sm:$0xff]   ;;  %v7028_v28 = vld [vmem:[%s9198_s1 + $0x260] sm:$0xff]   ;;  %v7033_v33 = vld [vmem:[%s9198_s1 + $0x2e8] sm:$0xff]  }
  0x1e   :  { %6272 = vmatprep.subr.bf16.mxu1 %v6969_v29  ;;  %v7029_v29 = vld [vmem:[%s9198_s1 + $0x2e0] sm:$0xff]   ;;  %v7035_v35 = vld [vmem:[%s9198_s1 + $0x2a8] sm:$0xff]   ;;  %v7037_v37 = vld [vmem:[%s9198_s1 + $0x2f0] sm:$0xff]  }
  0x1f   :  { %v7068_v6 = vld [vmem:[%s9198_s1 + $0x368] sm:$0xff]  }
  0x20   :  { %6251 = vmatpush3.bf16.msra.mxu0 %v6970_v30  ;;  %v7030_v30 = vld [vmem:[%s9198_s1 + $0x220] sm:$0xff]   ;;  %v7071_v9 = vld [vmem:[%s9198_s1 + $0x3a8] sm:$0xff]  }
  0x21   :  { %6273 = vmatpush3.bf16.msra.mxu1 %v6971_v31  ;;  %6280 = vmatprep.subr.bf16.mxu0 %v6976_v38  ;;  %v7031_v31 = vld [vmem:[%s9198_s1 + $0x2a0] sm:$0xff]   ;;  %v7038_v38 = vld [vmem:[%s9198_s1 + $0x230] sm:$0xff]  }
  0x22   :  { %6302 = vmatprep.subr.bf16.mxu1 %v6977_v39  ;;  %v7039_v39 = vld [vmem:[%s9198_s1 + $0x2b0] sm:$0xff]  }
  0x23   :  { %4407 = vmatmul.mubr.bf16.vlgmr.msra.gmra.mrb[0].mxu0 %v5660_v34  ;;  %v7034_v34 = vld [vmem:[%s9198_s1 + $0x228] sm:$0xff]  }
  0x24   :  { %4447 = vmatmul.mubr.bf16.vlgmr.msra.gmra.mrb[0].mxu1 %v5662_v36  ;;  %6281 = vmatpush3.bf16.msra.mxu0 %v6978_v40  ;;  %v7036_v36 = vld [vmem:[%s9198_s1 + $0x270] sm:$0xff]   ;;  %v7040_v40 = vld [vmem:[%s9198_s1 + $0x278] sm:$0xff]  }
  0x25   :  { %6303 = vmatpush3.bf16.msra.mxu1 %v6979_v41  ;;  %6282 = vmatprep.subr.bf16.mxu0 %v6980_v42  ;;  %v7041_v41 = vld [vmem:[%s9198_s1 + $0x2f8] sm:$0xff]  }
  0x26   :  { %6304 = vmatprep.subr.bf16.mxu1 %v6981_v43  ;;  %4486 = vmatprep.mubr.bf16.mxu0 %v5665_v8  ;;  %v7042_v42 = vld [vmem:[%s9198_s1 + $0x238] sm:$0xff]   ;;  %v7070_v8 = vld [vmem:[%s9198_s1 + $0x328] sm:$0xff]  }
  0x27   :  { %4526 = vmatprep.mubr.bf16.mxu1 %v5667_v11  ;;  %v7043_v43 = vld [vmem:[%s9198_s1 + $0x2b8] sm:$0xff]   ;;  %v7073_v11 = vld [vmem:[%s9198_s1 + $0x3f0] sm:$0xff]  }
  0x28   :  { %6283 = vmatpush3.bf16.msra.mxu0 %v6982_v44  ;;  %v19_v44 = vld [vmem:[%s9199_s0 + $0x20] sm:$0xff] }
  0x29   :  { %6305 = vmatpush3.bf16.msra.mxu1 %v6983_v45  ;;  %6284 = vmatprep.subr.bf16.mxu0 %v6984_v46  ;;  %v20_v45 = vld [vmem:[%s9199_s0 + $0x28] sm:$0xff]  ;;  %v5668_v46 = vcombine.low %v19_v44, %v19_v44 }
  0x2a   :  { %6306 = vmatprep.subr.bf16.mxu1 %v6985_v47  ;;  %v5669_v47 = vcombine.high %v19_v44, %v19_v44  ;;  %v7104_v44 = vld [vmem:[%s9198_s1 + $0x468] sm:$0xff]  }
  0x2c   :  { %6285 = vmatpush3.bf16.msra.mxu0 %v6986_v48  ;;  %v5670_v48 = vcombine.low %v20_v45, %v20_v45 }
  0x2d   :  { %6307 = vmatpush3.bf16.msra.mxu1 %v6987_v49  ;;  %6286 = vmatprep.subr.bf16.mxu0 %v6988_v50  ;;  %v5671_v49 = vcombine.high %v20_v45, %v20_v45  ;;  %v7048_v50 = vld [vmem:[%s9198_s1 + $0x340] sm:$0xff]   ;;  %v7105_v45 = vld [vmem:[%s9198_s1 + $0x4e8] sm:$0xff]  }
  0x2e   :  { %6308 = vmatprep.subr.bf16.mxu1 %v6989_v51  ;;  %v7049_v51 = vld [vmem:[%s9198_s1 + $0x3c0] sm:$0xff]  }
  0x30   :  { %6287 = vmatpush3.bf16.msra.mxu0 %v6990_v52  ;;  %v7050_v52 = vld [vmem:[%s9198_s1 + $0x300] sm:$0xff]  }
  0x31   :  { %6309 = vmatpush3.bf16.msra.mxu1 %v6991_v53  ;;  %6288 = vmatprep.subr.bf16.mxu0 %v6992_v54  ;;  %v7051_v53 = vld [vmem:[%s9198_s1 + $0x380] sm:$0xff]   ;;  %v7052_v54 = vld [vmem:[%s9198_s1 + $0x348] sm:$0xff]  }
  0x32   :  { %6310 = vmatprep.subr.bf16.mxu1 %v6993_v55  ;;  %v7053_v55 = vld [vmem:[%s9198_s1 + $0x3c8] sm:$0xff]  }
  0x34   :  { %6289 = vmatpush3.bf16.msra.mxu0 %v6994_v56  ;;  %v7054_v56 = vld [vmem:[%s9198_s1 + $0x308] sm:$0xff]  }
  0x35   :  { %6311 = vmatpush3.bf16.msra.mxu1 %v6995_v57  ;;  %6290 = vmatprep.subr.bf16.mxu0 %v6996_v58  ;;  %v7055_v57 = vld [vmem:[%s9198_s1 + $0x388] sm:$0xff]   ;;  %v7056_v58 = vld [vmem:[%s9198_s1 + $0x350] sm:$0xff]  }
  0x36   :  { %6312 = vmatprep.subr.bf16.mxu1 %v6997_v59  ;;  %v7057_v59 = vld [vmem:[%s9198_s1 + $0x3d0] sm:$0xff]  }
  0x38   :  { %6291 = vmatpush3.bf16.msra.mxu0 %v6998_v60  ;;  %v7058_v60 = vld [vmem:[%s9198_s1 + $0x310] sm:$0xff]  }
  0x39   :  { %6313 = vmatpush3.bf16.msra.mxu1 %v6999_v61  ;;  %6292 = vmatprep.subr.bf16.mxu0 %v7000_v62  ;;  %v7059_v61 = vld [vmem:[%s9198_s1 + $0x390] sm:$0xff]   ;;  %v7060_v62 = vld [vmem:[%s9198_s1 + $0x358] sm:$0xff]  }
  0x3a   :  { %6314 = vmatprep.subr.bf16.mxu1 %v7001_v63  ;;  %v7061_v63 = vld [vmem:[%s9198_s1 + $0x3d8] sm:$0xff]  }
  0x3c   :  { %6293 = vmatpush3.bf16.msra.mxu0 %v7002_v0  ;;  %v7062_v0 = vld [vmem:[%s9198_s1 + $0x318] sm:$0xff]  }
  0x3d   :  { %6315 = vmatpush3.bf16.msra.mxu1 %v7003_v1  ;;  %6294 = vmatprep.subr.bf16.mxu0 %v7004_v2  ;;  %v7063_v1 = vld [vmem:[%s9198_s1 + $0x398] sm:$0xff]   ;;  %v7064_v2 = vld [vmem:[%s9198_s1 + $0x360] sm:$0xff]  }
  0x3e   :  { %6316 = vmatprep.subr.bf16.mxu1 %v7005_v3  ;;  %v7065_v3 = vld [vmem:[%s9198_s1 + $0x3e0] sm:$0xff]  }
  0x40   :  { %6295 = vmatpush3.bf16.msra.mxu0 %v7006_v4  ;;  %v7066_v4 = vld [vmem:[%s9198_s1 + $0x320] sm:$0xff]  }
  0x41   :  { %6317 = vmatpush3.bf16.msra.mxu1 %v7007_v5  ;;  %6324 = vmatprep.subr.bf16.mxu0 %v7012_v12  ;;  %v7067_v5 = vld [vmem:[%s9198_s1 + $0x3a0] sm:$0xff]   ;;  %v7074_v12 = vld [vmem:[%s9198_s1 + $0x330] sm:$0xff]  }
  0x42   :  { %6346 = vmatprep.subr.bf16.mxu1 %v7013_v13  ;;  %v7075_v13 = vld [vmem:[%s9198_s1 + $0x3b0] sm:$0xff]  }
  0x43   :  { %4487 = vmatmul.mubr.bf16.vlgmr.msra.gmra.mrb[4].mxu0 %v5664_v7  ;;  %v7069_v7 = vld [vmem:[%s9198_s1 + $0x3e8] sm:$0xff]  }
  0x44   :  { %4527 = vmatmul.mubr.bf16.vlgmr.msra.gmra.mrb[4].mxu1 %v5666_v10  ;;  %6325 = vmatpush3.bf16.msra.mxu0 %v7014_v14  ;;  %v7072_v10 = vld [vmem:[%s9198_s1 + $0x370] sm:$0xff]   ;;  %v7076_v14 = vld [vmem:[%s9198_s1 + $0x378] sm:$0xff]  }
  0x45   :  { %6347 = vmatpush3.bf16.msra.mxu1 %v7015_v15  ;;  %6326 = vmatprep.subr.bf16.mxu0 %v7016_v16  ;;  %v7077_v15 = vld [vmem:[%s9198_s1 + $0x3f8] sm:$0xff]  }
  0x46   :  { %6348 = vmatprep.subr.bf16.mxu1 %v7017_v17  ;;  %4566 = vmatprep.mubr.bf16.mxu0 %v5669_v47  ;;  %v7078_v16 = vld [vmem:[%s9198_s1 + $0x338] sm:$0xff]   ;;  %v7107_v47 = vld [vmem:[%s9198_s1 + $0x4a8] sm:$0xff]  }
  0x47   :  { %4606 = vmatprep.mubr.bf16.mxu1 %v5671_v49  ;;  %v7079_v17 = vld [vmem:[%s9198_s1 + $0x3b8] sm:$0xff]   ;;  %v7109_v49 = vld [vmem:[%s9198_s1 + $0x4f0] sm:$0xff]  }
  0x48   :  { %6327 = vmatpush3.bf16.msra.mxu0 %v7018_v18  ;;  %v21_v18 = vld [vmem:[%s9199_s0 + $0x30] sm:$0xff] }
  0x49   :  { %6349 = vmatpush3.bf16.msra.mxu1 %v7019_v19  ;;  %6328 = vmatprep.subr.bf16.mxu0 %v7020_v20  ;;  %v22_v19 = vld [vmem:[%s9199_s0 + $0x38] sm:$0xff]  ;;  %v5672_v20 = vcombine.low %v21_v18, %v21_v18 }
  0x4a   :  { %6350 = vmatprep.subr.bf16.mxu1 %v7021_v21  ;;  %v5673_v21 = vcombine.high %v21_v18, %v21_v18  ;;  %v7140_v18 = vld [vmem:[%s9198_s1 + $0x568] sm:$0xff]  }
  0x4c   :  { %6329 = vmatpush3.bf16.msra.mxu0 %v7022_v22  ;;  %v5674_v22 = vcombine.low %v22_v19, %v22_v19 }
  0x4d   :  { %6351 = vmatpush3.bf16.msra.mxu1 %v7023_v23  ;;  %6330 = vmatprep.subr.bf16.mxu0 %v7024_v24  ;;  %v7084_v23 = vld [vmem:[%s9198_s1 + $0x440] sm:$0xff]   ;;  %v5675_v24 = vcombine.high %v22_v19, %v22_v19  ;;  %v7141_v19 = vld [vmem:[%s9198_s1 + $0x5e8] sm:$0xff]  }
  0x4e   :  { %6352 = vmatprep.subr.bf16.mxu1 %v7025_v25  ;;  %v7085_v25 = vld [vmem:[%s9198_s1 + $0x4c0] sm:$0xff]  }
  0x50   :  { %6331 = vmatpush3.bf16.msra.mxu0 %v7026_v26  ;;  %v7086_v26 = vld [vmem:[%s9198_s1 + $0x400] sm:$0xff]  }
  0x51   :  { %6353 = vmatpush3.bf16.msra.mxu1 %v7027_v27  ;;  %6332 = vmatprep.subr.bf16.mxu0 %v7028_v28  ;;  %v7087_v27 = vld [vmem:[%s9198_s1 + $0x480] sm:$0xff]   ;;  %v7088_v28 = vld [vmem:[%s9198_s1 + $0x448] sm:$0xff]  }
  0x52   :  { %6354 = vmatprep.subr.bf16.mxu1 %v7029_v29  ;;  %v7089_v29 = vld [vmem:[%s9198_s1 + $0x4c8] sm:$0xff]  }
  0x54   :  { %6333 = vmatpush3.bf16.msra.mxu0 %v7030_v30  ;;  %v7090_v30 = vld [vmem:[%s9198_s1 + $0x408] sm:$0xff]  }
  0x55   :  { %6355 = vmatpush3.bf16.msra.mxu1 %v7031_v31  ;;  %6334 = vmatprep.subr.bf16.mxu0 %v7032_v32  ;;  %v7091_v31 = vld [vmem:[%s9198_s1 + $0x488] sm:$0xff]   ;;  %v7092_v32 = vld [vmem:[%s9198_s1 + $0x450] sm:$0xff]  }
  0x56   :  { %6356 = vmatprep.subr.bf16.mxu1 %v7033_v33  ;;  %v7093_v33 = vld [vmem:[%s9198_s1 + $0x4d0] sm:$0xff]  }
  0x58   :  { %6335 = vmatpush3.bf16.msra.mxu0 %v7034_v34  ;;  %v7094_v34 = vld [vmem:[%s9198_s1 + $0x410] sm:$0xff]  }
  0x59   :  { %6357 = vmatpush3.bf16.msra.mxu1 %v7035_v35  ;;  %6336 = vmatprep.subr.bf16.mxu0 %v7036_v36  ;;  %v7095_v35 = vld [vmem:[%s9198_s1 + $0x490] sm:$0xff]   ;;  %v7096_v36 = vld [vmem:[%s9198_s1 + $0x458] sm:$0xff]  }
  0x5a   :  { %6358 = vmatprep.subr.bf16.mxu1 %v7037_v37  ;;  %v7097_v37 = vld [vmem:[%s9198_s1 + $0x4d8] sm:$0xff]  }
  0x5c   :  { %6337 = vmatpush3.bf16.msra.mxu0 %v7038_v38  ;;  %v7098_v38 = vld [vmem:[%s9198_s1 + $0x418] sm:$0xff]  }
  0x5d   :  { %6359 = vmatpush3.bf16.msra.mxu1 %v7039_v39  ;;  %6338 = vmatprep.subr.bf16.mxu0 %v7040_v40  ;;  %v7099_v39 = vld [vmem:[%s9198_s1 + $0x498] sm:$0xff]   ;;  %v7100_v40 = vld [vmem:[%s9198_s1 + $0x460] sm:$0xff]  }
  0x5e   :  { %6360 = vmatprep.subr.bf16.mxu1 %v7041_v41  ;;  %v7101_v41 = vld [vmem:[%s9198_s1 + $0x4e0] sm:$0xff]  }
  0x60   :  { %6339 = vmatpush3.bf16.msra.mxu0 %v7042_v42  ;;  %v7102_v42 = vld [vmem:[%s9198_s1 + $0x420] sm:$0xff]  }
  0x61   :  { %6361 = vmatpush3.bf16.msra.mxu1 %v7043_v43  ;;  %6368 = vmatprep.subr.bf16.mxu0 %v7048_v50  ;;  %v7103_v43 = vld [vmem:[%s9198_s1 + $0x4a0] sm:$0xff]   ;;  %v7110_v50 = vld [vmem:[%s9198_s1 + $0x430] sm:$0xff]  }
  0x62   :  { %6390 = vmatprep.subr.bf16.mxu1 %v7049_v51  ;;  %v7111_v51 = vld [vmem:[%s9198_s1 + $0x4b0] sm:$0xff]  }
  0x63   :  { %4567 = vmatmul.mubr.bf16.vlgmr.msra.gmra.mrb[8].mxu0 %v5668_v46  ;;  %v7106_v46 = vld [vmem:[%s9198_s1 + $0x428] sm:$0xff]  }
  0x64   :  { %4607 = vmatmul.mubr.bf16.vlgmr.msra.gmra.mrb[8].mxu1 %v5670_v48  ;;  %6369 = vmatpush3.bf16.msra.mxu0 %v7050_v52  ;;  %v7108_v48 = vld [vmem:[%s9198_s1 + $0x470] sm:$0xff]   ;;  %v7112_v52 = vld [vmem:[%s9198_s1 + $0x478] sm:$0xff]  }
  0x65   :  { %6391 = vmatpush3.bf16.msra.mxu1 %v7051_v53  ;;  %6370 = vmatprep.subr.bf16.mxu0 %v7052_v54  ;;  %v7113_v53 = vld [vmem:[%s9198_s1 + $0x4f8] sm:$0xff]  }
  0x66   :  { %6392 = vmatprep.subr.bf16.mxu1 %v7053_v55  ;;  %4646 = vmatprep.mubr.bf16.mxu0 %v5673_v21  ;;  %v7114_v54 = vld [vmem:[%s9198_s1 + $0x438] sm:$0xff]   ;;  %v7143_v21 = vld [vmem:[%s9198_s1 + $0x5a8] sm:$0xff]  }
  0x67   :  { %4686 = vmatprep.mubr.bf16.mxu1 %v5675_v24  ;;  %v7115_v55 = vld [vmem:[%s9198_s1 + $0x4b8] sm:$0xff]   ;;  %v7146_v24 = vld [vmem:[%s9198_s1 + $0x530] sm:$0xff]  }
  0x68   :  { %6371 = vmatpush3.bf16.msra.mxu0 %v7054_v56  ;;  %v23_v56 = vld [vmem:[%s9199_s0 + $0x40] sm:$0xff] }
  0x69   :  { %6393 = vmatpush3.bf16.msra.mxu1 %v7055_v57  ;;  %6372 = vmatprep.subr.bf16.mxu0 %v7056_v58  ;;  %v5676_v57 = vcombine.low %v23_v56, %v23_v56  ;;  %v5677_v58 = vcombine.high %v23_v56, %v23_v56  ;;  %v7176_v56 = vld [vmem:[%s9198_s1 + $0x668] sm:$0xff]  }
  0x6a   :  { %6394 = vmatprep.subr.bf16.mxu1 %v7057_v59  ;;  %v24_v59 = vld [vmem:[%s9199_s0 + $0x48] sm:$0xff] }
  0x6c   :  { %6373 = vmatpush3.bf16.msra.mxu0 %v7058_v60  ;;  %v5678_v60 = vcombine.low %v24_v59, %v24_v59 }
  0x6d   :  { %6395 = vmatpush3.bf16.msra.mxu1 %v7059_v61  ;;  %6374 = vmatprep.subr.bf16.mxu0 %v7060_v62  ;;  %v5679_v61 = vcombine.high %v24_v59, %v24_v59  ;;  %v7120_v62 = vld [vmem:[%s9198_s1 + $0x540] sm:$0xff]   ;;  %v7179_v59 = vld [vmem:[%s9198_s1 + $0x6a8] sm:$0xff]  }
  0x6e   :  { %6396 = vmatprep.subr.bf16.mxu1 %v7061_v63  ;;  %v7121_v63 = vld [vmem:[%s9198_s1 + $0x5c0] sm:$0xff]  }
  0x70   :  { %6375 = vmatpush3.bf16.msra.mxu0 %v7062_v0  ;;  %v7122_v0 = vld [vmem:[%s9198_s1 + $0x500] sm:$0xff]  }
  0x71   :  { %6397 = vmatpush3.bf16.msra.mxu1 %v7063_v1  ;;  %6376 = vmatprep.subr.bf16.mxu0 %v7064_v2  ;;  %v7123_v1 = vld [vmem:[%s9198_s1 + $0x580] sm:$0xff]   ;;  %v7124_v2 = vld [vmem:[%s9198_s1 + $0x548] sm:$0xff]  }
  0x72   :  { %6398 = vmatprep.subr.bf16.mxu1 %v7065_v3  ;;  %v7125_v3 = vld [vmem:[%s9198_s1 + $0x5c8] sm:$0xff]  }
  0x74   :  { %6377 = vmatpush3.bf16.msra.mxu0 %v7066_v4  ;;  %v7126_v4 = vld [vmem:[%s9198_s1 + $0x508] sm:$0xff]  }
  0x75   :  { %6399 = vmatpush3.bf16.msra.mxu1 %v7067_v5  ;;  %6378 = vmatprep.subr.bf16.mxu0 %v7068_v6  ;;  %v7127_v5 = vld [vmem:[%s9198_s1 + $0x588] sm:$0xff]   ;;  %v7128_v6 = vld [vmem:[%s9198_s1 + $0x550] sm:$0xff]  }
  0x76   :  { %6400 = vmatprep.subr.bf16.mxu1 %v7069_v7  ;;  %v7129_v7 = vld [vmem:[%s9198_s1 + $0x5d0] sm:$0xff]  }
  0x78   :  { %6379 = vmatpush3.bf16.msra.mxu0 %v7070_v8  ;;  %v7130_v8 = vld [vmem:[%s9198_s1 + $0x510] sm:$0xff]  }
  0x79   :  { %6401 = vmatpush3.bf16.msra.mxu1 %v7071_v9  ;;  %6380 = vmatprep.subr.bf16.mxu0 %v7072_v10  ;;  %v7131_v9 = vld [vmem:[%s9198_s1 + $0x590] sm:$0xff]   ;;  %v7132_v10 = vld [vmem:[%s9198_s1 + $0x558] sm:$0xff]  }
  0x7a   :  { %6402 = vmatprep.subr.bf16.mxu1 %v7073_v11  ;;  %v7133_v11 = vld [vmem:[%s9198_s1 + $0x5d8] sm:$0xff]  }
  0x7c   :  { %6381 = vmatpush3.bf16.msra.mxu0 %v7074_v12  ;;  %v7134_v12 = vld [vmem:[%s9198_s1 + $0x518] sm:$0xff]  }
  0x7d   :  { %6403 = vmatpush3.bf16.msra.mxu1 %v7075_v13  ;;  %6382 = vmatprep.subr.bf16.mxu0 %v7076_v14  ;;  %v7135_v13 = vld [vmem:[%s9198_s1 + $0x598] sm:$0xff]   ;;  %v7136_v14 = vld [vmem:[%s9198_s1 + $0x560] sm:$0xff]  }
  0x7e   :  { %6404 = vmatprep.subr.bf16.mxu1 %v7077_v15  ;;  %v7137_v15 = vld [vmem:[%s9198_s1 + $0x5e0] sm:$0xff]  }
  0x80   :  { %6383 = vmatpush3.bf16.msra.mxu0 %v7078_v16  ;;  %v7138_v16 = vld [vmem:[%s9198_s1 + $0x520] sm:$0xff]  }
  0x81   :  { %6405 = vmatpush3.bf16.msra.mxu1 %v7079_v17  ;;  %6412 = vmatprep.subr.bf16.mxu0 %v7084_v23  ;;  %v7139_v17 = vld [vmem:[%s9198_s1 + $0x5a0] sm:$0xff]   ;;  %v7145_v23 = vld [vmem:[%s9198_s1 + $0x5f0] sm:$0xff]  }
  0x82   :  { %6434 = vmatprep.subr.bf16.mxu1 %v7085_v25  ;;  %v7147_v25 = vld [vmem:[%s9198_s1 + $0x5b0] sm:$0xff]  }
  0x83   :  { %4647 = vmatmul.mubr.bf16.vlgmr.msra.gmra.mrb[12].mxu0 %v5672_v20  ;;  %v7142_v20 = vld [vmem:[%s9198_s1 + $0x528] sm:$0xff]  }
  0x84   :  { %4687 = vmatmul.mubr.bf16.vlgmr.msra.gmra.mrb[12].mxu1 %v5674_v22  ;;  %6413 = vmatpush3.bf16.msra.mxu0 %v7086_v26  ;;  %v7144_v22 = vld [vmem:[%s9198_s1 + $0x570] sm:$0xff]   ;;  %v7148_v26 = vld [vmem:[%s9198_s1 + $0x578] sm:$0xff]  }
  0x85   :  { %6435 = vmatpush3.bf16.msra.mxu1 %v7087_v27  ;;  %6414 = vmatprep.subr.bf16.mxu0 %v7088_v28  ;;  %v7149_v27 = vld [vmem:[%s9198_s1 + $0x5f8] sm:$0xff]  }
  0x86   :  { %6436 = vmatprep.subr.bf16.mxu1 %v7089_v29  ;;  %4726 = vmatprep.mubr.bf16.mxu0 %v5677_v58  ;;  %v7150_v28 = vld [vmem:[%s9198_s1 + $0x538] sm:$0xff]   ;;  %v7178_v58 = vld [vmem:[%s9198_s1 + $0x628] sm:$0xff]  }
  0x87   :  { %4766 = vmatprep.mubr.bf16.mxu1 %v5679_v61  ;;  %v7151_v29 = vld [vmem:[%s9198_s1 + $0x5b8] sm:$0xff]   ;;  %v7181_v61 = vld [vmem:[%s9198_s1 + $0x6f0] sm:$0xff]  }
  0x88   :  { %6415 = vmatpush3.bf16.msra.mxu0 %v7090_v30  ;;  %v25_v30 = vld [vmem:[%s9199_s0 + $0x50] sm:$0xff] }
  0x89   :  { %6437 = vmatpush3.bf16.msra.mxu1 %v7091_v31  ;;  %6416 = vmatprep.subr.bf16.mxu0 %v7092_v32  ;;  %v26_v31 = vld [vmem:[%s9199_s0 + $0x58] sm:$0xff]  ;;  %v5680_v32 = vcombine.low %v25_v30, %v25_v30 }
  0x8a   :  { %6438 = vmatprep.subr.bf16.mxu1 %v7093_v33  ;;  %v5681_v33 = vcombine.high %v25_v30, %v25_v30  ;;  %v7211_v30 = vld [vmem:[%s9198_s1 + $0x7a0] sm:$0xff]  }
  0x8c   :  { %6417 = vmatpush3.bf16.msra.mxu0 %v7094_v34  ;;  %v5682_v34 = vcombine.low %v26_v31, %v26_v31 }
  0x8d   :  { %6439 = vmatpush3.bf16.msra.mxu1 %v7095_v35  ;;  %6418 = vmatprep.subr.bf16.mxu0 %v7096_v36  ;;  %v5683_v35 = vcombine.high %v26_v31, %v26_v31  ;;  %v7156_v36 = vld [vmem:[%s9198_s1 + $0x640] sm:$0xff]  }
  0x8e   :  { %6440 = vmatprep.subr.bf16.mxu1 %v7097_v37  ;;  %v7157_v37 = vld [vmem:[%s9198_s1 + $0x6c0] sm:$0xff]  }
  0x90   :  { %6419 = vmatpush3.bf16.msra.mxu0 %v7098_v38  ;;  %v7158_v38 = vld [vmem:[%s9198_s1 + $0x600] sm:$0xff]  }
  0x91   :  { %6441 = vmatpush3.bf16.msra.mxu1 %v7099_v39  ;;  %6420 = vmatprep.subr.bf16.mxu0 %v7100_v40  ;;  %v7159_v39 = vld [vmem:[%s9198_s1 + $0x680] sm:$0xff]   ;;  %v7160_v40 = vld [vmem:[%s9198_s1 + $0x648] sm:$0xff]  }
  0x92   :  { %6442 = vmatprep.subr.bf16.mxu1 %v7101_v41  ;;  %v7161_v41 = vld [vmem:[%s9198_s1 + $0x6c8] sm:$0xff]  }
  0x94   :  { %6421 = vmatpush3.bf16.msra.mxu0 %v7102_v42  ;;  %v7162_v42 = vld [vmem:[%s9198_s1 + $0x608] sm:$0xff]  }
  0x95   :  { %6443 = vmatpush3.bf16.msra.mxu1 %v7103_v43  ;;  %6422 = vmatprep.subr.bf16.mxu0 %v7104_v44  ;;  %v7163_v43 = vld [vmem:[%s9198_s1 + $0x688] sm:$0xff]   ;;  %v7164_v44 = vld [vmem:[%s9198_s1 + $0x650] sm:$0xff]  }
  0x96   :  { %6444 = vmatprep.subr.bf16.mxu1 %v7105_v45  ;;  %v7165_v45 = vld [vmem:[%s9198_s1 + $0x6d0] sm:$0xff]  }
  0x98   :  { %6423 = vmatpush3.bf16.msra.mxu0 %v7106_v46  ;;  %v7166_v46 = vld [vmem:[%s9198_s1 + $0x610] sm:$0xff]  }
  0x99   :  { %6445 = vmatpush3.bf16.msra.mxu1 %v7107_v47  ;;  %6424 = vmatprep.subr.bf16.mxu0 %v7108_v48  ;;  %v7167_v47 = vld [vmem:[%s9198_s1 + $0x690] sm:$0xff]   ;;  %v7168_v48 = vld [vmem:[%s9198_s1 + $0x658] sm:$0xff]  }
  0x9a   :  { %6446 = vmatprep.subr.bf16.mxu1 %v7109_v49  ;;  %v7169_v49 = vld [vmem:[%s9198_s1 + $0x6d8] sm:$0xff]  }
  0x9c   :  { %6425 = vmatpush3.bf16.msra.mxu0 %v7110_v50  ;;  %v7170_v50 = vld [vmem:[%s9198_s1 + $0x618] sm:$0xff]  }
  0x9d   :  { %6447 = vmatpush3.bf16.msra.mxu1 %v7111_v51  ;;  %6426 = vmatprep.subr.bf16.mxu0 %v7112_v52  ;;  %v7171_v51 = vld [vmem:[%s9198_s1 + $0x698] sm:$0xff]   ;;  %v7172_v52 = vld [vmem:[%s9198_s1 + $0x660] sm:$0xff]  }
  0x9e   :  { %6448 = vmatprep.subr.bf16.mxu1 %v7113_v53  ;;  %v7173_v53 = vld [vmem:[%s9198_s1 + $0x6e0] sm:$0xff]  }
  0xa0   :  { %6427 = vmatpush3.bf16.msra.mxu0 %v7114_v54  ;;  %v7174_v54 = vld [vmem:[%s9198_s1 + $0x620] sm:$0xff]  }
  0xa1   :  { %6449 = vmatpush3.bf16.msra.mxu1 %v7115_v55  ;;  %6456 = vmatprep.subr.bf16.mxu0 %v7120_v62  ;;  %v7175_v55 = vld [vmem:[%s9198_s1 + $0x6a0] sm:$0xff]   ;;  %v7182_v62 = vld [vmem:[%s9198_s1 + $0x630] sm:$0xff]  }
  0xa2   :  { %6478 = vmatprep.subr.bf16.mxu1 %v7121_v63  ;;  %v7183_v63 = vld [vmem:[%s9198_s1 + $0x6b0] sm:$0xff]  }
  0xa3   :  { %4727 = vmatmul.mubr.bf16.vlgmr.msra.gmra.mrb[16].mxu0 %v5676_v57  ;;  %v7177_v57 = vld [vmem:[%s9198_s1 + $0x6e8] sm:$0xff]  }
  0xa4   :  { %4767 = vmatmul.mubr.bf16.vlgmr.msra.gmra.mrb[16].mxu1 %v5678_v60  ;;  %6457 = vmatpush3.bf16.msra.mxu0 %v7122_v0  ;;  %v7180_v60 = vld [vmem:[%s9198_s1 + $0x670] sm:$0xff]   ;;  %v7184_v0 = vld [vmem:[%s9198_s1 + $0x678] sm:$0xff]  }
  0xa5   :  { %6479 = vmatpush3.bf16.msra.mxu1 %v7123_v1  ;;  %6458 = vmatprep.subr.bf16.mxu0 %v7124_v2  ;;  %v7185_v1 = vld [vmem:[%s9198_s1 + $0x6f8] sm:$0xff]  }
  0xa6   :  { %6480 = vmatprep.subr.bf16.mxu1 %v7125_v3  ;;  %4806 = vmatprep.mubr.bf16.mxu0 %v5681_v33  ;;  %v7186_v2 = vld [vmem:[%s9198_s1 + $0x638] sm:$0xff]  }
  0xa7   :  { %4846 = vmatprep.mubr.bf16.mxu1 %v5683_v35  ;;  %v7187_v3 = vld [vmem:[%s9198_s1 + $0x6b8] sm:$0xff]  }
  0xa8   :  { %6459 = vmatpush3.bf16.msra.mxu0 %v7126_v4  ;;  %v27_v4 = vld [vmem:[%s9199_s0 + $0x60] sm:$0xff] }
  0xa9   :  { %6481 = vmatpush3.bf16.msra.mxu1 %v7127_v5  ;;  %6460 = vmatprep.subr.bf16.mxu0 %v7128_v6  ;;  %v28_v5 = vld [vmem:[%s9199_s0 + $0x68] sm:$0xff]  ;;  %v5684_v6 = vcombine.low %v27_v4, %v27_v4 }
  0xaa   :  { %6482 = vmatprep.subr.bf16.mxu1 %v7129_v7  ;;  %v5685_v7 = vcombine.high %v27_v4, %v27_v4  ;;  %v7235_v4 = vld [vmem:[%s9198_s1 + $0x888] sm:$0xff]  }
  0xac   :  { %6461 = vmatpush3.bf16.msra.mxu0 %v7130_v8  ;;  %v5686_v8 = vcombine.low %v28_v5, %v28_v5 }
  0xad   :  { %6483 = vmatpush3.bf16.msra.mxu1 %v7131_v9  ;;  %6462 = vmatprep.subr.bf16.mxu0 %v7132_v10  ;;  %v7192_v9 = vld [vmem:[%s9198_s1 + $0x740] sm:$0xff]   ;;  %v5687_v10 = vcombine.high %v28_v5, %v28_v5  ;;  %v7236_v5 = vld [vmem:[%s9198_s1 + $0x850] sm:$0xff]  }
  0xae   :  { %6484 = vmatprep.subr.bf16.mxu1 %v7133_v11  ;;  %v7193_v11 = vld [vmem:[%s9198_s1 + $0x7c0] sm:$0xff]  }
  0xb0   :  { %6463 = vmatpush3.bf16.msra.mxu0 %v7134_v12  ;;  %v7194_v12 = vld [vmem:[%s9198_s1 + $0x700] sm:$0xff]  }
  0xb1   :  { %6485 = vmatpush3.bf16.msra.mxu1 %v7135_v13  ;;  %6464 = vmatprep.subr.bf16.mxu0 %v7136_v14  ;;  %v7195_v13 = vld [vmem:[%s9198_s1 + $0x780] sm:$0xff]   ;;  %v7196_v14 = vld [vmem:[%s9198_s1 + $0x748] sm:$0xff]  }
  0xb2   :  { %6486 = vmatprep.subr.bf16.mxu1 %v7137_v15  ;;  %v7197_v15 = vld [vmem:[%s9198_s1 + $0x7c8] sm:$0xff]  }
  0xb4   :  { %6465 = vmatpush3.bf16.msra.mxu0 %v7138_v16  ;;  %v7198_v16 = vld [vmem:[%s9198_s1 + $0x708] sm:$0xff]  }
  0xb5   :  { %6487 = vmatpush3.bf16.msra.mxu1 %v7139_v17  ;;  %6466 = vmatprep.subr.bf16.mxu0 %v7140_v18  ;;  %v7199_v17 = vld [vmem:[%s9198_s1 + $0x788] sm:$0xff]   ;;  %v7200_v18 = vld [vmem:[%s9198_s1 + $0x750] sm:$0xff]  }
  0xb6   :  { %6488 = vmatprep.subr.bf16.mxu1 %v7141_v19  ;;  %v7201_v19 = vld [vmem:[%s9198_s1 + $0x7d0] sm:$0xff]  }
  0xb8   :  { %6467 = vmatpush3.bf16.msra.mxu0 %v7142_v20  ;;  %v7202_v20 = vld [vmem:[%s9198_s1 + $0x710] sm:$0xff]  }
  0xb9   :  { %6489 = vmatpush3.bf16.msra.mxu1 %v7143_v21  ;;  %6468 = vmatprep.subr.bf16.mxu0 %v7144_v22  ;;  %v7203_v21 = vld [vmem:[%s9198_s1 + $0x790] sm:$0xff]   ;;  %v7204_v22 = vld [vmem:[%s9198_s1 + $0x758] sm:$0xff]  }
  0xba   :  { %6490 = vmatprep.subr.bf16.mxu1 %v7145_v23  ;;  %v7205_v23 = vld [vmem:[%s9198_s1 + $0x7d8] sm:$0xff]  }
  0xbc   :  { %6469 = vmatpush3.bf16.msra.mxu0 %v7146_v24  ;;  %v7206_v24 = vld [vmem:[%s9198_s1 + $0x718] sm:$0xff]  }
  0xbd   :  { %6491 = vmatpush3.bf16.msra.mxu1 %v7147_v25  ;;  %6470 = vmatprep.subr.bf16.mxu0 %v7148_v26  ;;  %v7207_v25 = vld [vmem:[%s9198_s1 + $0x798] sm:$0xff]   ;;  %v7208_v26 = vld [vmem:[%s9198_s1 + $0x760] sm:$0xff]  }
  0xbe   :  { %6492 = vmatprep.subr.bf16.mxu1 %v7149_v27  ;;  %v7209_v27 = vld [vmem:[%s9198_s1 + $0x7e0] sm:$0xff]  }
  0xc0   :  { %6471 = vmatpush3.bf16.msra.mxu0 %v7150_v28  ;;  %v7210_v28 = vld [vmem:[%s9198_s1 + $0x720] sm:$0xff]  }
  0xc1   :  { %6493 = vmatpush3.bf16.msra.mxu1 %v7151_v29  ;;  %6500 = vmatprep.subr.bf16.mxu0 %v7156_v36 }
  0xc2   :  { %6522 = vmatprep.subr.bf16.mxu1 %v7157_v37  ;;  %v7212_v37 = vld [vmem:[%s9198_s1 + $0x768] sm:$0xff]  }
  0xc3   :  { %4807 = vmatmul.mubr.bf16.vlgmr.msra.gmra.mrb[20].mxu0 %v5680_v32  ;;  %v5659_v32 = vld [vmem:[%s9200_s2] ss:$0 sm:$0xff] }
  0xc4   :  { %4847 = vmatmul.mubr.bf16.vlgmr.msra.gmra.mrb[20].mxu1 %v5682_v34  ;;  %6501 = vmatpush3.bf16.msra.mxu0 %v7158_v38 }
  0xc5   :  { %6523 = vmatpush3.bf16.msra.mxu1 %v7159_v39  ;;  %6502 = vmatprep.subr.bf16.mxu0 %v7160_v40  ;;  %v7213_v39 = vld [vmem:[%s9198_s1 + $0x7e8] sm:$0xff]  }
  0xc6   :  { %6524 = vmatprep.subr.bf16.mxu1 %v7161_v41  ;;  %4886 = vmatprep.mubr.bf16.mxu0 %v5685_v7  ;;  %v7238_v7 = vld [vmem:[%s9198_s1 + $0x810] sm:$0xff]  }
  0xc7   :  { %4926 = vmatprep.mubr.bf16.mxu1 %v5687_v10  ;;  %v7241_v10 = vld [vmem:[%s9198_s1 + $0x8d8] sm:$0xff]  }
  0xc8   :  { %6503 = vmatpush3.bf16.msra.mxu0 %v7162_v42  ;;  %v7214_v42 = vld [vmem:[%s9198_s1 + $0x728] sm:$0xff]  }
  0xc9   :  { %6525 = vmatpush3.bf16.msra.mxu1 %v7163_v43  ;;  %6504 = vmatprep.subr.bf16.mxu0 %v7164_v44  ;;  %v7215_v44 = vld [vmem:[%s9198_s1 + $0x7a8] sm:$0xff]  }
  0xca   :  { %6526 = vmatprep.subr.bf16.mxu1 %v7165_v45 }
  0xcc   :  { %6505 = vmatpush3.bf16.msra.mxu0 %v7166_v46 }
  0xcd   :  { %6527 = vmatpush3.bf16.msra.mxu1 %v7167_v47  ;;  %6506 = vmatprep.subr.bf16.mxu0 %v7168_v48  ;;  %v7216_v47 = vld [vmem:[%s9198_s1 + $0x770] sm:$0xff]  }
  0xce   :  { %6528 = vmatprep.subr.bf16.mxu1 %v7169_v49  ;;  %v7217_v48 = vld [vmem:[%s9198_s1 + $0x7f0] sm:$0xff]  }
  0xcf   :  { %v7218_v49 = vld [vmem:[%s9198_s1 + $0x730] sm:$0xff]  }
  0xd0   :  { %6507 = vmatpush3.bf16.msra.mxu0 %v7170_v50  ;;  %v7219_v50 = vld [vmem:[%s9198_s1 + $0x7b0] sm:$0xff]  }
  0xd1   :  { %6529 = vmatpush3.bf16.msra.mxu1 %v7171_v51  ;;  %6508 = vmatprep.subr.bf16.mxu0 %v7172_v52  ;;  %v7220_v51 = vld [vmem:[%s9198_s1 + $0x778] sm:$0xff]  }
  0xd2   :  { %6530 = vmatprep.subr.bf16.mxu1 %v7173_v53  ;;  %v7221_v52 = vld [vmem:[%s9198_s1 + $0x7f8] sm:$0xff]  }
  0xd3   :  { %v7222_v53 = vld [vmem:[%s9198_s1 + $0x738] sm:$0xff]  }
  0xd4   :  { %6509 = vmatpush3.bf16.msra.mxu0 %v7174_v54  ;;  %v7223_v54 = vld [vmem:[%s9198_s1 + $0x7b8] sm:$0xff]  }
  0xd5   :  { %6531 = vmatpush3.bf16.msra.mxu1 %v7175_v55  ;;  %6510 = vmatprep.subr.bf16.mxu0 %v7176_v56  ;;  %v29_v55 = vld [vmem:[%s9199_s0 + $0x70] sm:$0xff]  ;;  %v30_v56 = vld [vmem:[%s9199_s0 + $0x78] sm:$0xff] }
  0xd6   :  { %6532 = vmatprep.subr.bf16.mxu1 %v7177_v57  ;;  %v5688_v57 = vcombine.low %v29_v55, %v29_v55 }
  0xd8   :  { %6511 = vmatpush3.bf16.msra.mxu0 %v7178_v58  ;;  %v5689_v58 = vcombine.high %v29_v55, %v29_v55  ;;  %v7272_v55 = vld [vmem:[%s9198_s1 + $0x950] sm:$0xff]  }
  0xd9   :  { %6533 = vmatpush3.bf16.msra.mxu1 %v7179_v59  ;;  %6512 = vmatprep.subr.bf16.mxu0 %v7180_v60  ;;  %v5690_v59 = vcombine.low %v30_v56, %v30_v56  ;;  %v5691_v60 = vcombine.high %v30_v56, %v30_v56  ;;  %v7273_v56 = vld [vmem:[%s9198_s1 + $0x9d0] sm:$0xff]  }
  0xda   :  { %6534 = vmatprep.subr.bf16.mxu1 %v7181_v61  ;;  %v7228_v61 = vld [vmem:[%s9198_s1 + $0x840] sm:$0xff]  }
  0xdc   :  { %6513 = vmatpush3.bf16.msra.mxu0 %v7182_v62  ;;  %v7229_v62 = vld [vmem:[%s9198_s1 + $0x8c0] sm:$0xff]  }
  0xdd   :  { %6535 = vmatpush3.bf16.msra.mxu1 %v7183_v63  ;;  %6514 = vmatprep.subr.bf16.mxu0 %v7184_v0  ;;  %v7230_v63 = vld [vmem:[%s9198_s1 + $0x800] sm:$0xff]  }
  0xde   :  { %6536 = vmatprep.subr.bf16.mxu1 %v7185_v1  ;;  %v7231_v0 = vld [vmem:[%s9198_s1 + $0x880] sm:$0xff]   ;;  %v7232_v1 = vld [vmem:[%s9198_s1 + $0x848] sm:$0xff]  }
  0xe0   :  { %6515 = vmatpush3.bf16.msra.mxu0 %v7186_v2  ;;  %v7233_v2 = vld [vmem:[%s9198_s1 + $0x8c8] sm:$0xff]  }
  0xe1   :  { %6537 = vmatpush3.bf16.msra.mxu1 %v7187_v3  ;;  %6544 = vmatprep.subr.bf16.mxu0 %v7192_v9  ;;  %v7234_v3 = vld [vmem:[%s9198_s1 + $0x808] sm:$0xff]   ;;  %v7240_v9 = vld [vmem:[%s9198_s1 + $0x858] sm:$0xff]  }
  0xe2   :  { %6566 = vmatprep.subr.bf16.mxu1 %v7193_v11  ;;  %v7242_v11 = vld [vmem:[%s9198_s1 + $0x818] sm:$0xff]  }
  0xe3   :  { %4887 = vmatmul.mubr.bf16.vlgmr.msra.gmra.mrb[24].mxu0 %v5684_v6  ;;  %v7237_v6 = vld [vmem:[%s9198_s1 + $0x8d0] sm:$0xff]  }
  0xe4   :  { %4927 = vmatmul.mubr.bf16.vlgmr.msra.gmra.mrb[24].mxu1 %v5686_v8  ;;  %6545 = vmatpush3.bf16.msra.mxu0 %v7194_v12  ;;  %v7239_v8 = vld [vmem:[%s9198_s1 + $0x890] sm:$0xff]   ;;  %v7243_v12 = vld [vmem:[%s9198_s1 + $0x898] sm:$0xff]  }
  0xe5   :  { %6567 = vmatpush3.bf16.msra.mxu1 %v7195_v13  ;;  %6546 = vmatprep.subr.bf16.mxu0 %v7196_v14  ;;  %v7244_v13 = vld [vmem:[%s9198_s1 + $0x860] sm:$0xff]  }
  0xe6   :  { %6568 = vmatprep.subr.bf16.mxu1 %v7197_v15  ;;  %4966 = vmatprep.mubr.bf16.mxu0 %v5689_v58  ;;  %v7245_v14 = vld [vmem:[%s9198_s1 + $0x8e0] sm:$0xff]   ;;  %v7275_v58 = vld [vmem:[%s9198_s1 + $0x990] sm:$0xff]  }
  0xe7   :  { %5006 = vmatprep.mubr.bf16.mxu1 %v5691_v60  ;;  %v7246_v15 = vld [vmem:[%s9198_s1 + $0x820] sm:$0xff]   ;;  %v7277_v60 = vld [vmem:[%s9198_s1 + $0x9d8] sm:$0xff]  }
  0xe8   :  { %6547 = vmatpush3.bf16.msra.mxu0 %v7198_v16 }
  0xe9   :  { %6569 = vmatpush3.bf16.msra.mxu1 %v7199_v17  ;;  %6548 = vmatprep.subr.bf16.mxu0 %v7200_v18  ;;  %v7247_v17 = vld [vmem:[%s9198_s1 + $0x8a0] sm:$0xff]  }
  0xea   :  { %6570 = vmatprep.subr.bf16.mxu1 %v7201_v19 }
  0xec   :  { %6549 = vmatpush3.bf16.msra.mxu0 %v7202_v20 }
  0xed   :  { %6571 = vmatpush3.bf16.msra.mxu1 %v7203_v21  ;;  %6550 = vmatprep.subr.bf16.mxu0 %v7204_v22 }
  0xee   :  { %6572 = vmatprep.subr.bf16.mxu1 %v7205_v23  ;;  %v7248_v23 = vld [vmem:[%s9198_s1 + $0x868] sm:$0xff]  }
  0xf0   :  { %6551 = vmatpush3.bf16.msra.mxu0 %v7206_v24 }
  0xf1   :  { %6573 = vmatpush3.bf16.msra.mxu1 %v7207_v25  ;;  %6552 = vmatprep.subr.bf16.mxu0 %v7208_v26  ;;  %v7249_v25 = vld [vmem:[%s9198_s1 + $0x8e8] sm:$0xff]  }
  0xf2   :  { %6574 = vmatprep.subr.bf16.mxu1 %v7209_v27 }
  0xf4   :  { %6553 = vmatpush3.bf16.msra.mxu0 %v7210_v28  ;;  %v7250_v28 = vld [vmem:[%s9198_s1 + $0x828] sm:$0xff]  }
  0xf5   :  { %6575 = vmatpush3.bf16.msra.mxu1 %v7211_v30  ;;  %6554 = vmatprep.subr.bf16.mxu0 %v7212_v37  ;;  %v7251_v30 = vld [vmem:[%s9198_s1 + $0x8a8] sm:$0xff]   ;;  %v7256_v37 = vld [vmem:[%s9198_s1 + $0x878] sm:$0xff]  }
  0xf6   :  { %v6252_v29 = vpop.f32.mrb[0].mxu0  ;;  %6576 = vmatprep.subr.bf16.mxu1 %v7213_v39  ;;  %v7258_v39 = vld [vmem:[%s9198_s1 + $0x838] sm:$0xff]  }
  0xf7   :  { %v6274_v31 = vpop.f32.mrb[0].mxu1  ;;  %v6253_v33 = vpop.f32.mrb[1].mxu0 }
  0xf8   :  { %v6275_v34 = vpop.f32.mrb[1].mxu1  ;;  %v6254_v35 = vadd.f32 %v6253_v33, %v6252_v29  ;;  %v6255_v38 = vpop.f32.mrb[2].mxu0  ;;  %6555 = vmatpush3.bf16.msra.mxu0 %v7214_v42  ;;  %v7252_v33 = vld [vmem:[%s9198_s1 + $0x870] sm:$0xff]   ;;  %v32_v42 = vld [vmem:[%s9199_s0 + $0x88] sm:$0xff] }
  0xf9   :  { %v6276_v36 = vadd.f32 %v6275_v34, %v6274_v31  ;;  %v6277_v40 = vpop.f32.mrb[2].mxu1  ;;  %v6256_v43 = vpop.f32.mrb[3].mxu0  ;;  %6577 = vmatpush3.bf16.msra.mxu1 %v7215_v44  ;;  %6556 = vmatprep.subr.bf16.mxu0 %v7216_v47  ;;  %v7253_v34 = vld [vmem:[%s9198_s1 + $0x8f0] sm:$0xff]   ;;  %v7257_v38 = vld [vmem:[%s9198_s1 + $0x8f8] sm:$0xff]   ;;  %v7264_v47 = vld [vmem:[%s9198_s1 + $0x940] sm:$0xff]  }
  0xfa   :  { %v4409_v41 = vadd.f32 %v6254_v35, %v5659_v32  ;;  %v6278_v45 = vpop.f32.mrb[3].mxu1  ;;  %6578 = vmatprep.subr.bf16.mxu1 %v7217_v48  ;;  %v7254_v35 = vld [vmem:[%s9198_s1 + $0x830] sm:$0xff]   ;;  %v7259_v40 = vld [vmem:[%s9198_s1 + $0x8b8] sm:$0xff]   ;;  %v7265_v48 = vld [vmem:[%s9198_s1 + $0x9c0] sm:$0xff]  }
  0xfb   :  { %v5694_v45 = vcombine.low %v32_v42, %v32_v42 }
  0xfc   :  { %v8325_v46 = vadd.f32 %v6276_v36, %v4409_v41  ;;  %6557 = vmatpush3.bf16.msra.mxu0 %v7218_v49  ;;  %v7255_v36 = vld [vmem:[%s9198_s1 + $0x8b0] sm:$0xff]   ;;  %v31_v41 = vld [vmem:[%s9199_s0 + $0x80] sm:$0xff] }
  0xfd   :  { %6579 = vmatpush3.bf16.msra.mxu1 %v7219_v50  ;;  %6558 = vmatprep.subr.bf16.mxu0 %v7220_v51  ;;  %v5692_v43 = vcombine.low %v31_v41, %v31_v41  ;;  %v5693_v44 = vcombine.high %v31_v41, %v31_v41  ;;  %v7266_v49 = vld [vmem:[%s9198_s1 + $0x900] sm:$0xff]   ;;  %v7268_v51 = vld [vmem:[%s9198_s1 + $0x948] sm:$0xff]   ;;  %v7308_v41 = vld [vmem:[%s9198_s1 + $0xa50] sm:$0xff]  }
  0xfe   :  { %6580 = vmatprep.subr.bf16.mxu1 %v7221_v52  ;;  %v7267_v50 = vld [vmem:[%s9198_s1 + $0x980] sm:$0xff]   ;;  %v7269_v52 = vld [vmem:[%s9198_s1 + $0x9c8] sm:$0xff]  }
 0x100   :  { %6559 = vmatpush3.bf16.msra.mxu0 %v7222_v53  ;;  %v7270_v53 = vld [vmem:[%s9198_s1 + $0x908] sm:$0xff]  }
 0x101   :  { %6581 = vmatpush3.bf16.msra.mxu1 %v7223_v54  ;;  %6588 = vmatprep.subr.bf16.mxu0 %v7228_v61  ;;  %v7271_v54 = vld [vmem:[%s9198_s1 + $0x988] sm:$0xff]   ;;  %v7278_v61 = vld [vmem:[%s9198_s1 + $0x918] sm:$0xff]  }
 0x102   :  { %6610 = vmatprep.subr.bf16.mxu1 %v7229_v62  ;;  %v7279_v62 = vld [vmem:[%s9198_s1 + $0x998] sm:$0xff]  }
 0x103   :  { %4967 = vmatmul.mubr.bf16.vlgmr.msra.gmra.mrb[28].mxu0 %v5688_v57  ;;  %v7274_v57 = vld [vmem:[%s9198_s1 + $0x910] sm:$0xff]  }
 0x104   :  { %5007 = vmatmul.mubr.bf16.vlgmr.msra.gmra.mrb[28].mxu1 %v5690_v59  ;;  %6589 = vmatpush3.bf16.msra.mxu0 %v7230_v63  ;;  %v7276_v59 = vld [vmem:[%s9198_s1 + $0x958] sm:$0xff]   ;;  %v7280_v63 = vld [vmem:[%s9198_s1 + $0x960] sm:$0xff]  }
 0x105   :  { %6611 = vmatpush3.bf16.msra.mxu1 %v7231_v0  ;;  %6590 = vmatprep.subr.bf16.mxu0 %v7232_v1  ;;  %v7281_v0 = vld [vmem:[%s9198_s1 + $0x9e0] sm:$0xff]  }
 0x106   :  { %6612 = vmatprep.subr.bf16.mxu1 %v7233_v2  ;;  %5046 = vmatprep.mubr.bf16.mxu0 %v5693_v44  ;;  %v7282_v2 = vld [vmem:[%s9198_s1 + $0x920] sm:$0xff]   ;;  %v7311_v44 = vld [vmem:[%s9198_s1 + $0xa90] sm:$0xff]  }
 0x108   :  { %6591 = vmatpush3.bf16.msra.mxu0 %v7234_v3 }
 0x109   :  { %6613 = vmatpush3.bf16.msra.mxu1 %v7235_v4  ;;  %6592 = vmatprep.subr.bf16.mxu0 %v7236_v5  ;;  %v7283_v4 = vld [vmem:[%s9198_s1 + $0x9a0] sm:$0xff]  }
 0x10a   :  { %6614 = vmatprep.subr.bf16.mxu1 %v7237_v6 }
 0x10c   :  { %6593 = vmatpush3.bf16.msra.mxu0 %v7238_v7 }
 0x10d   :  { %6615 = vmatpush3.bf16.msra.mxu1 %v7239_v8  ;;  %6594 = vmatprep.subr.bf16.mxu0 %v7240_v9  ;;  %v7284_v8 = vld [vmem:[%s9198_s1 + $0x968] sm:$0xff]  }
 0x10e   :  { %6616 = vmatprep.subr.bf16.mxu1 %v7241_v10  ;;  %v7285_v10 = vld [vmem:[%s9198_s1 + $0x9e8] sm:$0xff]  }
 0x110   :  { %6595 = vmatpush3.bf16.msra.mxu0 %v7242_v11 }
 0x111   :  { %6617 = vmatpush3.bf16.msra.mxu1 %v7243_v12  ;;  %6596 = vmatprep.subr.bf16.mxu0 %v7244_v13 }
 0x112   :  { %6618 = vmatprep.subr.bf16.mxu1 %v7245_v14  ;;  %v7286_v14 = vld [vmem:[%s9198_s1 + $0x928] sm:$0xff]  }
 0x114   :  { %6597 = vmatpush3.bf16.msra.mxu0 %v7246_v15  ;;  %v7287_v15 = vld [vmem:[%s9198_s1 + $0x9a8] sm:$0xff]  }
 0x115   :  { %6619 = vmatpush3.bf16.msra.mxu1 %v7247_v17  ;;  %6598 = vmatprep.subr.bf16.mxu0 %v7248_v23  ;;  %v7292_v23 = vld [vmem:[%s9198_s1 + $0x978] sm:$0xff]  }
 0x116   :  { %v6296_v16 = vpop.f32.mrb[4].mxu0  ;;  %6620 = vmatprep.subr.bf16.mxu1 %v7249_v25  ;;  %v7294_v25 = vld [vmem:[%s9198_s1 + $0x938] sm:$0xff]  }
 0x117   :  { %v6318_v18 = vpop.f32.mrb[4].mxu1  ;;  %v6297_v19 = vpop.f32.mrb[5].mxu0 }
 0x118   :  { %v6319_v20 = vpop.f32.mrb[5].mxu1  ;;  %v6298_v21 = vadd.f32 %v6297_v19, %v6296_v16  ;;  %v6299_v24 = vpop.f32.mrb[6].mxu0  ;;  %6599 = vmatpush3.bf16.msra.mxu0 %v7250_v28  ;;  %v7288_v19 = vld [vmem:[%s9198_s1 + $0x970] sm:$0xff]   ;;  %v34_v28 = vld [vmem:[%s9199_s0 + $0x98] sm:$0xff] }
 0x119   :  { %v6320_v22 = vadd.f32 %v6319_v20, %v6318_v18  ;;  %v6321_v26 = vpop.f32.mrb[6].mxu1  ;;  %v6300_v29 = vpop.f32.mrb[7].mxu0  ;;  %6621 = vmatpush3.bf16.msra.mxu1 %v7251_v30  ;;  %6600 = vmatprep.subr.bf16.mxu0 %v7252_v33  ;;  %v7289_v20 = vld [vmem:[%s9198_s1 + $0x9f0] sm:$0xff]   ;;  %v7293_v24 = vld [vmem:[%s9198_s1 + $0x9f8] sm:$0xff]   ;;  %v5699_v33 = vcombine.high %v34_v28, %v34_v28 }
 0x11a   :  { %v4489_v27 = vadd.f32 %v6298_v21, %v8325_v46  ;;  %v6322_v31 = vpop.f32.mrb[7].mxu1  ;;  %6622 = vmatprep.subr.bf16.mxu1 %v7253_v34  ;;  %v5695_v46 = vcombine.high %v32_v42, %v32_v42  ;;  %v7290_v21 = vld [vmem:[%s9198_s1 + $0x930] sm:$0xff]   ;;  %v7295_v26 = vld [vmem:[%s9198_s1 + $0x9b8] sm:$0xff]   ;;  %v7301_v34 = vld [vmem:[%s9198_s1 + $0xac0] sm:$0xff]  }
 0x11b   :  { %v5698_v31 = vcombine.low %v34_v28, %v34_v28  ;;  %v7309_v42 = vld [vmem:[%s9198_s1 + $0xad0] sm:$0xff]  }
 0x11c   :  { %v8430_v32 = vadd.f32 %v6320_v22, %v4489_v27  ;;  %6601 = vmatpush3.bf16.msra.mxu0 %v7254_v35  ;;  %5086 = vmatprep.mubr.bf16.mxu1 %v5695_v46  ;;  %v7291_v22 = vld [vmem:[%s9198_s1 + $0x9b0] sm:$0xff]   ;;  %v7302_v35 = vld [vmem:[%s9198_s1 + $0xa00] sm:$0xff]   ;;  %v7313_v46 = vld [vmem:[%s9198_s1 + $0xad8] sm:$0xff]  }
 0x11d   :  { %6623 = vmatpush3.bf16.msra.mxu1 %v7255_v36  ;;  %6602 = vmatprep.subr.bf16.mxu0 %v7256_v37  ;;  %v33_v27 = vld [vmem:[%s9199_s0 + $0x90] sm:$0xff]  ;;  %v7303_v36 = vld [vmem:[%s9198_s1 + $0xa80] sm:$0xff]   ;;  %v7304_v37 = vld [vmem:[%s9198_s1 + $0xa48] sm:$0xff]  }
 0x11e   :  { %6624 = vmatprep.subr.bf16.mxu1 %v7257_v38  ;;  %v5696_v29 = vcombine.low %v33_v27, %v33_v27  ;;  %v5697_v30 = vcombine.high %v33_v27, %v33_v27  ;;  %v7305_v38 = vld [vmem:[%s9198_s1 + $0xac8] sm:$0xff]   ;;  %v7344_v27 = vld [vmem:[%s9198_s1 + $0xb50] sm:$0xff]  }
 0x11f   :  { %v7345_v28 = vld [vmem:[%s9198_s1 + $0xbd0] sm:$0xff]  }
 0x120   :  { %6603 = vmatpush3.bf16.msra.mxu0 %v7258_v39  ;;  %v7306_v39 = vld [vmem:[%s9198_s1 + $0xa08] sm:$0xff]  }
 0x121   :  { %6625 = vmatpush3.bf16.msra.mxu1 %v7259_v40  ;;  %6632 = vmatprep.subr.bf16.mxu0 %v7264_v47  ;;  %v7307_v40 = vld [vmem:[%s9198_s1 + $0xa88] sm:$0xff]   ;;  %v7314_v47 = vld [vmem:[%s9198_s1 + $0xa18] sm:$0xff]  }
 0x122   :  { %6654 = vmatprep.subr.bf16.mxu1 %v7265_v48  ;;  %v7315_v48 = vld [vmem:[%s9198_s1 + $0xa98] sm:$0xff]  }
 0x123   :  { %5047 = vmatmul.mubr.bf16.vlgmr.msra.gmra.mrb[32].mxu0 %v5692_v43  ;;  %v7310_v43 = vld [vmem:[%s9198_s1 + $0xa10] sm:$0xff]  }
 0x124   :  { %5087 = vmatmul.mubr.bf16.vlgmr.msra.gmra.mrb[32].mxu1 %v5694_v45  ;;  %6633 = vmatpush3.bf16.msra.mxu0 %v7266_v49  ;;  %v7312_v45 = vld [vmem:[%s9198_s1 + $0xa58] sm:$0xff]   ;;  %v7316_v49 = vld [vmem:[%s9198_s1 + $0xa60] sm:$0xff]  }
 0x125   :  { %6655 = vmatpush3.bf16.msra.mxu1 %v7267_v50  ;;  %6634 = vmatprep.subr.bf16.mxu0 %v7268_v51  ;;  %v7317_v50 = vld [vmem:[%s9198_s1 + $0xae0] sm:$0xff]  }
 0x126   :  { %6656 = vmatprep.subr.bf16.mxu1 %v7269_v52  ;;  %5126 = vmatprep.mubr.bf16.mxu0 %v5697_v30  ;;  %v7318_v52 = vld [vmem:[%s9198_s1 + $0xa20] sm:$0xff]   ;;  %v7347_v30 = vld [vmem:[%s9198_s1 + $0xb90] sm:$0xff]  }
 0x127   :  { %5166 = vmatprep.mubr.bf16.mxu1 %v5699_v33  ;;  %v7350_v33 = vld [vmem:[%s9198_s1 + $0xb18] sm:$0xff]  }
 0x128   :  { %6635 = vmatpush3.bf16.msra.mxu0 %v7270_v53 }
 0x129   :  { %6657 = vmatpush3.bf16.msra.mxu1 %v7271_v54  ;;  %6636 = vmatprep.subr.bf16.mxu0 %v7272_v55  ;;  %v7319_v54 = vld [vmem:[%s9198_s1 + $0xaa0] sm:$0xff]  }
 0x12a   :  { %6658 = vmatprep.subr.bf16.mxu1 %v7273_v56 }
 0x12c   :  { %6637 = vmatpush3.bf16.msra.mxu0 %v7274_v57  ;;  %v7320_v57 = vld [vmem:[%s9198_s1 + $0xa68] sm:$0xff]  }
 0x12d   :  { %6659 = vmatpush3.bf16.msra.mxu1 %v7275_v58  ;;  %6638 = vmatprep.subr.bf16.mxu0 %v7276_v59 }
 0x12e   :  { %6660 = vmatprep.subr.bf16.mxu1 %v7277_v60  ;;  %v7321_v60 = vld [vmem:[%s9198_s1 + $0xae8] sm:$0xff]  }
 0x130   :  { %6639 = vmatpush3.bf16.msra.mxu0 %v7278_v61 }
 0x131   :  { %6661 = vmatpush3.bf16.msra.mxu1 %v7279_v62  ;;  %6640 = vmatprep.subr.bf16.mxu0 %v7280_v63  ;;  %v7322_v63 = vld [vmem:[%s9198_s1 + $0xa28] sm:$0xff]  }
 0x132   :  { %6662 = vmatprep.subr.bf16.mxu1 %v7281_v0 }
 0x134   :  { %6641 = vmatpush3.bf16.msra.mxu0 %v7282_v2 }
 0x135   :  { %6663 = vmatpush3.bf16.msra.mxu1 %v7283_v4  ;;  %6642 = vmatprep.subr.bf16.mxu0 %v7284_v8  ;;  %v7324_v4 = vld [vmem:[%s9198_s1 + $0xa70] sm:$0xff]  }
 0x136   :  { %v6340_v1 = vpop.f32.mrb[8].mxu0  ;;  %6664 = vmatprep.subr.bf16.mxu1 %v7285_v10  ;;  %v7327_v8 = vld [vmem:[%s9198_s1 + $0xab0] sm:$0xff]   ;;  %v7329_v10 = vld [vmem:[%s9198_s1 + $0xaf8] sm:$0xff]  }
 0x137   :  { %v6362_v3 = vpop.f32.mrb[8].mxu1  ;;  %v6341_v5 = vpop.f32.mrb[9].mxu0 }
 0x138   :  { %v6342_v6 = vadd.f32 %v6341_v5, %v6340_v1  ;;  %v6363_v7 = vpop.f32.mrb[9].mxu1  ;;  %v6343_v11 = vpop.f32.mrb[10].mxu0  ;;  %6643 = vmatpush3.bf16.msra.mxu0 %v7286_v14  ;;  %v7323_v1 = vld [vmem:[%s9198_s1 + $0xaa8] sm:$0xff]  }
 0x139   :  { %v6364_v9 = vadd.f32 %v6363_v7, %v6362_v3  ;;  %v6365_v13 = vpop.f32.mrb[10].mxu1  ;;  %v6344_v16 = vpop.f32.mrb[11].mxu0  ;;  %6665 = vmatpush3.bf16.msra.mxu1 %v7287_v15  ;;  %6644 = vmatprep.subr.bf16.mxu0 %v7288_v19  ;;  %v7326_v7 = vld [vmem:[%s9198_s1 + $0xa30] sm:$0xff]   ;;  %v7330_v11 = vld [vmem:[%s9198_s1 + $0xa38] sm:$0xff]   ;;  %v7336_v19 = vld [vmem:[%s9198_s1 + $0xb40] sm:$0xff]  }
 0x13a   :  { %v4569_v12 = vadd.f32 %v6342_v6, %v8430_v32  ;;  %v6366_v18 = vpop.f32.mrb[11].mxu1  ;;  %6666 = vmatprep.subr.bf16.mxu1 %v7289_v20  ;;  %v7300_v32 = vld [vmem:[%s9198_s1 + $0xa40] sm:$0xff]   ;;  %v7325_v6 = vld [vmem:[%s9198_s1 + $0xaf0] sm:$0xff]   ;;  %v36_v16 = vld [vmem:[%s9199_s0 + $0xa8] sm:$0xff] }
 0x13b   :  { %v35_v13 = vld [vmem:[%s9199_s0 + $0xa0] sm:$0xff]  ;;  %v5703_v18 = vcombine.high %v36_v16, %v36_v16 }
 0x13c   :  { %v8535_v17 = vadd.f32 %v6364_v9, %v4569_v12  ;;  %6645 = vmatpush3.bf16.msra.mxu0 %v7290_v21  ;;  %v7328_v9 = vld [vmem:[%s9198_s1 + $0xa78] sm:$0xff]   ;;  %v5700_v14 = vcombine.low %v35_v13, %v35_v13  ;;  %v5701_v15 = vcombine.high %v35_v13, %v35_v13  ;;  %v7337_v20 = vld [vmem:[%s9198_s1 + $0xbc0] sm:$0xff]   ;;  %v7380_v13 = vld [vmem:[%s9198_s1 + $0xc50] sm:$0xff]  }
 0x13d   :  { %6667 = vmatpush3.bf16.msra.mxu1 %v7291_v22  ;;  %6646 = vmatprep.subr.bf16.mxu0 %v7292_v23  ;;  %v7331_v12 = vld [vmem:[%s9198_s1 + $0xab8] sm:$0xff]   ;;  %v7338_v21 = vld [vmem:[%s9198_s1 + $0xb00] sm:$0xff]   ;;  %v7340_v23 = vld [vmem:[%s9198_s1 + $0xb48] sm:$0xff]  }
 0x13e   :  { %6668 = vmatprep.subr.bf16.mxu1 %v7293_v24  ;;  %v7339_v22 = vld [vmem:[%s9198_s1 + $0xb80] sm:$0xff]   ;;  %v7341_v24 = vld [vmem:[%s9198_s1 + $0xbc8] sm:$0xff]  }
 0x140   :  { %6647 = vmatpush3.bf16.msra.mxu0 %v7294_v25  ;;  %v7342_v25 = vld [vmem:[%s9198_s1 + $0xb08] sm:$0xff]  }
 0x141   :  { %6669 = vmatpush3.bf16.msra.mxu1 %v7295_v26  ;;  %6676 = vmatprep.subr.bf16.mxu0 %v7300_v32  ;;  %v7343_v26 = vld [vmem:[%s9198_s1 + $0xb88] sm:$0xff]   ;;  %v7349_v32 = vld [vmem:[%s9198_s1 + $0xbd8] sm:$0xff]  }
 0x142   :  { %6698 = vmatprep.subr.bf16.mxu1 %v7301_v34  ;;  %v7351_v34 = vld [vmem:[%s9198_s1 + $0xb98] sm:$0xff]  }
 0x143   :  { %5127 = vmatmul.mubr.bf16.vlgmr.msra.gmra.mrb[36].mxu0 %v5696_v29  ;;  %v7346_v29 = vld [vmem:[%s9198_s1 + $0xb10] sm:$0xff]  }
 0x144   :  { %5167 = vmatmul.mubr.bf16.vlgmr.msra.gmra.mrb[36].mxu1 %v5698_v31  ;;  %6677 = vmatpush3.bf16.msra.mxu0 %v7302_v35  ;;  %v7348_v31 = vld [vmem:[%s9198_s1 + $0xb58] sm:$0xff]   ;;  %v7352_v35 = vld [vmem:[%s9198_s1 + $0xb60] sm:$0xff]  }
 0x145   :  { %6699 = vmatpush3.bf16.msra.mxu1 %v7303_v36  ;;  %6678 = vmatprep.subr.bf16.mxu0 %v7304_v37  ;;  %v7353_v36 = vld [vmem:[%s9198_s1 + $0xbe0] sm:$0xff]  }
 0x146   :  { %6700 = vmatprep.subr.bf16.mxu1 %v7305_v38  ;;  %5206 = vmatprep.mubr.bf16.mxu0 %v5701_v15  ;;  %v7354_v38 = vld [vmem:[%s9198_s1 + $0xb20] sm:$0xff]   ;;  %v7382_v15 = vld [vmem:[%s9198_s1 + $0xc10] sm:$0xff]  }
 0x147   :  { %5246 = vmatprep.mubr.bf16.mxu1 %v5703_v18  ;;  %v7385_v18 = vld [vmem:[%s9198_s1 + $0xcd8] sm:$0xff]  }
 0x148   :  { %6679 = vmatpush3.bf16.msra.mxu0 %v7306_v39 }
 0x149   :  { %6701 = vmatpush3.bf16.msra.mxu1 %v7307_v40  ;;  %6680 = vmatprep.subr.bf16.mxu0 %v7308_v41  ;;  %v7355_v40 = vld [vmem:[%s9198_s1 + $0xba0] sm:$0xff]  }
 0x14a   :  { %6702 = vmatprep.subr.bf16.mxu1 %v7309_v42 }
 0x14c   :  { %6681 = vmatpush3.bf16.msra.mxu0 %v7310_v43  ;;  %v7356_v43 = vld [vmem:[%s9198_s1 + $0xb68] sm:$0xff]  }
 0x14d   :  { %6703 = vmatpush3.bf16.msra.mxu1 %v7311_v44  ;;  %6682 = vmatprep.subr.bf16.mxu0 %v7312_v45 }
 0x14e   :  { %6704 = vmatprep.subr.bf16.mxu1 %v7313_v46  ;;  %v7357_v46 = vld [vmem:[%s9198_s1 + $0xbe8] sm:$0xff]  }
 0x150   :  { %6683 = vmatpush3.bf16.msra.mxu0 %v7314_v47 }
 0x151   :  { %6705 = vmatpush3.bf16.msra.mxu1 %v7315_v48  ;;  %6684 = vmatprep.subr.bf16.mxu0 %v7316_v49  ;;  %v7358_v49 = vld [vmem:[%s9198_s1 + $0xb28] sm:$0xff]  }
 0x152   :  { %6706 = vmatprep.subr.bf16.mxu1 %v7317_v50 }
 0x154   :  { %6685 = vmatpush3.bf16.msra.mxu0 %v7318_v52 }
 0x155   :  { %6707 = vmatpush3.bf16.msra.mxu1 %v7319_v54  ;;  %6686 = vmatprep.subr.bf16.mxu0 %v7320_v57  ;;  %v7360_v54 = vld [vmem:[%s9198_s1 + $0xb70] sm:$0xff]  }
 0x156   :  { %v6384_v51 = vpop.f32.mrb[12].mxu0  ;;  %6708 = vmatprep.subr.bf16.mxu1 %v7321_v60  ;;  %v7362_v57 = vld [vmem:[%s9198_s1 + $0xb30] sm:$0xff]   ;;  %v7365_v60 = vld [vmem:[%s9198_s1 + $0xbf8] sm:$0xff]  }
 0x157   :  { %v6406_v53 = vpop.f32.mrb[12].mxu1  ;;  %v6385_v55 = vpop.f32.mrb[13].mxu0 }
 0x158   :  { %v6407_v56 = vpop.f32.mrb[13].mxu1  ;;  %v6386_v58 = vadd.f32 %v6385_v55, %v6384_v51  ;;  %v6387_v61 = vpop.f32.mrb[14].mxu0  ;;  %6687 = vmatpush3.bf16.msra.mxu0 %v7322_v63  ;;  %v7359_v51 = vld [vmem:[%s9198_s1 + $0xba8] sm:$0xff]   ;;  %v37_v63 = vld [vmem:[%s9199_s0 + $0xb0] sm:$0xff] }
 0x159   :  { %v6408_v59 = vadd.f32 %v6407_v56, %v6406_v53  ;;  %v6409_v62 = vpop.f32.mrb[14].mxu1  ;;  %v6388_v2 = vpop.f32.mrb[15].mxu0  ;;  %6709 = vmatpush3.bf16.msra.mxu1 %v7323_v1  ;;  %6688 = vmatprep.subr.bf16.mxu0 %v7324_v4  ;;  %v7361_v56 = vld [vmem:[%s9198_s1 + $0xbf0] sm:$0xff]   ;;  %v7366_v61 = vld [vmem:[%s9198_s1 + $0xb38] sm:$0xff]   ;;  %v5704_v1 = vcombine.low %v37_v63, %v37_v63 }
 0x15a   :  { %v4649_v0 = vadd.f32 %v6386_v58, %v8535_v17  ;;  %v6410_v3 = vpop.f32.mrb[15].mxu1  ;;  %6710 = vmatprep.subr.bf16.mxu1 %v7325_v6  ;;  %v5702_v17 = vcombine.low %v36_v16, %v36_v16  ;;  %v7363_v58 = vld [vmem:[%s9198_s1 + $0xbb0] sm:$0xff]   ;;  %v7367_v62 = vld [vmem:[%s9198_s1 + $0xbb8] sm:$0xff]   ;;  %v5705_v2 = vcombine.high %v37_v63, %v37_v63  ;;  %v7373_v6 = vld [vmem:[%s9198_s1 + $0xcc0] sm:$0xff]  }
 0x15b   :  { %v7383_v16 = vld [vmem:[%s9198_s1 + $0xc90] sm:$0xff]  }
 0x15c   :  { %v8643_v5 = vadd.f32 %v6408_v59, %v4649_v0  ;;  %6689 = vmatpush3.bf16.msra.mxu0 %v7326_v7  ;;  %v7364_v59 = vld [vmem:[%s9198_s1 + $0xb78] sm:$0xff]   ;;  %v7374_v7 = vld [vmem:[%s9198_s1 + $0xc00] sm:$0xff]   ;;  %v7416_v63 = vld [vmem:[%s9198_s1 + $0xd50] sm:$0xff]  }
 0x15d   :  { %6711 = vmatpush3.bf16.msra.mxu1 %v7327_v8  ;;  %6690 = vmatprep.subr.bf16.mxu0 %v7328_v9  ;;  %v38_v0 = vld [vmem:[%s9199_s0 + $0xb8] sm:$0xff]  ;;  %v7375_v8 = vld [vmem:[%s9198_s1 + $0xc80] sm:$0xff]   ;;  %v7376_v9 = vld [vmem:[%s9198_s1 + $0xc48] sm:$0xff]  }
 0x15e   :  { %6712 = vmatprep.subr.bf16.mxu1 %v7329_v10  ;;  %v5706_v3 = vcombine.low %v38_v0, %v38_v0  ;;  %v5707_v4 = vcombine.high %v38_v0, %v38_v0  ;;  %v7377_v10 = vld [vmem:[%s9198_s1 + $0xcc8] sm:$0xff]   ;;  %v7417_v0 = vld [vmem:[%s9198_s1 + $0xdd0] sm:$0xff]  }
 0x160   :  { %6691 = vmatpush3.bf16.msra.mxu0 %v7330_v11  ;;  %v7378_v11 = vld [vmem:[%s9198_s1 + $0xc08] sm:$0xff]  }
 0x161   :  { %6713 = vmatpush3.bf16.msra.mxu1 %v7331_v12  ;;  %6720 = vmatprep.subr.bf16.mxu0 %v7336_v19  ;;  %v7379_v12 = vld [vmem:[%s9198_s1 + $0xc88] sm:$0xff]   ;;  %v7386_v19 = vld [vmem:[%s9198_s1 + $0xc18] sm:$0xff]  }
 0x162   :  { %6742 = vmatprep.subr.bf16.mxu1 %v7337_v20  ;;  %v7387_v20 = vld [vmem:[%s9198_s1 + $0xc98] sm:$0xff]  }
 0x163   :  { %5207 = vmatmul.mubr.bf16.vlgmr.msra.gmra.mrb[40].mxu0 %v5700_v14  ;;  %v7381_v14 = vld [vmem:[%s9198_s1 + $0xcd0] sm:$0xff]  }
 0x164   :  { %5247 = vmatmul.mubr.bf16.vlgmr.msra.gmra.mrb[40].mxu1 %v5702_v17  ;;  %6721 = vmatpush3.bf16.msra.mxu0 %v7338_v21  ;;  %v7384_v17 = vld [vmem:[%s9198_s1 + $0xc58] sm:$0xff]   ;;  %v7388_v21 = vld [vmem:[%s9198_s1 + $0xc60] sm:$0xff]  }
 0x165   :  { %6743 = vmatpush3.bf16.msra.mxu1 %v7339_v22  ;;  %6722 = vmatprep.subr.bf16.mxu0 %v7340_v23  ;;  %v7389_v22 = vld [vmem:[%s9198_s1 + $0xce0] sm:$0xff]  }
 0x166   :  { %6744 = vmatprep.subr.bf16.mxu1 %v7341_v24  ;;  %5286 = vmatprep.mubr.bf16.mxu0 %v5705_v2  ;;  %v7390_v24 = vld [vmem:[%s9198_s1 + $0xc20] sm:$0xff]   ;;  %v7419_v2 = vld [vmem:[%s9198_s1 + $0xd90] sm:$0xff]  }
 0x167   :  { %5326 = vmatprep.mubr.bf16.mxu1 %v5707_v4  ;;  %v7421_v4 = vld [vmem:[%s9198_s1 + $0xdd8] sm:$0xff]  }
 0x168   :  { %6723 = vmatpush3.bf16.msra.mxu0 %v7342_v25 }
 0x169   :  { %6745 = vmatpush3.bf16.msra.mxu1 %v7343_v26  ;;  %6724 = vmatprep.subr.bf16.mxu0 %v7344_v27  ;;  %v7391_v26 = vld [vmem:[%s9198_s1 + $0xca0] sm:$0xff]  }
 0x16a   :  { %6746 = vmatprep.subr.bf16.mxu1 %v7345_v28 }
 0x16c   :  { %6725 = vmatpush3.bf16.msra.mxu0 %v7346_v29 }
 0x16d   :  { %6747 = vmatpush3.bf16.msra.mxu1 %v7347_v30  ;;  %6726 = vmatprep.subr.bf16.mxu0 %v7348_v31  ;;  %v7392_v30 = vld [vmem:[%s9198_s1 + $0xc68] sm:$0xff]  }
 0x16e   :  { %6748 = vmatprep.subr.bf16.mxu1 %v7349_v32  ;;  %v7393_v32 = vld [vmem:[%s9198_s1 + $0xce8] sm:$0xff]  }
 0x170   :  { %6727 = vmatpush3.bf16.msra.mxu0 %v7350_v33 }
 0x171   :  { %6749 = vmatpush3.bf16.msra.mxu1 %v7351_v34  ;;  %6728 = vmatprep.subr.bf16.mxu0 %v7352_v35 }
 0x172   :  { %6750 = vmatprep.subr.bf16.mxu1 %v7353_v36  ;;  %v7394_v36 = vld [vmem:[%s9198_s1 + $0xc28] sm:$0xff]  }
 0x174   :  { %6729 = vmatpush3.bf16.msra.mxu0 %v7354_v38 }
 0x175   :  { %6751 = vmatpush3.bf16.msra.mxu1 %v7355_v40  ;;  %6730 = vmatprep.subr.bf16.mxu0 %v7356_v43  ;;  %v7398_v43 = vld [vmem:[%s9198_s1 + $0xc30] sm:$0xff]  }
 0x176   :  { %v6428_v37 = vpop.f32.mrb[16].mxu0  ;;  %6752 = vmatprep.subr.bf16.mxu1 %v7357_v46  ;;  %v7401_v46 = vld [vmem:[%s9198_s1 + $0xcf8] sm:$0xff]  }
 0x177   :  { %v6450_v39 = vpop.f32.mrb[16].mxu1  ;;  %v6429_v41 = vpop.f32.mrb[17].mxu0 }
 0x178   :  { %v6451_v42 = vpop.f32.mrb[17].mxu1  ;;  %v6430_v44 = vadd.f32 %v6429_v41, %v6428_v37  ;;  %v6431_v47 = vpop.f32.mrb[18].mxu0  ;;  %6731 = vmatpush3.bf16.msra.mxu0 %v7358_v49  ;;  %v7395_v37 = vld [vmem:[%s9198_s1 + $0xca8] sm:$0xff]   ;;  %v7396_v41 = vld [vmem:[%s9198_s1 + $0xc70] sm:$0xff]   ;;  %v39_v49 = vld [vmem:[%s9199_s0 + $0xc0] sm:$0xff] }
 0x179   :  { %v6452_v45 = vadd.f32 %v6451_v42, %v6450_v39  ;;  %v6453_v48 = vpop.f32.mrb[18].mxu1  ;;  %v6432_v52 = vpop.f32.mrb[19].mxu0  ;;  %6753 = vmatpush3.bf16.msra.mxu1 %v7359_v51  ;;  %6732 = vmatprep.subr.bf16.mxu0 %v7360_v54  ;;  %v7397_v42 = vld [vmem:[%s9198_s1 + $0xcf0] sm:$0xff]   ;;  %v7402_v47 = vld [vmem:[%s9198_s1 + $0xc38] sm:$0xff]   ;;  %v5708_v51 = vcombine.low %v39_v49, %v39_v49  ;;  %v7408_v54 = vld [vmem:[%s9198_s1 + $0xd40] sm:$0xff]  }
 0x17a   :  { %v4729_v50 = vadd.f32 %v6430_v44, %v8643_v5  ;;  %v6454_v53 = vpop.f32.mrb[19].mxu1  ;;  %6754 = vmatprep.subr.bf16.mxu1 %v7361_v56  ;;  %v7372_v5 = vld [vmem:[%s9198_s1 + $0xc40] sm:$0xff]   ;;  %v7399_v44 = vld [vmem:[%s9198_s1 + $0xcb0] sm:$0xff]   ;;  %v7403_v48 = vld [vmem:[%s9198_s1 + $0xcb8] sm:$0xff]   ;;  %v5709_v52 = vcombine.high %v39_v49, %v39_v49 }
 0x17b   :  { %v7409_v56 = vld [vmem:[%s9198_s1 + $0xdc0] sm:$0xff]   ;;  %v7452_v49 = vld [vmem:[%s9198_s1 + $0xe50] sm:$0xff]  }
 0x17c   :  { %v8748_v55 = vadd.f32 %v6452_v45, %v4729_v50  ;;  %6733 = vmatpush3.bf16.msra.mxu0 %v7362_v57  ;;  %v7400_v45 = vld [vmem:[%s9198_s1 + $0xc78] sm:$0xff]   ;;  %v40_v50 = vld [vmem:[%s9199_s0 + $0xc8] sm:$0xff]  ;;  %v7410_v57 = vld [vmem:[%s9198_s1 + $0xd00] sm:$0xff]  }
 0x17d   :  { %6755 = vmatpush3.bf16.msra.mxu1 %v7363_v58  ;;  %6734 = vmatprep.subr.bf16.mxu0 %v7364_v59  ;;  %v5710_v53 = vcombine.low %v40_v50, %v40_v50  ;;  %v7411_v58 = vld [vmem:[%s9198_s1 + $0xd80] sm:$0xff]   ;;  %v7412_v59 = vld [vmem:[%s9198_s1 + $0xd48] sm:$0xff]  }
 0x17e   :  { %6756 = vmatprep.subr.bf16.mxu1 %v7365_v60  ;;  %v7413_v60 = vld [vmem:[%s9198_s1 + $0xdc8] sm:$0xff]  }
 0x180   :  { %6735 = vmatpush3.bf16.msra.mxu0 %v7366_v61  ;;  %v7414_v61 = vld [vmem:[%s9198_s1 + $0xd08] sm:$0xff]  }
 0x181   :  { %6757 = vmatpush3.bf16.msra.mxu1 %v7367_v62  ;;  %6764 = vmatprep.subr.bf16.mxu0 %v7372_v5  ;;  %v7415_v62 = vld [vmem:[%s9198_s1 + $0xd88] sm:$0xff]   ;;  %v7422_v5 = vld [vmem:[%s9198_s1 + $0xd18] sm:$0xff]  }
 0x182   :  { %6786 = vmatprep.subr.bf16.mxu1 %v7373_v6  ;;  %v7423_v6 = vld [vmem:[%s9198_s1 + $0xd98] sm:$0xff]  }
 0x183   :  { %5287 = vmatmul.mubr.bf16.vlgmr.msra.gmra.mrb[44].mxu0 %v5704_v1  ;;  %v7418_v1 = vld [vmem:[%s9198_s1 + $0xd10] sm:$0xff]  }
 0x184   :  { %5327 = vmatmul.mubr.bf16.vlgmr.msra.gmra.mrb[44].mxu1 %v5706_v3  ;;  %6765 = vmatpush3.bf16.msra.mxu0 %v7374_v7  ;;  %v7420_v3 = vld [vmem:[%s9198_s1 + $0xd58] sm:$0xff]   ;;  %v7424_v7 = vld [vmem:[%s9198_s1 + $0xd60] sm:$0xff]  }
 0x185   :  { %6787 = vmatpush3.bf16.msra.mxu1 %v7375_v8  ;;  %6766 = vmatprep.subr.bf16.mxu0 %v7376_v9  ;;  %v7425_v8 = vld [vmem:[%s9198_s1 + $0xde0] sm:$0xff]  }
 0x186   :  { %6788 = vmatprep.subr.bf16.mxu1 %v7377_v10  ;;  %5366 = vmatprep.mubr.bf16.mxu0 %v5709_v52  ;;  %v7426_v10 = vld [vmem:[%s9198_s1 + $0xd20] sm:$0xff]   ;;  %v7455_v52 = vld [vmem:[%s9198_s1 + $0xe90] sm:$0xff]  }
 0x188   :  { %6767 = vmatpush3.bf16.msra.mxu0 %v7378_v11 }
 0x189   :  { %6789 = vmatpush3.bf16.msra.mxu1 %v7379_v12  ;;  %6768 = vmatprep.subr.bf16.mxu0 %v7380_v13  ;;  %v7427_v12 = vld [vmem:[%s9198_s1 + $0xda0] sm:$0xff]  }
 0x18a   :  { %6790 = vmatprep.subr.bf16.mxu1 %v7381_v14 }
 0x18c   :  { %6769 = vmatpush3.bf16.msra.mxu0 %v7382_v15  ;;  %v7428_v15 = vld [vmem:[%s9198_s1 + $0xd68] sm:$0xff]  }
 0x18d   :  { %6791 = vmatpush3.bf16.msra.mxu1 %v7383_v16  ;;  %6770 = vmatprep.subr.bf16.mxu0 %v7384_v17 }
 0x18e   :  { %6792 = vmatprep.subr.bf16.mxu1 %v7385_v18  ;;  %v7429_v18 = vld [vmem:[%s9198_s1 + $0xde8] sm:$0xff]  }
 0x190   :  { %6771 = vmatpush3.bf16.msra.mxu0 %v7386_v19 }
 0x191   :  { %6793 = vmatpush3.bf16.msra.mxu1 %v7387_v20  ;;  %6772 = vmatprep.subr.bf16.mxu0 %v7388_v21  ;;  %v7430_v21 = vld [vmem:[%s9198_s1 + $0xd28] sm:$0xff]  }
 0x192   :  { %6794 = vmatprep.subr.bf16.mxu1 %v7389_v22 }
 0x194   :  { %6773 = vmatpush3.bf16.msra.mxu0 %v7390_v24 }
 0x195   :  { %6795 = vmatpush3.bf16.msra.mxu1 %v7391_v26  ;;  %6774 = vmatprep.subr.bf16.mxu0 %v7392_v30  ;;  %v7432_v26 = vld [vmem:[%s9198_s1 + $0xd70] sm:$0xff]  }
 0x196   :  { %v6472_v23 = vpop.f32.mrb[20].mxu0  ;;  %6796 = vmatprep.subr.bf16.mxu1 %v7393_v32  ;;  %v7435_v30 = vld [vmem:[%s9198_s1 + $0xdb0] sm:$0xff]   ;;  %v7437_v32 = vld [vmem:[%s9198_s1 + $0xdf8] sm:$0xff]  }
 0x197   :  { %v6494_v25 = vpop.f32.mrb[20].mxu1  ;;  %v6473_v27 = vpop.f32.mrb[21].mxu0 }
 0x198   :  { %v6474_v28 = vadd.f32 %v6473_v27, %v6472_v23  ;;  %v6495_v29 = vpop.f32.mrb[21].mxu1  ;;  %v6475_v33 = vpop.f32.mrb[22].mxu0  ;;  %6775 = vmatpush3.bf16.msra.mxu0 %v7394_v36  ;;  %v7431_v23 = vld [vmem:[%s9198_s1 + $0xda8] sm:$0xff]  }
 0x199   :  { %v6496_v31 = vadd.f32 %v6495_v29, %v6494_v25  ;;  %v6497_v35 = vpop.f32.mrb[22].mxu1  ;;  %v6476_v38 = vpop.f32.mrb[23].mxu0  ;;  %6797 = vmatpush3.bf16.msra.mxu1 %v7395_v37  ;;  %6776 = vmatprep.subr.bf16.mxu0 %v7396_v41  ;;  %v7434_v29 = vld [vmem:[%s9198_s1 + $0xd30] sm:$0xff]   ;;  %v7438_v33 = vld [vmem:[%s9198_s1 + $0xd38] sm:$0xff]   ;;  %v7444_v41 = vld [vmem:[%s9198_s1 + $0xe40] sm:$0xff]  }
 0x19a   :  { %v4809_v34 = vadd.f32 %v6474_v28, %v8748_v55  ;;  %v6498_v40 = vpop.f32.mrb[23].mxu1  ;;  %6798 = vmatprep.subr.bf16.mxu1 %v7397_v42  ;;  %v5711_v55 = vcombine.high %v40_v50, %v40_v50  ;;  %v7433_v28 = vld [vmem:[%s9198_s1 + $0xdf0] sm:$0xff]   ;;  %v42_v38 = vld [vmem:[%s9199_s0 + $0xd8] sm:$0xff]  ;;  %v7445_v42 = vld [vmem:[%s9198_s1 + $0xec0] sm:$0xff]  }
 0x19b   :  { %v41_v35 = vld [vmem:[%s9199_s0 + $0xd0] sm:$0xff]  ;;  %v5715_v40 = vcombine.high %v42_v38, %v42_v38 }
 0x19c   :  { %v8850_v39 = vadd.f32 %v6496_v31, %v4809_v34  ;;  %6777 = vmatpush3.bf16.msra.mxu0 %v7398_v43  ;;  %5406 = vmatprep.mubr.bf16.mxu1 %v5711_v55  ;;  %v7436_v31 = vld [vmem:[%s9198_s1 + $0xd78] sm:$0xff]   ;;  %v5712_v36 = vcombine.low %v41_v35, %v41_v35  ;;  %v5713_v37 = vcombine.high %v41_v35, %v41_v35  ;;  %v7446_v43 = vld [vmem:[%s9198_s1 + $0xe00] sm:$0xff]   ;;  %v7453_v50 = vld [vmem:[%s9198_s1 + $0xed0] sm:$0xff]  }
 0x19d   :  { %6799 = vmatpush3.bf16.msra.mxu1 %v7399_v44  ;;  %6778 = vmatprep.subr.bf16.mxu0 %v7400_v45  ;;  %v7439_v34 = vld [vmem:[%s9198_s1 + $0xdb8] sm:$0xff]   ;;  %v7447_v44 = vld [vmem:[%s9198_s1 + $0xe80] sm:$0xff]   ;;  %v7448_v45 = vld [vmem:[%s9198_s1 + $0xe48] sm:$0xff]  }
 0x19e   :  { %6800 = vmatprep.subr.bf16.mxu1 %v7401_v46  ;;  %v7449_v46 = vld [vmem:[%s9198_s1 + $0xec8] sm:$0xff]   ;;  %v7458_v55 = vld [vmem:[%s9198_s1 + $0xe18] sm:$0xff]   ;;  %v7488_v35 = vld [vmem:[%s9198_s1 + $0xf50] sm:$0xff]  }
 0x1a0   :  { %6779 = vmatpush3.bf16.msra.mxu0 %v7402_v47  ;;  %v7450_v47 = vld [vmem:[%s9198_s1 + $0xe08] sm:$0xff]  }
 0x1a1   :  { %6801 = vmatpush3.bf16.msra.mxu1 %v7403_v48  ;;  %6808 = vmatprep.subr.bf16.mxu0 %v7408_v54  ;;  %v7451_v48 = vld [vmem:[%s9198_s1 + $0xe88] sm:$0xff]   ;;  %v7457_v54 = vld [vmem:[%s9198_s1 + $0xed8] sm:$0xff]  }
 0x1a2   :  { %6830 = vmatprep.subr.bf16.mxu1 %v7409_v56  ;;  %v7459_v56 = vld [vmem:[%s9198_s1 + $0xe98] sm:$0xff]  }
 0x1a3   :  { %5367 = vmatmul.mubr.bf16.vlgmr.msra.gmra.mrb[48].mxu0 %v5708_v51  ;;  %v7454_v51 = vld [vmem:[%s9198_s1 + $0xe10] sm:$0xff]  }
 0x1a4   :  { %5407 = vmatmul.mubr.bf16.vlgmr.msra.gmra.mrb[48].mxu1 %v5710_v53  ;;  %6809 = vmatpush3.bf16.msra.mxu0 %v7410_v57  ;;  %v7456_v53 = vld [vmem:[%s9198_s1 + $0xe58] sm:$0xff]   ;;  %v7460_v57 = vld [vmem:[%s9198_s1 + $0xe60] sm:$0xff]  }
 0x1a5   :  { %6831 = vmatpush3.bf16.msra.mxu1 %v7411_v58  ;;  %6810 = vmatprep.subr.bf16.mxu0 %v7412_v59  ;;  %v7461_v58 = vld [vmem:[%s9198_s1 + $0xee0] sm:$0xff]  }
 0x1a6   :  { %6832 = vmatprep.subr.bf16.mxu1 %v7413_v60  ;;  %5446 = vmatprep.mubr.bf16.mxu0 %v5713_v37  ;;  %v7462_v60 = vld [vmem:[%s9198_s1 + $0xe20] sm:$0xff]   ;;  %v7490_v37 = vld [vmem:[%s9198_s1 + $0xf10] sm:$0xff]  }
 0x1a7   :  { %5486 = vmatprep.mubr.bf16.mxu1 %v5715_v40  ;;  %v7493_v40 = vld [vmem:[%s9198_s1 + $0xfd8] sm:$0xff]  }
 0x1a8   :  { %6811 = vmatpush3.bf16.msra.mxu0 %v7414_v61 }
 0x1a9   :  { %6833 = vmatpush3.bf16.msra.mxu1 %v7415_v62  ;;  %6812 = vmatprep.subr.bf16.mxu0 %v7416_v63  ;;  %v7463_v62 = vld [vmem:[%s9198_s1 + $0xea0] sm:$0xff]  }
 0x1aa   :  { %6834 = vmatprep.subr.bf16.mxu1 %v7417_v0 }
 0x1ac   :  { %6813 = vmatpush3.bf16.msra.mxu0 %v7418_v1  ;;  %v7464_v1 = vld [vmem:[%s9198_s1 + $0xe68] sm:$0xff]  }
 0x1ad   :  { %6835 = vmatpush3.bf16.msra.mxu1 %v7419_v2  ;;  %6814 = vmatprep.subr.bf16.mxu0 %v7420_v3 }
 0x1ae   :  { %6836 = vmatprep.subr.bf16.mxu1 %v7421_v4  ;;  %v7465_v4 = vld [vmem:[%s9198_s1 + $0xee8] sm:$0xff]  }
 0x1b0   :  { %6815 = vmatpush3.bf16.msra.mxu0 %v7422_v5 }
 0x1b1   :  { %6837 = vmatpush3.bf16.msra.mxu1 %v7423_v6  ;;  %6816 = vmatprep.subr.bf16.mxu0 %v7424_v7  ;;  %v7466_v7 = vld [vmem:[%s9198_s1 + $0xe28] sm:$0xff]  }
 0x1b2   :  { %6838 = vmatprep.subr.bf16.mxu1 %v7425_v8 }
 0x1b4   :  { %6817 = vmatpush3.bf16.msra.mxu0 %v7426_v10 }
 0x1b5   :  { %6839 = vmatpush3.bf16.msra.mxu1 %v7427_v12  ;;  %6818 = vmatprep.subr.bf16.mxu0 %v7428_v15  ;;  %v7468_v12 = vld [vmem:[%s9198_s1 + $0xe70] sm:$0xff]  }
 0x1b6   :  { %v6516_v9 = vpop.f32.mrb[24].mxu0  ;;  %6840 = vmatprep.subr.bf16.mxu1 %v7429_v18  ;;  %v7470_v15 = vld [vmem:[%s9198_s1 + $0xe30] sm:$0xff]   ;;  %v7473_v18 = vld [vmem:[%s9198_s1 + $0xef8] sm:$0xff]  }
 0x1b7   :  { %v6538_v11 = vpop.f32.mrb[24].mxu1  ;;  %v6517_v13 = vpop.f32.mrb[25].mxu0 }
 0x1b8   :  { %v6539_v14 = vpop.f32.mrb[25].mxu1  ;;  %v6518_v16 = vadd.f32 %v6517_v13, %v6516_v9  ;;  %v6519_v19 = vpop.f32.mrb[26].mxu0  ;;  %6819 = vmatpush3.bf16.msra.mxu0 %v7430_v21  ;;  %v7467_v9 = vld [vmem:[%s9198_s1 + $0xea8] sm:$0xff]   ;;  %v43_v21 = vld [vmem:[%s9199_s0 + $0xe0] sm:$0xff] }
 0x1b9   :  { %v6540_v17 = vadd.f32 %v6539_v14, %v6538_v11  ;;  %v6541_v20 = vpop.f32.mrb[26].mxu1  ;;  %v6520_v24 = vpop.f32.mrb[27].mxu0  ;;  %6841 = vmatpush3.bf16.msra.mxu1 %v7431_v23  ;;  %6820 = vmatprep.subr.bf16.mxu0 %v7432_v26  ;;  %v7469_v14 = vld [vmem:[%s9198_s1 + $0xef0] sm:$0xff]   ;;  %v7474_v19 = vld [vmem:[%s9198_s1 + $0xe38] sm:$0xff]   ;;  %v5716_v23 = vcombine.low %v43_v21, %v43_v21 }
 0x1ba   :  { %v4889_v22 = vadd.f32 %v6518_v16, %v8850_v39  ;;  %v6542_v25 = vpop.f32.mrb[27].mxu1  ;;  %6842 = vmatprep.subr.bf16.mxu1 %v7433_v28  ;;  %v5714_v39 = vcombine.low %v42_v38, %v42_v38  ;;  %v7471_v16 = vld [vmem:[%s9198_s1 + $0xeb0] sm:$0xff]   ;;  %v7475_v20 = vld [vmem:[%s9198_s1 + $0xeb8] sm:$0xff]   ;;  %v5717_v24 = vcombine.high %v43_v21, %v43_v21  ;;  %v7481_v28 = vld [vmem:[%s9198_s1 + $0xfc0] sm:$0xff]  }
 0x1bb   :  { %v7491_v38 = vld [vmem:[%s9198_s1 + $0xf90] sm:$0xff]  }
 0x1bc   :  { %v8958_v27 = vadd.f32 %v6540_v17, %v4889_v22  ;;  %6821 = vmatpush3.bf16.msra.mxu0 %v7434_v29  ;;  %v7472_v17 = vld [vmem:[%s9198_s1 + $0xe78] sm:$0xff]   ;;  %v44_v22 = vld [vmem:[%s9199_s0 + $0xe8] sm:$0xff]  ;;  %v7482_v29 = vld [vmem:[%s9198_s1 + $0xf00] sm:$0xff]  }
 0x1bd   :  { %6843 = vmatpush3.bf16.msra.mxu1 %v7435_v30  ;;  %6822 = vmatprep.subr.bf16.mxu0 %v7436_v31  ;;  %v5718_v25 = vcombine.low %v44_v22, %v44_v22  ;;  %v5719_v26 = vcombine.high %v44_v22, %v44_v22  ;;  %v7483_v30 = vld [vmem:[%s9198_s1 + $0xf80] sm:$0xff]   ;;  %v7484_v31 = vld [vmem:[%s9198_s1 + $0xf48] sm:$0xff]  }
 0x1be   :  { %6844 = vmatprep.subr.bf16.mxu1 %v7437_v32  ;;  %v7485_v32 = vld [vmem:[%s9198_s1 + $0xfc8] sm:$0xff]  }
 0x1c0   :  { %6823 = vmatpush3.bf16.msra.mxu0 %v7438_v33  ;;  %v7486_v33 = vld [vmem:[%s9198_s1 + $0xf08] sm:$0xff]  }
 0x1c1   :  { %6845 = vmatpush3.bf16.msra.mxu1 %v7439_v34  ;;  %6852 = vmatprep.subr.bf16.mxu0 %v7444_v41  ;;  %v7487_v34 = vld [vmem:[%s9198_s1 + $0xf88] sm:$0xff]   ;;  %v7494_v41 = vld [vmem:[%s9198_s1 + $0xf18] sm:$0xff]  }
 0x1c2   :  { %6874 = vmatprep.subr.bf16.mxu1 %v7445_v42  ;;  %v7495_v42 = vld [vmem:[%s9198_s1 + $0xf98] sm:$0xff]  }
 0x1c3   :  { %5447 = vmatmul.mubr.bf16.vlgmr.msra.gmra.mrb[52].mxu0 %v5712_v36  ;;  %v7489_v36 = vld [vmem:[%s9198_s1 + $0xfd0] sm:$0xff]  }
 0x1c4   :  { %5487 = vmatmul.mubr.bf16.vlgmr.msra.gmra.mrb[52].mxu1 %v5714_v39  ;;  %6853 = vmatpush3.bf16.msra.mxu0 %v7446_v43  ;;  %v7492_v39 = vld [vmem:[%s9198_s1 + $0xf58] sm:$0xff]   ;;  %v7496_v43 = vld [vmem:[%s9198_s1 + $0xf60] sm:$0xff]  }
 0x1c5   :  { %6875 = vmatpush3.bf16.msra.mxu1 %v7447_v44  ;;  %6854 = vmatprep.subr.bf16.mxu0 %v7448_v45  ;;  %v7497_v44 = vld [vmem:[%s9198_s1 + $0xfe0] sm:$0xff]  }
 0x1c6   :  { %6876 = vmatprep.subr.bf16.mxu1 %v7449_v46  ;;  %5526 = vmatprep.mubr.bf16.mxu0 %v5717_v24  ;;  %v7498_v45 = vld [vmem:[%s9198_s1 + $0xf20] sm:$0xff]  }
 0x1c7   :  { %5566 = vmatprep.mubr.bf16.mxu1 %v5719_v26 }
 0x1c8   :  { %6855 = vmatpush3.bf16.msra.mxu0 %v7450_v47  ;;  %v7499_v47 = vld [vmem:[%s9198_s1 + $0xfa0] sm:$0xff]  }
 0x1c9   :  { %6877 = vmatpush3.bf16.msra.mxu1 %v7451_v48  ;;  %6856 = vmatprep.subr.bf16.mxu0 %v7452_v49 }
 0x1ca   :  { %6878 = vmatprep.subr.bf16.mxu1 %v7453_v50 }
 0x1cc   :  { %6857 = vmatpush3.bf16.msra.mxu0 %v7454_v51 }
 0x1cd   :  { %6879 = vmatpush3.bf16.msra.mxu1 %v7455_v52  ;;  %6858 = vmatprep.subr.bf16.mxu0 %v7456_v53  ;;  %v7500_v53 = vld [vmem:[%s9198_s1 + $0xf68] sm:$0xff]  }
 0x1ce   :  { %6880 = vmatprep.subr.bf16.mxu1 %v7457_v54 }
 0x1d0   :  { %6859 = vmatpush3.bf16.msra.mxu0 %v7458_v55  ;;  %v7501_v55 = vld [vmem:[%s9198_s1 + $0xfe8] sm:$0xff]  }
 0x1d1   :  { %6881 = vmatpush3.bf16.msra.mxu1 %v7459_v56  ;;  %6860 = vmatprep.subr.bf16.mxu0 %v7460_v57 }
 0x1d2   :  { %6882 = vmatprep.subr.bf16.mxu1 %v7461_v58  ;;  %v7502_v58 = vld [vmem:[%s9198_s1 + $0xf28] sm:$0xff]  }
 0x1d4   :  { %6861 = vmatpush3.bf16.msra.mxu0 %v7462_v60  ;;  %v7503_v60 = vld [vmem:[%s9198_s1 + $0xfa8] sm:$0xff]  }
 0x1d5   :  { %6883 = vmatpush3.bf16.msra.mxu1 %v7463_v62  ;;  %6862 = vmatprep.subr.bf16.mxu0 %v7464_v1  ;;  %v7506_v1 = vld [vmem:[%s9198_s1 + $0xf30] sm:$0xff]  }
 0x1d6   :  { %v6560_v59 = vpop.f32.mrb[28].mxu0  ;;  %6884 = vmatprep.subr.bf16.mxu1 %v7465_v4  ;;  %v7509_v4 = vld [vmem:[%s9198_s1 + $0xff8] sm:$0xff]  }
 0x1d7   :  { %v6582_v61 = vpop.f32.mrb[28].mxu1  ;;  %v6561_v63 = vpop.f32.mrb[29].mxu0 }
 0x1d8   :  { %v6583_v0 = vpop.f32.mrb[29].mxu1  ;;  %v6562_v2 = vadd.f32 %v6561_v63, %v6560_v59  ;;  %v6563_v5 = vpop.f32.mrb[30].mxu0  ;;  %6863 = vmatpush3.bf16.msra.mxu0 %v7466_v7  ;;  %v7504_v63 = vld [vmem:[%s9198_s1 + $0xf70] sm:$0xff]  }
 0x1d9   :  { %v6584_v3 = vadd.f32 %v6583_v0, %v6582_v61  ;;  %v6585_v6 = vpop.f32.mrb[30].mxu1  ;;  %v6564_v10 = vpop.f32.mrb[31].mxu0  ;;  %6885 = vmatpush3.bf16.msra.mxu1 %v7467_v9  ;;  %6864 = vmatprep.subr.bf16.mxu0 %v7468_v12  ;;  %v7505_v0 = vld [vmem:[%s9198_s1 + $0xff0] sm:$0xff]   ;;  %v7510_v5 = vld [vmem:[%s9198_s1 + $0xf38] sm:$0xff]  }
 0x1da   :  { %v4969_v8 = vadd.f32 %v6562_v2, %v8958_v27  ;;  %v6586_v11 = vpop.f32.mrb[31].mxu1  ;;  %6886 = vmatprep.subr.bf16.mxu1 %v7469_v14  ;;  %v7480_v27 = vld [vmem:[%s9198_s1 + $0xf40] sm:$0xff]   ;;  %v7507_v2 = vld [vmem:[%s9198_s1 + $0xfb0] sm:$0xff]   ;;  %v7511_v6 = vld [vmem:[%s9198_s1 + $0xfb8] sm:$0xff]  }
 0x1db   :  { %v45_v7 = vld [vmem:[%s9199_s0 + $0xf0] sm:$0xff] }
 0x1dc   :  { %v9063_v13 = vadd.f32 %v6584_v3, %v4969_v8  ;;  %6865 = vmatpush3.bf16.msra.mxu0 %v7470_v15  ;;  %v7508_v3 = vld [vmem:[%s9198_s1 + $0xf78] sm:$0xff]   ;;  %v5720_v9 = vcombine.low %v45_v7, %v45_v7  ;;  %v5721_v10 = vcombine.high %v45_v7, %v45_v7 }
 0x1dd   :  { %6887 = vmatpush3.bf16.msra.mxu1 %v7471_v16  ;;  %6866 = vmatprep.subr.bf16.mxu0 %v7472_v17  ;;  %v46_v8 = vld [vmem:[%s9199_s0 + $0xf8] sm:$0xff] }
 0x1de   :  { %6888 = vmatprep.subr.bf16.mxu1 %v7473_v18  ;;  %v5722_v11 = vcombine.low %v46_v8, %v46_v8  ;;  %v5723_v12 = vcombine.high %v46_v8, %v46_v8 }
 0x1e0   :  { %6867 = vmatpush3.bf16.msra.mxu0 %v7474_v19 }
 0x1e1   :  { %6889 = vmatpush3.bf16.msra.mxu1 %v7475_v20  ;;  %6896 = vmatprep.subr.bf16.mxu0 %v7480_v27 }
 0x1e2   :  { %6918 = vmatprep.subr.bf16.mxu1 %v7481_v28 }
 0x1e3   :  { %5527 = vmatmul.mubr.bf16.vlgmr.msra.gmra.mrb[56].mxu0 %v5716_v23 }
 0x1e4   :  { %5567 = vmatmul.mubr.bf16.vlgmr.msra.gmra.mrb[56].mxu1 %v5718_v25  ;;  %6897 = vmatpush3.bf16.msra.mxu0 %v7482_v29 }
 0x1e5   :  { %6919 = vmatpush3.bf16.msra.mxu1 %v7483_v30  ;;  %6898 = vmatprep.subr.bf16.mxu0 %v7484_v31 }
 0x1e6   :  { %6920 = vmatprep.subr.bf16.mxu1 %v7485_v32  ;;  %5606 = vmatprep.mubr.bf16.mxu0 %v5721_v10 }
 0x1e7   :  { %5646 = vmatprep.mubr.bf16.mxu1 %v5723_v12 }
 0x1e8   :  { %6899 = vmatpush3.bf16.msra.mxu0 %v7486_v33 }
 0x1e9   :  { %6921 = vmatpush3.bf16.msra.mxu1 %v7487_v34  ;;  %6900 = vmatprep.subr.bf16.mxu0 %v7488_v35 }
 0x1ea   :  { %6922 = vmatprep.subr.bf16.mxu1 %v7489_v36 }
 0x1ec   :  { %6901 = vmatpush3.bf16.msra.mxu0 %v7490_v37 }
 0x1ed   :  { %6923 = vmatpush3.bf16.msra.mxu1 %v7491_v38  ;;  %6902 = vmatprep.subr.bf16.mxu0 %v7492_v39 }
 0x1ee   :  { %6924 = vmatprep.subr.bf16.mxu1 %v7493_v40 }
 0x1f0   :  { %6903 = vmatpush3.bf16.msra.mxu0 %v7494_v41 }
 0x1f1   :  { %6925 = vmatpush3.bf16.msra.mxu1 %v7495_v42  ;;  %6904 = vmatprep.subr.bf16.mxu0 %v7496_v43 }
 0x1f2   :  { %6926 = vmatprep.subr.bf16.mxu1 %v7497_v44 }
 0x1f4   :  { %6905 = vmatpush3.bf16.msra.mxu0 %v7498_v45 }
 0x1f5   :  { %6927 = vmatpush3.bf16.msra.mxu1 %v7499_v47  ;;  %6906 = vmatprep.subr.bf16.mxu0 %v7500_v53 }
 0x1f6   :  { %v6604_v46 = vpop.f32.mrb[32].mxu0  ;;  %6928 = vmatprep.subr.bf16.mxu1 %v7501_v55 }
 0x1f7   :  { %v6626_v48 = vpop.f32.mrb[32].mxu1  ;;  %v6605_v49 = vpop.f32.mrb[33].mxu0 }
 0x1f8   :  { %v6627_v50 = vpop.f32.mrb[33].mxu1  ;;  %v6606_v51 = vadd.f32 %v6605_v49, %v6604_v46  ;;  %v6607_v54 = vpop.f32.mrb[34].mxu0  ;;  %6907 = vmatpush3.bf16.msra.mxu0 %v7502_v58 }
 0x1f9   :  { %v6628_v52 = vadd.f32 %v6627_v50, %v6626_v48  ;;  %v6629_v56 = vpop.f32.mrb[34].mxu1  ;;  %v6608_v59 = vpop.f32.mrb[35].mxu0  ;;  %6929 = vmatpush3.bf16.msra.mxu1 %v7503_v60  ;;  %6908 = vmatprep.subr.bf16.mxu0 %v7504_v63 }
 0x1fa   :  { %v5049_v57 = vadd.f32 %v6606_v51, %v9063_v13  ;;  %v6630_v61 = vpop.f32.mrb[35].mxu1  ;;  %6930 = vmatprep.subr.bf16.mxu1 %v7505_v0 }
 0x1fc   :  { %v5089_v62 = vadd.f32 %v6628_v52, %v5049_v57  ;;  %6909 = vmatpush3.bf16.msra.mxu0 %v7506_v1 }
 0x1fd   :  { %6931 = vmatpush3.bf16.msra.mxu1 %v7507_v2  ;;  %6910 = vmatprep.subr.bf16.mxu0 %v7508_v3 }
 0x1fe   :  { %6932 = vmatprep.subr.bf16.mxu1 %v7509_v4 }
 0x200   :  { %6911 = vmatpush3.bf16.msra.mxu0 %v7510_v5 }
 0x201   :  { %6933 = vmatpush3.bf16.msra.mxu1 %v7511_v6 }
 0x203   :  { %5607 = vmatmul.mubr.bf16.vlgmr.msra.gmra.mrb[60].mxu0 %v5720_v9 }
 0x204   :  { %5647 = vmatmul.mubr.bf16.vlgmr.msra.gmra.mrb[60].mxu1 %v5722_v11 }
 0x216   :  { %v6648_v13 = vpop.f32.mrb[36].mxu0 }
 0x217   :  { %v6670_v14 = vpop.f32.mrb[36].mxu1  ;;  %v6649_v15 = vpop.f32.mrb[37].mxu0 }
 0x218   :  { %v6650_v16 = vadd.f32 %v6649_v15, %v6648_v13  ;;  %v6671_v17 = vpop.f32.mrb[37].mxu1  ;;  %v6651_v18 = vpop.f32.mrb[38].mxu0 }
 0x219   :  { %v6672_v19 = vadd.f32 %v6671_v17, %v6670_v14  ;;  %v6673_v20 = vpop.f32.mrb[38].mxu1  ;;  %v6652_v21 = vpop.f32.mrb[39].mxu0 }
 0x21a   :  { %v5129_v22 = vadd.f32 %v6650_v16, %v5089_v62  ;;  %v6674_v23 = vpop.f32.mrb[39].mxu1 }
 0x21c   :  { %v5169_v24 = vadd.f32 %v6672_v19, %v5129_v22 }
 0x236   :  { %v6692_v25 = vpop.f32.mrb[40].mxu0 }
 0x237   :  { %v6714_v26 = vpop.f32.mrb[40].mxu1  ;;  %v6693_v27 = vpop.f32.mrb[41].mxu0 }
 0x238   :  { %v6715_v28 = vpop.f32.mrb[41].mxu1  ;;  %v6694_v29 = vadd.f32 %v6693_v27, %v6692_v25  ;;  %v6695_v31 = vpop.f32.mrb[42].mxu0 }
 0x239   :  { %v6716_v30 = vadd.f32 %v6715_v28, %v6714_v26  ;;  %v6717_v32 = vpop.f32.mrb[42].mxu1  ;;  %v6696_v33 = vpop.f32.mrb[43].mxu0 }
 0x23a   :  { %v6718_v34 = vpop.f32.mrb[43].mxu1  ;;  %v5209_v35 = vadd.f32 %v6694_v29, %v5169_v24 }
 0x23c   :  { %v5249_v36 = vadd.f32 %v6716_v30, %v5209_v35 }
 0x256   :  { %v6736_v37 = vpop.f32.mrb[44].mxu0 }
 0x257   :  { %v6758_v38 = vpop.f32.mrb[44].mxu1  ;;  %v6737_v39 = vpop.f32.mrb[45].mxu0 }
 0x258   :  { %v6738_v40 = vadd.f32 %v6737_v39, %v6736_v37  ;;  %v6759_v41 = vpop.f32.mrb[45].mxu1  ;;  %v6739_v42 = vpop.f32.mrb[46].mxu0 }
 0x259   :  { %v6760_v43 = vadd.f32 %v6759_v41, %v6758_v38  ;;  %v6761_v44 = vpop.f32.mrb[46].mxu1  ;;  %v6740_v45 = vpop.f32.mrb[47].mxu0 }
 0x25a   :  { %v5289_v46 = vadd.f32 %v6738_v40, %v5249_v36  ;;  %v6762_v47 = vpop.f32.mrb[47].mxu1 }
 0x25c   :  { %v5329_v48 = vadd.f32 %v6760_v43, %v5289_v46 }
 0x276   :  { %v6780_v49 = vpop.f32.mrb[48].mxu0 }
 0x277   :  { %v6802_v50 = vpop.f32.mrb[48].mxu1  ;;  %v6781_v51 = vpop.f32.mrb[49].mxu0 }
 0x278   :  { %v6782_v52 = vadd.f32 %v6781_v51, %v6780_v49  ;;  %v6803_v53 = vpop.f32.mrb[49].mxu1  ;;  %v6783_v54 = vpop.f32.mrb[50].mxu0 }
 0x279   :  { %v6804_v55 = vadd.f32 %v6803_v53, %v6802_v50  ;;  %v6805_v56 = vpop.f32.mrb[50].mxu1  ;;  %v6784_v57 = vpop.f32.mrb[51].mxu0 }
 0x27a   :  { %v5369_v58 = vadd.f32 %v6782_v52, %v5329_v48  ;;  %v6806_v59 = vpop.f32.mrb[51].mxu1 }
 0x27c   :  { %v5409_v60 = vadd.f32 %v6804_v55, %v5369_v58 }
 0x296   :  { %v6824_v61 = vpop.f32.mrb[52].mxu0 }
 0x297   :  { %v6846_v62 = vpop.f32.mrb[52].mxu1  ;;  %v6825_v63 = vpop.f32.mrb[53].mxu0 }
 0x298   :  { %v6847_v0 = vpop.f32.mrb[53].mxu1  ;;  %v6826_v1 = vadd.f32 %v6825_v63, %v6824_v61  ;;  %v6827_v3 = vpop.f32.mrb[54].mxu0 }
 0x299   :  { %v6848_v2 = vadd.f32 %v6847_v0, %v6846_v62  ;;  %v6849_v4 = vpop.f32.mrb[54].mxu1  ;;  %v6828_v5 = vpop.f32.mrb[55].mxu0 }
 0x29a   :  { %v6850_v6 = vpop.f32.mrb[55].mxu1  ;;  %v5449_v7 = vadd.f32 %v6826_v1, %v5409_v60 }
 0x29c   :  { %v5489_v8 = vadd.f32 %v6848_v2, %v5449_v7 }
 0x2b6   :  { %v6868_v9 = vpop.f32.mrb[56].mxu0 }
 0x2b7   :  { %v6890_v10 = vpop.f32.mrb[56].mxu1  ;;  %v6869_v11 = vpop.f32.mrb[57].mxu0 }
 0x2b8   :  { %v6870_v12 = vadd.f32 %v6869_v11, %v6868_v9  ;;  %v6891_v13 = vpop.f32.mrb[57].mxu1  ;;  %v6871_v14 = vpop.f32.mrb[58].mxu0 }
 0x2b9   :  { %v6892_v15 = vadd.f32 %v6891_v13, %v6890_v10  ;;  %v6893_v16 = vpop.f32.mrb[58].mxu1  ;;  %v6872_v17 = vpop.f32.mrb[59].mxu0 }
 0x2ba   :  { %v5529_v18 = vadd.f32 %v6870_v12, %v5489_v8  ;;  %v6894_v19 = vpop.f32.mrb[59].mxu1 }
 0x2bc   :  { %v5569_v20 = vadd.f32 %v6892_v15, %v5529_v18 }
 0x2d6   :  { %v6912_v21 = vpop.f32.mrb[60].mxu0 }
 0x2d7   :  { %v6934_v22 = vpop.f32.mrb[60].mxu1  ;;  %v6913_v23 = vpop.f32.mrb[61].mxu0 }
 0x2d8   :  { %v6914_v24 = vadd.f32 %v6913_v23, %v6912_v21  ;;  %v6935_v25 = vpop.f32.mrb[61].mxu1  ;;  %v6915_v26 = vpop.f32.mrb[62].mxu0 }
 0x2d9   :  { %v6936_v27 = vadd.f32 %v6935_v25, %v6934_v22  ;;  %v6937_v28 = vpop.f32.mrb[62].mxu1  ;;  %v6916_v29 = vpop.f32.mrb[63].mxu0 }
 0x2da   :  { %v5609_v30 = vadd.f32 %v6914_v24, %v5569_v20  ;;  %v6938_v31 = vpop.f32.mrb[63].mxu1 }
 0x2dc   :  { %v5649_v32 = vadd.f32 %v6936_v27, %v5609_v30 }
 0x2de   :  { %5654 = vst [vmem:[%s9201_s3] sm:$0xff] %v5649_v32 }

</bundles_post_ra>
